<compile_context>
chip_gen: v7x
topology: tpu7x:2x2x1
jax: 0.10.0
libtpu: 0.0.40
codegen_flags: <defaults>
</compile_context>

<pallas_src>
import functools

import numpy as np

import jax
import jax.numpy as jnp
from jax.experimental import pallas as pl
from jax.experimental.pallas import tpu as pltpu

EPS = 1e-5  # PyTorch BatchNorm default eps

_VMEM = pl.BlockSpec(memory_space=pltpu.MemorySpace.VMEM)


# ---------------------------------------------------------------------------
# In-kernel helpers
# ---------------------------------------------------------------------------

def _bn_train(x, g, b, mask=None, count=None):
    """Training-mode BatchNorm via sufficient statistics (E[x^2] - E[x]^2).

    If `mask` (rows, 1) is given, statistics are taken over the `count` valid
    rows only (padded-flat layout); the affine transform is applied to all rows
    (invalid rows are discarded by the caller).
    """
    if mask is None:
        mean = jnp.mean(x, axis=0, keepdims=True)
        var = jnp.mean(x * x, axis=0, keepdims=True) - mean * mean
    else:
        xm = x * mask
        mean = jnp.sum(xm, axis=0, keepdims=True) / count
        var = jnp.sum(xm * x, axis=0, keepdims=True) / count - mean * mean
    scale = g * jax.lax.rsqrt(var + EPS)
    return x * scale + (b - mean * scale)


def _erf(x):
    # Abramowitz & Stegun 7.1.26 polynomial, |error| < 1.5e-7 (exact-GELU
    # semantics up to f32 rounding; PyTorch nn.GELU() default is erf-based).
    a1, a2, a3, a4, a5 = (0.254829592, -0.284496736, 1.421413741,
                          -1.453152027, 1.061405429)
    p = 0.3275911
    s = jnp.where(x >= 0.0, 1.0, -1.0)
    ax = jnp.abs(x)
    t = 1.0 / (1.0 + p * ax)
    poly = ((((a5 * t + a4) * t + a3) * t + a2) * t + a1) * t
    return s * (1.0 - poly * jnp.exp(-ax * ax))


def _conv3x3_flat(src_ref, w_ref, guard, rows, row_pitch, oc):
    """3x3 / stride-1 / pad-1 conv in padded-flat layout.

    `src_ref` is a zero-guarded (guard + rows + guard, C) VMEM ref whose center
    `rows` rows hold the zero-padded feature map flattened row-major with row
    pitch `row_pitch` (= W+2).  Each tap is a constant row shift, so the conv
    is 9 accumulated bf16 MXU GEMMs -- no im2col, no reshapes.
    """
    acc = jnp.zeros((rows, oc), jnp.float32)
    for di in range(3):
        for dj in range(3):
            shift = (di - 1) * row_pitch + (dj - 1)
            lhs = src_ref[pl.ds(guard + shift, rows), :].astype(jnp.bfloat16)
            acc = acc + jnp.dot(lhs, w_ref[di * 3 + dj],
                                preferred_element_type=jnp.float32)
    return acc


# ---------------------------------------------------------------------------
# Pallas kernels (all tensors tiny -> single full-array VMEM blocks, no grid)
# ---------------------------------------------------------------------------

def _stem_kernel(x_ref, w_ref, g_ref, b_ref, o_ref):
    """conv1 (7x7/2 as im2col GEMM) + BN (batch stats) + ReLU."""
    out = jnp.dot(x_ref[...].astype(jnp.bfloat16), w_ref[...],
                  preferred_element_type=jnp.float32)
    o_ref[...] = jnp.maximum(_bn_train(out, g_ref[...], b_ref[...]), 0.0)


def _block_kernel(n, hh, ww, oc, xg_ref, mask_ref, w1_ref, g1_ref, b1_ref,
                  w2_ref, g2_ref, b2_ref, o_ref, hg_ref):
    """Fully-fused stride-1 BasicBlock: conv3x3+BN+ReLU+conv3x3+BN+res+ReLU."""
    wp = ww + 2
    rows = n * (hh + 2) * wp
    guard = wp + 1
    count = float(n * hh * ww)
    mask = mask_ref[...]

    # conv1 + BN1 + ReLU (zero invalid rows so they act as conv2's zero pad)
    acc1 = _conv3x3_flat(xg_ref, w1_ref, guard, rows, wp, oc)
    h1 = jnp.maximum(_bn_train(acc1, g1_ref[...], b1_ref[...], mask, count),
                     0.0) * mask

    # stage the intermediate in a zero-guarded VMEM scratch (never HBM)
    hg_ref[...] = jnp.zeros_like(hg_ref)
    hg_ref[pl.ds(guard, rows), :] = h1

    # conv2 + BN2 + residual + ReLU
    acc2 = _conv3x3_flat(hg_ref, w2_ref, guard, rows, wp, oc)
    out = _bn_train(acc2, g2_ref[...], b2_ref[...], mask, count)
    identity = xg_ref[pl.ds(guard, rows), :]
    o_ref[...] = jnp.maximum(out + identity, 0.0)


def _block_down_kernel(n, hh, ww, oc, pat_ref, dpat_ref, mask_ref,
                       w1_ref, g1_ref, b1_ref, w2_ref, g2_ref, b2_ref,
                       wd_ref, gd_ref, bd_ref, o_ref, hg_ref):
    """Fully-fused stride-2 BasicBlock with 1x1 downsample shortcut."""
    wp = ww + 2
    rows = n * (hh + 2) * wp
    guard = wp + 1
    count = float(n * hh * ww)
    mask = mask_ref[...]

    # conv1 (3x3/2, via tiny im2col patches laid out in the output frame)
    acc1 = jnp.dot(pat_ref[...].astype(jnp.bfloat16), w1_ref[...],
                   preferred_element_type=jnp.float32)
    h1 = jnp.maximum(_bn_train(acc1, g1_ref[...], b1_ref[...], mask, count),
                     0.0) * mask

    hg_ref[...] = jnp.zeros_like(hg_ref)
    hg_ref[pl.ds(guard, rows), :] = h1

    # conv2 (3x3/1) + BN2
    acc2 = _conv3x3_flat(hg_ref, w2_ref, guard, rows, wp, oc)
    out = _bn_train(acc2, g2_ref[...], b2_ref[...], mask, count)

    # downsample shortcut: 1x1/2 conv + BN
    dacc = jnp.dot(dpat_ref[...].astype(jnp.bfloat16), wd_ref[...],
                   preferred_element_type=jnp.float32)
    identity = _bn_train(dacc, gd_ref[...], bd_ref[...], mask, count)

    o_ref[...] = jnp.maximum(out + identity, 0.0)


def _head_kernel(x_ref, w1_ref, b1_ref, g_ref, be_ref, w2_ref, b2_ref, o_ref):
    """avgpool + Linear(128,64) + BatchNorm1d(64) + GELU + Linear(64,10)."""
    pooled = jnp.mean(x_ref[...], axis=1)  # adaptive avg pool fused in
    h = jnp.dot(pooled.astype(jnp.bfloat16), w1_ref[...],
                preferred_element_type=jnp.float32) + b1_ref[...]
    h = _bn_train(h, g_ref[...], be_ref[...])
    h = 0.5 * h * (1.0 + _erf(h * 0.7071067811865476))
    o_ref[...] = jnp.dot(h.astype(jnp.bfloat16), w2_ref[...],
                         preferred_element_type=jnp.float32) + b2_ref[...]


# ---------------------------------------------------------------------------
# Host-side glue (layout plumbing only -- no heavy compute outside kernels)
# ---------------------------------------------------------------------------

def im2col(x, kh, kw, stride, pad):
    """x: (N,H,W,C) -> patches (N,OH,OW,KH*KW*C), K ordered (kh, kw, C)."""
    n, h, w, c = x.shape
    xp = jnp.pad(x, ((0, 0), (pad, pad), (pad, pad), (0, 0)))
    oh = (h + 2 * pad - kh) // stride + 1
    ow = (w + 2 * pad - kw) // stride + 1
    cols = []
    for i in range(kh):
        for j in range(kw):
            cols.append(xp[:, i:i + stride * (oh - 1) + 1:stride,
                            j:j + stride * (ow - 1) + 1:stride, :])
    patches = jnp.stack(cols, axis=3)  # (N, OH, OW, KH*KW, C)
    return patches.reshape(n, oh, ow, kh * kw * c), (n, oh, ow)


def _spatial_pad_flat(x4d):
    """(N,H,W,C) -> zero-pad spatially by 1 and flatten to (N*(H+2)*(W+2), C)."""
    n, h, w, c = x4d.shape
    xp = jnp.pad(x4d, ((0, 0), (1, 1), (1, 1), (0, 0)))
    return xp.reshape(n * (h + 2) * (w + 2), c)


def _valid_mask(n, hh, ww):
    """(rows, 1) f32 mask of valid (non-pad) positions in the padded-flat frame."""
    m = np.zeros((n, hh + 2, ww + 2, 1), np.float32)
    m[:, 1:1 + hh, 1:1 + ww, :] = 1.0
    return jnp.asarray(m.reshape(n * (hh + 2) * (ww + 2), 1))


def stem_conv(patches2d, w, g, b):
    m = patches2d.shape[0]
    oc = w.shape[-1]
    return pl.pallas_call(
        _stem_kernel,
        out_shape=jax.ShapeDtypeStruct((m, oc), jnp.float32),
        in_specs=[_VMEM] * 4,
        out_specs=_VMEM,
    )(patches2d, w, g, b)


def maxpool3x3s2(y):
    """3x3/2 pad-1 max pool as pairwise max over 9 shifted strided slices."""
    n, h, w, c = y.shape
    oh, ow = h // 2, w // 2
    yp = jnp.pad(y, ((0, 0), (1, 1), (1, 1), (0, 0)),
                 constant_values=-jnp.inf)
    out = None
    for i in range(3):
        for j in range(3):
            win = yp[:, i:i + 2 * oh - 1:2, j:j + 2 * ow - 1:2, :]
            out = win if out is None else jnp.maximum(out, win)
    return out


def block_s1(x, p):
    """Stride-1 BasicBlock (no downsample) -- one fused pallas_call."""
    n, hh, ww, c = x.shape
    oc = c
    wp = ww + 2
    rows = n * (hh + 2) * wp
    guard = wp + 1
    xg = jnp.pad(_spatial_pad_flat(x), ((guard, guard), (0, 0)))
    mask = _valid_mask(n, hh, ww)
    kern = functools.partial(_block_kernel, n, hh, ww, oc)
    out = pl.pallas_call(
        kern,
        out_shape=jax.ShapeDtypeStruct((rows, oc), jnp.float32),
        in_specs=[_VMEM] * 8,
        out_specs=_VMEM,
        scratch_shapes=[pltpu.VMEM((rows + 2 * guard, oc), jnp.float32)],
    )(xg, mask, p["w1"], p["bn1_g"], p["bn1_b"],
      p["w2"], p["bn2_g"], p["bn2_b"])
    return out.reshape(n, hh + 2, wp, oc)[:, 1:1 + hh, 1:1 + ww, :]


def block_down(x, p):
    """Stride-2 BasicBlock with 1x1 downsample -- one fused pallas_call."""
    n, h, w, c = x.shape
    oc = p["bn1_g"].shape[-1]
    oh, ow = h // 2, w // 2
    wp = ow + 2
    rows = n * (oh + 2) * wp
    guard = wp + 1
    # tiny im2col for the stride-2 3x3 conv / 1x1 downsample, laid out directly
    # in the padded output frame (zero rows at pad positions).
    pat4, _ = im2col(x, 3, 3, 2, 1)              # (n, oh, ow, 9c)
    pat = _spatial_pad_flat(pat4)                # (rows, 9c)
    dpat = _spatial_pad_flat(x[:, ::2, ::2, :])  # (rows, c)
    mask = _valid_mask(n, oh, ow)
    kern = functools.partial(_block_down_kernel, n, oh, ow, oc)
    out = pl.pallas_call(
        kern,
        out_shape=jax.ShapeDtypeStruct((rows, oc), jnp.float32),
        in_specs=[_VMEM] * 12,
        out_specs=_VMEM,
        scratch_shapes=[pltpu.VMEM((rows + 2 * guard, oc), jnp.float32)],
    )(pat, dpat, mask, p["w1"], p["bn1_g"], p["bn1_b"],
      p["w2"], p["bn2_g"], p["bn2_b"], p["wd"], p["bnd_g"], p["bnd_b"])
    return out.reshape(n, oh + 2, wp, oc)[:, 1:1 + oh, 1:1 + ow, :]


def fc_head(x3d, p):
    n = x3d.shape[0]
    return pl.pallas_call(
        _head_kernel,
        out_shape=jax.ShapeDtypeStruct((n, 10), jnp.float32),
        in_specs=[_VMEM] * 7,
        out_specs=_VMEM,
    )(x3d, p["w1"], p["b1"], p["bn_g"], p["bn_b"], p["w2"], p["b2"])


@jax.jit
def resnet18_forward(params, x_nchw):
    x = jnp.transpose(x_nchw, (0, 2, 3, 1)).astype(jnp.float32)  # NCHW -> NHWC
    # conv1 7x7/2 p3 + bn1 + relu (im2col kept only here: C=3 is MXU-tiny)
    patches4, (n, oh, ow) = im2col(x, 7, 7, 2, 3)
    y = stem_conv(patches4.reshape(n * oh * ow, -1),
                  params["conv1_w"], params["bn1_g"], params["bn1_b"])
    # maxpool 3x3/2 p1 (pairwise max, output-sized intermediates)
    x = maxpool3x3s2(y.reshape(n, oh, ow, 64))
    # layer1: 2 x BasicBlock(64), stride 1
    x = block_s1(x, params["layer1"][0])
    x = block_s1(x, params["layer1"][1])
    # layer2: BasicBlock(64->128, stride 2, downsample) + BasicBlock(128)
    x = block_down(x, params["layer2"][0])
    x = block_s1(x, params["layer2"][1])
    # adaptive avg pool + flatten + fc head (all fused in one kernel)
    nb, hb, wb, cb = x.shape
    return fc_head(x.reshape(nb, hb * wb, cb), params["fc"])


# ---------------------------------------------------------------------------
# Parameters
# ---------------------------------------------------------------------------

def init_params(key):
    """Torch-like parameter layout (HWIO conv weights, per-channel BN)."""
    it = iter(jax.random.split(key, 64))

    def nrm(shape, scale=0.05):
        return (scale * jax.random.normal(next(it), shape)).astype(jnp.float32)

    def bn(c):
        return {"g": (1.0 + 0.1 * jax.random.normal(next(it), (c,))).astype(jnp.float32),
                "b": (0.1 * jax.random.normal(next(it), (c,))).astype(jnp.float32)}

    def block(ic, oc, downsample):
        p = {"conv1": nrm((3, 3, ic, oc)), "bn1": bn(oc),
             "conv2": nrm((3, 3, oc, oc)), "bn2": bn(oc)}
        if downsample:
            p["down_conv"] = nrm((1, 1, ic, oc))
            p["down_bn"] = bn(oc)
        return p

    return {
        "conv1": nrm((7, 7, 3, 64)),  # HWIO
        "bn1": bn(64),
        "layer1": [block(64, 64, False), block(64, 64, False)],
        "layer2": [block(64, 128, True), block(128, 128, False)],
        "fc": {"w1": nrm((128, 64)), "b1": nrm((64,)),
               "bn": bn(64),
               "w2": nrm((64, 10)), "b2": nrm((10,))},
    }


def prepare_params(raw):
    """One-time conversion to kernel layout: flattened bf16 conv weights,
    (1, C) f32 BN params -- hoisted out of the per-call wrappers."""
    bf16, f32 = jnp.bfloat16, jnp.float32

    def bn2(bn, oc):
        return (bn["g"].reshape(1, oc).astype(f32),
                bn["b"].reshape(1, oc).astype(f32))

    def s1_block(bp):
        c, oc = bp["conv1"].shape[2], bp["conv1"].shape[3]
        g1, b1 = bn2(bp["bn1"], oc)
        g2, b2 = bn2(bp["bn2"], oc)
        return {"w1": bp["conv1"].reshape(9, c, oc).astype(bf16),
                "bn1_g": g1, "bn1_b": b1,
                "w2": bp["conv2"].reshape(9, oc, oc).astype(bf16),
                "bn2_g": g2, "bn2_b": b2}

    def down_block(bp):
        c, oc = bp["conv1"].shape[2], bp["conv1"].shape[3]
        g1, b1 = bn2(bp["bn1"], oc)
        g2, b2 = bn2(bp["bn2"], oc)
        gd, bd = bn2(bp["down_bn"], oc)
        return {"w1": bp["conv1"].reshape(9 * c, oc).astype(bf16),
                "bn1_g": g1, "bn1_b": b1,
                "w2": bp["conv2"].reshape(9, oc, oc).astype(bf16),
                "bn2_g": g2, "bn2_b": b2,
                "wd": bp["down_conv"].reshape(c, oc).astype(bf16),
                "bnd_g": gd, "bnd_b": bd}

    g1, b1 = bn2(raw["bn1"], 64)
    gf, bff = bn2(raw["fc"]["bn"], 64)
    return {
        "conv1_w": raw["conv1"].reshape(7 * 7 * 3, 64).astype(bf16),
        "bn1_g": g1, "bn1_b": b1,
        "layer1": [s1_block(raw["layer1"][0]), s1_block(raw["layer1"][1])],
        "layer2": [down_block(raw["layer2"][0]), s1_block(raw["layer2"][1])],
        "fc": {"w1": raw["fc"]["w1"].astype(bf16),
               "b1": raw["fc"]["b1"].reshape(1, 64).astype(f32),
               "bn_g": gf, "bn_b": bff,
               "w2": raw["fc"]["w2"].astype(bf16),
               "b2": raw["fc"]["b2"].reshape(1, 10).astype(f32)},
    }


if __name__ == "__main__":
    root = jax.random.PRNGKey(0)
    pkey, xkey = jax.random.split(root)
    params = prepare_params(init_params(pkey))
    # NCHW like PyTorch: batch=2, 3 channels, 32x32 spatial -> (2, 10) logits
    x = jax.random.normal(xkey, (2, 3, 32, 32), dtype=jnp.float32)
    out = resnet18_forward(params, x)
    jax.block_until_ready(out)
    assert out.shape == (2, 10) and out.dtype == jnp.float32
    print("KERNEL_OK")
</pallas_src>

<mosaic_0001>
module attributes {stable_mosaic.version = 11 : i64} {
  func.func @_stem_kernel(%arg0: memref<512x147xf32, #tpu.memory_space<vmem>>, %arg1: memref<147x64xbf16, #tpu.memory_space<vmem>>, %arg2: memref<1x64xf32, #tpu.memory_space<vmem>>, %arg3: memref<1x64xf32, #tpu.memory_space<vmem>>, %arg4: memref<512x64xf32, #tpu.memory_space<vmem>>) attributes {dimension_semantics = [], scalar_prefetch = 0 : i64, scratch_operands = 0 : i64, tpu.core_type = #tpu.core_type<tc>} {
    %c0 = arith.constant 0 : index
    %c0_0 = arith.constant 0 : index
    %0 = vector.load %arg0[%c0, %c0_0] : memref<512x147xf32, #tpu.memory_space<vmem>>, vector<512x147xf32>
    %1 = arith.truncf %0 : vector<512x147xf32> to vector<512x147xbf16>
    %c0_1 = arith.constant 0 : index
    %c0_2 = arith.constant 0 : index
    %2 = vector.load %arg1[%c0_1, %c0_2] : memref<147x64xbf16, #tpu.memory_space<vmem>>, vector<147x64xbf16>
    %cst = arith.constant dense<0.000000e+00> : vector<512x64xf32>
    %3 = tpu.matmul %1, %2, %cst {dimension_numbers = #tpu.dot_dimension_numbers<[1], [0], [0], [1], [0, 0, 1, 1], [], []>} : vector<512x147xbf16>, vector<147x64xbf16>, vector<512x64xf32> -> vector<512x64xf32>
    %c0_3 = arith.constant 0 : index
    %c0_4 = arith.constant 0 : index
    %4 = vector.load %arg2[%c0_3, %c0_4] : memref<1x64xf32, #tpu.memory_space<vmem>>, vector<1x64xf32>
    %c0_5 = arith.constant 0 : index
    %c0_6 = arith.constant 0 : index
    %5 = vector.load %arg3[%c0_5, %c0_6] : memref<1x64xf32, #tpu.memory_space<vmem>>, vector<1x64xf32>
    %cst_7 = arith.constant dense<0.000000e+00> : vector<64xf32>
    %6 = vector.multi_reduction <add>, %3, %cst_7 [0] : vector<512x64xf32> to vector<64xf32>
    %7 = vector.shape_cast %6 : vector<64xf32> to vector<1x64xf32>
    %cst_8 = arith.constant 5.120000e+02 : f32
    %8 = vector.broadcast %cst_8 : f32 to vector<1x64xf32>
    %9 = arith.divf %7, %8 : vector<1x64xf32>
    %10 = arith.mulf %3, %3 : vector<512x64xf32>
    %cst_9 = arith.constant dense<0.000000e+00> : vector<64xf32>
    %11 = vector.multi_reduction <add>, %10, %cst_9 [0] : vector<512x64xf32> to vector<64xf32>
    %12 = vector.shape_cast %11 : vector<64xf32> to vector<1x64xf32>
    %cst_10 = arith.constant 5.120000e+02 : f32
    %13 = vector.broadcast %cst_10 : f32 to vector<1x64xf32>
    %14 = arith.divf %12, %13 : vector<1x64xf32>
    %15 = arith.mulf %9, %9 : vector<1x64xf32>
    %16 = arith.subf %14, %15 : vector<1x64xf32>
    %cst_11 = arith.constant 9.99999974E-6 : f32
    %17 = vector.broadcast %cst_11 : f32 to vector<1x64xf32>
    %18 = arith.addf %16, %17 : vector<1x64xf32>
    %19 = math.rsqrt %18 : vector<1x64xf32>
    %20 = arith.mulf %4, %19 : vector<1x64xf32>
    %21 = vector.broadcast %20 : vector<1x64xf32> to vector<512x64xf32>
    %22 = arith.mulf %3, %21 : vector<512x64xf32>
    %23 = arith.mulf %9, %20 : vector<1x64xf32>
    %24 = arith.subf %5, %23 : vector<1x64xf32>
    %25 = vector.broadcast %24 : vector<1x64xf32> to vector<512x64xf32>
    %26 = arith.addf %22, %25 : vector<512x64xf32>
    %cst_12 = arith.constant 0.000000e+00 : f32
    %27 = vector.broadcast %cst_12 : f32 to vector<512x64xf32>
    %28 = arith.maximumf %26, %27 : vector<512x64xf32>
    %c0_13 = arith.constant 0 : index
    %c0_14 = arith.constant 0 : index
    %29 = vector.load %arg4[%c0_13, %c0_14] : memref<512x64xf32, #tpu.memory_space<vmem>>, vector<512x64xf32>
    tpu.vector_store %arg4[%c0_13, %c0_14], %28 {strides = array<i32>} : memref<512x64xf32, #tpu.memory_space<vmem>>, vector<512x64xf32>,
    return
  }
}

module attributes {stable_mosaic.version = 11 : i64} {
  func.func @_block_kernel(%arg0: memref<222x64xf32, #tpu.memory_space<vmem>>, %arg1: memref<200x1xf32, #tpu.memory_space<vmem>>, %arg2: memref<9x64x64xbf16, #tpu.memory_space<vmem>>, %arg3: memref<1x64xf32, #tpu.memory_space<vmem>>, %arg4: memref<1x64xf32, #tpu.memory_space<vmem>>, %arg5: memref<9x64x64xbf16, #tpu.memory_space<vmem>>, %arg6: memref<1x64xf32, #tpu.memory_space<vmem>>, %arg7: memref<1x64xf32, #tpu.memory_space<vmem>>, %arg8: memref<200x64xf32, #tpu.memory_space<vmem>>, %arg9: memref<222x64xf32, #tpu.memory_space<vmem>>) attributes {dimension_semantics = [], scalar_prefetch = 0 : i64, scratch_operands = 1 : i64, tpu.core_type = #tpu.core_type<tc>} {
    %c0 = arith.constant 0 : index
    %c0_0 = arith.constant 0 : index
    %0 = vector.load %arg1[%c0, %c0_0] : memref<200x1xf32, #tpu.memory_space<vmem>>, vector<200x1xf32>
    %cst = arith.constant 0.000000e+00 : f32
    %1 = vector.broadcast %cst : f32 to vector<200x64xf32>
    %c0_1 = arith.constant 0 : index
    %c0_2 = arith.constant 0 : index
    %2 = vector.load %arg0[%c0_1, %c0_2] : memref<222x64xf32, #tpu.memory_space<vmem>>, vector<200x64xf32>
    %3 = arith.truncf %2 : vector<200x64xf32> to vector<200x64xbf16>
    %c0_3 = arith.constant 0 : index
    %c0_4 = arith.constant 0 : index
    %c0_5 = arith.constant 0 : index
    %4 = vector.load %arg2[%c0_3, %c0_4, %c0_5] : memref<9x64x64xbf16, #tpu.memory_space<vmem>>, vector<1x64x64xbf16>
    %5 = vector.shape_cast %4 : vector<1x64x64xbf16> to vector<64x64xbf16>
    %cst_6 = arith.constant dense<0.000000e+00> : vector<200x64xf32>
    %6 = tpu.matmul %3, %5, %cst_6 {dimension_numbers = #tpu.dot_dimension_numbers<[1], [0], [0], [1], [0, 0, 1, 1], [], []>} : vector<200x64xbf16>, vector<64x64xbf16>, vector<200x64xf32> -> vector<200x64xf32>
    %7 = arith.addf %1, %6 : vector<200x64xf32>
    %c1 = arith.constant 1 : index
    %c0_7 = arith.constant 0 : index
    %8 = vector.load %arg0[%c1, %c0_7] : memref<222x64xf32, #tpu.memory_space<vmem>>, vector<200x64xf32>
    %9 = arith.truncf %8 : vector<200x64xf32> to vector<200x64xbf16>
    %c1_8 = arith.constant 1 : index
    %c0_9 = arith.constant 0 : index
    %c0_10 = arith.constant 0 : index
    %10 = vector.load %arg2[%c1_8, %c0_9, %c0_10] : memref<9x64x64xbf16, #tpu.memory_space<vmem>>, vector<1x64x64xbf16>
    %11 = vector.shape_cast %10 : vector<1x64x64xbf16> to vector<64x64xbf16>
    %cst_11 = arith.constant dense<0.000000e+00> : vector<200x64xf32>
    %12 = tpu.matmul %9, %11, %cst_11 {dimension_numbers = #tpu.dot_dimension_numbers<[1], [0], [0], [1], [0, 0, 1, 1], [], []>} : vector<200x64xbf16>, vector<64x64xbf16>, vector<200x64xf32> -> vector<200x64xf32>
    %13 = arith.addf %7, %12 : vector<200x64xf32>
    %c2 = arith.constant 2 : index
    %c0_12 = arith.constant 0 : index
    %14 = vector.load %arg0[%c2, %c0_12] : memref<222x64xf32, #tpu.memory_space<vmem>>, vector<200x64xf32>
    %15 = arith.truncf %14 : vector<200x64xf32> to vector<200x64xbf16>
    %c2_13 = arith.constant 2 : index
    %c0_14 = arith.constant 0 : index
    %c0_15 = arith.constant 0 : index
    %16 = vector.load %arg2[%c2_13, %c0_14, %c0_15] : memref<9x64x64xbf16, #tpu.memory_space<vmem>>, vector<1x64x64xbf16>
    %17 = vector.shape_cast %16 : vector<1x64x64xbf16> to vector<64x64xbf16>
    %cst_16 = arith.constant dense<0.000000e+00> : vector<200x64xf32>
    %18 = tpu.matmul %15, %17, %cst_16 {dimension_numbers = #tpu.dot_dimension_numbers<[1], [0], [0], [1], [0, 0, 1, 1], [], []>} : vector<200x64xbf16>, vector<64x64xbf16>, vector<200x64xf32> -> vector<200x64xf32>
    %19 = arith.addf %13, %18 : vector<200x64xf32>
    %c10 = arith.constant 10 : index
    %c0_17 = arith.constant 0 : index
    %20 = vector.load %arg0[%c10, %c0_17] : memref<222x64xf32, #tpu.memory_space<vmem>>, vector<200x64xf32>
    %21 = arith.truncf %20 : vector<200x64xf32> to vector<200x64xbf16>
    %c3 = arith.constant 3 : index
    %c0_18 = arith.constant 0 : index
    %c0_19 = arith.constant 0 : index
    %22 = vector.load %arg2[%c3, %c0_18, %c0_19] : memref<9x64x64xbf16, #tpu.memory_space<vmem>>, vector<1x64x64xbf16>
    %23 = vector.shape_cast %22 : vector<1x64x64xbf16> to vector<64x64xbf16>
    %cst_20 = arith.constant dense<0.000000e+00> : vector<200x64xf32>
    %24 = tpu.matmul %21, %23, %cst_20 {dimension_numbers = #tpu.dot_dimension_numbers<[1], [0], [0], [1], [0, 0, 1, 1], [], []>} : vector<200x64xbf16>, vector<64x64xbf16>, vector<200x64xf32> -> vector<200x64xf32>
    %25 = arith.addf %19, %24 : vector<200x64xf32>
    %c11 = arith.constant 11 : index
    %c0_21 = arith.constant 0 : index
    %26 = vector.load %arg0[%c11, %c0_21] : memref<222x64xf32, #tpu.memory_space<vmem>>, vector<200x64xf32>
    %27 = arith.truncf %26 : vector<200x64xf32> to vector<200x64xbf16>
    %c4 = arith.constant 4 : index
    %c0_22 = arith.constant 0 : index
    %c0_23 = arith.constant 0 : index
    %28 = vector.load %arg2[%c4, %c0_22, %c0_23] : memref<9x64x64xbf16, #tpu.memory_space<vmem>>, vector<1x64x64xbf16>
    %29 = vector.shape_cast %28 : vector<1x64x64xbf16> to vector<64x64xbf16>
    %cst_24 = arith.constant dense<0.000000e+00> : vector<200x64xf32>
    %30 = tpu.matmul %27, %29, %cst_24 {dimension_numbers = #tpu.dot_dimension_numbers<[1], [0], [0], [1], [0, 0, 1, 1], [], []>} : vector<200x64xbf16>, vector<64x64xbf16>, vector<200x64xf32> -> vector<200x64xf32>
    %31 = arith.addf %25, %30 : vector<200x64xf32>
    %c12 = arith.constant 12 : index
    %c0_25 = arith.constant 0 : index
    %32 = vector.load %arg0[%c12, %c0_25] : memref<222x64xf32, #tpu.memory_space<vmem>>, vector<200x64xf32>
    %33 = arith.truncf %32 : vector<200x64xf32> to vector<200x64xbf16>
    %c5 = arith.constant 5 : index
    %c0_26 = arith.constant 0 : index
    %c0_27 = arith.constant 0 : index
    %34 = vector.load %arg2[%c5, %c0_26, %c0_27] : memref<9x64x64xbf16, #tpu.memory_space<vmem>>, vector<1x64x64xbf16>
    %35 = vector.shape_cast %34 : vector<1x64x64xbf16> to vector<64x64xbf16>
    %cst_28 = arith.constant dense<0.000000e+00> : vector<200x64xf32>
    %36 = tpu.matmul %33, %35, %cst_28 {dimension_numbers = #tpu.dot_dimension_numbers<[1], [0], [0], [1], [0, 0, 1, 1], [], []>} : vector<200x64xbf16>, vector<64x64xbf16>, vector<200x64xf32> -> vector<200x64xf32>
    %37 = arith.addf %31, %36 : vector<200x64xf32>
    %c20 = arith.constant 20 : index
    %c0_29 = arith.constant 0 : index
    %38 = vector.load %arg0[%c20, %c0_29] : memref<222x64xf32, #tpu.memory_space<vmem>>, vector<200x64xf32>
    %39 = arith.truncf %38 : vector<200x64xf32> to vector<200x64xbf16>
    %c6 = arith.constant 6 : index
    %c0_30 = arith.constant 0 : index
    %c0_31 = arith.constant 0 : index
    %40 = vector.load %arg2[%c6, %c0_30, %c0_31] : memref<9x64x64xbf16, #tpu.memory_space<vmem>>, vector<1x64x64xbf16>
    %41 = vector.shape_cast %40 : vector<1x64x64xbf16> to vector<64x64xbf16>
    %cst_32 = arith.constant dense<0.000000e+00> : vector<200x64xf32>
    %42 = tpu.matmul %39, %41, %cst_32 {dimension_numbers = #tpu.dot_dimension_numbers<[1], [0], [0], [1], [0, 0, 1, 1], [], []>} : vector<200x64xbf16>, vector<64x64xbf16>, vector<200x64xf32> -> vector<200x64xf32>
    %43 = arith.addf %37, %42 : vector<200x64xf32>
    %c21 = arith.constant 21 : index
    %c0_33 = arith.constant 0 : index
    %44 = vector.load %arg0[%c21, %c0_33] : memref<222x64xf32, #tpu.memory_space<vmem>>, vector<200x64xf32>
    %45 = arith.truncf %44 : vector<200x64xf32> to vector<200x64xbf16>
    %c7 = arith.constant 7 : index
    %c0_34 = arith.constant 0 : index
    %c0_35 = arith.constant 0 : index
    %46 = vector.load %arg2[%c7, %c0_34, %c0_35] : memref<9x64x64xbf16, #tpu.memory_space<vmem>>, vector<1x64x64xbf16>
    %47 = vector.shape_cast %46 : vector<1x64x64xbf16> to vector<64x64xbf16>
    %cst_36 = arith.constant dense<0.000000e+00> : vector<200x64xf32>
    %48 = tpu.matmul %45, %47, %cst_36 {dimension_numbers = #tpu.dot_dimension_numbers<[1], [0], [0], [1], [0, 0, 1, 1], [], []>} : vector<200x64xbf16>, vector<64x64xbf16>, vector<200x64xf32> -> vector<200x64xf32>
    %49 = arith.addf %43, %48 : vector<200x64xf32>
    %c22 = arith.constant 22 : index
    %c0_37 = arith.constant 0 : index
    %50 = vector.load %arg0[%c22, %c0_37] : memref<222x64xf32, #tpu.memory_space<vmem>>, vector<200x64xf32>
    %51 = arith.truncf %50 : vector<200x64xf32> to vector<200x64xbf16>
    %c8 = arith.constant 8 : index
    %c0_38 = arith.constant 0 : index
    %c0_39 = arith.constant 0 : index
    %52 = vector.load %arg2[%c8, %c0_38, %c0_39] : memref<9x64x64xbf16, #tpu.memory_space<vmem>>, vector<1x64x64xbf16>
    %53 = vector.shape_cast %52 : vector<1x64x64xbf16> to vector<64x64xbf16>
    %cst_40 = arith.constant dense<0.000000e+00> : vector<200x64xf32>
    %54 = tpu.matmul %51, %53, %cst_40 {dimension_numbers = #tpu.dot_dimension_numbers<[1], [0], [0], [1], [0, 0, 1, 1], [], []>} : vector<200x64xbf16>, vector<64x64xbf16>, vector<200x64xf32> -> vector<200x64xf32>
    %55 = arith.addf %49, %54 : vector<200x64xf32>
    %c0_41 = arith.constant 0 : index
    %c0_42 = arith.constant 0 : index
    %56 = vector.load %arg3[%c0_41, %c0_42] : memref<1x64xf32, #tpu.memory_space<vmem>>, vector<1x64xf32>
    %c0_43 = arith.constant 0 : index
    %c0_44 = arith.constant 0 : index
    %57 = vector.load %arg4[%c0_43, %c0_44] : memref<1x64xf32, #tpu.memory_space<vmem>>, vector<1x64xf32>
    %58 = vector.broadcast %0 : vector<200x1xf32> to vector<200x64xf32>
    %59 = arith.mulf %55, %58 : vector<200x64xf32>
    %cst_45 = arith.constant dense<0.000000e+00> : vector<64xf32>
    %60 = vector.multi_reduction <add>, %59, %cst_45 [0] : vector<200x64xf32> to vector<64xf32>
    %61 = vector.shape_cast %60 : vector<64xf32> to vector<1x64xf32>
    %cst_46 = arith.constant 1.280000e+02 : f32
    %62 = vector.broadcast %cst_46 : f32 to vector<1x64xf32>
    %63 = arith.divf %61, %62 : vector<1x64xf32>
    %64 = arith.mulf %59, %55 : vector<200x64xf32>
    %cst_47 = arith.constant dense<0.000000e+00> : vector<64xf32>
    %65 = vector.multi_reduction <add>, %64, %cst_47 [0] : vector<200x64xf32> to vector<64xf32>
    %66 = vector.shape_cast %65 : vector<64xf32> to vector<1x64xf32>
    %cst_48 = arith.constant 1.280000e+02 : f32
    %67 = vector.broadcast %cst_48 : f32 to vector<1x64xf32>
    %68 = arith.divf %66, %67 : vector<1x64xf32>
    %69 = arith.mulf %63, %63 : vector<1x64xf32>
    %70 = arith.subf %68, %69 : vector<1x64xf32>
    %cst_49 = arith.constant 9.99999974E-6 : f32
    %71 = vector.broadcast %cst_49 : f32 to vector<1x64xf32>
    %72 = arith.addf %70, %71 : vector<1x64xf32>
    %73 = math.rsqrt %72 : vector<1x64xf32>
    %74 = arith.mulf %56, %73 : vector<1x64xf32>
    %75 = vector.broadcast %74 : vector<1x64xf32> to vector<200x64xf32>
    %76 = arith.mulf %55, %75 : vector<200x64xf32>
    %77 = arith.mulf %63, %74 : vector<1x64xf32>
    %78 = arith.subf %57, %77 : vector<1x64xf32>
    %79 = vector.broadcast %78 : vector<1x64xf32> to vector<200x64xf32>
    %80 = arith.addf %76, %79 : vector<200x64xf32>
    %cst_50 = arith.constant 0.000000e+00 : f32
    %81 = vector.broadcast %cst_50 : f32 to vector<200x64xf32>
    %82 = arith.maximumf %80, %81 : vector<200x64xf32>
    %83 = vector.broadcast %0 : vector<200x1xf32> to vector<200x64xf32>
    %84 = arith.mulf %82, %83 : vector<200x64xf32>
    %cst_51 = arith.constant 0.000000e+00 : f32
    %85 = vector.broadcast %cst_51 : f32 to vector<222x64xf32>
    %c0_52 = arith.constant 0 : index
    %c0_53 = arith.constant 0 : index
    %86 = vector.load %arg9[%c0_52, %c0_53] : memref<222x64xf32, #tpu.memory_space<vmem>>, vector<222x64xf32>
    tpu.vector_store %arg9[%c0_52, %c0_53], %85 {strides = array<i32>} : memref<222x64xf32, #tpu.memory_space<vmem>>, vector<222x64xf32>,
    %c11_54 = arith.constant 11 : index
    %c0_55 = arith.constant 0 : index
    %87 = vector.load %arg9[%c11_54, %c0_55] : memref<222x64xf32, #tpu.memory_space<vmem>>, vector<200x64xf32>
    tpu.vector_store %arg9[%c11_54, %c0_55], %84 {strides = array<i32>} : memref<222x64xf32, #tpu.memory_space<vmem>>, vector<200x64xf32>,
    %cst_56 = arith.constant 0.000000e+00 : f32
    %88 = vector.broadcast %cst_56 : f32 to vector<200x64xf32>
    %c0_57 = arith.constant 0 : index
    %c0_58 = arith.constant 0 : index
    %89 = vector.load %arg9[%c0_57, %c0_58] : memref<222x64xf32, #tpu.memory_space<vmem>>, vector<200x64xf32>
    %90 = arith.truncf %89 : vector<200x64xf32> to vector<200x64xbf16>
    %c0_59 = arith.constant 0 : index
    %c0_60 = arith.constant 0 : index
    %c0_61 = arith.constant 0 : index
    %91 = vector.load %arg5[%c0_59, %c0_60, %c0_61] : memref<9x64x64xbf16, #tpu.memory_space<vmem>>, vector<1x64x64xbf16>
    %92 = vector.shape_cast %91 : vector<1x64x64xbf16> to vector<64x64xbf16>
    %cst_62 = arith.constant dense<0.000000e+00> : vector<200x64xf32>
    %93 = tpu.matmul %90, %92, %cst_62 {dimension_numbers = #tpu.dot_dimension_numbers<[1], [0], [0], [1], [0, 0, 1, 1], [], []>} : vector<200x64xbf16>, vector<64x64xbf16>, vector<200x64xf32> -> vector<200x64xf32>
    %94 = arith.addf %88, %93 : vector<200x64xf32>
    %c1_63 = arith.constant 1 : index
    %c0_64 = arith.constant 0 : index
    %95 = vector.load %arg9[%c1_63, %c0_64] : memref<222x64xf32, #tpu.memory_space<vmem>>, vector<200x64xf32>
    %96 = arith.truncf %95 : vector<200x64xf32> to vector<200x64xbf16>
    %c1_65 = arith.constant 1 : index
    %c0_66 = arith.constant 0 : index
    %c0_67 = arith.constant 0 : index
    %97 = vector.load %arg5[%c1_65, %c0_66, %c0_67] : memref<9x64x64xbf16, #tpu.memory_space<vmem>>, vector<1x64x64xbf16>
    %98 = vector.shape_cast %97 : vector<1x64x64xbf16> to vector<64x64xbf16>
    %cst_68 = arith.constant dense<0.000000e+00> : vector<200x64xf32>
    %99 = tpu.matmul %96, %98, %cst_68 {dimension_numbers = #tpu.dot_dimension_numbers<[1], [0], [0], [1], [0, 0, 1, 1], [], []>} : vector<200x64xbf16>, vector<64x64xbf16>, vector<200x64xf32> -> vector<200x64xf32>
    %100 = arith.addf %94, %99 : vector<200x64xf32>
    %c2_69 = arith.constant 2 : index
    %c0_70 = arith.constant 0 : index
    %101 = vector.load %arg9[%c2_69, %c0_70] : memref<222x64xf32, #tpu.memory_space<vmem>>, vector<200x64xf32>
    %102 = arith.truncf %101 : vector<200x64xf32> to vector<200x64xbf16>
    %c2_71 = arith.constant 2 : index
    %c0_72 = arith.constant 0 : index
    %c0_73 = arith.constant 0 : index
    %103 = vector.load %arg5[%c2_71, %c0_72, %c0_73] : memref<9x64x64xbf16, #tpu.memory_space<vmem>>, vector<1x64x64xbf16>
    %104 = vector.shape_cast %103 : vector<1x64x64xbf16> to vector<64x64xbf16>
    %cst_74 = arith.constant dense<0.000000e+00> : vector<200x64xf32>
    %105 = tpu.matmul %102, %104, %cst_74 {dimension_numbers = #tpu.dot_dimension_numbers<[1], [0], [0], [1], [0, 0, 1, 1], [], []>} : vector<200x64xbf16>, vector<64x64xbf16>, vector<200x64xf32> -> vector<200x64xf32>
    %106 = arith.addf %100, %105 : vector<200x64xf32>
    %c10_75 = arith.constant 10 : index
    %c0_76 = arith.constant 0 : index
    %107 = vector.load %arg9[%c10_75, %c0_76] : memref<222x64xf32, #tpu.memory_space<vmem>>, vector<200x64xf32>
    %108 = arith.truncf %107 : vector<200x64xf32> to vector<200x64xbf16>
    %c3_77 = arith.constant 3 : index
    %c0_78 = arith.constant 0 : index
    %c0_79 = arith.constant 0 : index
    %109 = vector.load %arg5[%c3_77, %c0_78, %c0_79] : memref<9x64x64xbf16, #tpu.memory_space<vmem>>, vector<1x64x64xbf16>
    %110 = vector.shape_cast %109 : vector<1x64x64xbf16> to vector<64x64xbf16>
    %cst_80 = arith.constant dense<0.000000e+00> : vector<200x64xf32>
    %111 = tpu.matmul %108, %110, %cst_80 {dimension_numbers = #tpu.dot_dimension_numbers<[1], [0], [0], [1], [0, 0, 1, 1], [], []>} : vector<200x64xbf16>, vector<64x64xbf16>, vector<200x64xf32> -> vector<200x64xf32>
    %112 = arith.addf %106, %111 : vector<200x64xf32>
    %c11_81 = arith.constant 11 : index
    %c0_82 = arith.constant 0 : index
    %113 = vector.load %arg9[%c11_81, %c0_82] : memref<222x64xf32, #tpu.memory_space<vmem>>, vector<200x64xf32>
    %114 = arith.truncf %113 : vector<200x64xf32> to vector<200x64xbf16>
    %c4_83 = arith.constant 4 : index
    %c0_84 = arith.constant 0 : index
    %c0_85 = arith.constant 0 : index
    %115 = vector.load %arg5[%c4_83, %c0_84, %c0_85] : memref<9x64x64xbf16, #tpu.memory_space<vmem>>, vector<1x64x64xbf16>
    %116 = vector.shape_cast %115 : vector<1x64x64xbf16> to vector<64x64xbf16>
    %cst_86 = arith.constant dense<0.000000e+00> : vector<200x64xf32>
    %117 = tpu.matmul %114, %116, %cst_86 {dimension_numbers = #tpu.dot_dimension_numbers<[1], [0], [0], [1], [0, 0, 1, 1], [], []>} : vector<200x64xbf16>, vector<64x64xbf16>, vector<200x64xf32> -> vector<200x64xf32>
    %118 = arith.addf %112, %117 : vector<200x64xf32>
    %c12_87 = arith.constant 12 : index
    %c0_88 = arith.constant 0 : index
    %119 = vector.load %arg9[%c12_87, %c0_88] : memref<222x64xf32, #tpu.memory_space<vmem>>, vector<200x64xf32>
    %120 = arith.truncf %119 : vector<200x64xf32> to vector<200x64xbf16>
    %c5_89 = arith.constant 5 : index
    %c0_90 = arith.constant 0 : index
    %c0_91 = arith.constant 0 : index
    %121 = vector.load %arg5[%c5_89, %c0_90, %c0_91] : memref<9x64x64xbf16, #tpu.memory_space<vmem>>, vector<1x64x64xbf16>
    %122 = vector.shape_cast %121 : vector<1x64x64xbf16> to vector<64x64xbf16>
    %cst_92 = arith.constant dense<0.000000e+00> : vector<200x64xf32>
    %123 = tpu.matmul %120, %122, %cst_92 {dimension_numbers = #tpu.dot_dimension_numbers<[1], [0], [0], [1], [0, 0, 1, 1], [], []>} : vector<200x64xbf16>, vector<64x64xbf16>, vector<200x64xf32> -> vector<200x64xf32>
    %124 = arith.addf %118, %123 : vector<200x64xf32>
    %c20_93 = arith.constant 20 : index
    %c0_94 = arith.constant 0 : index
    %125 = vector.load %arg9[%c20_93, %c0_94] : memref<222x64xf32, #tpu.memory_space<vmem>>, vector<200x64xf32>
    %126 = arith.truncf %125 : vector<200x64xf32> to vector<200x64xbf16>
    %c6_95 = arith.constant 6 : index
    %c0_96 = arith.constant 0 : index
    %c0_97 = arith.constant 0 : index
    %127 = vector.load %arg5[%c6_95, %c0_96, %c0_97] : memref<9x64x64xbf16, #tpu.memory_space<vmem>>, vector<1x64x64xbf16>
    %128 = vector.shape_cast %127 : vector<1x64x64xbf16> to vector<64x64xbf16>
    %cst_98 = arith.constant dense<0.000000e+00> : vector<200x64xf32>
    %129 = tpu.matmul %126, %128, %cst_98 {dimension_numbers = #tpu.dot_dimension_numbers<[1], [0], [0], [1], [0, 0, 1, 1], [], []>} : vector<200x64xbf16>, vector<64x64xbf16>, vector<200x64xf32> -> vector<200x64xf32>
    %130 = arith.addf %124, %129 : vector<200x64xf32>
    %c21_99 = arith.constant 21 : index
    %c0_100 = arith.constant 0 : index
    %131 = vector.load %arg9[%c21_99, %c0_100] : memref<222x64xf32, #tpu.memory_space<vmem>>, vector<200x64xf32>
    %132 = arith.truncf %131 : vector<200x64xf32> to vector<200x64xbf16>
    %c7_101 = arith.constant 7 : index
    %c0_102 = arith.constant 0 : index
    %c0_103 = arith.constant 0 : index
    %133 = vector.load %arg5[%c7_101, %c0_102, %c0_103] : memref<9x64x64xbf16, #tpu.memory_space<vmem>>, vector<1x64x64xbf16>
    %134 = vector.shape_cast %133 : vector<1x64x64xbf16> to vector<64x64xbf16>
    %cst_104 = arith.constant dense<0.000000e+00> : vector<200x64xf32>
    %135 = tpu.matmul %132, %134, %cst_104 {dimension_numbers = #tpu.dot_dimension_numbers<[1], [0], [0], [1], [0, 0, 1, 1], [], []>} : vector<200x64xbf16>, vector<64x64xbf16>, vector<200x64xf32> -> vector<200x64xf32>
    %136 = arith.addf %130, %135 : vector<200x64xf32>
    %c22_105 = arith.constant 22 : index
    %c0_106 = arith.constant 0 : index
    %137 = vector.load %arg9[%c22_105, %c0_106] : memref<222x64xf32, #tpu.memory_space<vmem>>, vector<200x64xf32>
    %138 = arith.truncf %137 : vector<200x64xf32> to vector<200x64xbf16>
    %c8_107 = arith.constant 8 : index
    %c0_108 = arith.constant 0 : index
    %c0_109 = arith.constant 0 : index
    %139 = vector.load %arg5[%c8_107, %c0_108, %c0_109] : memref<9x64x64xbf16, #tpu.memory_space<vmem>>, vector<1x64x64xbf16>
    %140 = vector.shape_cast %139 : vector<1x64x64xbf16> to vector<64x64xbf16>
    %cst_110 = arith.constant dense<0.000000e+00> : vector<200x64xf32>
    %141 = tpu.matmul %138, %140, %cst_110 {dimension_numbers = #tpu.dot_dimension_numbers<[1], [0], [0], [1], [0, 0, 1, 1], [], []>} : vector<200x64xbf16>, vector<64x64xbf16>, vector<200x64xf32> -> vector<200x64xf32>
    %142 = arith.addf %136, %141 : vector<200x64xf32>
    %c0_111 = arith.constant 0 : index
    %c0_112 = arith.constant 0 : index
    %143 = vector.load %arg6[%c0_111, %c0_112] : memref<1x64xf32, #tpu.memory_space<vmem>>, vector<1x64xf32>
    %c0_113 = arith.constant 0 : index
    %c0_114 = arith.constant 0 : index
    %144 = vector.load %arg7[%c0_113, %c0_114] : memref<1x64xf32, #tpu.memory_space<vmem>>, vector<1x64xf32>
    %145 = vector.broadcast %0 : vector<200x1xf32> to vector<200x64xf32>
    %146 = arith.mulf %142, %145 : vector<200x64xf32>
    %cst_115 = arith.constant dense<0.000000e+00> : vector<64xf32>
    %147 = vector.multi_reduction <add>, %146, %cst_115 [0] : vector<200x64xf32> to vector<64xf32>
    %148 = vector.shape_cast %147 : vector<64xf32> to vector<1x64xf32>
    %cst_116 = arith.constant 1.280000e+02 : f32
    %149 = vector.broadcast %cst_116 : f32 to vector<1x64xf32>
    %150 = arith.divf %148, %149 : vector<1x64xf32>
    %151 = arith.mulf %146, %142 : vector<200x64xf32>
    %cst_117 = arith.constant dense<0.000000e+00> : vector<64xf32>
    %152 = vector.multi_reduction <add>, %151, %cst_117 [0] : vector<200x64xf32> to vector<64xf32>
    %153 = vector.shape_cast %152 : vector<64xf32> to vector<1x64xf32>
    %cst_118 = arith.constant 1.280000e+02 : f32
    %154 = vector.broadcast %cst_118 : f32 to vector<1x64xf32>
    %155 = arith.divf %153, %154 : vector<1x64xf32>
    %156 = arith.mulf %150, %150 : vector<1x64xf32>
    %157 = arith.subf %155, %156 : vector<1x64xf32>
    %cst_119 = arith.constant 9.99999974E-6 : f32
    %158 = vector.broadcast %cst_119 : f32 to vector<1x64xf32>
    %159 = arith.addf %157, %158 : vector<1x64xf32>
    %160 = math.rsqrt %159 : vector<1x64xf32>
    %161 = arith.mulf %143, %160 : vector<1x64xf32>
    %162 = vector.broadcast %161 : vector<1x64xf32> to vector<200x64xf32>
    %163 = arith.mulf %142, %162 : vector<200x64xf32>
    %164 = arith.mulf %150, %161 : vector<1x64xf32>
    %165 = arith.subf %144, %164 : vector<1x64xf32>
    %166 = vector.broadcast %165 : vector<1x64xf32> to vector<200x64xf32>
    %167 = arith.addf %163, %166 : vector<200x64xf32>
    %c11_120 = arith.constant 11 : index
    %c0_121 = arith.constant 0 : index
    %168 = vector.load %arg0[%c11_120, %c0_121] : memref<222x64xf32, #tpu.memory_space<vmem>>, vector<200x64xf32>
    %169 = arith.addf %167, %168 : vector<200x64xf32>
    %cst_122 = arith.constant 0.000000e+00 : f32
    %170 = vector.broadcast %cst_122 : f32 to vector<200x64xf32>
    %171 = arith.maximumf %169, %170 : vector<200x64xf32>
    %c0_123 = arith.constant 0 : index
    %c0_124 = arith.constant 0 : index
    %172 = vector.load %arg8[%c0_123, %c0_124] : memref<200x64xf32, #tpu.memory_space<vmem>>, vector<200x64xf32>
    tpu.vector_store %arg8[%c0_123, %c0_124], %171 {strides = array<i32>} : memref<200x64xf32, #tpu.memory_space<vmem>>, vector<200x64xf32>,
    return
  }
}

module attributes {stable_mosaic.version = 11 : i64} {
  func.func @_block_down_kernel(%arg0: memref<72x576xf32, #tpu.memory_space<vmem>>, %arg1: memref<72x64xf32, #tpu.memory_space<vmem>>, %arg2: memref<72x1xf32, #tpu.memory_space<vmem>>, %arg3: memref<576x128xbf16, #tpu.memory_space<vmem>>, %arg4: memref<1x128xf32, #tpu.memory_space<vmem>>, %arg5: memref<1x128xf32, #tpu.memory_space<vmem>>, %arg6: memref<9x128x128xbf16, #tpu.memory_space<vmem>>, %arg7: memref<1x128xf32, #tpu.memory_space<vmem>>, %arg8: memref<1x128xf32, #tpu.memory_space<vmem>>, %arg9: memref<64x128xbf16, #tpu.memory_space<vmem>>, %arg10: memref<1x128xf32, #tpu.memory_space<vmem>>, %arg11: memref<1x128xf32, #tpu.memory_space<vmem>>, %arg12: memref<72x128xf32, #tpu.memory_space<vmem>>, %arg13: memref<86x128xf32, #tpu.memory_space<vmem>>) attributes {dimension_semantics = [], scalar_prefetch = 0 : i64, scratch_operands = 1 : i64, tpu.core_type = #tpu.core_type<tc>} {
    %c0 = arith.constant 0 : index
    %c0_0 = arith.constant 0 : index
    %0 = vector.load %arg2[%c0, %c0_0] : memref<72x1xf32, #tpu.memory_space<vmem>>, vector<72x1xf32>
    %c0_1 = arith.constant 0 : index
    %c0_2 = arith.constant 0 : index
    %1 = vector.load %arg0[%c0_1, %c0_2] : memref<72x576xf32, #tpu.memory_space<vmem>>, vector<72x576xf32>
    %2 = arith.truncf %1 : vector<72x576xf32> to vector<72x576xbf16>
    %c0_3 = arith.constant 0 : index
    %c0_4 = arith.constant 0 : index
    %3 = vector.load %arg3[%c0_3, %c0_4] : memref<576x128xbf16, #tpu.memory_space<vmem>>, vector<576x128xbf16>
    %cst = arith.constant dense<0.000000e+00> : vector<72x128xf32>
    %4 = tpu.matmul %2, %3, %cst {dimension_numbers = #tpu.dot_dimension_numbers<[1], [0], [0], [1], [0, 0, 1, 1], [], []>} : vector<72x576xbf16>, vector<576x128xbf16>, vector<72x128xf32> -> vector<72x128xf32>
    %c0_5 = arith.constant 0 : index
    %c0_6 = arith.constant 0 : index
    %5 = vector.load %arg4[%c0_5, %c0_6] : memref<1x128xf32, #tpu.memory_space<vmem>>, vector<1x128xf32>
    %c0_7 = arith.constant 0 : index
    %c0_8 = arith.constant 0 : index
    %6 = vector.load %arg5[%c0_7, %c0_8] : memref<1x128xf32, #tpu.memory_space<vmem>>, vector<1x128xf32>
    %7 = vector.broadcast %0 : vector<72x1xf32> to vector<72x128xf32>
    %8 = arith.mulf %4, %7 : vector<72x128xf32>
    %cst_9 = arith.constant dense<0.000000e+00> : vector<128xf32>
    %9 = vector.multi_reduction <add>, %8, %cst_9 [0] : vector<72x128xf32> to vector<128xf32>
    %10 = vector.shape_cast %9 : vector<128xf32> to vector<1x128xf32>
    %cst_10 = arith.constant 3.200000e+01 : f32
    %11 = vector.broadcast %cst_10 : f32 to vector<1x128xf32>
    %12 = arith.divf %10, %11 : vector<1x128xf32>
    %13 = arith.mulf %8, %4 : vector<72x128xf32>
    %cst_11 = arith.constant dense<0.000000e+00> : vector<128xf32>
    %14 = vector.multi_reduction <add>, %13, %cst_11 [0] : vector<72x128xf32> to vector<128xf32>
    %15 = vector.shape_cast %14 : vector<128xf32> to vector<1x128xf32>
    %cst_12 = arith.constant 3.200000e+01 : f32
    %16 = vector.broadcast %cst_12 : f32 to vector<1x128xf32>
    %17 = arith.divf %15, %16 : vector<1x128xf32>
    %18 = arith.mulf %12, %12 : vector<1x128xf32>
    %19 = arith.subf %17, %18 : vector<1x128xf32>
    %cst_13 = arith.constant 9.99999974E-6 : f32
    %20 = vector.broadcast %cst_13 : f32 to vector<1x128xf32>
    %21 = arith.addf %19, %20 : vector<1x128xf32>
    %22 = math.rsqrt %21 : vector<1x128xf32>
    %23 = arith.mulf %5, %22 : vector<1x128xf32>
    %24 = vector.broadcast %23 : vector<1x128xf32> to vector<72x128xf32>
    %25 = arith.mulf %4, %24 : vector<72x128xf32>
    %26 = arith.mulf %12, %23 : vector<1x128xf32>
    %27 = arith.subf %6, %26 : vector<1x128xf32>
    %28 = vector.broadcast %27 : vector<1x128xf32> to vector<72x128xf32>
    %29 = arith.addf %25, %28 : vector<72x128xf32>
    %cst_14 = arith.constant 0.000000e+00 : f32
    %30 = vector.broadcast %cst_14 : f32 to vector<72x128xf32>
    %31 = arith.maximumf %29, %30 : vector<72x128xf32>
    %32 = vector.broadcast %0 : vector<72x1xf32> to vector<72x128xf32>
    %33 = arith.mulf %31, %32 : vector<72x128xf32>
    %cst_15 = arith.constant 0.000000e+00 : f32
    %34 = vector.broadcast %cst_15 : f32 to vector<86x128xf32>
    %c0_16 = arith.constant 0 : index
    %c0_17 = arith.constant 0 : index
    %35 = vector.load %arg13[%c0_16, %c0_17] : memref<86x128xf32, #tpu.memory_space<vmem>>, vector<86x128xf32>
    tpu.vector_store %arg13[%c0_16, %c0_17], %34 {strides = array<i32>} : memref<86x128xf32, #tpu.memory_space<vmem>>, vector<86x128xf32>,
    %c7 = arith.constant 7 : index
    %c0_18 = arith.constant 0 : index
    %36 = vector.load %arg13[%c7, %c0_18] : memref<86x128xf32, #tpu.memory_space<vmem>>, vector<72x128xf32>
    tpu.vector_store %arg13[%c7, %c0_18], %33 {strides = array<i32>} : memref<86x128xf32, #tpu.memory_space<vmem>>, vector<72x128xf32>,
    %cst_19 = arith.constant 0.000000e+00 : f32
    %37 = vector.broadcast %cst_19 : f32 to vector<72x128xf32>
    %c0_20 = arith.constant 0 : index
    %c0_21 = arith.constant 0 : index
    %38 = vector.load %arg13[%c0_20, %c0_21] : memref<86x128xf32, #tpu.memory_space<vmem>>, vector<72x128xf32>
    %39 = arith.truncf %38 : vector<72x128xf32> to vector<72x128xbf16>
    %c0_22 = arith.constant 0 : index
    %c0_23 = arith.constant 0 : index
    %c0_24 = arith.constant 0 : index
    %40 = vector.load %arg6[%c0_22, %c0_23, %c0_24] : memref<9x128x128xbf16, #tpu.memory_space<vmem>>, vector<1x128x128xbf16>
    %41 = vector.shape_cast %40 : vector<1x128x128xbf16> to vector<128x128xbf16>
    %cst_25 = arith.constant dense<0.000000e+00> : vector<72x128xf32>
    %42 = tpu.matmul %39, %41, %cst_25 {dimension_numbers = #tpu.dot_dimension_numbers<[1], [0], [0], [1], [0, 0, 1, 1], [], []>} : vector<72x128xbf16>, vector<128x128xbf16>, vector<72x128xf32> -> vector<72x128xf32>
    %43 = arith.addf %37, %42 : vector<72x128xf32>
    %c1 = arith.constant 1 : index
    %c0_26 = arith.constant 0 : index
    %44 = vector.load %arg13[%c1, %c0_26] : memref<86x128xf32, #tpu.memory_space<vmem>>, vector<72x128xf32>
    %45 = arith.truncf %44 : vector<72x128xf32> to vector<72x128xbf16>
    %c1_27 = arith.constant 1 : index
    %c0_28 = arith.constant 0 : index
    %c0_29 = arith.constant 0 : index
    %46 = vector.load %arg6[%c1_27, %c0_28, %c0_29] : memref<9x128x128xbf16, #tpu.memory_space<vmem>>, vector<1x128x128xbf16>
    %47 = vector.shape_cast %46 : vector<1x128x128xbf16> to vector<128x128xbf16>
    %cst_30 = arith.constant dense<0.000000e+00> : vector<72x128xf32>
    %48 = tpu.matmul %45, %47, %cst_30 {dimension_numbers = #tpu.dot_dimension_numbers<[1], [0], [0], [1], [0, 0, 1, 1], [], []>} : vector<72x128xbf16>, vector<128x128xbf16>, vector<72x128xf32> -> vector<72x128xf32>
    %49 = arith.addf %43, %48 : vector<72x128xf32>
    %c2 = arith.constant 2 : index
    %c0_31 = arith.constant 0 : index
    %50 = vector.load %arg13[%c2, %c0_31] : memref<86x128xf32, #tpu.memory_space<vmem>>, vector<72x128xf32>
    %51 = arith.truncf %50 : vector<72x128xf32> to vector<72x128xbf16>
    %c2_32 = arith.constant 2 : index
    %c0_33 = arith.constant 0 : index
    %c0_34 = arith.constant 0 : index
    %52 = vector.load %arg6[%c2_32, %c0_33, %c0_34] : memref<9x128x128xbf16, #tpu.memory_space<vmem>>, vector<1x128x128xbf16>
    %53 = vector.shape_cast %52 : vector<1x128x128xbf16> to vector<128x128xbf16>
    %cst_35 = arith.constant dense<0.000000e+00> : vector<72x128xf32>
    %54 = tpu.matmul %51, %53, %cst_35 {dimension_numbers = #tpu.dot_dimension_numbers<[1], [0], [0], [1], [0, 0, 1, 1], [], []>} : vector<72x128xbf16>, vector<128x128xbf16>, vector<72x128xf32> -> vector<72x128xf32>
    %55 = arith.addf %49, %54 : vector<72x128xf32>
    %c6 = arith.constant 6 : index
    %c0_36 = arith.constant 0 : index
    %56 = vector.load %arg13[%c6, %c0_36] : memref<86x128xf32, #tpu.memory_space<vmem>>, vector<72x128xf32>
    %57 = arith.truncf %56 : vector<72x128xf32> to vector<72x128xbf16>
    %c3 = arith.constant 3 : index
    %c0_37 = arith.constant 0 : index
    %c0_38 = arith.constant 0 : index
    %58 = vector.load %arg6[%c3, %c0_37, %c0_38] : memref<9x128x128xbf16, #tpu.memory_space<vmem>>, vector<1x128x128xbf16>
    %59 = vector.shape_cast %58 : vector<1x128x128xbf16> to vector<128x128xbf16>
    %cst_39 = arith.constant dense<0.000000e+00> : vector<72x128xf32>
    %60 = tpu.matmul %57, %59, %cst_39 {dimension_numbers = #tpu.dot_dimension_numbers<[1], [0], [0], [1], [0, 0, 1, 1], [], []>} : vector<72x128xbf16>, vector<128x128xbf16>, vector<72x128xf32> -> vector<72x128xf32>
    %61 = arith.addf %55, %60 : vector<72x128xf32>
    %c7_40 = arith.constant 7 : index
    %c0_41 = arith.constant 0 : index
    %62 = vector.load %arg13[%c7_40, %c0_41] : memref<86x128xf32, #tpu.memory_space<vmem>>, vector<72x128xf32>
    %63 = arith.truncf %62 : vector<72x128xf32> to vector<72x128xbf16>
    %c4 = arith.constant 4 : index
    %c0_42 = arith.constant 0 : index
    %c0_43 = arith.constant 0 : index
    %64 = vector.load %arg6[%c4, %c0_42, %c0_43] : memref<9x128x128xbf16, #tpu.memory_space<vmem>>, vector<1x128x128xbf16>
    %65 = vector.shape_cast %64 : vector<1x128x128xbf16> to vector<128x128xbf16>
    %cst_44 = arith.constant dense<0.000000e+00> : vector<72x128xf32>
    %66 = tpu.matmul %63, %65, %cst_44 {dimension_numbers = #tpu.dot_dimension_numbers<[1], [0], [0], [1], [0, 0, 1, 1], [], []>} : vector<72x128xbf16>, vector<128x128xbf16>, vector<72x128xf32> -> vector<72x128xf32>
    %67 = arith.addf %61, %66 : vector<72x128xf32>
    %c8 = arith.constant 8 : index
    %c0_45 = arith.constant 0 : index
    %68 = vector.load %arg13[%c8, %c0_45] : memref<86x128xf32, #tpu.memory_space<vmem>>, vector<72x128xf32>
    %69 = arith.truncf %68 : vector<72x128xf32> to vector<72x128xbf16>
    %c5 = arith.constant 5 : index
    %c0_46 = arith.constant 0 : index
    %c0_47 = arith.constant 0 : index
    %70 = vector.load %arg6[%c5, %c0_46, %c0_47] : memref<9x128x128xbf16, #tpu.memory_space<vmem>>, vector<1x128x128xbf16>
    %71 = vector.shape_cast %70 : vector<1x128x128xbf16> to vector<128x128xbf16>
    %cst_48 = arith.constant dense<0.000000e+00> : vector<72x128xf32>
    %72 = tpu.matmul %69, %71, %cst_48 {dimension_numbers = #tpu.dot_dimension_numbers<[1], [0], [0], [1], [0, 0, 1, 1], [], []>} : vector<72x128xbf16>, vector<128x128xbf16>, vector<72x128xf32> -> vector<72x128xf32>
    %73 = arith.addf %67, %72 : vector<72x128xf32>
    %c12 = arith.constant 12 : index
    %c0_49 = arith.constant 0 : index
    %74 = vector.load %arg13[%c12, %c0_49] : memref<86x128xf32, #tpu.memory_space<vmem>>, vector<72x128xf32>
    %75 = arith.truncf %74 : vector<72x128xf32> to vector<72x128xbf16>
    %c6_50 = arith.constant 6 : index
    %c0_51 = arith.constant 0 : index
    %c0_52 = arith.constant 0 : index
    %76 = vector.load %arg6[%c6_50, %c0_51, %c0_52] : memref<9x128x128xbf16, #tpu.memory_space<vmem>>, vector<1x128x128xbf16>
    %77 = vector.shape_cast %76 : vector<1x128x128xbf16> to vector<128x128xbf16>
    %cst_53 = arith.constant dense<0.000000e+00> : vector<72x128xf32>
    %78 = tpu.matmul %75, %77, %cst_53 {dimension_numbers = #tpu.dot_dimension_numbers<[1], [0], [0], [1], [0, 0, 1, 1], [], []>} : vector<72x128xbf16>, vector<128x128xbf16>, vector<72x128xf32> -> vector<72x128xf32>
    %79 = arith.addf %73, %78 : vector<72x128xf32>
    %c13 = arith.constant 13 : index
    %c0_54 = arith.constant 0 : index
    %80 = vector.load %arg13[%c13, %c0_54] : memref<86x128xf32, #tpu.memory_space<vmem>>, vector<72x128xf32>
    %81 = arith.truncf %80 : vector<72x128xf32> to vector<72x128xbf16>
    %c7_55 = arith.constant 7 : index
    %c0_56 = arith.constant 0 : index
    %c0_57 = arith.constant 0 : index
    %82 = vector.load %arg6[%c7_55, %c0_56, %c0_57] : memref<9x128x128xbf16, #tpu.memory_space<vmem>>, vector<1x128x128xbf16>
    %83 = vector.shape_cast %82 : vector<1x128x128xbf16> to vector<128x128xbf16>
    %cst_58 = arith.constant dense<0.000000e+00> : vector<72x128xf32>
    %84 = tpu.matmul %81, %83, %cst_58 {dimension_numbers = #tpu.dot_dimension_numbers<[1], [0], [0], [1], [0, 0, 1, 1], [], []>} : vector<72x128xbf16>, vector<128x128xbf16>, vector<72x128xf32> -> vector<72x128xf32>
    %85 = arith.addf %79, %84 : vector<72x128xf32>
    %c14 = arith.constant 14 : index
    %c0_59 = arith.constant 0 : index
    %86 = vector.load %arg13[%c14, %c0_59] : memref<86x128xf32, #tpu.memory_space<vmem>>, vector<72x128xf32>
    %87 = arith.truncf %86 : vector<72x128xf32> to vector<72x128xbf16>
    %c8_60 = arith.constant 8 : index
    %c0_61 = arith.constant 0 : index
    %c0_62 = arith.constant 0 : index
    %88 = vector.load %arg6[%c8_60, %c0_61, %c0_62] : memref<9x128x128xbf16, #tpu.memory_space<vmem>>, vector<1x128x128xbf16>
    %89 = vector.shape_cast %88 : vector<1x128x128xbf16> to vector<128x128xbf16>
    %cst_63 = arith.constant dense<0.000000e+00> : vector<72x128xf32>
    %90 = tpu.matmul %87, %89, %cst_63 {dimension_numbers = #tpu.dot_dimension_numbers<[1], [0], [0], [1], [0, 0, 1, 1], [], []>} : vector<72x128xbf16>, vector<128x128xbf16>, vector<72x128xf32> -> vector<72x128xf32>
    %91 = arith.addf %85, %90 : vector<72x128xf32>
    %c0_64 = arith.constant 0 : index
    %c0_65 = arith.constant 0 : index
    %92 = vector.load %arg7[%c0_64, %c0_65] : memref<1x128xf32, #tpu.memory_space<vmem>>, vector<1x128xf32>
    %c0_66 = arith.constant 0 : index
    %c0_67 = arith.constant 0 : index
    %93 = vector.load %arg8[%c0_66, %c0_67] : memref<1x128xf32, #tpu.memory_space<vmem>>, vector<1x128xf32>
    %94 = vector.broadcast %0 : vector<72x1xf32> to vector<72x128xf32>
    %95 = arith.mulf %91, %94 : vector<72x128xf32>
    %cst_68 = arith.constant dense<0.000000e+00> : vector<128xf32>
    %96 = vector.multi_reduction <add>, %95, %cst_68 [0] : vector<72x128xf32> to vector<128xf32>
    %97 = vector.shape_cast %96 : vector<128xf32> to vector<1x128xf32>
    %cst_69 = arith.constant 3.200000e+01 : f32
    %98 = vector.broadcast %cst_69 : f32 to vector<1x128xf32>
    %99 = arith.divf %97, %98 : vector<1x128xf32>
    %100 = arith.mulf %95, %91 : vector<72x128xf32>
    %cst_70 = arith.constant dense<0.000000e+00> : vector<128xf32>
    %101 = vector.multi_reduction <add>, %100, %cst_70 [0] : vector<72x128xf32> to vector<128xf32>
    %102 = vector.shape_cast %101 : vector<128xf32> to vector<1x128xf32>
    %cst_71 = arith.constant 3.200000e+01 : f32
    %103 = vector.broadcast %cst_71 : f32 to vector<1x128xf32>
    %104 = arith.divf %102, %103 : vector<1x128xf32>
    %105 = arith.mulf %99, %99 : vector<1x128xf32>
    %106 = arith.subf %104, %105 : vector<1x128xf32>
    %cst_72 = arith.constant 9.99999974E-6 : f32
    %107 = vector.broadcast %cst_72 : f32 to vector<1x128xf32>
    %108 = arith.addf %106, %107 : vector<1x128xf32>
    %109 = math.rsqrt %108 : vector<1x128xf32>
    %110 = arith.mulf %92, %109 : vector<1x128xf32>
    %111 = vector.broadcast %110 : vector<1x128xf32> to vector<72x128xf32>
    %112 = arith.mulf %91, %111 : vector<72x128xf32>
    %113 = arith.mulf %99, %110 : vector<1x128xf32>
    %114 = arith.subf %93, %113 : vector<1x128xf32>
    %115 = vector.broadcast %114 : vector<1x128xf32> to vector<72x128xf32>
    %116 = arith.addf %112, %115 : vector<72x128xf32>
    %c0_73 = arith.constant 0 : index
    %c0_74 = arith.constant 0 : index
    %117 = vector.load %arg1[%c0_73, %c0_74] : memref<72x64xf32, #tpu.memory_space<vmem>>, vector<72x64xf32>
    %118 = arith.truncf %117 : vector<72x64xf32> to vector<72x64xbf16>
    %c0_75 = arith.constant 0 : index
    %c0_76 = arith.constant 0 : index
    %119 = vector.load %arg9[%c0_75, %c0_76] : memref<64x128xbf16, #tpu.memory_space<vmem>>, vector<64x128xbf16>
    %cst_77 = arith.constant dense<0.000000e+00> : vector<72x128xf32>
    %120 = tpu.matmul %118, %119, %cst_77 {dimension_numbers = #tpu.dot_dimension_numbers<[1], [0], [0], [1], [0, 0, 1, 1], [], []>} : vector<72x64xbf16>, vector<64x128xbf16>, vector<72x128xf32> -> vector<72x128xf32>
    %c0_78 = arith.constant 0 : index
    %c0_79 = arith.constant 0 : index
    %121 = vector.load %arg10[%c0_78, %c0_79] : memref<1x128xf32, #tpu.memory_space<vmem>>, vector<1x128xf32>
    %c0_80 = arith.constant 0 : index
    %c0_81 = arith.constant 0 : index
    %122 = vector.load %arg11[%c0_80, %c0_81] : memref<1x128xf32, #tpu.memory_space<vmem>>, vector<1x128xf32>
    %123 = vector.broadcast %0 : vector<72x1xf32> to vector<72x128xf32>
    %124 = arith.mulf %120, %123 : vector<72x128xf32>
    %cst_82 = arith.constant dense<0.000000e+00> : vector<128xf32>
    %125 = vector.multi_reduction <add>, %124, %cst_82 [0] : vector<72x128xf32> to vector<128xf32>
    %126 = vector.shape_cast %125 : vector<128xf32> to vector<1x128xf32>
    %cst_83 = arith.constant 3.200000e+01 : f32
    %127 = vector.broadcast %cst_83 : f32 to vector<1x128xf32>
    %128 = arith.divf %126, %127 : vector<1x128xf32>
    %129 = arith.mulf %124, %120 : vector<72x128xf32>
    %cst_84 = arith.constant dense<0.000000e+00> : vector<128xf32>
    %130 = vector.multi_reduction <add>, %129, %cst_84 [0] : vector<72x128xf32> to vector<128xf32>
    %131 = vector.shape_cast %130 : vector<128xf32> to vector<1x128xf32>
    %cst_85 = arith.constant 3.200000e+01 : f32
    %132 = vector.broadcast %cst_85 : f32 to vector<1x128xf32>
    %133 = arith.divf %131, %132 : vector<1x128xf32>
    %134 = arith.mulf %128, %128 : vector<1x128xf32>
    %135 = arith.subf %133, %134 : vector<1x128xf32>
    %cst_86 = arith.constant 9.99999974E-6 : f32
    %136 = vector.broadcast %cst_86 : f32 to vector<1x128xf32>
    %137 = arith.addf %135, %136 : vector<1x128xf32>
    %138 = math.rsqrt %137 : vector<1x128xf32>
    %139 = arith.mulf %121, %138 : vector<1x128xf32>
    %140 = vector.broadcast %139 : vector<1x128xf32> to vector<72x128xf32>
    %141 = arith.mulf %120, %140 : vector<72x128xf32>
    %142 = arith.mulf %128, %139 : vector<1x128xf32>
    %143 = arith.subf %122, %142 : vector<1x128xf32>
    %144 = vector.broadcast %143 : vector<1x128xf32> to vector<72x128xf32>
    %145 = arith.addf %141, %144 : vector<72x128xf32>
    %146 = arith.addf %116, %145 : vector<72x128xf32>
    %cst_87 = arith.constant 0.000000e+00 : f32
    %147 = vector.broadcast %cst_87 : f32 to vector<72x128xf32>
    %148 = arith.maximumf %146, %147 : vector<72x128xf32>
    %c0_88 = arith.constant 0 : index
    %c0_89 = arith.constant 0 : index
    %149 = vector.load %arg12[%c0_88, %c0_89] : memref<72x128xf32, #tpu.memory_space<vmem>>, vector<72x128xf32>
    tpu.vector_store %arg12[%c0_88, %c0_89], %148 {strides = array<i32>} : memref<72x128xf32, #tpu.memory_space<vmem>>, vector<72x128xf32>,
    return
  }
}

module attributes {stable_mosaic.version = 11 : i64} {
  func.func @_block_kernel(%arg0: memref<86x128xf32, #tpu.memory_space<vmem>>, %arg1: memref<72x1xf32, #tpu.memory_space<vmem>>, %arg2: memref<9x128x128xbf16, #tpu.memory_space<vmem>>, %arg3: memref<1x128xf32, #tpu.memory_space<vmem>>, %arg4: memref<1x128xf32, #tpu.memory_space<vmem>>, %arg5: memref<9x128x128xbf16, #tpu.memory_space<vmem>>, %arg6: memref<1x128xf32, #tpu.memory_space<vmem>>, %arg7: memref<1x128xf32, #tpu.memory_space<vmem>>, %arg8: memref<72x128xf32, #tpu.memory_space<vmem>>, %arg9: memref<86x128xf32, #tpu.memory_space<vmem>>) attributes {dimension_semantics = [], scalar_prefetch = 0 : i64, scratch_operands = 1 : i64, tpu.core_type = #tpu.core_type<tc>} {
    %c0 = arith.constant 0 : index
    %c0_0 = arith.constant 0 : index
    %0 = vector.load %arg1[%c0, %c0_0] : memref<72x1xf32, #tpu.memory_space<vmem>>, vector<72x1xf32>
    %cst = arith.constant 0.000000e+00 : f32
    %1 = vector.broadcast %cst : f32 to vector<72x128xf32>
    %c0_1 = arith.constant 0 : index
    %c0_2 = arith.constant 0 : index
    %2 = vector.load %arg0[%c0_1, %c0_2] : memref<86x128xf32, #tpu.memory_space<vmem>>, vector<72x128xf32>
    %3 = arith.truncf %2 : vector<72x128xf32> to vector<72x128xbf16>
    %c0_3 = arith.constant 0 : index
    %c0_4 = arith.constant 0 : index
    %c0_5 = arith.constant 0 : index
    %4 = vector.load %arg2[%c0_3, %c0_4, %c0_5] : memref<9x128x128xbf16, #tpu.memory_space<vmem>>, vector<1x128x128xbf16>
    %5 = vector.shape_cast %4 : vector<1x128x128xbf16> to vector<128x128xbf16>
    %cst_6 = arith.constant dense<0.000000e+00> : vector<72x128xf32>
    %6 = tpu.matmul %3, %5, %cst_6 {dimension_numbers = #tpu.dot_dimension_numbers<[1], [0], [0], [1], [0, 0, 1, 1], [], []>} : vector<72x128xbf16>, vector<128x128xbf16>, vector<72x128xf32> -> vector<72x128xf32>
    %7 = arith.addf %1, %6 : vector<72x128xf32>
    %c1 = arith.constant 1 : index
    %c0_7 = arith.constant 0 : index
    %8 = vector.load %arg0[%c1, %c0_7] : memref<86x128xf32, #tpu.memory_space<vmem>>, vector<72x128xf32>
    %9 = arith.truncf %8 : vector<72x128xf32> to vector<72x128xbf16>
    %c1_8 = arith.constant 1 : index
    %c0_9 = arith.constant 0 : index
    %c0_10 = arith.constant 0 : index
    %10 = vector.load %arg2[%c1_8, %c0_9, %c0_10] : memref<9x128x128xbf16, #tpu.memory_space<vmem>>, vector<1x128x128xbf16>
    %11 = vector.shape_cast %10 : vector<1x128x128xbf16> to vector<128x128xbf16>
    %cst_11 = arith.constant dense<0.000000e+00> : vector<72x128xf32>
    %12 = tpu.matmul %9, %11, %cst_11 {dimension_numbers = #tpu.dot_dimension_numbers<[1], [0], [0], [1], [0, 0, 1, 1], [], []>} : vector<72x128xbf16>, vector<128x128xbf16>, vector<72x128xf32> -> vector<72x128xf32>
    %13 = arith.addf %7, %12 : vector<72x128xf32>
    %c2 = arith.constant 2 : index
    %c0_12 = arith.constant 0 : index
    %14 = vector.load %arg0[%c2, %c0_12] : memref<86x128xf32, #tpu.memory_space<vmem>>, vector<72x128xf32>
    %15 = arith.truncf %14 : vector<72x128xf32> to vector<72x128xbf16>
    %c2_13 = arith.constant 2 : index
    %c0_14 = arith.constant 0 : index
    %c0_15 = arith.constant 0 : index
    %16 = vector.load %arg2[%c2_13, %c0_14, %c0_15] : memref<9x128x128xbf16, #tpu.memory_space<vmem>>, vector<1x128x128xbf16>
    %17 = vector.shape_cast %16 : vector<1x128x128xbf16> to vector<128x128xbf16>
    %cst_16 = arith.constant dense<0.000000e+00> : vector<72x128xf32>
    %18 = tpu.matmul %15, %17, %cst_16 {dimension_numbers = #tpu.dot_dimension_numbers<[1], [0], [0], [1], [0, 0, 1, 1], [], []>} : vector<72x128xbf16>, vector<128x128xbf16>, vector<72x128xf32> -> vector<72x128xf32>
    %19 = arith.addf %13, %18 : vector<72x128xf32>
    %c6 = arith.constant 6 : index
    %c0_17 = arith.constant 0 : index
    %20 = vector.load %arg0[%c6, %c0_17] : memref<86x128xf32, #tpu.memory_space<vmem>>, vector<72x128xf32>
    %21 = arith.truncf %20 : vector<72x128xf32> to vector<72x128xbf16>
    %c3 = arith.constant 3 : index
    %c0_18 = arith.constant 0 : index
    %c0_19 = arith.constant 0 : index
    %22 = vector.load %arg2[%c3, %c0_18, %c0_19] : memref<9x128x128xbf16, #tpu.memory_space<vmem>>, vector<1x128x128xbf16>
    %23 = vector.shape_cast %22 : vector<1x128x128xbf16> to vector<128x128xbf16>
    %cst_20 = arith.constant dense<0.000000e+00> : vector<72x128xf32>
    %24 = tpu.matmul %21, %23, %cst_20 {dimension_numbers = #tpu.dot_dimension_numbers<[1], [0], [0], [1], [0, 0, 1, 1], [], []>} : vector<72x128xbf16>, vector<128x128xbf16>, vector<72x128xf32> -> vector<72x128xf32>
    %25 = arith.addf %19, %24 : vector<72x128xf32>
    %c7 = arith.constant 7 : index
    %c0_21 = arith.constant 0 : index
    %26 = vector.load %arg0[%c7, %c0_21] : memref<86x128xf32, #tpu.memory_space<vmem>>, vector<72x128xf32>
    %27 = arith.truncf %26 : vector<72x128xf32> to vector<72x128xbf16>
    %c4 = arith.constant 4 : index
    %c0_22 = arith.constant 0 : index
    %c0_23 = arith.constant 0 : index
    %28 = vector.load %arg2[%c4, %c0_22, %c0_23] : memref<9x128x128xbf16, #tpu.memory_space<vmem>>, vector<1x128x128xbf16>
    %29 = vector.shape_cast %28 : vector<1x128x128xbf16> to vector<128x128xbf16>
    %cst_24 = arith.constant dense<0.000000e+00> : vector<72x128xf32>
    %30 = tpu.matmul %27, %29, %cst_24 {dimension_numbers = #tpu.dot_dimension_numbers<[1], [0], [0], [1], [0, 0, 1, 1], [], []>} : vector<72x128xbf16>, vector<128x128xbf16>, vector<72x128xf32> -> vector<72x128xf32>
    %31 = arith.addf %25, %30 : vector<72x128xf32>
    %c8 = arith.constant 8 : index
    %c0_25 = arith.constant 0 : index
    %32 = vector.load %arg0[%c8, %c0_25] : memref<86x128xf32, #tpu.memory_space<vmem>>, vector<72x128xf32>
    %33 = arith.truncf %32 : vector<72x128xf32> to vector<72x128xbf16>
    %c5 = arith.constant 5 : index
    %c0_26 = arith.constant 0 : index
    %c0_27 = arith.constant 0 : index
    %34 = vector.load %arg2[%c5, %c0_26, %c0_27] : memref<9x128x128xbf16, #tpu.memory_space<vmem>>, vector<1x128x128xbf16>
    %35 = vector.shape_cast %34 : vector<1x128x128xbf16> to vector<128x128xbf16>
    %cst_28 = arith.constant dense<0.000000e+00> : vector<72x128xf32>
    %36 = tpu.matmul %33, %35, %cst_28 {dimension_numbers = #tpu.dot_dimension_numbers<[1], [0], [0], [1], [0, 0, 1, 1], [], []>} : vector<72x128xbf16>, vector<128x128xbf16>, vector<72x128xf32> -> vector<72x128xf32>
    %37 = arith.addf %31, %36 : vector<72x128xf32>
    %c12 = arith.constant 12 : index
    %c0_29 = arith.constant 0 : index
    %38 = vector.load %arg0[%c12, %c0_29] : memref<86x128xf32, #tpu.memory_space<vmem>>, vector<72x128xf32>
    %39 = arith.truncf %38 : vector<72x128xf32> to vector<72x128xbf16>
    %c6_30 = arith.constant 6 : index
    %c0_31 = arith.constant 0 : index
    %c0_32 = arith.constant 0 : index
    %40 = vector.load %arg2[%c6_30, %c0_31, %c0_32] : memref<9x128x128xbf16, #tpu.memory_space<vmem>>, vector<1x128x128xbf16>
    %41 = vector.shape_cast %40 : vector<1x128x128xbf16> to vector<128x128xbf16>
    %cst_33 = arith.constant dense<0.000000e+00> : vector<72x128xf32>
    %42 = tpu.matmul %39, %41, %cst_33 {dimension_numbers = #tpu.dot_dimension_numbers<[1], [0], [0], [1], [0, 0, 1, 1], [], []>} : vector<72x128xbf16>, vector<128x128xbf16>, vector<72x128xf32> -> vector<72x128xf32>
    %43 = arith.addf %37, %42 : vector<72x128xf32>
    %c13 = arith.constant 13 : index
    %c0_34 = arith.constant 0 : index
    %44 = vector.load %arg0[%c13, %c0_34] : memref<86x128xf32, #tpu.memory_space<vmem>>, vector<72x128xf32>
    %45 = arith.truncf %44 : vector<72x128xf32> to vector<72x128xbf16>
    %c7_35 = arith.constant 7 : index
    %c0_36 = arith.constant 0 : index
    %c0_37 = arith.constant 0 : index
    %46 = vector.load %arg2[%c7_35, %c0_36, %c0_37] : memref<9x128x128xbf16, #tpu.memory_space<vmem>>, vector<1x128x128xbf16>
    %47 = vector.shape_cast %46 : vector<1x128x128xbf16> to vector<128x128xbf16>
    %cst_38 = arith.constant dense<0.000000e+00> : vector<72x128xf32>
    %48 = tpu.matmul %45, %47, %cst_38 {dimension_numbers = #tpu.dot_dimension_numbers<[1], [0], [0], [1], [0, 0, 1, 1], [], []>} : vector<72x128xbf16>, vector<128x128xbf16>, vector<72x128xf32> -> vector<72x128xf32>
    %49 = arith.addf %43, %48 : vector<72x128xf32>
    %c14 = arith.constant 14 : index
    %c0_39 = arith.constant 0 : index
    %50 = vector.load %arg0[%c14, %c0_39] : memref<86x128xf32, #tpu.memory_space<vmem>>, vector<72x128xf32>
    %51 = arith.truncf %50 : vector<72x128xf32> to vector<72x128xbf16>
    %c8_40 = arith.constant 8 : index
    %c0_41 = arith.constant 0 : index
    %c0_42 = arith.constant 0 : index
    %52 = vector.load %arg2[%c8_40, %c0_41, %c0_42] : memref<9x128x128xbf16, #tpu.memory_space<vmem>>, vector<1x128x128xbf16>
    %53 = vector.shape_cast %52 : vector<1x128x128xbf16> to vector<128x128xbf16>
    %cst_43 = arith.constant dense<0.000000e+00> : vector<72x128xf32>
    %54 = tpu.matmul %51, %53, %cst_43 {dimension_numbers = #tpu.dot_dimension_numbers<[1], [0], [0], [1], [0, 0, 1, 1], [], []>} : vector<72x128xbf16>, vector<128x128xbf16>, vector<72x128xf32> -> vector<72x128xf32>
    %55 = arith.addf %49, %54 : vector<72x128xf32>
    %c0_44 = arith.constant 0 : index
    %c0_45 = arith.constant 0 : index
    %56 = vector.load %arg3[%c0_44, %c0_45] : memref<1x128xf32, #tpu.memory_space<vmem>>, vector<1x128xf32>
    %c0_46 = arith.constant 0 : index
    %c0_47 = arith.constant 0 : index
    %57 = vector.load %arg4[%c0_46, %c0_47] : memref<1x128xf32, #tpu.memory_space<vmem>>, vector<1x128xf32>
    %58 = vector.broadcast %0 : vector<72x1xf32> to vector<72x128xf32>
    %59 = arith.mulf %55, %58 : vector<72x128xf32>
    %cst_48 = arith.constant dense<0.000000e+00> : vector<128xf32>
    %60 = vector.multi_reduction <add>, %59, %cst_48 [0] : vector<72x128xf32> to vector<128xf32>
    %61 = vector.shape_cast %60 : vector<128xf32> to vector<1x128xf32>
    %cst_49 = arith.constant 3.200000e+01 : f32
    %62 = vector.broadcast %cst_49 : f32 to vector<1x128xf32>
    %63 = arith.divf %61, %62 : vector<1x128xf32>
    %64 = arith.mulf %59, %55 : vector<72x128xf32>
    %cst_50 = arith.constant dense<0.000000e+00> : vector<128xf32>
    %65 = vector.multi_reduction <add>, %64, %cst_50 [0] : vector<72x128xf32> to vector<128xf32>
    %66 = vector.shape_cast %65 : vector<128xf32> to vector<1x128xf32>
    %cst_51 = arith.constant 3.200000e+01 : f32
    %67 = vector.broadcast %cst_51 : f32 to vector<1x128xf32>
    %68 = arith.divf %66, %67 : vector<1x128xf32>
    %69 = arith.mulf %63, %63 : vector<1x128xf32>
    %70 = arith.subf %68, %69 : vector<1x128xf32>
    %cst_52 = arith.constant 9.99999974E-6 : f32
    %71 = vector.broadcast %cst_52 : f32 to vector<1x128xf32>
    %72 = arith.addf %70, %71 : vector<1x128xf32>
    %73 = math.rsqrt %72 : vector<1x128xf32>
    %74 = arith.mulf %56, %73 : vector<1x128xf32>
    %75 = vector.broadcast %74 : vector<1x128xf32> to vector<72x128xf32>
    %76 = arith.mulf %55, %75 : vector<72x128xf32>
    %77 = arith.mulf %63, %74 : vector<1x128xf32>
    %78 = arith.subf %57, %77 : vector<1x128xf32>
    %79 = vector.broadcast %78 : vector<1x128xf32> to vector<72x128xf32>
    %80 = arith.addf %76, %79 : vector<72x128xf32>
    %cst_53 = arith.constant 0.000000e+00 : f32
    %81 = vector.broadcast %cst_53 : f32 to vector<72x128xf32>
    %82 = arith.maximumf %80, %81 : vector<72x128xf32>
    %83 = vector.broadcast %0 : vector<72x1xf32> to vector<72x128xf32>
    %84 = arith.mulf %82, %83 : vector<72x128xf32>
    %cst_54 = arith.constant 0.000000e+00 : f32
    %85 = vector.broadcast %cst_54 : f32 to vector<86x128xf32>
    %c0_55 = arith.constant 0 : index
    %c0_56 = arith.constant 0 : index
    %86 = vector.load %arg9[%c0_55, %c0_56] : memref<86x128xf32, #tpu.memory_space<vmem>>, vector<86x128xf32>
    tpu.vector_store %arg9[%c0_55, %c0_56], %85 {strides = array<i32>} : memref<86x128xf32, #tpu.memory_space<vmem>>, vector<86x128xf32>,
    %c7_57 = arith.constant 7 : index
    %c0_58 = arith.constant 0 : index
    %87 = vector.load %arg9[%c7_57, %c0_58] : memref<86x128xf32, #tpu.memory_space<vmem>>, vector<72x128xf32>
    tpu.vector_store %arg9[%c7_57, %c0_58], %84 {strides = array<i32>} : memref<86x128xf32, #tpu.memory_space<vmem>>, vector<72x128xf32>,
    %cst_59 = arith.constant 0.000000e+00 : f32
    %88 = vector.broadcast %cst_59 : f32 to vector<72x128xf32>
    %c0_60 = arith.constant 0 : index
    %c0_61 = arith.constant 0 : index
    %89 = vector.load %arg9[%c0_60, %c0_61] : memref<86x128xf32, #tpu.memory_space<vmem>>, vector<72x128xf32>
    %90 = arith.truncf %89 : vector<72x128xf32> to vector<72x128xbf16>
    %c0_62 = arith.constant 0 : index
    %c0_63 = arith.constant 0 : index
    %c0_64 = arith.constant 0 : index
    %91 = vector.load %arg5[%c0_62, %c0_63, %c0_64] : memref<9x128x128xbf16, #tpu.memory_space<vmem>>, vector<1x128x128xbf16>
    %92 = vector.shape_cast %91 : vector<1x128x128xbf16> to vector<128x128xbf16>
    %cst_65 = arith.constant dense<0.000000e+00> : vector<72x128xf32>
    %93 = tpu.matmul %90, %92, %cst_65 {dimension_numbers = #tpu.dot_dimension_numbers<[1], [0], [0], [1], [0, 0, 1, 1], [], []>} : vector<72x128xbf16>, vector<128x128xbf16>, vector<72x128xf32> -> vector<72x128xf32>
    %94 = arith.addf %88, %93 : vector<72x128xf32>
    %c1_66 = arith.constant 1 : index
    %c0_67 = arith.constant 0 : index
    %95 = vector.load %arg9[%c1_66, %c0_67] : memref<86x128xf32, #tpu.memory_space<vmem>>, vector<72x128xf32>
    %96 = arith.truncf %95 : vector<72x128xf32> to vector<72x128xbf16>
    %c1_68 = arith.constant 1 : index
    %c0_69 = arith.constant 0 : index
    %c0_70 = arith.constant 0 : index
    %97 = vector.load %arg5[%c1_68, %c0_69, %c0_70] : memref<9x128x128xbf16, #tpu.memory_space<vmem>>, vector<1x128x128xbf16>
    %98 = vector.shape_cast %97 : vector<1x128x128xbf16> to vector<128x128xbf16>
    %cst_71 = arith.constant dense<0.000000e+00> : vector<72x128xf32>
    %99 = tpu.matmul %96, %98, %cst_71 {dimension_numbers = #tpu.dot_dimension_numbers<[1], [0], [0], [1], [0, 0, 1, 1], [], []>} : vector<72x128xbf16>, vector<128x128xbf16>, vector<72x128xf32> -> vector<72x128xf32>
    %100 = arith.addf %94, %99 : vector<72x128xf32>
    %c2_72 = arith.constant 2 : index
    %c0_73 = arith.constant 0 : index
    %101 = vector.load %arg9[%c2_72, %c0_73] : memref<86x128xf32, #tpu.memory_space<vmem>>, vector<72x128xf32>
    %102 = arith.truncf %101 : vector<72x128xf32> to vector<72x128xbf16>
    %c2_74 = arith.constant 2 : index
    %c0_75 = arith.constant 0 : index
    %c0_76 = arith.constant 0 : index
    %103 = vector.load %arg5[%c2_74, %c0_75, %c0_76] : memref<9x128x128xbf16, #tpu.memory_space<vmem>>, vector<1x128x128xbf16>
    %104 = vector.shape_cast %103 : vector<1x128x128xbf16> to vector<128x128xbf16>
    %cst_77 = arith.constant dense<0.000000e+00> : vector<72x128xf32>
    %105 = tpu.matmul %102, %104, %cst_77 {dimension_numbers = #tpu.dot_dimension_numbers<[1], [0], [0], [1], [0, 0, 1, 1], [], []>} : vector<72x128xbf16>, vector<128x128xbf16>, vector<72x128xf32> -> vector<72x128xf32>
    %106 = arith.addf %100, %105 : vector<72x128xf32>
    %c6_78 = arith.constant 6 : index
    %c0_79 = arith.constant 0 : index
    %107 = vector.load %arg9[%c6_78, %c0_79] : memref<86x128xf32, #tpu.memory_space<vmem>>, vector<72x128xf32>
    %108 = arith.truncf %107 : vector<72x128xf32> to vector<72x128xbf16>
    %c3_80 = arith.constant 3 : index
    %c0_81 = arith.constant 0 : index
    %c0_82 = arith.constant 0 : index
    %109 = vector.load %arg5[%c3_80, %c0_81, %c0_82] : memref<9x128x128xbf16, #tpu.memory_space<vmem>>, vector<1x128x128xbf16>
    %110 = vector.shape_cast %109 : vector<1x128x128xbf16> to vector<128x128xbf16>
    %cst_83 = arith.constant dense<0.000000e+00> : vector<72x128xf32>
    %111 = tpu.matmul %108, %110, %cst_83 {dimension_numbers = #tpu.dot_dimension_numbers<[1], [0], [0], [1], [0, 0, 1, 1], [], []>} : vector<72x128xbf16>, vector<128x128xbf16>, vector<72x128xf32> -> vector<72x128xf32>
    %112 = arith.addf %106, %111 : vector<72x128xf32>
    %c7_84 = arith.constant 7 : index
    %c0_85 = arith.constant 0 : index
    %113 = vector.load %arg9[%c7_84, %c0_85] : memref<86x128xf32, #tpu.memory_space<vmem>>, vector<72x128xf32>
    %114 = arith.truncf %113 : vector<72x128xf32> to vector<72x128xbf16>
    %c4_86 = arith.constant 4 : index
    %c0_87 = arith.constant 0 : index
    %c0_88 = arith.constant 0 : index
    %115 = vector.load %arg5[%c4_86, %c0_87, %c0_88] : memref<9x128x128xbf16, #tpu.memory_space<vmem>>, vector<1x128x128xbf16>
    %116 = vector.shape_cast %115 : vector<1x128x128xbf16> to vector<128x128xbf16>
    %cst_89 = arith.constant dense<0.000000e+00> : vector<72x128xf32>
    %117 = tpu.matmul %114, %116, %cst_89 {dimension_numbers = #tpu.dot_dimension_numbers<[1], [0], [0], [1], [0, 0, 1, 1], [], []>} : vector<72x128xbf16>, vector<128x128xbf16>, vector<72x128xf32> -> vector<72x128xf32>
    %118 = arith.addf %112, %117 : vector<72x128xf32>
    %c8_90 = arith.constant 8 : index
    %c0_91 = arith.constant 0 : index
    %119 = vector.load %arg9[%c8_90, %c0_91] : memref<86x128xf32, #tpu.memory_space<vmem>>, vector<72x128xf32>
    %120 = arith.truncf %119 : vector<72x128xf32> to vector<72x128xbf16>
    %c5_92 = arith.constant 5 : index
    %c0_93 = arith.constant 0 : index
    %c0_94 = arith.constant 0 : index
    %121 = vector.load %arg5[%c5_92, %c0_93, %c0_94] : memref<9x128x128xbf16, #tpu.memory_space<vmem>>, vector<1x128x128xbf16>
    %122 = vector.shape_cast %121 : vector<1x128x128xbf16> to vector<128x128xbf16>
    %cst_95 = arith.constant dense<0.000000e+00> : vector<72x128xf32>
    %123 = tpu.matmul %120, %122, %cst_95 {dimension_numbers = #tpu.dot_dimension_numbers<[1], [0], [0], [1], [0, 0, 1, 1], [], []>} : vector<72x128xbf16>, vector<128x128xbf16>, vector<72x128xf32> -> vector<72x128xf32>
    %124 = arith.addf %118, %123 : vector<72x128xf32>
    %c12_96 = arith.constant 12 : index
    %c0_97 = arith.constant 0 : index
    %125 = vector.load %arg9[%c12_96, %c0_97] : memref<86x128xf32, #tpu.memory_space<vmem>>, vector<72x128xf32>
    %126 = arith.truncf %125 : vector<72x128xf32> to vector<72x128xbf16>
    %c6_98 = arith.constant 6 : index
    %c0_99 = arith.constant 0 : index
    %c0_100 = arith.constant 0 : index
    %127 = vector.load %arg5[%c6_98, %c0_99, %c0_100] : memref<9x128x128xbf16, #tpu.memory_space<vmem>>, vector<1x128x128xbf16>
    %128 = vector.shape_cast %127 : vector<1x128x128xbf16> to vector<128x128xbf16>
    %cst_101 = arith.constant dense<0.000000e+00> : vector<72x128xf32>
    %129 = tpu.matmul %126, %128, %cst_101 {dimension_numbers = #tpu.dot_dimension_numbers<[1], [0], [0], [1], [0, 0, 1, 1], [], []>} : vector<72x128xbf16>, vector<128x128xbf16>, vector<72x128xf32> -> vector<72x128xf32>
    %130 = arith.addf %124, %129 : vector<72x128xf32>
    %c13_102 = arith.constant 13 : index
    %c0_103 = arith.constant 0 : index
    %131 = vector.load %arg9[%c13_102, %c0_103] : memref<86x128xf32, #tpu.memory_space<vmem>>, vector<72x128xf32>
    %132 = arith.truncf %131 : vector<72x128xf32> to vector<72x128xbf16>
    %c7_104 = arith.constant 7 : index
    %c0_105 = arith.constant 0 : index
    %c0_106 = arith.constant 0 : index
    %133 = vector.load %arg5[%c7_104, %c0_105, %c0_106] : memref<9x128x128xbf16, #tpu.memory_space<vmem>>, vector<1x128x128xbf16>
    %134 = vector.shape_cast %133 : vector<1x128x128xbf16> to vector<128x128xbf16>
    %cst_107 = arith.constant dense<0.000000e+00> : vector<72x128xf32>
    %135 = tpu.matmul %132, %134, %cst_107 {dimension_numbers = #tpu.dot_dimension_numbers<[1], [0], [0], [1], [0, 0, 1, 1], [], []>} : vector<72x128xbf16>, vector<128x128xbf16>, vector<72x128xf32> -> vector<72x128xf32>
    %136 = arith.addf %130, %135 : vector<72x128xf32>
    %c14_108 = arith.constant 14 : index
    %c0_109 = arith.constant 0 : index
    %137 = vector.load %arg9[%c14_108, %c0_109] : memref<86x128xf32, #tpu.memory_space<vmem>>, vector<72x128xf32>
    %138 = arith.truncf %137 : vector<72x128xf32> to vector<72x128xbf16>
    %c8_110 = arith.constant 8 : index
    %c0_111 = arith.constant 0 : index
    %c0_112 = arith.constant 0 : index
    %139 = vector.load %arg5[%c8_110, %c0_111, %c0_112] : memref<9x128x128xbf16, #tpu.memory_space<vmem>>, vector<1x128x128xbf16>
    %140 = vector.shape_cast %139 : vector<1x128x128xbf16> to vector<128x128xbf16>
    %cst_113 = arith.constant dense<0.000000e+00> : vector<72x128xf32>
    %141 = tpu.matmul %138, %140, %cst_113 {dimension_numbers = #tpu.dot_dimension_numbers<[1], [0], [0], [1], [0, 0, 1, 1], [], []>} : vector<72x128xbf16>, vector<128x128xbf16>, vector<72x128xf32> -> vector<72x128xf32>
    %142 = arith.addf %136, %141 : vector<72x128xf32>
    %c0_114 = arith.constant 0 : index
    %c0_115 = arith.constant 0 : index
    %143 = vector.load %arg6[%c0_114, %c0_115] : memref<1x128xf32, #tpu.memory_space<vmem>>, vector<1x128xf32>
    %c0_116 = arith.constant 0 : index
    %c0_117 = arith.constant 0 : index
    %144 = vector.load %arg7[%c0_116, %c0_117] : memref<1x128xf32, #tpu.memory_space<vmem>>, vector<1x128xf32>
    %145 = vector.broadcast %0 : vector<72x1xf32> to vector<72x128xf32>
    %146 = arith.mulf %142, %145 : vector<72x128xf32>
    %cst_118 = arith.constant dense<0.000000e+00> : vector<128xf32>
    %147 = vector.multi_reduction <add>, %146, %cst_118 [0] : vector<72x128xf32> to vector<128xf32>
    %148 = vector.shape_cast %147 : vector<128xf32> to vector<1x128xf32>
    %cst_119 = arith.constant 3.200000e+01 : f32
    %149 = vector.broadcast %cst_119 : f32 to vector<1x128xf32>
    %150 = arith.divf %148, %149 : vector<1x128xf32>
    %151 = arith.mulf %146, %142 : vector<72x128xf32>
    %cst_120 = arith.constant dense<0.000000e+00> : vector<128xf32>
    %152 = vector.multi_reduction <add>, %151, %cst_120 [0] : vector<72x128xf32> to vector<128xf32>
    %153 = vector.shape_cast %152 : vector<128xf32> to vector<1x128xf32>
    %cst_121 = arith.constant 3.200000e+01 : f32
    %154 = vector.broadcast %cst_121 : f32 to vector<1x128xf32>
    %155 = arith.divf %153, %154 : vector<1x128xf32>
    %156 = arith.mulf %150, %150 : vector<1x128xf32>
    %157 = arith.subf %155, %156 : vector<1x128xf32>
    %cst_122 = arith.constant 9.99999974E-6 : f32
    %158 = vector.broadcast %cst_122 : f32 to vector<1x128xf32>
    %159 = arith.addf %157, %158 : vector<1x128xf32>
    %160 = math.rsqrt %159 : vector<1x128xf32>
    %161 = arith.mulf %143, %160 : vector<1x128xf32>
    %162 = vector.broadcast %161 : vector<1x128xf32> to vector<72x128xf32>
    %163 = arith.mulf %142, %162 : vector<72x128xf32>
    %164 = arith.mulf %150, %161 : vector<1x128xf32>
    %165 = arith.subf %144, %164 : vector<1x128xf32>
    %166 = vector.broadcast %165 : vector<1x128xf32> to vector<72x128xf32>
    %167 = arith.addf %163, %166 : vector<72x128xf32>
    %c7_123 = arith.constant 7 : index
    %c0_124 = arith.constant 0 : index
    %168 = vector.load %arg0[%c7_123, %c0_124] : memref<86x128xf32, #tpu.memory_space<vmem>>, vector<72x128xf32>
    %169 = arith.addf %167, %168 : vector<72x128xf32>
    %cst_125 = arith.constant 0.000000e+00 : f32
    %170 = vector.broadcast %cst_125 : f32 to vector<72x128xf32>
    %171 = arith.maximumf %169, %170 : vector<72x128xf32>
    %c0_126 = arith.constant 0 : index
    %c0_127 = arith.constant 0 : index
    %172 = vector.load %arg8[%c0_126, %c0_127] : memref<72x128xf32, #tpu.memory_space<vmem>>, vector<72x128xf32>
    tpu.vector_store %arg8[%c0_126, %c0_127], %171 {strides = array<i32>} : memref<72x128xf32, #tpu.memory_space<vmem>>, vector<72x128xf32>,
    return
  }
}

module attributes {stable_mosaic.version = 11 : i64} {
  func.func @_head_kernel(%arg0: memref<2x16x128xf32, #tpu.memory_space<vmem>>, %arg1: memref<128x64xbf16, #tpu.memory_space<vmem>>, %arg2: memref<1x64xf32, #tpu.memory_space<vmem>>, %arg3: memref<1x64xf32, #tpu.memory_space<vmem>>, %arg4: memref<1x64xf32, #tpu.memory_space<vmem>>, %arg5: memref<64x10xbf16, #tpu.memory_space<vmem>>, %arg6: memref<1x10xf32, #tpu.memory_space<vmem>>, %arg7: memref<2x10xf32, #tpu.memory_space<vmem>>) attributes {dimension_semantics = [], scalar_prefetch = 0 : i64, scratch_operands = 0 : i64, tpu.core_type = #tpu.core_type<tc>} {
    %c0 = arith.constant 0 : index
    %c0_0 = arith.constant 0 : index
    %c0_1 = arith.constant 0 : index
    %0 = vector.load %arg0[%c0, %c0_0, %c0_1] : memref<2x16x128xf32, #tpu.memory_space<vmem>>, vector<2x16x128xf32>
    %cst = arith.constant dense<0.000000e+00> : vector<2x128xf32>
    %1 = vector.multi_reduction <add>, %0, %cst [1] : vector<2x16x128xf32> to vector<2x128xf32>
    %cst_2 = arith.constant 1.600000e+01 : f32
    %2 = vector.broadcast %cst_2 : f32 to vector<2x128xf32>
    %3 = arith.divf %1, %2 : vector<2x128xf32>
    %4 = arith.truncf %3 : vector<2x128xf32> to vector<2x128xbf16>
    %c0_3 = arith.constant 0 : index
    %c0_4 = arith.constant 0 : index
    %5 = vector.load %arg1[%c0_3, %c0_4] : memref<128x64xbf16, #tpu.memory_space<vmem>>, vector<128x64xbf16>
    %cst_5 = arith.constant dense<0.000000e+00> : vector<2x64xf32>
    %6 = tpu.matmul %4, %5, %cst_5 {dimension_numbers = #tpu.dot_dimension_numbers<[1], [0], [0], [1], [0, 0, 1, 1], [], []>} : vector<2x128xbf16>, vector<128x64xbf16>, vector<2x64xf32> -> vector<2x64xf32>
    %c0_6 = arith.constant 0 : index
    %c0_7 = arith.constant 0 : index
    %7 = vector.load %arg2[%c0_6, %c0_7] : memref<1x64xf32, #tpu.memory_space<vmem>>, vector<1x64xf32>
    %8 = vector.broadcast %7 : vector<1x64xf32> to vector<2x64xf32>
    %9 = arith.addf %6, %8 : vector<2x64xf32>
    %c0_8 = arith.constant 0 : index
    %c0_9 = arith.constant 0 : index
    %10 = vector.load %arg3[%c0_8, %c0_9] : memref<1x64xf32, #tpu.memory_space<vmem>>, vector<1x64xf32>
    %c0_10 = arith.constant 0 : index
    %c0_11 = arith.constant 0 : index
    %11 = vector.load %arg4[%c0_10, %c0_11] : memref<1x64xf32, #tpu.memory_space<vmem>>, vector<1x64xf32>
    %cst_12 = arith.constant dense<0.000000e+00> : vector<64xf32>
    %12 = vector.multi_reduction <add>, %9, %cst_12 [0] : vector<2x64xf32> to vector<64xf32>
    %13 = vector.shape_cast %12 : vector<64xf32> to vector<1x64xf32>
    %cst_13 = arith.constant 2.000000e+00 : f32
    %14 = vector.broadcast %cst_13 : f32 to vector<1x64xf32>
    %15 = arith.divf %13, %14 : vector<1x64xf32>
    %16 = arith.mulf %9, %9 : vector<2x64xf32>
    %cst_14 = arith.constant dense<0.000000e+00> : vector<64xf32>
    %17 = vector.multi_reduction <add>, %16, %cst_14 [0] : vector<2x64xf32> to vector<64xf32>
    %18 = vector.shape_cast %17 : vector<64xf32> to vector<1x64xf32>
    %cst_15 = arith.constant 2.000000e+00 : f32
    %19 = vector.broadcast %cst_15 : f32 to vector<1x64xf32>
    %20 = arith.divf %18, %19 : vector<1x64xf32>
    %21 = arith.mulf %15, %15 : vector<1x64xf32>
    %22 = arith.subf %20, %21 : vector<1x64xf32>
    %cst_16 = arith.constant 9.99999974E-6 : f32
    %23 = vector.broadcast %cst_16 : f32 to vector<1x64xf32>
    %24 = arith.addf %22, %23 : vector<1x64xf32>
    %25 = math.rsqrt %24 : vector<1x64xf32>
    %26 = arith.mulf %10, %25 : vector<1x64xf32>
    %27 = vector.broadcast %26 : vector<1x64xf32> to vector<2x64xf32>
    %28 = arith.mulf %9, %27 : vector<2x64xf32>
    %29 = arith.mulf %15, %26 : vector<1x64xf32>
    %30 = arith.subf %11, %29 : vector<1x64xf32>
    %31 = vector.broadcast %30 : vector<1x64xf32> to vector<2x64xf32>
    %32 = arith.addf %28, %31 : vector<2x64xf32>
    %cst_17 = arith.constant 5.000000e-01 : f32
    %33 = vector.broadcast %cst_17 : f32 to vector<2x64xf32>
    %34 = arith.mulf %33, %32 : vector<2x64xf32>
    %cst_18 = arith.constant 0.707106769 : f32
    %35 = vector.broadcast %cst_18 : f32 to vector<2x64xf32>
    %36 = arith.mulf %32, %35 : vector<2x64xf32>
    %cst_19 = arith.constant 0.000000e+00 : f32
    %37 = vector.broadcast %cst_19 : f32 to vector<2x64xf32>
    %38 = arith.cmpf oge, %36, %37 : vector<2x64xf32>
    %cst_20 = arith.constant 1.000000e+00 : f32
    %cst_21 = arith.constant -1.000000e+00 : f32
    %39 = vector.broadcast %cst_20 : f32 to vector<2x64xf32>
    %40 = vector.broadcast %cst_21 : f32 to vector<2x64xf32>
    %41 = arith.select %38, %39, %40 : vector<2x64xi1>, vector<2x64xf32>
    %42 = math.absf %36 : vector<2x64xf32>
    %cst_22 = arith.constant 0.327591091 : f32
    %43 = vector.broadcast %cst_22 : f32 to vector<2x64xf32>
    %44 = arith.mulf %43, %42 : vector<2x64xf32>
    %cst_23 = arith.constant 1.000000e+00 : f32
    %45 = vector.broadcast %cst_23 : f32 to vector<2x64xf32>
    %46 = arith.addf %45, %44 : vector<2x64xf32>
    %cst_24 = arith.constant 1.000000e+00 : f32
    %47 = vector.broadcast %cst_24 : f32 to vector<2x64xf32>
    %48 = arith.divf %47, %46 : vector<2x64xf32>
    %cst_25 = arith.constant 1.06140542 : f32
    %49 = vector.broadcast %cst_25 : f32 to vector<2x64xf32>
    %50 = arith.mulf %49, %48 : vector<2x64xf32>
    %cst_26 = arith.constant -1.45315206 : f32
    %51 = vector.broadcast %cst_26 : f32 to vector<2x64xf32>
    %52 = arith.addf %50, %51 : vector<2x64xf32>
    %53 = arith.mulf %52, %48 : vector<2x64xf32>
    %cst_27 = arith.constant 1.42141378 : f32
    %54 = vector.broadcast %cst_27 : f32 to vector<2x64xf32>
    %55 = arith.addf %53, %54 : vector<2x64xf32>
    %56 = arith.mulf %55, %48 : vector<2x64xf32>
    %cst_28 = arith.constant -0.284496725 : f32
    %57 = vector.broadcast %cst_28 : f32 to vector<2x64xf32>
    %58 = arith.addf %56, %57 : vector<2x64xf32>
    %59 = arith.mulf %58, %48 : vector<2x64xf32>
    %cst_29 = arith.constant 0.254829586 : f32
    %60 = vector.broadcast %cst_29 : f32 to vector<2x64xf32>
    %61 = arith.addf %59, %60 : vector<2x64xf32>
    %62 = arith.mulf %61, %48 : vector<2x64xf32>
    %cst_30 = arith.constant 0.000000e+00 : f32
    %63 = vector.broadcast %cst_30 : f32 to vector<2x64xf32>
    %64 = arith.subf %63, %42 : vector<2x64xf32>
    %65 = arith.mulf %64, %42 : vector<2x64xf32>
    %66 = math.exp %65 : vector<2x64xf32>
    %67 = arith.mulf %62, %66 : vector<2x64xf32>
    %cst_31 = arith.constant 1.000000e+00 : f32
    %68 = vector.broadcast %cst_31 : f32 to vector<2x64xf32>
    %69 = arith.subf %68, %67 : vector<2x64xf32>
    %70 = arith.mulf %41, %69 : vector<2x64xf32>
    %cst_32 = arith.constant 1.000000e+00 : f32
    %71 = vector.broadcast %cst_32 : f32 to vector<2x64xf32>
    %72 = arith.addf %71, %70 : vector<2x64xf32>
    %73 = arith.mulf %34, %72 : vector<2x64xf32>
    %74 = arith.truncf %73 : vector<2x64xf32> to vector<2x64xbf16>
    %c0_33 = arith.constant 0 : index
    %c0_34 = arith.constant 0 : index
    %75 = vector.load %arg5[%c0_33, %c0_34] : memref<64x10xbf16, #tpu.memory_space<vmem>>, vector<64x10xbf16>
    %cst_35 = arith.constant dense<0.000000e+00> : vector<2x10xf32>
    %76 = tpu.matmul %74, %75, %cst_35 {dimension_numbers = #tpu.dot_dimension_numbers<[1], [0], [0], [1], [0, 0, 1, 1], [], []>} : vector<2x64xbf16>, vector<64x10xbf16>, vector<2x10xf32> -> vector<2x10xf32>
    %c0_36 = arith.constant 0 : index
    %c0_37 = arith.constant 0 : index
    %77 = vector.load %arg6[%c0_36, %c0_37] : memref<1x10xf32, #tpu.memory_space<vmem>>, vector<1x10xf32>
    %78 = vector.broadcast %77 : vector<1x10xf32> to vector<2x10xf32>
    %79 = arith.addf %76, %78 : vector<2x10xf32>
    %c0_38 = arith.constant 0 : index
    %c0_39 = arith.constant 0 : index
    %80 = vector.load %arg7[%c0_38, %c0_39] : memref<2x10xf32, #tpu.memory_space<vmem>>, vector<2x10xf32>
    tpu.vector_store %arg7[%c0_38, %c0_39], %79 {strides = array<i32>} : memref<2x10xf32, #tpu.memory_space<vmem>>, vector<2x10xf32>,
    return
  }
}

</mosaic_0001>

<bundles_post_ra>
// kernel: resnet18_forward.6
= control target key start
LH: loop header
LB: loop body
LE: loop exit
PB: predicated region body
PF: predicated region fallthrough
CT: control target
= control target key end

     0   :  { %v1370_v0 = vmov 0   ;;  %vm286_vm0 = vcmask 154624   ;;  %vm383_vm1 = vcmask 1040384   ;;  %vm384_vm2 = vcmask 1041408   ;;  %s3163_s1 = inlined_call_operand.vmem [shape: bf16[147,64], index: 1, kind: input, shape index: {}]   ;;  %s3164_s0 = inlined_call_operand.vmem [shape: f32[512,147], index: 0, kind: input, shape index: {}]   ;;  %s3165_s2 = inlined_call_operand.vmem [shape: f32[1,64], index: 2, kind: input, shape index: {}]   ;;  %s3166_s3 = inlined_call_operand.vmem [shape: f32[1,64], index: 3, kind: input, shape index: {}]   ;;  %s3167_s4 = inlined_call_operand.vmem [shape: f32[512,64], index: 4, kind: output, shape index: {}]  }
   0x1   :  { %390 = vmatprep.subr.bf16.mxu0 %v1370_v0  ;;  %v1358_v1 = vld [vmem:[%s3163_s1] sm:$0xff]   ;;  %1336 = vmatprep.subr.bf16.mxu1 %v1370_v0  ;;  %v1359_v2 = vld [vmem:[%s3163_s1 + $0x8] sm:$0xff]   ;;  %v1360_v3 = vld [vmem:[%s3163_s1 + $0x10] sm:$0xff]   ;;  %v1371_v15 = vmov 65535   ;;  %vm681_vm3 = vcmask 523264  }
   0x2   :  { %391 = vmatpush1.bf16.msra.mxu0 %v1358_v1  ;;  %1346 = vmatpush1.bf16.msra.mxu1 %v1358_v1  ;;  %v19_v4 = vld [vmem:[%s3164_s0 + $0x8] sm:$0xff]  ;;  %v1361_v5 = vld [vmem:[%s3163_s1 + $0x18] sm:$0xff]   ;;  %v1362_v8 = vld [vmem:[%s3163_s1 + $0x20] sm:$0xff]   ;;  %v385_v16 = vsel %vm383_vm1, 4294967295, %v1371_v15 }
   0x3   :  { %392 = vmatprep.subr.bf16.mxu0 %v1370_v0  ;;  %1337 = vmatprep.subr.bf16.mxu1 %v1370_v0  ;;  %v21_v6 = vld [vmem:[%s3164_s0 + $0x18] sm:$0xff]  ;;  %v1363_v9 = vld [vmem:[%s3163_s1 + $0x28] sm:$0xff]   ;;  %v1364_v13 = vld [vmem:[%s3163_s1 + $0x30] sm:$0xff]   ;;  %v386_v19 = vsel %vm384_vm2, %v385_v16, 0 }
   0x4   :  { %v147_v7 = vpack.c.bf16 %v21_v6, %v19_v4  ;;  %v83_v10 = vld [vmem:[%s3164_s0 + $0x208] sm:$0xff]  ;;  %v85_v11 = vld [vmem:[%s3164_s0 + $0x218] sm:$0xff]  ;;  %v1366_v17 = vld [vmem:[%s3163_s1 + $0x40] sm:$0xff]  }
   0x5   :  { %v179_v12 = vpack.c.bf16 %v85_v11, %v83_v10  ;;  %v1365_v14 = vld [vmem:[%s3163_s1 + $0x38] sm:$0xff]   ;;  %v1367_v18 = vld [vmem:[%s3163_s1 + $0x48] ss:$0 sps:$4 sm:$0x33]   ;;  %v18_v20 = vld [vmem:[%s3164_s0] sm:$0xff] }
   0x6   :  { %393 = vmatpush1.bf16.msra.mxu0 %v1359_v2  ;;  %1347 = vmatpush1.bf16.msra.mxu1 %v1359_v2  ;;  %v20_v21 = vld [vmem:[%s3164_s0 + $0x10] sm:$0xff]  ;;  %v388_v22 = vand.u32 %v1367_v18, %v386_v19  ;;  %v23_v23 = vld [vmem:[%s3164_s0 + $0x28] sm:$0xff]  ;;  %v82_v24 = vld [vmem:[%s3164_s0 + $0x200] sm:$0xff] }
   0x7   :  { %394 = vmatprep.subr.bf16.mxu0 %v1370_v0  ;;  %1338 = vmatprep.subr.bf16.mxu1 %v1370_v0  ;;  %v84_v25 = vld [vmem:[%s3164_s0 + $0x210] sm:$0xff]  ;;  %v25_v26 = vld [vmem:[%s3164_s0 + $0x38] sm:$0xff]  ;;  %v87_v27 = vld [vmem:[%s3164_s0 + $0x228] sm:$0xff]  ;;  %v146_v29 = vpack.c.bf16 %v20_v21, %v18_v20 }
   0x8   :  { %1304 = vmatprep.mubr.msk.bf16.mxu0 %vm286_vm0, %v147_v7  ;;  %1320 = vmatprep.mubr.msk.bf16.mxu1 %vm286_vm0, %v179_v12  ;;  %v89_v28 = vld [vmem:[%s3164_s0 + $0x238] sm:$0xff]  ;;  %v178_v30 = vpack.c.bf16 %v84_v25, %v82_v24  ;;  %v149_v31 = vpack.c.bf16 %v25_v26, %v23_v23  ;;  %v22_v33 = vld [vmem:[%s3164_s0 + $0x20] sm:$0xff]  ;;  %v24_v34 = vld [vmem:[%s3164_s0 + $0x30] sm:$0xff] }
   0x9   :  { %v181_v32 = vpack.c.bf16 %v89_v28, %v87_v27  ;;  %v27_v35 = vld [vmem:[%s3164_s0 + $0x48] sm:$0xff]  ;;  %v86_v36 = vld [vmem:[%s3164_s0 + $0x220] sm:$0xff]  ;;  %v88_v37 = vld [vmem:[%s3164_s0 + $0x230] sm:$0xff]  ;;  %v148_v41 = vpack.c.bf16 %v24_v34, %v22_v33 }
   0xa   :  { %395 = vmatpush1.bf16.msra.mxu0 %v1360_v3  ;;  %1348 = vmatpush1.bf16.msra.mxu1 %v1360_v3  ;;  %v29_v38 = vld [vmem:[%s3164_s0 + $0x58] sm:$0xff]  ;;  %v91_v39 = vld [vmem:[%s3164_s0 + $0x248] sm:$0xff]  ;;  %v180_v42 = vpack.c.bf16 %v88_v37, %v86_v36  ;;  %v26_v45 = vld [vmem:[%s3164_s0 + $0x40] sm:$0xff] }
   0xb   :  { %396 = vmatprep.subr.bf16.mxu0 %v1370_v0  ;;  %1339 = vmatprep.subr.bf16.mxu1 %v1370_v0  ;;  %v93_v40 = vld [vmem:[%s3164_s0 + $0x258] sm:$0xff]  ;;  %v151_v43 = vpack.c.bf16 %v29_v38, %v27_v35  ;;  %v28_v46 = vld [vmem:[%s3164_s0 + $0x50] sm:$0xff]  ;;  %v31_v47 = vld [vmem:[%s3164_s0 + $0x68] sm:$0xff] }
   0xc   :  { %v183_v44 = vpack.c.bf16 %v93_v40, %v91_v39  ;;  %v90_v48 = vld [vmem:[%s3164_s0 + $0x240] sm:$0xff]  ;;  %v92_v49 = vld [vmem:[%s3164_s0 + $0x250] sm:$0xff]  ;;  %v33_v50 = vld [vmem:[%s3164_s0 + $0x78] sm:$0xff]  ;;  %v150_v53 = vpack.c.bf16 %v28_v46, %v26_v45 }
   0xd   :  { %v95_v51 = vld [vmem:[%s3164_s0 + $0x268] sm:$0xff]  ;;  %v97_v52 = vld [vmem:[%s3164_s0 + $0x278] sm:$0xff]  ;;  %v182_v54 = vpack.c.bf16 %v92_v49, %v90_v48  ;;  %v153_v55 = vpack.c.bf16 %v33_v50, %v31_v47  ;;  %v30_v57 = vld [vmem:[%s3164_s0 + $0x60] sm:$0xff] }
   0xe   :  { %397 = vmatpush1.bf16.msra.mxu0 %v1361_v5  ;;  %1349 = vmatpush1.bf16.msra.mxu1 %v1361_v5  ;;  %v185_v56 = vpack.c.bf16 %v97_v52, %v95_v51  ;;  %v32_v58 = vld [vmem:[%s3164_s0 + $0x70] sm:$0xff]  ;;  %v35_v59 = vld [vmem:[%s3164_s0 + $0x88] sm:$0xff]  ;;  %v94_v60 = vld [vmem:[%s3164_s0 + $0x260] sm:$0xff] }
   0xf   :  { %398 = vmatprep.subr.bf16.mxu0 %v1370_v0  ;;  %1340 = vmatprep.subr.bf16.mxu1 %v1370_v0  ;;  %v96_v61 = vld [vmem:[%s3164_s0 + $0x270] sm:$0xff]  ;;  %v37_v62 = vld [vmem:[%s3164_s0 + $0x98] sm:$0xff]  ;;  %v99_v63 = vld [vmem:[%s3164_s0 + $0x288] sm:$0xff]  ;;  %v152_v1 = vpack.c.bf16 %v32_v58, %v30_v57 }
  0x10   :  { %v184_v2 = vpack.c.bf16 %v96_v61, %v94_v60  ;;  %v155_v3 = vpack.c.bf16 %v37_v62, %v35_v59  ;;  %v34_v5 = vld [vmem:[%s3164_s0 + $0x80] sm:$0xff]  ;;  %v36_v6 = vld [vmem:[%s3164_s0 + $0x90] sm:$0xff]  ;;  %v39_v7 = vld [vmem:[%s3164_s0 + $0xa8] sm:$0xff] }
  0x11   :  { %v41_v10 = vld [vmem:[%s3164_s0 + $0xb8] sm:$0xff]  ;;  %v103_v11 = vld [vmem:[%s3164_s0 + $0x2a8] sm:$0xff]  ;;  %v40_v18 = vld [vmem:[%s3164_s0 + $0xb0] sm:$0xff] }
  0x12   :  { %399 = vmatpush1.bf16.msra.mxu0 %v1362_v8  ;;  %1350 = vmatpush1.bf16.msra.mxu1 %v1362_v8  ;;  %v98_v8 = vld [vmem:[%s3164_s0 + $0x280] sm:$0xff]  ;;  %v105_v12 = vld [vmem:[%s3164_s0 + $0x2b8] sm:$0xff]  ;;  %v157_v15 = vpack.c.bf16 %v41_v10, %v39_v7  ;;  %v43_v19 = vld [vmem:[%s3164_s0 + $0xc8] sm:$0xff] }
  0x13   :  { %400 = vmatprep.subr.bf16.mxu0 %v1370_v0  ;;  %1341 = vmatprep.subr.bf16.mxu1 %v1370_v0  ;;  %v189_v16 = vpack.c.bf16 %v105_v12, %v103_v11  ;;  %v102_v20 = vld [vmem:[%s3164_s0 + $0x2a0] sm:$0xff]  ;;  %v104_v21 = vld [vmem:[%s3164_s0 + $0x2b0] sm:$0xff]  ;;  %v107_v23 = vld [vmem:[%s3164_s0 + $0x2c8] sm:$0xff] }
  0x14   :  { %v109_v24 = vld [vmem:[%s3164_s0 + $0x2d8] sm:$0xff]  ;;  %v188_v26 = vpack.c.bf16 %v104_v21, %v102_v20  ;;  %v108_v33 = vld [vmem:[%s3164_s0 + $0x2d0] sm:$0xff]  ;;  %v111_v35 = vld [vmem:[%s3164_s0 + $0x2e8] sm:$0xff] }
  0x15   :  { %v191_v28 = vpack.c.bf16 %v109_v24, %v107_v23  ;;  %v49_v34 = vld [vmem:[%s3164_s0 + $0xf8] sm:$0xff]  ;;  %v112_v45 = vld [vmem:[%s3164_s0 + $0x2f0] sm:$0xff]  ;;  %v115_v47 = vld [vmem:[%s3164_s0 + $0x308] sm:$0xff] }
  0x16   :  { %401 = vmatpush1.bf16.msra.mxu0 %v1363_v9  ;;  %1351 = vmatpush1.bf16.msra.mxu1 %v1363_v9  ;;  %v100_v9 = vld [vmem:[%s3164_s0 + $0x290] sm:$0xff]  ;;  %v113_v36 = vld [vmem:[%s3164_s0 + $0x2f8] sm:$0xff]  ;;  %v119_v59 = vld [vmem:[%s3164_s0 + $0x328] sm:$0xff] }
  0x17   :  { %402 = vmatprep.subr.bf16.mxu0 %v1370_v0  ;;  %1342 = vmatprep.subr.bf16.mxu1 %v1370_v0  ;;  %v193_v40 = vpack.c.bf16 %v113_v36, %v111_v35  ;;  %v53_v46 = vld [vmem:[%s3164_s0 + $0x118] sm:$0xff]  ;;  %v116_v57 = vld [vmem:[%s3164_s0 + $0x310] sm:$0xff]  ;;  %v123_v7 = vld [vmem:[%s3164_s0 + $0x348] sm:$0xff] }
  0x18   :  { %v117_v48 = vld [vmem:[%s3164_s0 + $0x318] sm:$0xff] }
  0x19   :  { %v195_v52 = vpack.c.bf16 %v117_v48, %v115_v47  ;;  %v57_v58 = vld [vmem:[%s3164_s0 + $0x138] sm:$0xff] }
  0x1a   :  { %403 = vmatpush1.bf16.msra.mxu0 %v1364_v13  ;;  %1352 = vmatpush1.bf16.msra.mxu1 %v1364_v13  ;;  %v154_v13 = vpack.c.bf16 %v36_v6, %v34_v5  ;;  %v121_v60 = vld [vmem:[%s3164_s0 + $0x338] sm:$0xff]  ;;  %v120_v5 = vld [vmem:[%s3164_s0 + $0x330] sm:$0xff] }
  0x1b   :  { %404 = vmatprep.subr.bf16.mxu0 %v1370_v0  ;;  %1343 = vmatprep.subr.bf16.mxu1 %v1370_v0  ;;  %v61_v6 = vld [vmem:[%s3164_s0 + $0x158] sm:$0xff] }
  0x1c   :  { %v129_v20 = vld [vmem:[%s3164_s0 + $0x378] sm:$0xff] }
  0x1e   :  { %405 = vmatpush1.bf16.msra.mxu0 %v1365_v14  ;;  %1353 = vmatpush1.bf16.msra.mxu1 %v1365_v14  ;;  %v186_v14 = vpack.c.bf16 %v100_v9, %v98_v8  ;;  %v125_v8 = vld [vmem:[%s3164_s0 + $0x358] sm:$0xff] }
  0x1f   :  { %406 = vmatprep.subr.bf16.mxu0 %v1370_v0  ;;  %1344 = vmatprep.subr.bf16.mxu1 %v1370_v0  ;;  %v199_v12 = vpack.c.bf16 %v125_v8, %v123_v7 }
  0x22   :  { %407 = vmatpush1.bf16.msra.mxu0 %v1366_v17  ;;  %1354 = vmatpush1.bf16.msra.mxu1 %v1366_v17  ;;  %v38_v17 = vld [vmem:[%s3164_s0 + $0xa0] sm:$0xff] }
  0x23   :  { %408 = vmatprep.subr.bf16.mxu0 %v1370_v0  ;;  %1345 = vmatprep.subr.bf16.mxu1 %v1370_v0  ;;  %v101_v0 = vld [vmem:[%s3164_s0 + $0x298] sm:$0xff]  ;;  %v156_v25 = vpack.c.bf16 %v40_v18, %v38_v17  ;;  %v124_v17 = vld [vmem:[%s3164_s0 + $0x350] sm:$0xff] }
  0x24   :  { %v187_v4 = vpack.c.bf16 %v101_v0, %v99_v63  ;;  %v197_v0 = vpack.c.bf16 %v121_v60, %v119_v59  ;;  %v65_v18 = vld [vmem:[%s3164_s0 + $0x178] sm:$0xff] }
  0x26   :  { %409 = vmatpush1.bf16.msra.mxu0 %v388_v22  ;;  %1355 = vmatpush1.bf16.msra.mxu1 %v388_v22  ;;  %v45_v22 = vld [vmem:[%s3164_s0 + $0xd8] sm:$0xff] }
  0x27   :  { %v159_v27 = vpack.c.bf16 %v45_v22, %v43_v19  ;;  %v127_v19 = vld [vmem:[%s3164_s0 + $0x368] sm:$0xff] }
  0x28   :  { %v201_v24 = vpack.c.bf16 %v129_v20, %v127_v19 }
  0x29   :  { %423 = vmatmul.mubr.bf16.vlgmr.msra.gmra.mrb[0].mxu0 %v146_v29  ;;  %551 = vmatmul.mubr.bf16.vlgmr.msra.gmra.mrb[0].mxu1 %v178_v30  ;;  %v42_v29 = vld [vmem:[%s3164_s0 + $0xc0] sm:$0xff]  ;;  %v44_v30 = vld [vmem:[%s3164_s0 + $0xd0] sm:$0xff] }
  0x2a   :  { %1305 = vmatprep.mubr.msk.bf16.mxu0 %vm286_vm0, %v149_v31  ;;  %1321 = vmatprep.mubr.msk.bf16.mxu1 %vm286_vm0, %v181_v32  ;;  %v47_v31 = vld [vmem:[%s3164_s0 + $0xe8] sm:$0xff]  ;;  %v106_v32 = vld [vmem:[%s3164_s0 + $0x2c0] sm:$0xff]  ;;  %v158_v37 = vpack.c.bf16 %v44_v30, %v42_v29  ;;  %v128_v29 = vld [vmem:[%s3164_s0 + $0x370] sm:$0xff] }
  0x2b   :  { %v190_v38 = vpack.c.bf16 %v108_v33, %v106_v32  ;;  %v161_v39 = vpack.c.bf16 %v49_v34, %v47_v31  ;;  %v69_v30 = vld [vmem:[%s3164_s0 + $0x198] sm:$0xff]  ;;  %v131_v31 = vld [vmem:[%s3164_s0 + $0x388] sm:$0xff] }
  0x2c   :  { %v133_v32 = vld [vmem:[%s3164_s0 + $0x398] sm:$0xff] }
  0x2d   :  { %v203_v36 = vpack.c.bf16 %v133_v32, %v131_v31 }
  0x31   :  { %431 = vmatmul.mubr.bf16.gmra.mrb[4].mxu0 %v148_v41  ;;  %559 = vmatmul.mubr.bf16.gmra.mrb[4].mxu1 %v180_v42  ;;  %v46_v41 = vld [vmem:[%s3164_s0 + $0xe0] sm:$0xff]  ;;  %v48_v42 = vld [vmem:[%s3164_s0 + $0xf0] sm:$0xff] }
  0x32   :  { %1306 = vmatprep.mubr.msk.bf16.mxu0 %vm286_vm0, %v151_v43  ;;  %1322 = vmatprep.mubr.msk.bf16.mxu1 %vm286_vm0, %v183_v44  ;;  %v51_v43 = vld [vmem:[%s3164_s0 + $0x108] sm:$0xff]  ;;  %v110_v44 = vld [vmem:[%s3164_s0 + $0x2e0] sm:$0xff]  ;;  %v160_v49 = vpack.c.bf16 %v48_v42, %v46_v41  ;;  %v132_v41 = vld [vmem:[%s3164_s0 + $0x390] sm:$0xff] }
  0x33   :  { %v192_v50 = vpack.c.bf16 %v112_v45, %v110_v44  ;;  %v163_v51 = vpack.c.bf16 %v53_v46, %v51_v43  ;;  %v73_v42 = vld [vmem:[%s3164_s0 + $0x1b8] sm:$0xff]  ;;  %v135_v43 = vld [vmem:[%s3164_s0 + $0x3a8] sm:$0xff] }
  0x34   :  { %v137_v44 = vld [vmem:[%s3164_s0 + $0x3b8] sm:$0xff] }
  0x35   :  { %v205_v48 = vpack.c.bf16 %v137_v44, %v135_v43 }
  0x39   :  { %439 = vmatmul.mubr.bf16.gmra.mrb[8].mxu0 %v150_v53  ;;  %567 = vmatmul.mubr.bf16.gmra.mrb[8].mxu1 %v182_v54  ;;  %v50_v53 = vld [vmem:[%s3164_s0 + $0x100] sm:$0xff]  ;;  %v52_v54 = vld [vmem:[%s3164_s0 + $0x110] sm:$0xff] }
  0x3a   :  { %1307 = vmatprep.mubr.msk.bf16.mxu0 %vm286_vm0, %v153_v55  ;;  %1323 = vmatprep.mubr.msk.bf16.mxu1 %vm286_vm0, %v185_v56  ;;  %v55_v55 = vld [vmem:[%s3164_s0 + $0x128] sm:$0xff]  ;;  %v114_v56 = vld [vmem:[%s3164_s0 + $0x300] sm:$0xff]  ;;  %v162_v61 = vpack.c.bf16 %v52_v54, %v50_v53  ;;  %v136_v53 = vld [vmem:[%s3164_s0 + $0x3b0] sm:$0xff] }
  0x3b   :  { %v194_v62 = vpack.c.bf16 %v116_v57, %v114_v56  ;;  %v165_v63 = vpack.c.bf16 %v57_v58, %v55_v55  ;;  %v77_v54 = vld [vmem:[%s3164_s0 + $0x1d8] sm:$0xff]  ;;  %v139_v55 = vld [vmem:[%s3164_s0 + $0x3c8] sm:$0xff] }
  0x3c   :  { %v141_v56 = vld [vmem:[%s3164_s0 + $0x3d8] sm:$0xff] }
  0x3d   :  { %v207_v60 = vpack.c.bf16 %v141_v56, %v139_v55 }
  0x41   :  { %447 = vmatmul.mubr.bf16.gmra.mrb[12].mxu0 %v152_v1  ;;  %575 = vmatmul.mubr.bf16.gmra.mrb[12].mxu1 %v184_v2  ;;  %v54_v1 = vld [vmem:[%s3164_s0 + $0x120] sm:$0xff]  ;;  %v56_v2 = vld [vmem:[%s3164_s0 + $0x130] sm:$0xff] }
  0x42   :  { %1308 = vmatprep.mubr.msk.bf16.mxu0 %vm286_vm0, %v155_v3  ;;  %1324 = vmatprep.mubr.msk.bf16.mxu1 %vm286_vm0, %v187_v4  ;;  %v59_v3 = vld [vmem:[%s3164_s0 + $0x148] sm:$0xff]  ;;  %v118_v4 = vld [vmem:[%s3164_s0 + $0x320] sm:$0xff]  ;;  %v164_v9 = vpack.c.bf16 %v56_v2, %v54_v1  ;;  %v140_v1 = vld [vmem:[%s3164_s0 + $0x3d0] sm:$0xff] }
  0x43   :  { %v196_v10 = vpack.c.bf16 %v120_v5, %v118_v4  ;;  %v167_v11 = vpack.c.bf16 %v61_v6, %v59_v3  ;;  %v81_v2 = vld [vmem:[%s3164_s0 + $0x1f8] sm:$0xff]  ;;  %v143_v3 = vld [vmem:[%s3164_s0 + $0x3e8] sm:$0xff] }
  0x44   :  { %v145_v4 = vld [vmem:[%s3164_s0 + $0x3f8] sm:$0xff] }
  0x45   :  { %v209_v8 = vpack.c.bf16 %v145_v4, %v143_v3 }
  0x49   :  { %455 = vmatmul.mubr.bf16.gmra.mrb[16].mxu0 %v154_v13  ;;  %583 = vmatmul.mubr.bf16.gmra.mrb[16].mxu1 %v186_v14  ;;  %v58_v13 = vld [vmem:[%s3164_s0 + $0x140] sm:$0xff]  ;;  %v60_v14 = vld [vmem:[%s3164_s0 + $0x150] sm:$0xff] }
  0x4a   :  { %1309 = vmatprep.mubr.msk.bf16.mxu0 %vm286_vm0, %v157_v15  ;;  %1325 = vmatprep.mubr.msk.bf16.mxu1 %vm286_vm0, %v189_v16  ;;  %v63_v15 = vld [vmem:[%s3164_s0 + $0x168] sm:$0xff]  ;;  %v122_v16 = vld [vmem:[%s3164_s0 + $0x340] sm:$0xff]  ;;  %v166_v21 = vpack.c.bf16 %v60_v14, %v58_v13 }
  0x4b   :  { %v198_v22 = vpack.c.bf16 %v124_v17, %v122_v16  ;;  %v169_v23 = vpack.c.bf16 %v65_v18, %v63_v15 }
  0x51   :  { %463 = vmatmul.mubr.bf16.gmra.mrb[20].mxu0 %v156_v25  ;;  %591 = vmatmul.mubr.bf16.gmra.mrb[20].mxu1 %v188_v26  ;;  %v62_v25 = vld [vmem:[%s3164_s0 + $0x160] sm:$0xff]  ;;  %v64_v26 = vld [vmem:[%s3164_s0 + $0x170] sm:$0xff] }
  0x52   :  { %1310 = vmatprep.mubr.msk.bf16.mxu0 %vm286_vm0, %v159_v27  ;;  %1326 = vmatprep.mubr.msk.bf16.mxu1 %vm286_vm0, %v191_v28  ;;  %v67_v27 = vld [vmem:[%s3164_s0 + $0x188] sm:$0xff]  ;;  %v126_v28 = vld [vmem:[%s3164_s0 + $0x360] sm:$0xff]  ;;  %v168_v33 = vpack.c.bf16 %v64_v26, %v62_v25 }
  0x53   :  { %v200_v34 = vpack.c.bf16 %v128_v29, %v126_v28  ;;  %v171_v35 = vpack.c.bf16 %v69_v30, %v67_v27 }
  0x59   :  { %471 = vmatmul.mubr.bf16.gmra.mrb[24].mxu0 %v158_v37  ;;  %599 = vmatmul.mubr.bf16.gmra.mrb[24].mxu1 %v190_v38  ;;  %v66_v37 = vld [vmem:[%s3164_s0 + $0x180] sm:$0xff]  ;;  %v68_v38 = vld [vmem:[%s3164_s0 + $0x190] sm:$0xff] }
  0x5a   :  { %1311 = vmatprep.mubr.msk.bf16.mxu0 %vm286_vm0, %v161_v39  ;;  %1327 = vmatprep.mubr.msk.bf16.mxu1 %vm286_vm0, %v193_v40  ;;  %v71_v39 = vld [vmem:[%s3164_s0 + $0x1a8] sm:$0xff]  ;;  %v130_v40 = vld [vmem:[%s3164_s0 + $0x380] sm:$0xff]  ;;  %v170_v45 = vpack.c.bf16 %v68_v38, %v66_v37 }
  0x5b   :  { %v202_v46 = vpack.c.bf16 %v132_v41, %v130_v40  ;;  %v173_v47 = vpack.c.bf16 %v73_v42, %v71_v39 }
  0x61   :  { %479 = vmatmul.mubr.bf16.gmra.mrb[28].mxu0 %v160_v49  ;;  %607 = vmatmul.mubr.bf16.gmra.mrb[28].mxu1 %v192_v50  ;;  %v70_v49 = vld [vmem:[%s3164_s0 + $0x1a0] sm:$0xff]  ;;  %v72_v50 = vld [vmem:[%s3164_s0 + $0x1b0] sm:$0xff] }
  0x62   :  { %1312 = vmatprep.mubr.msk.bf16.mxu0 %vm286_vm0, %v163_v51  ;;  %1328 = vmatprep.mubr.msk.bf16.mxu1 %vm286_vm0, %v195_v52  ;;  %v75_v51 = vld [vmem:[%s3164_s0 + $0x1c8] sm:$0xff]  ;;  %v134_v52 = vld [vmem:[%s3164_s0 + $0x3a0] sm:$0xff]  ;;  %v172_v57 = vpack.c.bf16 %v72_v50, %v70_v49 }
  0x63   :  { %v204_v58 = vpack.c.bf16 %v136_v53, %v134_v52  ;;  %v175_v59 = vpack.c.bf16 %v77_v54, %v75_v51 }
  0x69   :  { %487 = vmatmul.mubr.bf16.gmra.mrb[32].mxu0 %v162_v61  ;;  %615 = vmatmul.mubr.bf16.gmra.mrb[32].mxu1 %v194_v62  ;;  %v74_v61 = vld [vmem:[%s3164_s0 + $0x1c0] sm:$0xff]  ;;  %v76_v62 = vld [vmem:[%s3164_s0 + $0x1d0] sm:$0xff] }
  0x6a   :  { %1313 = vmatprep.mubr.msk.bf16.mxu0 %vm286_vm0, %v165_v63  ;;  %1329 = vmatprep.mubr.msk.bf16.mxu1 %vm286_vm0, %v197_v0  ;;  %v79_v63 = vld [vmem:[%s3164_s0 + $0x1e8] sm:$0xff]  ;;  %v138_v0 = vld [vmem:[%s3164_s0 + $0x3c0] sm:$0xff]  ;;  %v174_v5 = vpack.c.bf16 %v76_v62, %v74_v61 }
  0x6b   :  { %v206_v6 = vpack.c.bf16 %v140_v1, %v138_v0  ;;  %v177_v7 = vpack.c.bf16 %v81_v2, %v79_v63 }
  0x71   :  { %495 = vmatmul.mubr.bf16.gmra.mrb[36].mxu0 %v164_v9  ;;  %623 = vmatmul.mubr.bf16.gmra.mrb[36].mxu1 %v196_v10  ;;  %v78_v9 = vld [vmem:[%s3164_s0 + $0x1e0] sm:$0xff]  ;;  %v80_v10 = vld [vmem:[%s3164_s0 + $0x1f0] sm:$0xff] }
  0x72   :  { %1314 = vmatprep.mubr.msk.bf16.mxu0 %vm286_vm0, %v167_v11  ;;  %1330 = vmatprep.mubr.msk.bf16.mxu1 %vm286_vm0, %v199_v12  ;;  %v142_v11 = vld [vmem:[%s3164_s0 + $0x3e0] sm:$0xff]  ;;  %v144_v12 = vld [vmem:[%s3164_s0 + $0x3f0] sm:$0xff]  ;;  %v176_v13 = vpack.c.bf16 %v80_v10, %v78_v9 }
  0x73   :  { %v208_v14 = vpack.c.bf16 %v144_v12, %v142_v11 }
  0x79   :  { %503 = vmatmul.mubr.bf16.gmra.mrb[40].mxu0 %v166_v21  ;;  %631 = vmatmul.mubr.bf16.gmra.mrb[40].mxu1 %v198_v22 }
  0x7a   :  { %1315 = vmatprep.mubr.msk.bf16.mxu0 %vm286_vm0, %v169_v23  ;;  %1331 = vmatprep.mubr.msk.bf16.mxu1 %vm286_vm0, %v201_v24 }
  0x81   :  { %511 = vmatmul.mubr.bf16.gmra.mrb[44].mxu0 %v168_v33  ;;  %639 = vmatmul.mubr.bf16.gmra.mrb[44].mxu1 %v200_v34 }
  0x82   :  { %1316 = vmatprep.mubr.msk.bf16.mxu0 %vm286_vm0, %v171_v35  ;;  %1332 = vmatprep.mubr.msk.bf16.mxu1 %vm286_vm0, %v203_v36 }
  0x89   :  { %519 = vmatmul.mubr.bf16.gmra.mrb[48].mxu0 %v170_v45  ;;  %647 = vmatmul.mubr.bf16.gmra.mrb[48].mxu1 %v202_v46 }
  0x8a   :  { %1317 = vmatprep.mubr.msk.bf16.mxu0 %vm286_vm0, %v173_v47  ;;  %1333 = vmatprep.mubr.msk.bf16.mxu1 %vm286_vm0, %v205_v48 }
  0x91   :  { %527 = vmatmul.mubr.bf16.gmra.mrb[52].mxu0 %v172_v57  ;;  %655 = vmatmul.mubr.bf16.gmra.mrb[52].mxu1 %v204_v58 }
  0x92   :  { %1318 = vmatprep.mubr.msk.bf16.mxu0 %vm286_vm0, %v175_v59  ;;  %1334 = vmatprep.mubr.msk.bf16.mxu1 %vm286_vm0, %v207_v60 }
  0x99   :  { %535 = vmatmul.mubr.bf16.gmra.mrb[56].mxu0 %v174_v5  ;;  %663 = vmatmul.mubr.bf16.gmra.mrb[56].mxu1 %v206_v6 }
  0x9a   :  { %1319 = vmatprep.mubr.msk.bf16.mxu0 %vm286_vm0, %v177_v7  ;;  %1335 = vmatprep.mubr.msk.bf16.mxu1 %vm286_vm0, %v209_v8 }
  0xa1   :  { %543 = vmatmul.mubr.bf16.gmra.mrb[60].mxu0 %v176_v13  ;;  %671 = vmatmul.mubr.bf16.gmra.mrb[60].mxu1 %v208_v14 }
  0xfc   :  { %v1863_v15 = vpop.f32.mrb[0].mxu0  ;;  %v1865_v16 = vpop.f32.mrb[0].mxu1 }
  0xfd   :  { %v817_v17 = vmul.f32 %v1863_v15, %v1863_v15  ;;  %v426_v18 = vpop.f32.mrb[1].mxu0  ;;  %v554_v19 = vpop.f32.mrb[1].mxu1  ;;  %v682_v22 = vsel %vm681_vm3, %v1863_v15, 0.0 }
  0xfe   :  { %v1869_v20 = vpop.f32.mrb[2].mxu0  ;;  %v1871_v21 = vpop.f32.mrb[2].mxu1 }
  0xff   :  { %v683_v23 = vsel %vm681_vm3, %v1869_v20, 0.0  ;;  %v818_v24 = vmul.f32 %v1869_v20, %v1869_v20  ;;  %v429_v25 = vpop.f32.mrb[3].mxu0  ;;  %v557_v26 = vpop.f32.mrb[3].mxu1  ;;  %v881_v28 = vsel %vm681_vm3, %v817_v17, 0.0 }
 0x100   :  { %v684_v27 = vadd.f32 %v683_v23, %v682_v22 }
 0x101   :  { %v882_v29 = vsel %vm681_vm3, %v818_v24, 0.0 }
 0x102   :  { %v883_v30 = vadd.f32 %v882_v29, %v881_v28 }
 0x104   :  { %v1881_v31 = vpop.f32.mrb[4].mxu0  ;;  %v1883_v32 = vpop.f32.mrb[4].mxu1 }
 0x105   :  { %v685_v33 = vsel %vm681_vm3, %v1881_v31, 0.0  ;;  %v819_v34 = vmul.f32 %v1881_v31, %v1881_v31  ;;  %v434_v35 = vpop.f32.mrb[5].mxu0  ;;  %v562_v36 = vpop.f32.mrb[5].mxu1 }
 0x106   :  { %v686_v37 = vadd.f32 %v685_v33, %v684_v27  ;;  %v1889_v38 = vpop.f32.mrb[6].mxu0  ;;  %v1891_v39 = vpop.f32.mrb[6].mxu1 }
 0x107   :  { %v884_v40 = vsel %vm681_vm3, %v819_v34, 0.0  ;;  %v687_v41 = vsel %vm681_vm3, %v1889_v38, 0.0  ;;  %v820_v42 = vmul.f32 %v1889_v38, %v1889_v38  ;;  %v437_v43 = vpop.f32.mrb[7].mxu0  ;;  %v565_v44 = vpop.f32.mrb[7].mxu1 }
 0x108   :  { %v885_v45 = vadd.f32 %v884_v40, %v883_v30  ;;  %v688_v46 = vadd.f32 %v687_v41, %v686_v37 }
 0x109   :  { %v886_v47 = vsel %vm681_vm3, %v820_v42, 0.0 }
 0x10a   :  { %v887_v48 = vadd.f32 %v886_v47, %v885_v45 }
 0x10c   :  { %v1899_v49 = vpop.f32.mrb[8].mxu0  ;;  %v1901_v50 = vpop.f32.mrb[8].mxu1 }
 0x10d   :  { %v689_v51 = vsel %vm681_vm3, %v1899_v49, 0.0  ;;  %v821_v52 = vmul.f32 %v1899_v49, %v1899_v49  ;;  %v442_v53 = vpop.f32.mrb[9].mxu0  ;;  %v570_v54 = vpop.f32.mrb[9].mxu1 }
 0x10e   :  { %v690_v55 = vadd.f32 %v689_v51, %v688_v46  ;;  %v1907_v56 = vpop.f32.mrb[10].mxu0  ;;  %v1909_v57 = vpop.f32.mrb[10].mxu1 }
 0x10f   :  { %v888_v58 = vsel %vm681_vm3, %v821_v52, 0.0  ;;  %v691_v59 = vsel %vm681_vm3, %v1907_v56, 0.0  ;;  %v822_v60 = vmul.f32 %v1907_v56, %v1907_v56  ;;  %v445_v61 = vpop.f32.mrb[11].mxu0  ;;  %v573_v62 = vpop.f32.mrb[11].mxu1 }
 0x110   :  { %v889_v63 = vadd.f32 %v888_v58, %v887_v48  ;;  %v692_v0 = vadd.f32 %v691_v59, %v690_v55 }
 0x111   :  { %v890_v1 = vsel %vm681_vm3, %v822_v60, 0.0 }
 0x112   :  { %v891_v2 = vadd.f32 %v890_v1, %v889_v63 }
 0x114   :  { %v1917_v3 = vpop.f32.mrb[12].mxu0  ;;  %v1919_v4 = vpop.f32.mrb[12].mxu1 }
 0x115   :  { %v693_v5 = vsel %vm681_vm3, %v1917_v3, 0.0  ;;  %v823_v6 = vmul.f32 %v1917_v3, %v1917_v3  ;;  %v450_v7 = vpop.f32.mrb[13].mxu0  ;;  %v578_v8 = vpop.f32.mrb[13].mxu1 }
 0x116   :  { %v694_v9 = vadd.f32 %v693_v5, %v692_v0  ;;  %v1925_v10 = vpop.f32.mrb[14].mxu0  ;;  %v1927_v11 = vpop.f32.mrb[14].mxu1 }
 0x117   :  { %v892_v12 = vsel %vm681_vm3, %v823_v6, 0.0  ;;  %v695_v13 = vsel %vm681_vm3, %v1925_v10, 0.0  ;;  %v824_v14 = vmul.f32 %v1925_v10, %v1925_v10  ;;  %v453_v17 = vpop.f32.mrb[15].mxu0  ;;  %v581_v18 = vpop.f32.mrb[15].mxu1 }
 0x118   :  { %v893_v19 = vadd.f32 %v892_v12, %v891_v2  ;;  %v696_v22 = vadd.f32 %v695_v13, %v694_v9 }
 0x119   :  { %v894_v23 = vsel %vm681_vm3, %v824_v14, 0.0 }
 0x11a   :  { %v895_v24 = vadd.f32 %v894_v23, %v893_v19 }
 0x11c   :  { %v1935_v25 = vpop.f32.mrb[16].mxu0  ;;  %v1937_v26 = vpop.f32.mrb[16].mxu1 }
 0x11d   :  { %v697_v27 = vsel %vm681_vm3, %v1935_v25, 0.0  ;;  %v825_v28 = vmul.f32 %v1935_v25, %v1935_v25  ;;  %v458_v29 = vpop.f32.mrb[17].mxu0  ;;  %v586_v30 = vpop.f32.mrb[17].mxu1 }
 0x11e   :  { %v698_v33 = vadd.f32 %v697_v27, %v696_v22  ;;  %v1943_v34 = vpop.f32.mrb[18].mxu0  ;;  %v1945_v35 = vpop.f32.mrb[18].mxu1 }
 0x11f   :  { %v896_v36 = vsel %vm681_vm3, %v825_v28, 0.0  ;;  %v699_v37 = vsel %vm681_vm3, %v1943_v34, 0.0  ;;  %v826_v40 = vmul.f32 %v1943_v34, %v1943_v34  ;;  %v461_v41 = vpop.f32.mrb[19].mxu0  ;;  %v589_v42 = vpop.f32.mrb[19].mxu1 }
 0x120   :  { %v897_v43 = vadd.f32 %v896_v36, %v895_v24  ;;  %v700_v44 = vadd.f32 %v699_v37, %v698_v33 }
 0x121   :  { %v898_v45 = vsel %vm681_vm3, %v826_v40, 0.0 }
 0x122   :  { %v899_v46 = vadd.f32 %v898_v45, %v897_v43 }
 0x124   :  { %v1953_v47 = vpop.f32.mrb[20].mxu0  ;;  %v1955_v48 = vpop.f32.mrb[20].mxu1 }
 0x125   :  { %v701_v51 = vsel %vm681_vm3, %v1953_v47, 0.0  ;;  %v827_v52 = vmul.f32 %v1953_v47, %v1953_v47  ;;  %v466_v53 = vpop.f32.mrb[21].mxu0  ;;  %v594_v54 = vpop.f32.mrb[21].mxu1 }
 0x126   :  { %v702_v55 = vadd.f32 %v701_v51, %v700_v44  ;;  %v1961_v58 = vpop.f32.mrb[22].mxu0  ;;  %v1963_v59 = vpop.f32.mrb[22].mxu1 }
 0x127   :  { %v900_v60 = vsel %vm681_vm3, %v827_v52, 0.0  ;;  %v703_v61 = vsel %vm681_vm3, %v1961_v58, 0.0  ;;  %v828_v62 = vmul.f32 %v1961_v58, %v1961_v58  ;;  %v469_v63 = vpop.f32.mrb[23].mxu0  ;;  %v597_v0 = vpop.f32.mrb[23].mxu1 }
 0x128   :  { %v901_v1 = vadd.f32 %v900_v60, %v899_v46  ;;  %v704_v2 = vadd.f32 %v703_v61, %v702_v55 }
 0x129   :  { %v902_v5 = vsel %vm681_vm3, %v828_v62, 0.0 }
 0x12a   :  { %v903_v6 = vadd.f32 %v902_v5, %v901_v1 }
 0x12c   :  { %v1971_v7 = vpop.f32.mrb[24].mxu0  ;;  %v1973_v8 = vpop.f32.mrb[24].mxu1 }
 0x12d   :  { %v705_v9 = vsel %vm681_vm3, %v1971_v7, 0.0  ;;  %v829_v12 = vmul.f32 %v1971_v7, %v1971_v7  ;;  %v474_v13 = vpop.f32.mrb[25].mxu0  ;;  %v602_v14 = vpop.f32.mrb[25].mxu1 }
 0x12e   :  { %v706_v17 = vadd.f32 %v705_v9, %v704_v2  ;;  %v1979_v18 = vpop.f32.mrb[26].mxu0  ;;  %v1981_v19 = vpop.f32.mrb[26].mxu1 }
 0x12f   :  { %v904_v22 = vsel %vm681_vm3, %v829_v12, 0.0  ;;  %v707_v23 = vsel %vm681_vm3, %v1979_v18, 0.0  ;;  %v830_v24 = vmul.f32 %v1979_v18, %v1979_v18  ;;  %v477_v27 = vpop.f32.mrb[27].mxu0  ;;  %v605_v28 = vpop.f32.mrb[27].mxu1 }
 0x130   :  { %v905_v29 = vadd.f32 %v904_v22, %v903_v6  ;;  %v708_v30 = vadd.f32 %v707_v23, %v706_v17 }
 0x131   :  { %v906_v33 = vsel %vm681_vm3, %v830_v24, 0.0 }
 0x132   :  { %v907_v36 = vadd.f32 %v906_v33, %v905_v29 }
 0x134   :  { %v1989_v37 = vpop.f32.mrb[28].mxu0  ;;  %v1991_v40 = vpop.f32.mrb[28].mxu1 }
 0x135   :  { %3193 = vst [vmem:[#allocation2_spill] sm:$0xff] %v1989_v37  ;;  %v709_v41 = vsel %vm681_vm3, %v1989_v37, 0.0  ;;  %v831_v42 = vmul.f32 %v1989_v37, %v1989_v37  ;;  %v482_v43 = vpop.f32.mrb[29].mxu0  ;;  %v610_v44 = vpop.f32.mrb[29].mxu1  ;;  %v747_v37 = vsel %vm681_vm3, %v1871_v21, 0.0 }
 0x136   :  { %v710_v45 = vadd.f32 %v709_v41, %v708_v30  ;;  %v1997_v46 = vpop.f32.mrb[30].mxu0  ;;  %v1999_v51 = vpop.f32.mrb[30].mxu1 }
 0x137   :  { %3194 = vst [vmem:[#allocation3_spill] sm:$0xff] %v1997_v46  ;;  %v908_v52 = vsel %vm681_vm3, %v831_v42, 0.0  ;;  %v711_v53 = vsel %vm681_vm3, %v1997_v46, 0.0  ;;  %v832_v54 = vmul.f32 %v1997_v46, %v1997_v46  ;;  %v485_v55 = vpop.f32.mrb[31].mxu0  ;;  %v613_v60 = vpop.f32.mrb[31].mxu1 }
 0x138   :  { %v909_v61 = vadd.f32 %v908_v52, %v907_v36  ;;  %v712_v62 = vadd.f32 %v711_v53, %v710_v45 }
 0x139   :  { %v910_v63 = vsel %vm681_vm3, %v832_v54, 0.0 }
 0x13a   :  { %v911_v0 = vadd.f32 %v910_v63, %v909_v61 }
 0x13c   :  { %v2007_v1 = vpop.f32.mrb[32].mxu0  ;;  %v2009_v2 = vpop.f32.mrb[32].mxu1 }
 0x13d   :  { %3195 = vst [vmem:[#allocation4_spill] sm:$0xff] %v2007_v1  ;;  %v713_v5 = vsel %vm681_vm3, %v2007_v1, 0.0  ;;  %v833_v6 = vmul.f32 %v2007_v1, %v2007_v1  ;;  %v490_v9 = vpop.f32.mrb[33].mxu0  ;;  %v618_v12 = vpop.f32.mrb[33].mxu1 }
 0x13e   :  { %v714_v13 = vadd.f32 %v713_v5, %v712_v62  ;;  %v2015_v14 = vpop.f32.mrb[34].mxu0  ;;  %v2017_v17 = vpop.f32.mrb[34].mxu1 }
 0x13f   :  { %3196 = vst [vmem:[#allocation5_spill] sm:$0xff] %v2015_v14  ;;  %v912_v22 = vsel %vm681_vm3, %v833_v6, 0.0  ;;  %v715_v23 = vsel %vm681_vm3, %v2015_v14, 0.0  ;;  %v834_v24 = vmul.f32 %v2015_v14, %v2015_v14  ;;  %v493_v27 = vpop.f32.mrb[35].mxu0  ;;  %v621_v28 = vpop.f32.mrb[35].mxu1 }
 0x140   :  { %v913_v29 = vadd.f32 %v912_v22, %v911_v0  ;;  %v716_v30 = vadd.f32 %v715_v23, %v714_v13 }
 0x141   :  { %v914_v33 = vsel %vm681_vm3, %v834_v24, 0.0 }
 0x142   :  { %v915_v36 = vadd.f32 %v914_v33, %v913_v29 }
 0x144   :  { %v2025_v41 = vpop.f32.mrb[36].mxu0  ;;  %v2027_v42 = vpop.f32.mrb[36].mxu1 }
 0x145   :  { %3197 = vst [vmem:[#allocation6_spill] sm:$0xff] %v2025_v41  ;;  %v717_v43 = vsel %vm681_vm3, %v2025_v41, 0.0  ;;  %v835_v44 = vmul.f32 %v2025_v41, %v2025_v41  ;;  %v498_v45 = vpop.f32.mrb[37].mxu0  ;;  %v626_v52 = vpop.f32.mrb[37].mxu1 }
 0x146   :  { %v718_v53 = vadd.f32 %v717_v43, %v716_v30  ;;  %v2033_v54 = vpop.f32.mrb[38].mxu0  ;;  %v2035_v55 = vpop.f32.mrb[38].mxu1 }
 0x147   :  { %3198 = vst [vmem:[#allocation7_spill] sm:$0xff] %v2033_v54  ;;  %v916_v60 = vsel %vm681_vm3, %v835_v44, 0.0  ;;  %v719_v61 = vsel %vm681_vm3, %v2033_v54, 0.0  ;;  %v836_v62 = vmul.f32 %v2033_v54, %v2033_v54  ;;  %v501_v63 = vpop.f32.mrb[39].mxu0  ;;  %v629_v0 = vpop.f32.mrb[39].mxu1 }
 0x148   :  { %v917_v5 = vadd.f32 %v916_v60, %v915_v36  ;;  %v720_v6 = vadd.f32 %v719_v61, %v718_v53 }
 0x149   :  { %v918_v9 = vsel %vm681_vm3, %v836_v62, 0.0 }
 0x14a   :  { %v919_v12 = vadd.f32 %v918_v9, %v917_v5 }
 0x14c   :  { %v2043_v13 = vpop.f32.mrb[40].mxu0  ;;  %v2045_v22 = vpop.f32.mrb[40].mxu1 }
 0x14d   :  { %3199 = vst [vmem:[#allocation8_spill] sm:$0xff] %v2043_v13  ;;  %v721_v23 = vsel %vm681_vm3, %v2043_v13, 0.0  ;;  %v837_v24 = vmul.f32 %v2043_v13, %v2043_v13  ;;  %v506_v27 = vpop.f32.mrb[41].mxu0  ;;  %v634_v28 = vpop.f32.mrb[41].mxu1 }
 0x14e   :  { %v722_v29 = vadd.f32 %v721_v23, %v720_v6  ;;  %v2051_v30 = vpop.f32.mrb[42].mxu0  ;;  %v2053_v33 = vpop.f32.mrb[42].mxu1 }
 0x14f   :  { %3200 = vst [vmem:[#allocation9_spill] sm:$0xff] %v2051_v30  ;;  %v920_v36 = vsel %vm681_vm3, %v837_v24, 0.0  ;;  %v723_v43 = vsel %vm681_vm3, %v2051_v30, 0.0  ;;  %v838_v44 = vmul.f32 %v2051_v30, %v2051_v30  ;;  %v509_v45 = vpop.f32.mrb[43].mxu0  ;;  %v637_v52 = vpop.f32.mrb[43].mxu1 }
 0x150   :  { %v921_v53 = vadd.f32 %v920_v36, %v919_v12  ;;  %v724_v60 = vadd.f32 %v723_v43, %v722_v29 }
 0x151   :  { %v922_v61 = vsel %vm681_vm3, %v838_v44, 0.0 }
 0x152   :  { %v923_v62 = vadd.f32 %v922_v61, %v921_v53 }
 0x154   :  { %v2061_v63 = vpop.f32.mrb[44].mxu0  ;;  %v2063_v0 = vpop.f32.mrb[44].mxu1 }
 0x155   :  { %3201 = vst [vmem:[#allocation10_spill] sm:$0xff] %v2061_v63  ;;  %v725_v5 = vsel %vm681_vm3, %v2061_v63, 0.0  ;;  %v839_v6 = vmul.f32 %v2061_v63, %v2061_v63  ;;  %v514_v9 = vpop.f32.mrb[45].mxu0  ;;  %v642_v23 = vpop.f32.mrb[45].mxu1 }
 0x156   :  { %v726_v24 = vadd.f32 %v725_v5, %v724_v60  ;;  %v2069_v27 = vpop.f32.mrb[46].mxu0  ;;  %v2071_v12 = vpop.f32.mrb[46].mxu1 }
 0x157   :  { %3202 = vst [vmem:[#allocation11_spill] sm:$0xff] %v2069_v27  ;;  %v924_v28 = vsel %vm681_vm3, %v839_v6, 0.0  ;;  %v727_v29 = vsel %vm681_vm3, %v2069_v27, 0.0  ;;  %v840_v36 = vmul.f32 %v2069_v27, %v2069_v27  ;;  %v517_v43 = vpop.f32.mrb[47].mxu0  ;;  %v645_v44 = vpop.f32.mrb[47].mxu1 }
 0x158   :  { %v925_v45 = vadd.f32 %v924_v28, %v923_v62  ;;  %v728_v52 = vadd.f32 %v727_v29, %v726_v24 }
 0x159   :  { %v926_v53 = vsel %vm681_vm3, %v840_v36, 0.0 }
 0x15a   :  { %v927_v61 = vadd.f32 %v926_v53, %v925_v45 }
 0x15c   :  { %v2079_v60 = vpop.f32.mrb[48].mxu0  ;;  %v2081_v5 = vpop.f32.mrb[48].mxu1 }
 0x15d   :  { %3203 = vst [vmem:[#allocation12_spill] sm:$0xff] %v2079_v60  ;;  %v729_v6 = vsel %vm681_vm3, %v2079_v60, 0.0  ;;  %v841_v9 = vmul.f32 %v2079_v60, %v2079_v60  ;;  %v522_v23 = vpop.f32.mrb[49].mxu0  ;;  %v650_v63 = vpop.f32.mrb[49].mxu1 }
 0x15e   :  { %v730_v27 = vadd.f32 %v729_v6, %v728_v52  ;;  %v2087_v43 = vpop.f32.mrb[50].mxu0  ;;  %v2089_v62 = vpop.f32.mrb[50].mxu1 }
 0x15f   :  { %3204 = vst [vmem:[#allocation13_spill] sm:$0xff] %v2087_v43  ;;  %3205 = vst [vmem:[#allocation14_spill] sm:$0xff] %v2089_v62  ;;  %v928_v24 = vsel %vm681_vm3, %v841_v9, 0.0  ;;  %v731_v28 = vsel %vm681_vm3, %v2087_v43, 0.0  ;;  %v842_v29 = vmul.f32 %v2087_v43, %v2087_v43  ;;  %v525_v36 = vpop.f32.mrb[51].mxu0  ;;  %v653_v44 = vpop.f32.mrb[51].mxu1 }
 0x160   :  { %v929_v45 = vadd.f32 %v928_v24, %v927_v61  ;;  %v732_v53 = vadd.f32 %v731_v28, %v730_v27 }
 0x161   :  { %v930_v23 = vsel %vm681_vm3, %v842_v29, 0.0 }
 0x162   :  { %v931_v63 = vadd.f32 %v930_v23, %v929_v45 }
 0x164   :  { %v2097_v52 = vpop.f32.mrb[52].mxu0  ;;  %v2099_v6 = vpop.f32.mrb[52].mxu1 }
 0x165   :  { %3206 = vst [vmem:[#allocation15_spill] sm:$0xff] %v2097_v52  ;;  %3207 = vst [vmem:[#allocation16_spill] sm:$0xff] %v2099_v6  ;;  %v733_v9 = vsel %vm681_vm3, %v2097_v52, 0.0  ;;  %v843_v60 = vmul.f32 %v2097_v52, %v2097_v52  ;;  %v530_v30 = vpop.f32.mrb[53].mxu0  ;;  %v658_v13 = vpop.f32.mrb[53].mxu1 }
 0x166   :  { %v734_v43 = vadd.f32 %v733_v9, %v732_v53  ;;  %v2105_v36 = vpop.f32.mrb[54].mxu0  ;;  %v2107_v61 = vpop.f32.mrb[54].mxu1 }
 0x167   :  { %3208 = vst [vmem:[#allocation17_spill] sm:$0xff] %v2105_v36  ;;  %3209 = vst [vmem:[#allocation18_spill] sm:$0xff] %v2107_v61  ;;  %v932_v27 = vsel %vm681_vm3, %v843_v60, 0.0  ;;  %v735_v24 = vsel %vm681_vm3, %v2105_v36, 0.0  ;;  %v844_v28 = vmul.f32 %v2105_v36, %v2105_v36  ;;  %v533_v29 = vpop.f32.mrb[55].mxu0  ;;  %v661_v44 = vpop.f32.mrb[55].mxu1 }
 0x168   :  { %v933_v45 = vadd.f32 %v932_v27, %v931_v63  ;;  %v736_v23 = vadd.f32 %v735_v24, %v734_v43 }
 0x169   :  { %v934_v30 = vsel %vm681_vm3, %v844_v28, 0.0 }
 0x16a   :  { %v935_v13 = vadd.f32 %v934_v30, %v933_v45 }
 0x16c   :  { %v2115_v53 = vpop.f32.mrb[56].mxu0  ;;  %v2117_v9 = vpop.f32.mrb[56].mxu1 }
 0x16d   :  { %3210 = vst [vmem:[#allocation19_spill] sm:$0xff] %v2115_v53  ;;  %3211 = vst [vmem:[#allocation20_spill] sm:$0xff] %v2117_v9  ;;  %v737_v60 = vsel %vm681_vm3, %v2115_v53, 0.0  ;;  %v845_v52 = vmul.f32 %v2115_v53, %v2115_v53  ;;  %v538_v54 = vpop.f32.mrb[57].mxu0  ;;  %v666_v41 = vpop.f32.mrb[57].mxu1 }
 0x16e   :  { %v738_v36 = vadd.f32 %v737_v60, %v736_v23  ;;  %v2123_v29 = vpop.f32.mrb[58].mxu0  ;;  %v2125_v63 = vpop.f32.mrb[58].mxu1 }
 0x16f   :  { %3212 = vst [vmem:[#allocation21_spill] sm:$0xff] %v2123_v29  ;;  %3213 = vst [vmem:[#allocation22_spill] sm:$0xff] %v2125_v63  ;;  %v936_v43 = vsel %vm681_vm3, %v845_v52, 0.0  ;;  %v739_v27 = vsel %vm681_vm3, %v2123_v29, 0.0  ;;  %v846_v24 = vmul.f32 %v2123_v29, %v2123_v29  ;;  %v541_v28 = vpop.f32.mrb[59].mxu0  ;;  %v669_v44 = vpop.f32.mrb[59].mxu1 }
 0x170   :  { %v937_v45 = vadd.f32 %v936_v43, %v935_v13  ;;  %v740_v30 = vadd.f32 %v739_v27, %v738_v36  ;;  %v849_v36 = vmul.f32 %v1865_v16, %v1865_v16 }
 0x171   :  { %v938_v54 = vsel %vm681_vm3, %v846_v24, 0.0 }
 0x172   :  { %v939_v41 = vadd.f32 %v938_v54, %v937_v45  ;;  %v850_v54 = vmul.f32 %v1871_v21, %v1871_v21  ;;  %v944_v46 = vsel %vm681_vm3, %v849_v36, 0.0 }
 0x174   :  { %v2133_v23 = vpop.f32.mrb[60].mxu0  ;;  %v2135_v60 = vpop.f32.mrb[60].mxu1 }
 0x175   :  { %3214 = vst [vmem:[#allocation23_spill] sm:$0xff] %v2133_v23  ;;  %3215 = vst [vmem:[#allocation24_spill] sm:$0xff] %v2135_v60  ;;  %v741_v52 = vsel %vm681_vm3, %v2133_v23, 0.0  ;;  %v847_v53 = vmul.f32 %v2133_v23, %v2133_v23  ;;  %v546_v14 = vpop.f32.mrb[61].mxu0  ;;  %v674_v1 = vpop.f32.mrb[61].mxu1 }
 0x176   :  { %v742_v29 = vadd.f32 %v741_v52, %v740_v30  ;;  %v2141_v28 = vpop.f32.mrb[62].mxu0  ;;  %v2143_v13 = vpop.f32.mrb[62].mxu1  ;;  %v745_v30 = vsel %vm681_vm3, %v1865_v16, 0.0 }
 0x177   :  { %3216 = vst [vmem:[#allocation25_spill] sm:$0xff] %v2143_v13  ;;  %v940_v43 = vsel %vm681_vm3, %v847_v53, 0.0  ;;  %v743_v27 = vsel %vm681_vm3, %v2141_v28, 0.0  ;;  %v848_v24 = vmul.f32 %v2141_v28, %v2141_v28  ;;  %v549_v44 = vpop.f32.mrb[63].mxu0  ;;  %v677_v45 = vpop.f32.mrb[63].mxu1 }
 0x178   :  { %v941_v14 = vadd.f32 %v940_v43, %v939_v41  ;;  %v744_v1 = vadd.f32 %v743_v27, %v742_v29  ;;  %v851_v44 = vmul.f32 %v1883_v32, %v1883_v32  ;;  %v946_v43 = vsel %vm681_vm3, %v850_v54, 0.0 }
 0x179   :  { %v942_v52 = vsel %vm681_vm3, %v848_v24, 0.0  ;;  %v749_v27 = vsel %vm681_vm3, %v1883_v32, 0.0  ;;  %v852_v24 = vmul.f32 %v1891_v39, %v1891_v39  ;;  %v753_v54 = vsel %vm681_vm3, %v1901_v50, 0.0 }
 0x17a   :  { %v746_v23 = vadd.f32 %v745_v30, %v744_v1  ;;  %v943_v53 = vadd.f32 %v942_v52, %v941_v14  ;;  %v948_v36 = vsel %vm681_vm3, %v851_v44, 0.0  ;;  %v751_v1 = vsel %vm681_vm3, %v1891_v39, 0.0 }
 0x17b   :  { %v853_v30 = vmul.f32 %v1901_v50, %v1901_v50  ;;  %v854_v52 = vmul.f32 %v1909_v57, %v1909_v57 }
 0x17c   :  { %v748_v41 = vadd.f32 %v747_v37, %v746_v23  ;;  %v945_v29 = vadd.f32 %v944_v46, %v943_v53  ;;  %v950_v23 = vsel %vm681_vm3, %v852_v24, 0.0 }
 0x17d   :  { %v952_v44 = vsel %vm681_vm3, %v853_v30, 0.0  ;;  %v954_v24 = vsel %vm681_vm3, %v854_v52, 0.0 }
 0x17e   :  { %v750_v45 = vadd.f32 %v749_v27, %v748_v41  ;;  %v947_v14 = vadd.f32 %v946_v43, %v945_v29  ;;  %v755_v29 = vsel %vm681_vm3, %v1909_v57, 0.0  ;;  %v855_v43 = vmul.f32 %v1919_v4, %v1919_v4 }
 0x180   :  { %v752_v37 = vadd.f32 %v751_v1, %v750_v45  ;;  %v949_v46 = vadd.f32 %v948_v36, %v947_v14  ;;  %v757_v14 = vsel %vm681_vm3, %v1919_v4, 0.0  ;;  %v856_v36 = vmul.f32 %v1927_v11, %v1927_v11 }
 0x181   :  { %v956_v30 = vsel %vm681_vm3, %v855_v43, 0.0 }
 0x182   :  { %v754_v53 = vadd.f32 %v753_v54, %v752_v37  ;;  %v951_v41 = vadd.f32 %v950_v23, %v949_v46  ;;  %v759_v46 = vsel %vm681_vm3, %v1927_v11, 0.0  ;;  %v857_v23 = vmul.f32 %v1937_v26, %v1937_v26 }
 0x183   :  { %v958_v52 = vsel %vm681_vm3, %v856_v36, 0.0 }
 0x184   :  { %v756_v27 = vadd.f32 %v755_v29, %v754_v53  ;;  %v953_v45 = vadd.f32 %v952_v44, %v951_v41  ;;  %v761_v41 = vsel %vm681_vm3, %v1937_v26, 0.0  ;;  %v858_v44 = vmul.f32 %v1945_v35, %v1945_v35 }
 0x185   :  { %v960_v43 = vsel %vm681_vm3, %v857_v23, 0.0 }
 0x186   :  { %v758_v1 = vadd.f32 %v757_v14, %v756_v27  ;;  %v955_v37 = vadd.f32 %v954_v24, %v953_v45  ;;  %v763_v45 = vsel %vm681_vm3, %v1945_v35, 0.0  ;;  %v859_v24 = vmul.f32 %v1955_v48, %v1955_v48 }
 0x187   :  { %v962_v36 = vsel %vm681_vm3, %v858_v44, 0.0 }
 0x188   :  { %v760_v54 = vadd.f32 %v759_v46, %v758_v1  ;;  %v957_v53 = vadd.f32 %v956_v30, %v955_v37  ;;  %v765_v37 = vsel %vm681_vm3, %v1955_v48, 0.0  ;;  %v860_v30 = vmul.f32 %v1963_v59, %v1963_v59 }
 0x189   :  { %v964_v23 = vsel %vm681_vm3, %v859_v24, 0.0 }
 0x18a   :  { %v959_v29 = vadd.f32 %v958_v52, %v957_v53  ;;  %v762_v27 = vadd.f32 %v761_v41, %v760_v54  ;;  %v767_v53 = vsel %vm681_vm3, %v1963_v59, 0.0  ;;  %v861_v52 = vmul.f32 %v1973_v8, %v1973_v8 }
 0x18b   :  { %v966_v44 = vsel %vm681_vm3, %v860_v30, 0.0 }
 0x18c   :  { %v764_v14 = vadd.f32 %v763_v45, %v762_v27  ;;  %v961_v1 = vadd.f32 %v960_v43, %v959_v29  ;;  %v769_v27 = vsel %vm681_vm3, %v1973_v8, 0.0  ;;  %v862_v43 = vmul.f32 %v1981_v19, %v1981_v19 }
 0x18d   :  { %v968_v24 = vsel %vm681_vm3, %v861_v52, 0.0 }
 0x18e   :  { %v766_v46 = vadd.f32 %v765_v37, %v764_v14  ;;  %v963_v54 = vadd.f32 %v962_v36, %v961_v1  ;;  %v771_v1 = vsel %vm681_vm3, %v1981_v19, 0.0  ;;  %v863_v36 = vmul.f32 %v1991_v40, %v1991_v40 }
 0x18f   :  { %v970_v30 = vsel %vm681_vm3, %v862_v43, 0.0 }
 0x190   :  { %v768_v41 = vadd.f32 %v767_v53, %v766_v46  ;;  %v965_v29 = vadd.f32 %v964_v23, %v963_v54  ;;  %v773_v54 = vsel %vm681_vm3, %v1991_v40, 0.0  ;;  %v864_v23 = vmul.f32 %v1999_v51, %v1999_v51 }
 0x191   :  { %v972_v52 = vsel %vm681_vm3, %v863_v36, 0.0 }
 0x192   :  { %v770_v45 = vadd.f32 %v769_v27, %v768_v41  ;;  %v967_v14 = vadd.f32 %v966_v44, %v965_v29  ;;  %v775_v29 = vsel %vm681_vm3, %v1999_v51, 0.0  ;;  %v865_v44 = vmul.f32 %v2009_v2, %v2009_v2 }
 0x193   :  { %v974_v43 = vsel %vm681_vm3, %v864_v23, 0.0 }
 0x194   :  { %v772_v37 = vadd.f32 %v771_v1, %v770_v45  ;;  %v969_v46 = vadd.f32 %v968_v24, %v967_v14  ;;  %v777_v14 = vsel %vm681_vm3, %v2009_v2, 0.0  ;;  %v866_v24 = vmul.f32 %v2017_v17, %v2017_v17 }
 0x195   :  { %v976_v36 = vsel %vm681_vm3, %v865_v44, 0.0 }
 0x196   :  { %v774_v53 = vadd.f32 %v773_v54, %v772_v37  ;;  %v971_v41 = vadd.f32 %v970_v30, %v969_v46  ;;  %v779_v46 = vsel %vm681_vm3, %v2017_v17, 0.0  ;;  %v867_v30 = vmul.f32 %v2027_v42, %v2027_v42 }
 0x197   :  { %v978_v23 = vsel %vm681_vm3, %v866_v24, 0.0 }
 0x198   :  { %v776_v27 = vadd.f32 %v775_v29, %v774_v53  ;;  %v973_v45 = vadd.f32 %v972_v52, %v971_v41  ;;  %v781_v41 = vsel %vm681_vm3, %v2027_v42, 0.0  ;;  %v868_v52 = vmul.f32 %v2035_v55, %v2035_v55 }
 0x199   :  { %v980_v44 = vsel %vm681_vm3, %v867_v30, 0.0 }
 0x19a   :  { %v778_v1 = vadd.f32 %v777_v14, %v776_v27  ;;  %v975_v37 = vadd.f32 %v974_v43, %v973_v45  ;;  %v783_v45 = vsel %vm681_vm3, %v2035_v55, 0.0  ;;  %v869_v43 = vmul.f32 %v2045_v22, %v2045_v22 }
 0x19b   :  { %v982_v24 = vsel %vm681_vm3, %v868_v52, 0.0 }
 0x19c   :  { %v977_v54 = vadd.f32 %v976_v36, %v975_v37  ;;  %v780_v53 = vadd.f32 %v779_v46, %v778_v1  ;;  %v785_v37 = vsel %vm681_vm3, %v2045_v22, 0.0  ;;  %v870_v36 = vmul.f32 %v2053_v33, %v2053_v33 }
 0x19d   :  { %v984_v30 = vsel %vm681_vm3, %v869_v43, 0.0 }
 0x19e   :  { %v979_v29 = vadd.f32 %v978_v23, %v977_v54  ;;  %v782_v27 = vadd.f32 %v781_v41, %v780_v53  ;;  %v787_v53 = vsel %vm681_vm3, %v2053_v33, 0.0  ;;  %v871_v23 = vmul.f32 %v2063_v0, %v2063_v0 }
 0x19f   :  { %v986_v52 = vsel %vm681_vm3, %v870_v36, 0.0 }
 0x1a0   :  { %v981_v14 = vadd.f32 %v980_v44, %v979_v29  ;;  %v784_v1 = vadd.f32 %v783_v45, %v782_v27  ;;  %v789_v27 = vsel %vm681_vm3, %v2063_v0, 0.0  ;;  %v872_v44 = vmul.f32 %v2071_v12, %v2071_v12 }
 0x1a1   :  { %v988_v43 = vsel %vm681_vm3, %v871_v23, 0.0 }
 0x1a2   :  { %v983_v46 = vadd.f32 %v982_v24, %v981_v14  ;;  %v786_v54 = vadd.f32 %v785_v37, %v784_v1  ;;  %v791_v1 = vsel %vm681_vm3, %v2071_v12, 0.0  ;;  %v873_v24 = vmul.f32 %v2081_v5, %v2081_v5 }
 0x1a3   :  { %v990_v36 = vsel %vm681_vm3, %v872_v44, 0.0 }
 0x1a4   :  { %v985_v41 = vadd.f32 %v984_v30, %v983_v46  ;;  %v788_v29 = vadd.f32 %v787_v53, %v786_v54  ;;  %v793_v54 = vsel %vm681_vm3, %v2081_v5, 0.0  ;;  %v874_v30 = vmul.f32 %v2089_v62, %v2089_v62 }
 0x1a5   :  { %v992_v23 = vsel %vm681_vm3, %v873_v24, 0.0 }
 0x1a6   :  { %v987_v45 = vadd.f32 %v986_v52, %v985_v41  ;;  %v790_v14 = vadd.f32 %v789_v27, %v788_v29  ;;  %v795_v29 = vsel %vm681_vm3, %v2089_v62, 0.0  ;;  %v875_v52 = vmul.f32 %v2099_v6, %v2099_v6 }
 0x1a7   :  { %v994_v44 = vsel %vm681_vm3, %v874_v30, 0.0 }
 0x1a8   :  { %v989_v37 = vadd.f32 %v988_v43, %v987_v45  ;;  %v792_v46 = vadd.f32 %v791_v1, %v790_v14  ;;  %v797_v14 = vsel %vm681_vm3, %v2099_v6, 0.0  ;;  %v876_v43 = vmul.f32 %v2107_v61, %v2107_v61 }
 0x1a9   :  { %v996_v24 = vsel %vm681_vm3, %v875_v52, 0.0 }
 0x1aa   :  { %v991_v53 = vadd.f32 %v990_v36, %v989_v37  ;;  %v794_v41 = vadd.f32 %v793_v54, %v792_v46  ;;  %v799_v46 = vsel %vm681_vm3, %v2107_v61, 0.0  ;;  %v877_v36 = vmul.f32 %v2117_v9, %v2117_v9 }
 0x1ab   :  { %v998_v30 = vsel %vm681_vm3, %v876_v43, 0.0 }
 0x1ac   :  { %v993_v27 = vadd.f32 %v992_v23, %v991_v53  ;;  %v796_v45 = vadd.f32 %v795_v29, %v794_v41  ;;  %v801_v41 = vsel %vm681_vm3, %v2117_v9, 0.0  ;;  %v878_v23 = vmul.f32 %v2125_v63, %v2125_v63 }
 0x1ad   :  { %v879_v29 = vmul.f32 %v2135_v60, %v2135_v60 }
 0x1ae   :  { %v995_v1 = vadd.f32 %v994_v44, %v993_v27  ;;  %v798_v37 = vadd.f32 %v797_v14, %v796_v45  ;;  %v1000_v45 = vsel %vm681_vm3, %v877_v36, 0.0  ;;  %v803_v44 = vsel %vm681_vm3, %v2125_v63, 0.0 }
 0x1af   :  { %v805_v14 = vsel %vm681_vm3, %v2135_v60, 0.0  ;;  %v807_v36 = vsel %vm681_vm3, %v2143_v13, 0.0 }
 0x1b0   :  { %v997_v54 = vadd.f32 %v996_v24, %v995_v1  ;;  %v800_v53 = vadd.f32 %v799_v46, %v798_v37  ;;  %v1002_v37 = vsel %vm681_vm3, %v878_v23, 0.0  ;;  %v1004_v24 = vsel %vm681_vm3, %v879_v29, 0.0 }
 0x1b1   :  { %v880_v46 = vmul.f32 %v2143_v13, %v2143_v13 }
 0x1b2   :  { %v999_v52 = vadd.f32 %v998_v30, %v997_v54  ;;  %v802_v27 = vadd.f32 %v801_v41, %v800_v53 }
 0x1b3   :  { %v1006_v41 = vsel %vm681_vm3, %v880_v46, 0.0  ;;  %v1021_v46 = vlaneseq }
 0x1b4   :  { %v1001_v43 = vadd.f32 %v1000_v45, %v999_v52  ;;  %v804_v1 = vadd.f32 %v803_v44, %v802_v27 }
 0x1b6   :  { %v1003_v9 = vadd.f32 %v1002_v37, %v1001_v43  ;;  %v806_v54 = vadd.f32 %v805_v14, %v804_v1 }
 0x1b8   :  { %v1005_v53 = vadd.f32 %v1004_v24, %v1003_v9  ;;  %v808_v30 = vadd.f32 %v807_v36, %v806_v54  ;;  %v2311_v54 = vshrl.u32 %v1021_v46, 7  ;;  %v3225_v46 = vld [vmem:[#allocation10_spill] sm:$0xff] }
 0x1ba   :  { %v809_v63 = vrot.slane %v808_v30, 4  ;;  %v1007_v60 = vadd.f32 %v1006_v41, %v1005_v53 }
 0x1bc   :  { %v810_v52 = vadd.f32 %v809_v63, %v808_v30  ;;  %v1008_v27 = vrot.slane %v1007_v60, 4  ;;  %v679_v63 = vld [vmem:[%s3165_s2] sm:$0x1] }
 0x1be   :  { %v811_v45 = vrot.slane %v810_v52, 2  ;;  %v1009_v23 = vadd.f32 %v1008_v27, %v1007_v60  ;;  %v3192_v60 = vsub.s32 0, %v2311_v54  ;;  %v3217_v27 = vld [vmem:[#allocation2_spill] sm:$0xff] }
 0x1c0   :  { %v812_v44 = vadd.f32 %v811_v45, %v810_v52  ;;  %v1010_v29 = vrot.slane %v1009_v23, 2  ;;  %v3218_v45 = vld [vmem:[#allocation3_spill] sm:$0xff] }
 0x1c2   :  { %v813_v61 = vrot.slane %v812_v44, 1  ;;  %v1011_v6 = vadd.f32 %v1010_v29, %v1009_v23  ;;  %v3219_v23 = vld [vmem:[#allocation4_spill] sm:$0xff]  ;;  %v3221_v29 = vld [vmem:[#allocation6_spill] sm:$0xff] }
 0x1c4   :  { %v814_v62 = vadd.f32 %v813_v61, %v812_v44  ;;  %v1012_v43 = vrot.slane %v1011_v6, 1  ;;  %v3220_v44 = vld [vmem:[#allocation5_spill] sm:$0xff] }
 0x1c6   :  { %v816_v14 = vmul.f32 0.001953125, %v814_v62  ;;  %v1013_v1 = vadd.f32 %v1012_v43, %v1011_v6  ;;  %v3222_v43 = vld [vmem:[#allocation7_spill] sm:$0xff] }
 0x1c8   :  { %v1014_v37 = vmul.f32 0.001953125, %v1013_v1  ;;  %v1015_v13 = vmul.f32 %v816_v14, %v816_v14  ;;  %v3223_v1 = vld [vmem:[#allocation8_spill] sm:$0xff] }
 0x1ca   :  { %v1016_v9 = vsub.f32 %v1014_v37, %v1015_v13 }
 0x1cc   :  { %v1017_v24 = vadd.f32 1e-05, %v1016_v9  ;;  %v3224_v9 = vld [vmem:[#allocation9_spill] sm:$0xff] }
 0x1ce   :  { %1368 = vrsqrt.f32 %v1017_v24 }
 0x1d8   :  { %v1369_v36 = vpop.eup %1368 }
 0x1d9   :  { %v1019_v53 = vmul.f32 %v1369_v36, %v679_v63  ;;  %v3226_v36 = vld [vmem:[#allocation11_spill] sm:$0xff] }
 0x1db   :  { %v2319_v62 = vrot.slane %v1019_v53, %v3192_v60  ;;  %v2321_v6 = vmul.f32 %v1019_v53, %v816_v14  ;;  %v3233_v60 = vld [vmem:[#allocation21_spill] sm:$0xff] }
 0x1dd   :  { %v2325_v61 = vmul.f32 %v2319_v62, %v1863_v15  ;;  %v2329_v13 = vmul.f32 %v2319_v62, %v1869_v20  ;;  %v2333_v30 = vmul.f32 %v2319_v62, %v1881_v31  ;;  %v2337_v41 = vmul.f32 %v2319_v62, %v1889_v38 }
 0x1de   :  { %v2341_v52 = vmul.f32 %v2319_v62, %v1899_v49  ;;  %v2345_v15 = vmul.f32 %v2319_v62, %v1907_v56  ;;  %v2349_v20 = vmul.f32 %v2319_v62, %v1917_v3  ;;  %v2353_v31 = vmul.f32 %v2319_v62, %v1925_v10 }
 0x1df   :  { %v2357_v38 = vmul.f32 %v2319_v62, %v1935_v25  ;;  %v2361_v49 = vmul.f32 %v2319_v62, %v1943_v34  ;;  %v2365_v56 = vmul.f32 %v2319_v62, %v1953_v47  ;;  %v2369_v3 = vmul.f32 %v2319_v62, %v1961_v58 }
 0x1e0   :  { %v2373_v10 = vmul.f32 %v2319_v62, %v1971_v7  ;;  %v2377_v25 = vmul.f32 %v2319_v62, %v1979_v18  ;;  %v2381_v34 = vmul.f32 %v2319_v62, %v3217_v27  ;;  %v2385_v47 = vmul.f32 %v2319_v62, %v3218_v45  ;;  %v3227_v27 = vld [vmem:[#allocation12_spill] sm:$0xff] }
 0x1e1   :  { %v2389_v58 = vmul.f32 %v2319_v62, %v3219_v23  ;;  %v2393_v7 = vmul.f32 %v2319_v62, %v3220_v44  ;;  %v2397_v18 = vmul.f32 %v2319_v62, %v3221_v29  ;;  %v2401_v14 = vmul.f32 %v2319_v62, %v3222_v43  ;;  %v3229_v23 = vld [vmem:[#allocation13_spill] sm:$0xff]  ;;  %v3230_v29 = vld [vmem:[#allocation15_spill] sm:$0xff] }
 0x1e2   :  { %v2405_v37 = vmul.f32 %v2319_v62, %v3223_v1  ;;  %v2409_v24 = vmul.f32 %v2319_v62, %v3224_v9  ;;  %v2413_v63 = vmul.f32 %v2319_v62, %v3225_v46  ;;  %v2417_v53 = vmul.f32 %v2319_v62, %v3226_v36  ;;  %v3231_v1 = vld [vmem:[#allocation17_spill] sm:$0xff]  ;;  %v3232_v46 = vld [vmem:[#allocation19_spill] sm:$0xff] }
 0x1e3   :  { %v2421_v45 = vmul.f32 %v2319_v62, %v3227_v27  ;;  %v2425_v44 = vmul.f32 %v2319_v62, %v3229_v23  ;;  %v2429_v43 = vmul.f32 %v2319_v62, %v3230_v29  ;;  %v2433_v9 = vmul.f32 %v2319_v62, %v3231_v1 }
 0x1e4   :  { %v2437_v36 = vmul.f32 %v2319_v62, %v3232_v46  ;;  %v2441_v27 = vmul.f32 %v2319_v62, %v3233_v60  ;;  %v2449_v29 = vmul.f32 %v2319_v62, %v2141_v28  ;;  %v2453_v1 = vmul.f32 %v2319_v62, %v1865_v16 }
 0x1e5   :  { %3228 = vst [vmem:[#allocation2_spill] sm:$0xff] %v2421_v45  ;;  %v3234_v45 = vld [vmem:[#allocation23_spill] sm:$0xff]  ;;  %v2457_v46 = vmul.f32 %v2319_v62, %v1871_v21  ;;  %v2461_v60 = vmul.f32 %v2319_v62, %v1883_v32  ;;  %v2469_v28 = vmul.f32 %v2319_v62, %v1901_v50  ;;  %v2473_v16 = vmul.f32 %v2319_v62, %v1909_v57 }
 0x1e6   :  { %v2445_v23 = vmul.f32 %v2319_v62, %v3234_v45  ;;  %v2465_v45 = vmul.f32 %v2319_v62, %v1891_v39  ;;  %v2477_v21 = vmul.f32 %v2319_v62, %v1919_v4  ;;  %v2481_v32 = vmul.f32 %v2319_v62, %v1927_v11 }
 0x1e7   :  { %v2485_v39 = vmul.f32 %v2319_v62, %v1937_v26  ;;  %v2489_v50 = vmul.f32 %v2319_v62, %v1945_v35  ;;  %v2493_v57 = vmul.f32 %v2319_v62, %v1955_v48  ;;  %v2497_v4 = vmul.f32 %v2319_v62, %v1963_v59 }
 0x1e8   :  { %v2501_v11 = vmul.f32 %v2319_v62, %v1973_v8  ;;  %v2505_v26 = vmul.f32 %v2319_v62, %v1981_v19  ;;  %v2509_v35 = vmul.f32 %v2319_v62, %v1991_v40  ;;  %v2513_v48 = vmul.f32 %v2319_v62, %v1999_v51  ;;  %v680_v51 = vld [vmem:[%s3166_s3] sm:$0x1] }
 0x1e9   :  { %v2517_v59 = vmul.f32 %v2319_v62, %v2009_v2  ;;  %v2521_v8 = vmul.f32 %v2319_v62, %v2017_v17  ;;  %v2525_v19 = vmul.f32 %v2319_v62, %v2027_v42  ;;  %v2529_v40 = vmul.f32 %v2319_v62, %v2035_v55 }
 0x1ea   :  { %v2536_v2 = vmul.f32 %v2319_v62, %v2045_v22  ;;  %v2540_v17 = vmul.f32 %v2319_v62, %v2053_v33  ;;  %v2544_v42 = vmul.f32 %v2319_v62, %v2063_v0  ;;  %v2548_v55 = vmul.f32 %v2319_v62, %v2071_v12 }
 0x1eb   :  { %3235 = vst [vmem:[#allocation3_spill] sm:$0xff] %v2525_v19  ;;  %3236 = vst [vmem:[#allocation4_spill] sm:$0xff] %v2529_v40  ;;  %v2552_v40 = vmul.f32 %v2319_v62, %v2081_v5  ;;  %v3242_v19 = vld [vmem:[#allocation14_spill] sm:$0xff] }
 0x1ec   :  { %3237 = vst [vmem:[#allocation5_spill] sm:$0xff] %v2536_v2  ;;  %3238 = vst [vmem:[#allocation6_spill] sm:$0xff] %v2540_v17  ;;  %v2556_v22 = vmul.f32 %v2319_v62, %v3242_v19  ;;  %v3244_v2 = vld [vmem:[#allocation16_spill] sm:$0xff]  ;;  %v3246_v17 = vld [vmem:[#allocation18_spill] sm:$0xff] }
 0x1ed   :  { %3239 = vst [vmem:[#allocation7_spill] sm:$0xff] %v2544_v42  ;;  %3240 = vst [vmem:[#allocation8_spill] sm:$0xff] %v2548_v55  ;;  %v2560_v33 = vmul.f32 %v2319_v62, %v3244_v2  ;;  %v2564_v0 = vmul.f32 %v2319_v62, %v3246_v17  ;;  %v3248_v42 = vld [vmem:[#allocation20_spill] sm:$0xff]  ;;  %v3249_v55 = vld [vmem:[#allocation22_spill] sm:$0xff]  ;;  %v3252_v17 = vsub.s32 0, %v2311_v54 }
 0x1ee   :  { %3241 = vst [vmem:[#allocation9_spill] sm:$0xff] %v2552_v40  ;;  %3243 = vst [vmem:[#allocation10_spill] sm:$0xff] %v2556_v22  ;;  %v2568_v12 = vmul.f32 %v2319_v62, %v3248_v42  ;;  %v2572_v5 = vmul.f32 %v2319_v62, %v3249_v55  ;;  %v3250_v40 = vld [vmem:[#allocation24_spill] sm:$0xff]  ;;  %v3251_v22 = vld [vmem:[#allocation25_spill] sm:$0xff] }
 0x1ef   :  { %3245 = vst [vmem:[#allocation11_spill] sm:$0xff] %v2560_v33  ;;  %3247 = vst [vmem:[#allocation12_spill] sm:$0xff] %v2564_v0  ;;  %v2576_v19 = vmul.f32 %v2319_v62, %v3250_v40  ;;  %v2580_v2 = vmul.f32 %v2319_v62, %v3251_v22  ;;  %v1091_v33 = vsub.f32 %v680_v51, %v2321_v6 }
 0x1f1   :  { %v2585_v0 = vrot.slane %v1091_v33, %v3252_v17 }
 0x1f2   :  { %v3256_v22 = vld [vmem:[#allocation3_spill] sm:$0xff]  ;;  %v3258_v33 = vld [vmem:[#allocation4_spill] sm:$0xff] }
 0x1f3   :  { %v2589_v42 = vadd.f32 %v2585_v0, %v2325_v61  ;;  %v2593_v55 = vadd.f32 %v2585_v0, %v2329_v13  ;;  %v2597_v40 = vadd.f32 %v2585_v0, %v2333_v30  ;;  %v2601_v62 = vadd.f32 %v2585_v0, %v2337_v41  ;;  %v3260_v17 = vld [vmem:[#allocation5_spill] sm:$0xff] }
 0x1f4   :  { %v2605_v54 = vadd.f32 %v2585_v0, %v2341_v52  ;;  %v2609_v6 = vadd.f32 %v2585_v0, %v2345_v15  ;;  %v2613_v61 = vadd.f32 %v2585_v0, %v2349_v20  ;;  %v2617_v13 = vadd.f32 %v2585_v0, %v2353_v31 }
 0x1f5   :  { %v2621_v30 = vadd.f32 %v2585_v0, %v2357_v38  ;;  %v2625_v41 = vadd.f32 %v2585_v0, %v2361_v49  ;;  %v2629_v52 = vadd.f32 %v2585_v0, %v2365_v56  ;;  %v2633_v15 = vadd.f32 %v2585_v0, %v2369_v3 }
 0x1f6   :  { %v2637_v20 = vadd.f32 %v2585_v0, %v2373_v10  ;;  %v2641_v31 = vadd.f32 %v2585_v0, %v2377_v25  ;;  %v2645_v38 = vadd.f32 %v2585_v0, %v2381_v34  ;;  %v2649_v49 = vadd.f32 %v2585_v0, %v2385_v47 }
 0x1f7   :  { %v2653_v56 = vadd.f32 %v2585_v0, %v2389_v58  ;;  %v2657_v3 = vadd.f32 %v2585_v0, %v2393_v7  ;;  %v2661_v10 = vadd.f32 %v2585_v0, %v2397_v18  ;;  %v2665_v25 = vadd.f32 %v2585_v0, %v2401_v14  ;;  %v3253_v18 = vld [vmem:[#allocation2_spill] sm:$0xff] }
 0x1f8   :  { %v2669_v34 = vadd.f32 %v2585_v0, %v2405_v37  ;;  %v2673_v47 = vadd.f32 %v2585_v0, %v2409_v24  ;;  %v2677_v58 = vadd.f32 %v2585_v0, %v2413_v63  ;;  %v2681_v7 = vadd.f32 %v2585_v0, %v2417_v53 }
 0x1f9   :  { %v2685_v14 = vadd.f32 %v2585_v0, %v3253_v18  ;;  %v2689_v37 = vadd.f32 %v2585_v0, %v2425_v44  ;;  %v2693_v24 = vadd.f32 %v2585_v0, %v2429_v43  ;;  %v2697_v63 = vadd.f32 %v2585_v0, %v2433_v9  ;;  %v3262_v18 = vld [vmem:[#allocation6_spill] sm:$0xff] }
 0x1fa   :  { %v2701_v53 = vadd.f32 %v2585_v0, %v2437_v36  ;;  %v2705_v51 = vadd.f32 %v2585_v0, %v2441_v27  ;;  %v2709_v44 = vadd.f32 %v2585_v0, %v2445_v23  ;;  %v2713_v43 = vadd.f32 %v2585_v0, %v2449_v29 }
 0x1fb   :  { %v2717_v9 = vadd.f32 %v2585_v0, %v2453_v1  ;;  %v2721_v36 = vadd.f32 %v2585_v0, %v2457_v46  ;;  %v2725_v27 = vadd.f32 %v2585_v0, %v2461_v60  ;;  %v2729_v23 = vadd.f32 %v2585_v0, %v2465_v45 }
 0x1fc   :  { %v2733_v29 = vadd.f32 %v2585_v0, %v2469_v28  ;;  %v2737_v1 = vadd.f32 %v2585_v0, %v2473_v16  ;;  %v2741_v46 = vadd.f32 %v2585_v0, %v2477_v21  ;;  %v2745_v60 = vadd.f32 %v2585_v0, %v2481_v32 }
 0x1fd   :  { %v2749_v45 = vadd.f32 %v2585_v0, %v2485_v39  ;;  %v2753_v28 = vadd.f32 %v2585_v0, %v2489_v50  ;;  %v2757_v16 = vadd.f32 %v2585_v0, %v2493_v57  ;;  %v2761_v21 = vadd.f32 %v2585_v0, %v2497_v4 }
 0x1fe   :  { %v2765_v32 = vadd.f32 %v2585_v0, %v2501_v11  ;;  %v2769_v39 = vadd.f32 %v2585_v0, %v2505_v26  ;;  %v2773_v50 = vadd.f32 %v2585_v0, %v2509_v35  ;;  %v2777_v57 = vadd.f32 %v2585_v0, %v2513_v48 }
 0x1ff   :  { %v2781_v4 = vadd.f32 %v2585_v0, %v2517_v59  ;;  %v2785_v11 = vadd.f32 %v2585_v0, %v2521_v8  ;;  %v2789_v26 = vadd.f32 %v2585_v0, %v3256_v22  ;;  %v2793_v35 = vadd.f32 %v2585_v0, %v3258_v33 }
 0x200   :  { %v2797_v48 = vadd.f32 %v2585_v0, %v3260_v17  ;;  %v2801_v59 = vadd.f32 %v2585_v0, %v3262_v18 }
 0x201   :  { %3254 = vst [vmem:[#allocation13_spill] sm:$0xff] %v2781_v4  ;;  %3255 = vst [vmem:[#allocation15_spill] sm:$0xff] %v2785_v11  ;;  %v3264_v4 = vld [vmem:[#allocation7_spill] sm:$0xff]  ;;  %v3265_v11 = vld [vmem:[#allocation8_spill] sm:$0xff] }
 0x202   :  { %3257 = vst [vmem:[#allocation17_spill] sm:$0xff] %v2789_v26  ;;  %3259 = vst [vmem:[#allocation19_spill] sm:$0xff] %v2793_v35  ;;  %v2805_v8 = vadd.f32 %v2585_v0, %v3264_v4  ;;  %v2809_v22 = vadd.f32 %v2585_v0, %v3265_v11  ;;  %v3266_v26 = vld [vmem:[#allocation9_spill] sm:$0xff]  ;;  %v3267_v35 = vld [vmem:[#allocation10_spill] sm:$0xff]  ;;  %v2829_v11 = vadd.f32 %v2585_v0, %v2568_v12  ;;  %v1165_v12 = vmax.f32 %v2601_v62, 0.0 }
 0x203   :  { %3261 = vst [vmem:[#allocation21_spill] sm:$0xff] %v2797_v48  ;;  %3263 = vst [vmem:[#allocation23_spill] sm:$0xff] %v2801_v59  ;;  %v2813_v33 = vadd.f32 %v2585_v0, %v3266_v26  ;;  %v2817_v17 = vadd.f32 %v2585_v0, %v3267_v35  ;;  %v3268_v48 = vld [vmem:[#allocation11_spill] sm:$0xff]  ;;  %v3270_v59 = vld [vmem:[#allocation12_spill] sm:$0xff]  ;;  %v2833_v26 = vadd.f32 %v2585_v0, %v2572_v5  ;;  %v1167_v5 = vmax.f32 %v2609_v6, 0.0 }
 0x204   :  { %v2821_v18 = vadd.f32 %v2585_v0, %v3268_v48  ;;  %v2825_v4 = vadd.f32 %v2585_v0, %v3270_v59  ;;  %3272 = vst [vmem:[#allocation18_spill] sm:$0xff] %v2829_v11  ;;  %v2837_v35 = vadd.f32 %v2585_v0, %v2576_v19  ;;  %v2841_v48 = vadd.f32 %v2585_v0, %v2580_v2 }
 0x205   :  { %3273 = vst [vmem:[#allocation20_spill] sm:$0xff] %v2833_v26  ;;  %v1163_v59 = vmax.f32 %v2593_v55, 0.0  ;;  %v1166_v11 = vmax.f32 %v2605_v54, 0.0  ;;  %v1168_v26 = vmax.f32 %v2613_v61, 0.0  ;;  %v1169_v19 = vmax.f32 %v2617_v13, 0.0  ;;  %1229 = vst.msk [vmem:[%s3167_s4 + $0x18] sm:$0xff] %vm681_vm3, %v1165_v12 }
 0x206   :  { %3269 = vst [vmem:[#allocation14_spill] sm:$0xff] %v2821_v18  ;;  %3271 = vst [vmem:[#allocation16_spill] sm:$0xff] %v2825_v4  ;;  %v1162_v18 = vmax.f32 %v2589_v42, 0.0  ;;  %v1164_v4 = vmax.f32 %v2597_v40, 0.0  ;;  %v1171_v0 = vmax.f32 %v2625_v41, 0.0  ;;  %v1172_v2 = vmax.f32 %v2629_v52, 0.0 }
 0x207   :  { %3274 = vst [vmem:[#allocation22_spill] sm:$0xff] %v2837_v35  ;;  %v1170_v35 = vmax.f32 %v2621_v30, 0.0  ;;  %v1173_v42 = vmax.f32 %v2633_v15, 0.0  ;;  %1227 = vst.msk [vmem:[%s3167_s4 + $0x8] sm:$0xff] %vm681_vm3, %v1163_v59  ;;  %v1174_v55 = vmax.f32 %v2637_v20, 0.0  ;;  %v1175_v40 = vmax.f32 %v2641_v31, 0.0 }
 0x208   :  { %1226 = vst.msk [vmem:[%s3167_s4] sm:$0xff] %vm681_vm3, %v1162_v18  ;;  %1228 = vst.msk [vmem:[%s3167_s4 + $0x10] sm:$0xff] %vm681_vm3, %v1164_v4  ;;  %v1176_v62 = vmax.f32 %v2645_v38, 0.0  ;;  %v1177_v54 = vmax.f32 %v2649_v49, 0.0  ;;  %v1178_v6 = vmax.f32 %v2653_v56, 0.0  ;;  %v1179_v61 = vmax.f32 %v2657_v3, 0.0 }
 0x209   :  { %1230 = vst.msk [vmem:[%s3167_s4 + $0x20] sm:$0xff] %vm681_vm3, %v1166_v11  ;;  %1231 = vst.msk [vmem:[%s3167_s4 + $0x28] sm:$0xff] %vm681_vm3, %v1167_v5  ;;  %v1180_v13 = vmax.f32 %v2661_v10, 0.0  ;;  %v1181_v30 = vmax.f32 %v2665_v25, 0.0  ;;  %v1182_v41 = vmax.f32 %v2669_v34, 0.0  ;;  %v1183_v52 = vmax.f32 %v2673_v47, 0.0 }
 0x20a   :  { %1232 = vst.msk [vmem:[%s3167_s4 + $0x30] sm:$0xff] %vm681_vm3, %v1168_v26  ;;  %1233 = vst.msk [vmem:[%s3167_s4 + $0x38] sm:$0xff] %vm681_vm3, %v1169_v19  ;;  %v1184_v15 = vmax.f32 %v2677_v58, 0.0  ;;  %v1185_v20 = vmax.f32 %v2681_v7, 0.0  ;;  %v1186_v31 = vmax.f32 %v2685_v14, 0.0  ;;  %v1187_v38 = vmax.f32 %v2689_v37, 0.0 }
 0x20b   :  { %1234 = vst.msk [vmem:[%s3167_s4 + $0x40] sm:$0xff] %vm681_vm3, %v1170_v35  ;;  %1235 = vst.msk [vmem:[%s3167_s4 + $0x48] sm:$0xff] %vm681_vm3, %v1171_v0  ;;  %v1188_v49 = vmax.f32 %v2693_v24, 0.0  ;;  %v1189_v56 = vmax.f32 %v2697_v63, 0.0  ;;  %v1190_v3 = vmax.f32 %v2701_v53, 0.0  ;;  %v1191_v10 = vmax.f32 %v2705_v51, 0.0 }
 0x20c   :  { %1236 = vst.msk [vmem:[%s3167_s4 + $0x50] sm:$0xff] %vm681_vm3, %v1172_v2  ;;  %1237 = vst.msk [vmem:[%s3167_s4 + $0x58] sm:$0xff] %vm681_vm3, %v1173_v42  ;;  %v1192_v25 = vmax.f32 %v2709_v44, 0.0  ;;  %v1193_v34 = vmax.f32 %v2713_v43, 0.0  ;;  %v1194_v47 = vmax.f32 %v2717_v9, 0.0  ;;  %v1195_v58 = vmax.f32 %v2721_v36, 0.0 }
 0x20d   :  { %1238 = vst.msk [vmem:[%s3167_s4 + $0x60] sm:$0xff] %vm681_vm3, %v1174_v55  ;;  %1239 = vst.msk [vmem:[%s3167_s4 + $0x68] sm:$0xff] %vm681_vm3, %v1175_v40  ;;  %v1196_v7 = vmax.f32 %v2725_v27, 0.0  ;;  %v1197_v14 = vmax.f32 %v2729_v23, 0.0  ;;  %v1198_v37 = vmax.f32 %v2733_v29, 0.0  ;;  %v1199_v24 = vmax.f32 %v2737_v1, 0.0 }
 0x20e   :  { %1240 = vst.msk [vmem:[%s3167_s4 + $0x70] sm:$0xff] %vm681_vm3, %v1176_v62  ;;  %1241 = vst.msk [vmem:[%s3167_s4 + $0x78] sm:$0xff] %vm681_vm3, %v1177_v54  ;;  %v1200_v63 = vmax.f32 %v2741_v46, 0.0  ;;  %v1201_v53 = vmax.f32 %v2745_v60, 0.0  ;;  %v1202_v51 = vmax.f32 %v2749_v45, 0.0  ;;  %v1203_v44 = vmax.f32 %v2753_v28, 0.0 }
 0x20f   :  { %1242 = vst.msk [vmem:[%s3167_s4 + $0x80] sm:$0xff] %vm681_vm3, %v1178_v6  ;;  %1243 = vst.msk [vmem:[%s3167_s4 + $0x88] sm:$0xff] %vm681_vm3, %v1179_v61  ;;  %v1204_v43 = vmax.f32 %v2757_v16, 0.0  ;;  %v1205_v9 = vmax.f32 %v2761_v21, 0.0  ;;  %v1206_v36 = vmax.f32 %v2765_v32, 0.0  ;;  %v1207_v27 = vmax.f32 %v2769_v39, 0.0 }
 0x210   :  { %1244 = vst.msk [vmem:[%s3167_s4 + $0x90] sm:$0xff] %vm681_vm3, %v1180_v13  ;;  %1245 = vst.msk [vmem:[%s3167_s4 + $0x98] sm:$0xff] %vm681_vm3, %v1181_v30  ;;  %v1208_v23 = vmax.f32 %v2773_v50, 0.0  ;;  %v1209_v29 = vmax.f32 %v2777_v57, 0.0  ;;  %v3275_v1 = vld [vmem:[#allocation13_spill] sm:$0xff]  ;;  %v3276_v60 = vld [vmem:[#allocation15_spill] sm:$0xff] }
 0x211   :  { %1246 = vst.msk [vmem:[%s3167_s4 + $0xa0] sm:$0xff] %vm681_vm3, %v1182_v41  ;;  %1247 = vst.msk [vmem:[%s3167_s4 + $0xa8] sm:$0xff] %vm681_vm3, %v1183_v52  ;;  %v1210_v46 = vmax.f32 %v3275_v1, 0.0  ;;  %v1211_v45 = vmax.f32 %v3276_v60, 0.0  ;;  %v3277_v28 = vld [vmem:[#allocation17_spill] sm:$0xff]  ;;  %v3278_v21 = vld [vmem:[#allocation19_spill] sm:$0xff] }
 0x212   :  { %1248 = vst.msk [vmem:[%s3167_s4 + $0xb0] sm:$0xff] %vm681_vm3, %v1184_v15  ;;  %1249 = vst.msk [vmem:[%s3167_s4 + $0xb8] sm:$0xff] %vm681_vm3, %v1185_v20  ;;  %v1212_v16 = vmax.f32 %v3277_v28, 0.0  ;;  %v1213_v32 = vmax.f32 %v3278_v21, 0.0  ;;  %v3279_v39 = vld [vmem:[#allocation21_spill] sm:$0xff]  ;;  %v3280_v57 = vld [vmem:[#allocation23_spill] sm:$0xff] }
 0x213   :  { %1250 = vst.msk [vmem:[%s3167_s4 + $0xc0] sm:$0xff] %vm681_vm3, %v1186_v31  ;;  %1251 = vst.msk [vmem:[%s3167_s4 + $0xc8] sm:$0xff] %vm681_vm3, %v1187_v38  ;;  %v1214_v50 = vmax.f32 %v3279_v39, 0.0  ;;  %v1215_v18 = vmax.f32 %v3280_v57, 0.0  ;;  %v1216_v4 = vmax.f32 %v2805_v8, 0.0  ;;  %v1217_v11 = vmax.f32 %v2809_v22, 0.0 }
 0x214   :  { %1252 = vst.msk [vmem:[%s3167_s4 + $0xd0] sm:$0xff] %vm681_vm3, %v1188_v49  ;;  %1253 = vst.msk [vmem:[%s3167_s4 + $0xd8] sm:$0xff] %vm681_vm3, %v1189_v56  ;;  %v1218_v8 = vmax.f32 %v2813_v33, 0.0  ;;  %v1219_v22 = vmax.f32 %v2817_v17, 0.0  ;;  %v3281_v26 = vld [vmem:[#allocation14_spill] sm:$0xff]  ;;  %v3282_v59 = vld [vmem:[#allocation16_spill] sm:$0xff] }
 0x215   :  { %1254 = vst.msk [vmem:[%s3167_s4 + $0xe0] sm:$0xff] %vm681_vm3, %v1190_v3  ;;  %1255 = vst.msk [vmem:[%s3167_s4 + $0xe8] sm:$0xff] %vm681_vm3, %v1191_v10  ;;  %v1220_v35 = vmax.f32 %v3281_v26, 0.0  ;;  %v1221_v12 = vmax.f32 %v3282_v59, 0.0  ;;  %v3283_v33 = vld [vmem:[#allocation18_spill] sm:$0xff]  ;;  %v3284_v5 = vld [vmem:[#allocation20_spill] sm:$0xff] }
 0x216   :  { %1256 = vst.msk [vmem:[%s3167_s4 + $0xf0] sm:$0xff] %vm681_vm3, %v1192_v25  ;;  %1257 = vst.msk [vmem:[%s3167_s4 + $0xf8] sm:$0xff] %vm681_vm3, %v1193_v34  ;;  %v1222_v17 = vmax.f32 %v3283_v33, 0.0  ;;  %v1223_v19 = vmax.f32 %v3284_v5, 0.0  ;;  %v3285_v0 = vld [vmem:[#allocation22_spill] sm:$0xff]  ;;  %v1225_v42 = vmax.f32 %v2841_v48, 0.0 }
 0x217   :  { %1258 = vst.msk [vmem:[%s3167_s4 + $0x100] sm:$0xff] %vm681_vm3, %v1194_v47  ;;  %1259 = vst.msk [vmem:[%s3167_s4 + $0x108] sm:$0xff] %vm681_vm3, %v1195_v58  ;;  %v1224_v2 = vmax.f32 %v3285_v0, 0.0 }
 0x218   :  { %1260 = vst.msk [vmem:[%s3167_s4 + $0x110] sm:$0xff] %vm681_vm3, %v1196_v7  ;;  %1261 = vst.msk [vmem:[%s3167_s4 + $0x118] sm:$0xff] %vm681_vm3, %v1197_v14 }
 0x219   :  { %1262 = vst.msk [vmem:[%s3167_s4 + $0x120] sm:$0xff] %vm681_vm3, %v1198_v37  ;;  %1263 = vst.msk [vmem:[%s3167_s4 + $0x128] sm:$0xff] %vm681_vm3, %v1199_v24 }
 0x21a   :  { %1264 = vst.msk [vmem:[%s3167_s4 + $0x130] sm:$0xff] %vm681_vm3, %v1200_v63  ;;  %1265 = vst.msk [vmem:[%s3167_s4 + $0x138] sm:$0xff] %vm681_vm3, %v1201_v53 }
 0x21b   :  { %1266 = vst.msk [vmem:[%s3167_s4 + $0x140] sm:$0xff] %vm681_vm3, %v1202_v51  ;;  %1267 = vst.msk [vmem:[%s3167_s4 + $0x148] sm:$0xff] %vm681_vm3, %v1203_v44 }
 0x21c   :  { %1268 = vst.msk [vmem:[%s3167_s4 + $0x150] sm:$0xff] %vm681_vm3, %v1204_v43  ;;  %1269 = vst.msk [vmem:[%s3167_s4 + $0x158] sm:$0xff] %vm681_vm3, %v1205_v9 }
 0x21d   :  { %1270 = vst.msk [vmem:[%s3167_s4 + $0x160] sm:$0xff] %vm681_vm3, %v1206_v36  ;;  %1271 = vst.msk [vmem:[%s3167_s4 + $0x168] sm:$0xff] %vm681_vm3, %v1207_v27 }
 0x21e   :  { %1272 = vst.msk [vmem:[%s3167_s4 + $0x170] sm:$0xff] %vm681_vm3, %v1208_v23  ;;  %1273 = vst.msk [vmem:[%s3167_s4 + $0x178] sm:$0xff] %vm681_vm3, %v1209_v29 }
 0x21f   :  { %1274 = vst.msk [vmem:[%s3167_s4 + $0x180] sm:$0xff] %vm681_vm3, %v1210_v46  ;;  %1275 = vst.msk [vmem:[%s3167_s4 + $0x188] sm:$0xff] %vm681_vm3, %v1211_v45 }
 0x220   :  { %1276 = vst.msk [vmem:[%s3167_s4 + $0x190] sm:$0xff] %vm681_vm3, %v1212_v16  ;;  %1277 = vst.msk [vmem:[%s3167_s4 + $0x198] sm:$0xff] %vm681_vm3, %v1213_v32 }
 0x221   :  { %1278 = vst.msk [vmem:[%s3167_s4 + $0x1a0] sm:$0xff] %vm681_vm3, %v1214_v50  ;;  %1279 = vst.msk [vmem:[%s3167_s4 + $0x1a8] sm:$0xff] %vm681_vm3, %v1215_v18 }
 0x222   :  { %1280 = vst.msk [vmem:[%s3167_s4 + $0x1b0] sm:$0xff] %vm681_vm3, %v1216_v4  ;;  %1281 = vst.msk [vmem:[%s3167_s4 + $0x1b8] sm:$0xff] %vm681_vm3, %v1217_v11 }
 0x223   :  { %1282 = vst.msk [vmem:[%s3167_s4 + $0x1c0] sm:$0xff] %vm681_vm3, %v1218_v8  ;;  %1283 = vst.msk [vmem:[%s3167_s4 + $0x1c8] sm:$0xff] %vm681_vm3, %v1219_v22 }
 0x224   :  { %1284 = vst.msk [vmem:[%s3167_s4 + $0x1d0] sm:$0xff] %vm681_vm3, %v1220_v35  ;;  %1285 = vst.msk [vmem:[%s3167_s4 + $0x1d8] sm:$0xff] %vm681_vm3, %v1221_v12 }
 0x225   :  { %1286 = vst.msk [vmem:[%s3167_s4 + $0x1e0] sm:$0xff] %vm681_vm3, %v1222_v17  ;;  %1287 = vst.msk [vmem:[%s3167_s4 + $0x1e8] sm:$0xff] %vm681_vm3, %v1223_v19 }
 0x226   :  { %1288 = vst.msk [vmem:[%s3167_s4 + $0x1f0] sm:$0xff] %vm681_vm3, %v1224_v2  ;;  %1289 = vst.msk [vmem:[%s3167_s4 + $0x1f8] sm:$0xff] %vm681_vm3, %v1225_v42 }

// kernel: resnet18_forward.7
= control target key start
LH: loop header
LB: loop body
LE: loop exit
PB: predicated region body
PF: predicated region fallthrough
CT: control target
= control target key end

     0   :  { %vm172_vm0 = vcmask 523264   ;;  %v11181_v0 = vmov 0.0   ;;  %vm8366_vm1 = vmmov 0   ;;  %vm2880_vm2 = vcmask 521216   ;;  %s11172_s2 = inlined_call_operand.vmem [shape: bf16[9,64,64], index: 2, kind: input, shape index: {}]   ;;  %s11173_s0 = inlined_call_operand.vmem [shape: f32[222,64], index: 0, kind: input, shape index: {}]   ;;  %s11174_s1 = inlined_call_operand.vmem [shape: f32[200,1], index: 1, kind: input, shape index: {}]   ;;  %s11175_s5 = inlined_call_operand.vmem [shape: bf16[9,64,64], index: 5, kind: input, shape index: {}]   ;;  %s11176_s3 = inlined_call_operand.vmem [shape: f32[1,64], index: 3, kind: input, shape index: {}]   ;;  %s11177_s4 = inlined_call_operand.vmem [shape: f32[1,64], index: 4, kind: input, shape index: {}]   ;;  %s11178_s6 = inlined_call_operand.vmem [shape: f32[1,64], index: 6, kind: input, shape index: {}]   ;;  %s11179_s7 = inlined_call_operand.vmem [shape: f32[1,64], index: 7, kind: input, shape index: {}]   ;;  %s11180_s8 = inlined_call_operand.vmem [shape: f32[200,64], index: 8, kind: output, shape index: {}]  }
   0x1   :  { %6372 = vmatprep.subr.bf16.mxu0 %v11181_v0  ;;  %v8289_v1 = vld [vmem:[%s11172_s2 + $0x20] sm:$0xff]   ;;  %6380 = vmatprep.mubr.msk.bf16.mxu0 %vm8366_vm1, %v11181_v0  ;;  %2853 = vst.msk [vmem:[#allocation2] sm:$0xff] %vm172_vm0, %v11181_v0  ;;  %2854 = vst.msk [vmem:[#allocation2 + $0x8] sm:$0xff] %vm172_vm0, %v11181_v0  ;;  %v8290_v2 = vld [vmem:[%s11172_s2 + $0x28] sm:$0xff]  }
   0x2   :  { %2855 = vst.msk [vmem:[#allocation2 + $0x10] sm:$0xff] %vm172_vm0, %v11181_v0  ;;  %2856 = vst.msk [vmem:[#allocation2 + $0x18] sm:$0xff] %vm172_vm0, %v11181_v0  ;;  %6912 = vmatprep.subr.bf16.mxu1 %v11181_v0  ;;  %6920 = vmatprep.mubr.msk.bf16.mxu1 %vm8366_vm1, %v11181_v0  ;;  %v8291_v3 = vld [vmem:[%s11172_s2 + $0x30] sm:$0xff]   ;;  %v8292_v4 = vld [vmem:[%s11172_s2 + $0x38] sm:$0xff]  }
   0x3   :  { %2857 = vst.msk [vmem:[#allocation2 + $0x20] sm:$0xff] %vm172_vm0, %v11181_v0  ;;  %2858 = vst.msk [vmem:[#allocation2 + $0x28] sm:$0xff] %vm172_vm0, %v11181_v0  ;;  %6373 = vmatpush3.bf16.msra.mxu0 %v8289_v1  ;;  %v101_v5 = vld [vmem:[%s11173_s0 + $0x1] sm:$0xff]  ;;  %v102_v6 = vld [vmem:[%s11173_s0 + $0x9] sm:$0xff] }
   0x4   :  { %2859 = vst.msk [vmem:[#allocation2 + $0x30] sm:$0xff] %vm172_vm0, %v11181_v0  ;;  %2860 = vst.msk [vmem:[#allocation2 + $0x38] sm:$0xff] %vm172_vm0, %v11181_v0  ;;  %6374 = vmatprep.subr.bf16.mxu0 %v11181_v0  ;;  %v126_v7 = vpack.c.bf16 %v102_v6, %v101_v5  ;;  %v8293_v8 = vld [vmem:[%s11172_s2] sm:$0xff]   ;;  %v103_v9 = vld [vmem:[%s11173_s0 + $0x11] sm:$0xff] }
   0x5   :  { %2861 = vst.msk [vmem:[#allocation2 + $0x40] sm:$0xff] %vm172_vm0, %v11181_v0  ;;  %2862 = vst.msk [vmem:[#allocation2 + $0x48] sm:$0xff] %vm172_vm0, %v11181_v0  ;;  %v104_v10 = vld [vmem:[%s11173_s0 + $0x19] sm:$0xff]  ;;  %v8294_v11 = vld [vmem:[%s11172_s2 + $0x8] sm:$0xff]  }
   0x6   :  { %2863 = vst.msk [vmem:[#allocation2 + $0x50] sm:$0xff] %vm172_vm0, %v11181_v0  ;;  %2864 = vst.msk [vmem:[#allocation2 + $0x58] sm:$0xff] %vm172_vm0, %v11181_v0  ;;  %v127_v12 = vpack.c.bf16 %v104_v10, %v103_v9  ;;  %v8295_v13 = vld [vmem:[%s11172_s2 + $0x10] sm:$0xff]   ;;  %v105_v14 = vld [vmem:[%s11173_s0 + $0x21] sm:$0xff] }
   0x7   :  { %2865 = vst.msk [vmem:[#allocation2 + $0x60] sm:$0xff] %vm172_vm0, %v11181_v0  ;;  %2866 = vst.msk [vmem:[#allocation2 + $0x68] sm:$0xff] %vm172_vm0, %v11181_v0  ;;  %6375 = vmatpush3.bf16.msra.mxu0 %v8290_v2  ;;  %v106_v15 = vld [vmem:[%s11173_s0 + $0x29] sm:$0xff]  ;;  %v8296_v16 = vld [vmem:[%s11172_s2 + $0x18] sm:$0xff]  }
   0x8   :  { %2867 = vst.msk [vmem:[#allocation2 + $0x70] sm:$0xff] %vm172_vm0, %v11181_v0  ;;  %2868 = vst.msk [vmem:[#allocation2 + $0x78] sm:$0xff] %vm172_vm0, %v11181_v0  ;;  %6376 = vmatprep.subr.bf16.mxu0 %v11181_v0  ;;  %v128_v17 = vpack.c.bf16 %v106_v15, %v105_v14  ;;  %v107_v18 = vld [vmem:[%s11173_s0 + $0x31] sm:$0xff]  ;;  %v108_v19 = vld [vmem:[%s11173_s0 + $0x39] sm:$0xff] }
   0x9   :  { %2869 = vst.msk [vmem:[#allocation2 + $0x80] sm:$0xff] %vm172_vm0, %v11181_v0  ;;  %2870 = vst.msk [vmem:[#allocation2 + $0x88] sm:$0xff] %vm172_vm0, %v11181_v0  ;;  %v129_v20 = vpack.c.bf16 %v108_v19, %v107_v18  ;;  %v109_v21 = vld [vmem:[%s11173_s0 + $0x41] sm:$0xff]  ;;  %v110_v22 = vld [vmem:[%s11173_s0 + $0x49] sm:$0xff] }
   0xa   :  { %2871 = vst.msk [vmem:[#allocation2 + $0x90] sm:$0xff] %vm172_vm0, %v11181_v0  ;;  %2872 = vst.msk [vmem:[#allocation2 + $0x98] sm:$0xff] %vm172_vm0, %v11181_v0  ;;  %v130_v23 = vpack.c.bf16 %v110_v22, %v109_v21  ;;  %v111_v24 = vld [vmem:[%s11173_s0 + $0x51] sm:$0xff]  ;;  %v112_v25 = vld [vmem:[%s11173_s0 + $0x59] sm:$0xff] }
   0xb   :  { %2873 = vst.msk [vmem:[#allocation2 + $0xa0] sm:$0xff] %vm172_vm0, %v11181_v0  ;;  %2874 = vst.msk [vmem:[#allocation2 + $0xa8] sm:$0xff] %vm172_vm0, %v11181_v0  ;;  %6377 = vmatpush3.bf16.msra.mxu0 %v8291_v3  ;;  %v131_v26 = vpack.c.bf16 %v112_v25, %v111_v24  ;;  %v113_v27 = vld [vmem:[%s11173_s0 + $0x61] sm:$0xff]  ;;  %v114_v28 = vld [vmem:[%s11173_s0 + $0x69] sm:$0xff] }
   0xc   :  { %2875 = vst.msk [vmem:[#allocation2 + $0xb0] sm:$0xff] %vm172_vm0, %v11181_v0  ;;  %2876 = vst.msk [vmem:[#allocation2 + $0xb8] sm:$0xff] %vm172_vm0, %v11181_v0  ;;  %6378 = vmatprep.subr.bf16.mxu0 %v11181_v0  ;;  %v132_v29 = vpack.c.bf16 %v114_v28, %v113_v27  ;;  %v115_v30 = vld [vmem:[%s11173_s0 + $0x71] sm:$0xff]  ;;  %v116_v31 = vld [vmem:[%s11173_s0 + $0x79] sm:$0xff] }
   0xd   :  { %2877 = vst.msk [vmem:[#allocation2 + $0xc0] sm:$0xff] %vm172_vm0, %v11181_v0  ;;  %2878 = vst.msk [vmem:[#allocation2 + $0xc8] sm:$0xff] %vm172_vm0, %v11181_v0  ;;  %v133_v32 = vpack.c.bf16 %v116_v31, %v115_v30  ;;  %v117_v33 = vld [vmem:[%s11173_s0 + $0x81] sm:$0xff]  ;;  %v118_v34 = vld [vmem:[%s11173_s0 + $0x89] sm:$0xff] }
   0xe   :  { %2879 = vst.msk [vmem:[#allocation2 + $0xd0] sm:$0xff] %vm172_vm0, %v11181_v0  ;;  %v134_v35 = vpack.c.bf16 %v118_v34, %v117_v33  ;;  %v119_v36 = vld [vmem:[%s11173_s0 + $0x91] sm:$0xff]  ;;  %v120_v37 = vld [vmem:[%s11173_s0 + $0x99] sm:$0xff]  ;;  %v121_v39 = vld [vmem:[%s11173_s0 + $0xa1] sm:$0xff] }
   0xf   :  { %6379 = vmatpush3.bf16.msra.mxu0 %v8292_v4  ;;  %v135_v38 = vpack.c.bf16 %v120_v37, %v119_v36  ;;  %v122_v40 = vld [vmem:[%s11173_s0 + $0xa9] sm:$0xff]  ;;  %v123_v42 = vld [vmem:[%s11173_s0 + $0xb1] sm:$0xff]  ;;  %v124_v43 = vld [vmem:[%s11173_s0 + $0xb9] sm:$0xff] }
  0x10   :  { %6432 = vmatprep.subr.bf16.mxu0 %v11181_v0  ;;  %v136_v41 = vpack.c.bf16 %v122_v40, %v121_v39  ;;  %v137_v44 = vpack.c.bf16 %v124_v43, %v123_v42  ;;  %v125_v45 = vld [vmem:[%s11173_s0 + $0xc1] sm:$0xff]  ;;  %v57_v51 = vld [vmem:[%s11173_s0 + $0x10] sm:$0xff]  ;;  %v58_v52 = vld [vmem:[%s11173_s0 + $0x18] sm:$0xff] }
  0x11   :  { %v138_v46 = vpack.c.bf16 %v125_v45, %v125_v45  ;;  %v55_v47 = vld [vmem:[%s11173_s0] sm:$0xff]  ;;  %v56_v48 = vld [vmem:[%s11173_s0 + $0x8] sm:$0xff]  ;;  %v81_v54 = vpack.c.bf16 %v58_v52, %v57_v51  ;;  %v8299_v55 = vld [vmem:[%s11172_s2 + $0x50] sm:$0xff]  }
  0x12   :  { %6381 = vmatmul.mubr.msk.bf16.vlgmr.msra.gmra.mrb[0].mxu0 %vm172_vm0, %v126_v7  ;;  %v80_v49 = vpack.c.bf16 %v56_v48, %v55_v47  ;;  %v8297_v50 = vld [vmem:[%s11172_s2 + $0x40] sm:$0xff]   ;;  %v8298_v53 = vld [vmem:[%s11172_s2 + $0x48] sm:$0xff]   ;;  %v8300_v58 = vld [vmem:[%s11172_s2 + $0x58] sm:$0xff]  }
  0x13   :  { %6433 = vmatpush3.bf16.msra.mxu0 %v8293_v8  ;;  %6384 = vmatprep.mubr.msk.bf16.mxu0 %vm8366_vm1, %v11181_v0  ;;  %v59_v56 = vld [vmem:[%s11173_s0 + $0x20] sm:$0xff]  ;;  %v60_v57 = vld [vmem:[%s11173_s0 + $0x28] sm:$0xff]  ;;  %v61_v60 = vld [vmem:[%s11173_s0 + $0x30] sm:$0xff] }
  0x14   :  { %6434 = vmatprep.subr.bf16.mxu0 %v11181_v0  ;;  %v82_v59 = vpack.c.bf16 %v60_v57, %v59_v56  ;;  %v62_v61 = vld [vmem:[%s11173_s0 + $0x38] sm:$0xff]  ;;  %v63_v63 = vld [vmem:[%s11173_s0 + $0x40] sm:$0xff]  ;;  %v64_v1 = vld [vmem:[%s11173_s0 + $0x48] sm:$0xff] }
  0x15   :  { %v83_v62 = vpack.c.bf16 %v62_v61, %v61_v60  ;;  %v84_v2 = vpack.c.bf16 %v64_v1, %v63_v63  ;;  %v65_v3 = vld [vmem:[%s11173_s0 + $0x50] sm:$0xff]  ;;  %v66_v4 = vld [vmem:[%s11173_s0 + $0x58] sm:$0xff]  ;;  %v67_v6 = vld [vmem:[%s11173_s0 + $0x60] sm:$0xff] }
  0x16   :  { %v85_v5 = vpack.c.bf16 %v66_v4, %v65_v3  ;;  %v68_v7 = vld [vmem:[%s11173_s0 + $0x68] sm:$0xff]  ;;  %v69_v9 = vld [vmem:[%s11173_s0 + $0x70] sm:$0xff]  ;;  %v70_v10 = vld [vmem:[%s11173_s0 + $0x78] sm:$0xff] }
  0x17   :  { %6435 = vmatpush3.bf16.msra.mxu0 %v8294_v11  ;;  %v86_v8 = vpack.c.bf16 %v68_v7, %v67_v6  ;;  %v87_v11 = vpack.c.bf16 %v70_v10, %v69_v9  ;;  %v73_v15 = vld [vmem:[%s11173_s0 + $0x90] sm:$0xff]  ;;  %v75_v18 = vld [vmem:[%s11173_s0 + $0xa0] sm:$0xff]  ;;  %v76_v19 = vld [vmem:[%s11173_s0 + $0xa8] sm:$0xff] }
  0x18   :  { %6436 = vmatprep.subr.bf16.mxu0 %v11181_v0  ;;  %v77_v21 = vld [vmem:[%s11173_s0 + $0xb0] sm:$0xff]  ;;  %v78_v22 = vld [vmem:[%s11173_s0 + $0xb8] sm:$0xff]  ;;  %v79_v24 = vld [vmem:[%s11173_s0 + $0xc0] sm:$0xff] }
  0x19   :  { %v92_v25 = vpack.c.bf16 %v79_v24, %v79_v24  ;;  %v8755_v27 = vld [vmem:[%s11173_s0 + $0xa] sm:$0xff]  ;;  %v8767_v30 = vld [vmem:[%s11173_s0 + $0x12] sm:$0xff]  ;;  %v8772_v31 = vld [vmem:[%s11173_s0 + $0x1a] sm:$0xff] }
  0x1a   :  { %6385 = vmatmul.mubr.msk.bf16.gmra.mrb[4].mxu0 %vm172_vm0, %v127_v12  ;;  %v71_v12 = vld [vmem:[%s11173_s0 + $0x80] sm:$0xff]  ;;  %v573_v33 = vpack.c.bf16 %v8772_v31, %v8767_v30  ;;  %v8303_v34 = vld [vmem:[%s11172_s2 + $0x70] sm:$0xff]   ;;  %v8304_v37 = vld [vmem:[%s11172_s2 + $0x78] sm:$0xff]  }
  0x1b   :  { %6388 = vmatprep.mubr.msk.bf16.mxu0 %vm8366_vm1, %v11181_v0  ;;  %6437 = vmatpush3.bf16.msra.mxu0 %v8295_v13  ;;  %v72_v13 = vld [vmem:[%s11173_s0 + $0x88] sm:$0xff]  ;;  %v8810_v39 = vld [vmem:[%s11173_s0 + $0x32] sm:$0xff]  ;;  %v8815_v40 = vld [vmem:[%s11173_s0 + $0x3a] sm:$0xff] }
  0x1c   :  { %6438 = vmatprep.subr.bf16.mxu0 %v11181_v0  ;;  %v88_v14 = vpack.c.bf16 %v72_v13, %v71_v12  ;;  %v8795_v36 = vld [vmem:[%s11173_s0 + $0x2a] sm:$0xff]  ;;  %v8825_v42 = vld [vmem:[%s11173_s0 + $0x42] sm:$0xff]  ;;  %v8840_v45 = vld [vmem:[%s11173_s0 + $0x52] sm:$0xff] }
  0x1d   :  { %v8830_v43 = vld [vmem:[%s11173_s0 + $0x4a] sm:$0xff]  ;;  %v8855_v48 = vld [vmem:[%s11173_s0 + $0x62] sm:$0xff]  ;;  %v561_v51 = vld [vmem:[%s11173_s0 + $0x72] sm:$0xff]  ;;  %v846_v12 = vpack.c.bf16 %v8825_v42, %v8815_v40 }
  0x1e   :  { %v8873_v52 = vld [vmem:[%s11173_s0 + $0x7a] sm:$0xff]  ;;  %v565_v57 = vld [vmem:[%s11173_s0 + $0x92] sm:$0xff]  ;;  %v567_v60 = vld [vmem:[%s11173_s0 + $0xa2] sm:$0xff]  ;;  %v847_v13 = vpack.c.bf16 %v8840_v45, %v8830_v43 }
  0x1f   :  { %6439 = vmatpush3.bf16.msra.mxu0 %v8296_v16  ;;  %v74_v16 = vld [vmem:[%s11173_s0 + $0x98] sm:$0xff]  ;;  %v568_v61 = vld [vmem:[%s11173_s0 + $0xaa] sm:$0xff]  ;;  %v571_v3 = vld [vmem:[%s11173_s0 + $0xc2] sm:$0xff] }
  0x20   :  { %6492 = vmatprep.subr.bf16.mxu0 %v11181_v0  ;;  %v569_v63 = vld [vmem:[%s11173_s0 + $0xb2] sm:$0xff]  ;;  %v570_v1 = vld [vmem:[%s11173_s0 + $0xba] sm:$0xff]  ;;  %v584_v4 = vpack.c.bf16 %v571_v3, %v571_v3  ;;  %v8306_v7 = vld [vmem:[%s11172_s2 + $0x88] sm:$0xff]  }
  0x21   :  { %v8305_v6 = vld [vmem:[%s11172_s2 + $0x80] sm:$0xff]   ;;  %v8307_v9 = vld [vmem:[%s11172_s2 + $0x90] sm:$0xff]   ;;  %v8308_v10 = vld [vmem:[%s11172_s2 + $0x98] sm:$0xff]  }
  0x22   :  { %6389 = vmatmul.mubr.msk.bf16.gmra.mrb[8].mxu0 %vm172_vm0, %v128_v17  ;;  %v89_v17 = vpack.c.bf16 %v74_v16, %v73_v15  ;;  %v1090_v24 = vld [vmem:[%s11173_s0 + $0x13] sm:$0xff] }
  0x23   :  { %6392 = vmatprep.mubr.msk.bf16.mxu0 %vm8366_vm1, %v11181_v0 }
  0x2a   :  { %6393 = vmatmul.mubr.msk.bf16.gmra.mrb[12].mxu0 %vm172_vm0, %v129_v20  ;;  %v90_v20 = vpack.c.bf16 %v76_v19, %v75_v18  ;;  %v853_v19 = vpack.c.bf16 %v569_v63, %v568_v61 }
  0x2b   :  { %6396 = vmatprep.mubr.msk.bf16.mxu0 %vm8366_vm1, %v11181_v0 }
  0x32   :  { %6397 = vmatmul.mubr.msk.bf16.gmra.mrb[16].mxu0 %vm172_vm0, %v130_v23  ;;  %v91_v23 = vpack.c.bf16 %v78_v22, %v77_v21  ;;  %v842_v21 = vld [vmem:[%s11173_s0 + $0xca] sm:$0xff] }
  0x33   :  { %6400 = vmatprep.mubr.msk.bf16.mxu0 %vm8366_vm1, %v11181_v0  ;;  %v855_v22 = vpack.c.bf16 %v842_v21, %v842_v21  ;;  %v9214_v21 = vld [vmem:[%s11173_s0 + $0x5c] sm:$0xff] }
  0x3a   :  { %6401 = vmatmul.mubr.msk.bf16.gmra.mrb[20].mxu0 %vm172_vm0, %v131_v26  ;;  %v547_v26 = vld [vmem:[%s11173_s0 + $0x2] sm:$0xff] }
  0x3b   :  { %6404 = vmatprep.mubr.msk.bf16.mxu0 %vm8366_vm1, %v11181_v0  ;;  %v572_v28 = vpack.c.bf16 %v8755_v27, %v547_v26  ;;  %v8309_v26 = vld [vmem:[%s11172_s2 + $0xa0] sm:$0xff]  }
  0x42   :  { %6405 = vmatmul.mubr.msk.bf16.gmra.mrb[24].mxu0 %vm172_vm0, %v132_v29  ;;  %v8301_v29 = vld [vmem:[%s11172_s2 + $0x60] sm:$0xff]  }
  0x43   :  { %6408 = vmatprep.mubr.msk.bf16.mxu0 %vm8366_vm1, %v11181_v0 }
  0x4a   :  { %6409 = vmatmul.mubr.msk.bf16.gmra.mrb[28].mxu0 %vm172_vm0, %v133_v32  ;;  %v8302_v32 = vld [vmem:[%s11172_s2 + $0x68] sm:$0xff]  }
  0x4b   :  { %6412 = vmatprep.mubr.msk.bf16.mxu0 %vm8366_vm1, %v11181_v0 }
  0x52   :  { %6413 = vmatmul.mubr.msk.bf16.gmra.mrb[32].mxu0 %vm172_vm0, %v134_v35  ;;  %v8790_v35 = vld [vmem:[%s11173_s0 + $0x22] sm:$0xff] }
  0x53   :  { %6416 = vmatprep.mubr.msk.bf16.mxu0 %vm8366_vm1, %v11181_v0 }
  0x5a   :  { %6417 = vmatmul.mubr.msk.bf16.gmra.mrb[36].mxu0 %vm172_vm0, %v135_v38  ;;  %v574_v38 = vpack.c.bf16 %v8795_v36, %v8790_v35 }
  0x5b   :  { %6420 = vmatprep.mubr.msk.bf16.mxu0 %vm8366_vm1, %v11181_v0 }
  0x62   :  { %6421 = vmatmul.mubr.msk.bf16.gmra.mrb[40].mxu0 %vm172_vm0, %v136_v41  ;;  %v575_v41 = vpack.c.bf16 %v8815_v40, %v8810_v39  ;;  %v1098_v40 = vld [vmem:[%s11173_s0 + $0x53] sm:$0xff] }
  0x63   :  { %6424 = vmatprep.mubr.msk.bf16.mxu0 %vm8366_vm1, %v11181_v0 }
  0x6a   :  { %6425 = vmatmul.mubr.msk.bf16.gmra.mrb[44].mxu0 %vm172_vm0, %v137_v44  ;;  %v576_v44 = vpack.c.bf16 %v8830_v43, %v8825_v42  ;;  %v1099_v42 = vld [vmem:[%s11173_s0 + $0x5b] sm:$0xff]  ;;  %v1100_v43 = vld [vmem:[%s11173_s0 + $0x63] sm:$0xff] }
  0x6b   :  { %6428 = vmatprep.mubr.msk.bf16.mxu0 %vm8366_vm1, %v11181_v0 }
  0x72   :  { %6429 = vmatmul.mubr.msk.bf16.gmra.mrb[48].mxu0 %vm172_vm0, %v138_v46  ;;  %v8845_v46 = vld [vmem:[%s11173_s0 + $0x5a] sm:$0xff] }
  0x73   :  { %6440 = vmatprep.mubr.msk.bf16.mxu0 %vm8366_vm1, %v11181_v0  ;;  %v577_v47 = vpack.c.bf16 %v8845_v46, %v8840_v45  ;;  %v1101_v45 = vld [vmem:[%s11173_s0 + $0x6b] sm:$0xff] }
  0x7a   :  { %6441 = vmatmul.mubr.msk.bf16.vlgmr.msra.gmra.mrb[0].mxu0 %vm172_vm0, %v80_v49  ;;  %v8860_v49 = vld [vmem:[%s11173_s0 + $0x6a] sm:$0xff] }
  0x7b   :  { %6493 = vmatpush3.bf16.msra.mxu0 %v8297_v50  ;;  %6444 = vmatprep.mubr.msk.bf16.mxu0 %vm8366_vm1, %v11181_v0  ;;  %v578_v50 = vpack.c.bf16 %v8860_v49, %v8855_v48  ;;  %v849_v15 = vpack.c.bf16 %v561_v51, %v8860_v49  ;;  %v1104_v49 = vld [vmem:[%s11173_s0 + $0x83] sm:$0xff] }
  0x7c   :  { %6494 = vmatprep.subr.bf16.mxu0 %v11181_v0 }
  0x7f   :  { %6495 = vmatpush3.bf16.msra.mxu0 %v8298_v53  ;;  %v579_v53 = vpack.c.bf16 %v8873_v52, %v561_v51  ;;  %v1105_v51 = vld [vmem:[%s11173_s0 + $0x8b] sm:$0xff] }
  0x80   :  { %6496 = vmatprep.subr.bf16.mxu0 %v11181_v0 }
  0x82   :  { %6445 = vmatmul.mubr.msk.bf16.gmra.mrb[4].mxu0 %vm172_vm0, %v81_v54  ;;  %v563_v54 = vld [vmem:[%s11173_s0 + $0x82] sm:$0xff] }
  0x83   :  { %6448 = vmatprep.mubr.msk.bf16.mxu0 %vm8366_vm1, %v11181_v0  ;;  %6497 = vmatpush3.bf16.msra.mxu0 %v8299_v55  ;;  %v564_v55 = vld [vmem:[%s11173_s0 + $0x8a] sm:$0xff]  ;;  %v850_v16 = vpack.c.bf16 %v563_v54, %v8873_v52  ;;  %v1106_v52 = vld [vmem:[%s11173_s0 + $0x93] sm:$0xff] }
  0x84   :  { %6498 = vmatprep.subr.bf16.mxu0 %v11181_v0  ;;  %v580_v56 = vpack.c.bf16 %v564_v55, %v563_v54  ;;  %v1107_v54 = vld [vmem:[%s11173_s0 + $0x9b] sm:$0xff] }
  0x87   :  { %6499 = vmatpush3.bf16.msra.mxu0 %v8300_v58  ;;  %v566_v58 = vld [vmem:[%s11173_s0 + $0x9a] sm:$0xff] }
  0x88   :  { %6552 = vmatprep.subr.bf16.mxu0 %v11181_v0  ;;  %v852_v18 = vpack.c.bf16 %v567_v60, %v566_v58 }
  0x8a   :  { %6449 = vmatmul.mubr.msk.bf16.gmra.mrb[8].mxu0 %vm172_vm0, %v82_v59  ;;  %v581_v59 = vpack.c.bf16 %v566_v58, %v565_v57  ;;  %v1110_v58 = vld [vmem:[%s11173_s0 + $0xb3] sm:$0xff] }
  0x8b   :  { %6452 = vmatprep.mubr.msk.bf16.mxu0 %vm8366_vm1, %v11181_v0 }
  0x92   :  { %6453 = vmatmul.mubr.msk.bf16.gmra.mrb[12].mxu0 %vm172_vm0, %v83_v62  ;;  %v582_v62 = vpack.c.bf16 %v568_v61, %v567_v60  ;;  %v1111_v60 = vld [vmem:[%s11173_s0 + $0xbb] sm:$0xff]  ;;  %v1112_v61 = vld [vmem:[%s11173_s0 + $0xc3] sm:$0xff] }
  0x93   :  { %6456 = vmatprep.mubr.msk.bf16.mxu0 %vm8366_vm1, %v11181_v0 }
  0x9a   :  { %6457 = vmatmul.mubr.msk.bf16.gmra.mrb[16].mxu0 %vm172_vm0, %v84_v2  ;;  %v583_v2 = vpack.c.bf16 %v570_v1, %v569_v63  ;;  %v1113_v63 = vld [vmem:[%s11173_s0 + $0xcb] sm:$0xff] }
  0x9b   :  { %6460 = vmatprep.mubr.msk.bf16.mxu0 %vm8366_vm1, %v11181_v0 }
  0xa2   :  { %6461 = vmatmul.mubr.msk.bf16.gmra.mrb[20].mxu0 %vm172_vm0, %v85_v5  ;;  %v843_v5 = vpack.c.bf16 %v8767_v30, %v8755_v27  ;;  %v1091_v27 = vld [vmem:[%s11173_s0 + $0x1b] sm:$0xff] }
  0xa3   :  { %6464 = vmatprep.mubr.msk.bf16.mxu0 %vm8366_vm1, %v11181_v0 }
  0xaa   :  { %6465 = vmatmul.mubr.msk.bf16.gmra.mrb[24].mxu0 %vm172_vm0, %v86_v8  ;;  %v844_v8 = vpack.c.bf16 %v8790_v35, %v8772_v31  ;;  %v8311_v31 = vld [vmem:[%s11172_s2 + $0xb0] sm:$0xff]  }
  0xab   :  { %6468 = vmatprep.mubr.msk.bf16.mxu0 %vm8366_vm1, %v11181_v0 }
  0xb2   :  { %6469 = vmatmul.mubr.msk.bf16.gmra.mrb[28].mxu0 %vm172_vm0, %v87_v11  ;;  %v845_v11 = vpack.c.bf16 %v8810_v39, %v8795_v36  ;;  %v1095_v36 = vld [vmem:[%s11173_s0 + $0x3b] sm:$0xff]  ;;  %v1097_v39 = vld [vmem:[%s11173_s0 + $0x4b] sm:$0xff] }
  0xb3   :  { %6472 = vmatprep.mubr.msk.bf16.mxu0 %vm8366_vm1, %v11181_v0 }
  0xba   :  { %6473 = vmatmul.mubr.msk.bf16.gmra.mrb[32].mxu0 %vm172_vm0, %v88_v14  ;;  %v848_v14 = vpack.c.bf16 %v8855_v48, %v8845_v46  ;;  %v1102_v46 = vld [vmem:[%s11173_s0 + $0x73] sm:$0xff]  ;;  %v1103_v48 = vld [vmem:[%s11173_s0 + $0x7b] sm:$0xff] }
  0xbb   :  { %6476 = vmatprep.mubr.msk.bf16.mxu0 %vm8366_vm1, %v11181_v0 }
  0xc2   :  { %6477 = vmatmul.mubr.msk.bf16.gmra.mrb[36].mxu0 %vm172_vm0, %v89_v17  ;;  %v851_v17 = vpack.c.bf16 %v565_v57, %v564_v55  ;;  %v1108_v55 = vld [vmem:[%s11173_s0 + $0xa3] sm:$0xff]  ;;  %v1109_v57 = vld [vmem:[%s11173_s0 + $0xab] sm:$0xff] }
  0xc3   :  { %6480 = vmatprep.mubr.msk.bf16.mxu0 %vm8366_vm1, %v11181_v0 }
  0xca   :  { %6481 = vmatmul.mubr.msk.bf16.gmra.mrb[40].mxu0 %vm172_vm0, %v90_v20  ;;  %v854_v20 = vpack.c.bf16 %v571_v3, %v570_v1  ;;  %v1126_v1 = vpack.c.bf16 %v1113_v63, %v1113_v63  ;;  %v9129_v3 = vld [vmem:[%s11173_s0 + $0x14] sm:$0xff]  ;;  %v1903_v63 = vld [vmem:[%s11173_s0 + $0x1d] sm:$0xff] }
  0xcb   :  { %6484 = vmatprep.mubr.msk.bf16.mxu0 %vm8366_vm1, %v11181_v0 }
  0xd2   :  { %6485 = vmatmul.mubr.msk.bf16.gmra.mrb[44].mxu0 %vm172_vm0, %v91_v23  ;;  %v1089_v23 = vld [vmem:[%s11173_s0 + $0xb] sm:$0xff] }
  0xd3   :  { %6488 = vmatprep.mubr.msk.bf16.mxu0 %vm8366_vm1, %v11181_v0 }
  0xda   :  { %6489 = vmatmul.mubr.msk.bf16.gmra.mrb[48].mxu0 %vm172_vm0, %v92_v25  ;;  %v1114_v25 = vpack.c.bf16 %v1090_v24, %v1089_v23  ;;  %v9229_v24 = vld [vmem:[%s11173_s0 + $0x6c] sm:$0xff] }
  0xdb   :  { %6500 = vmatprep.mubr.msk.bf16.mxu0 %vm8366_vm1, %v11181_v0 }
  0xe2   :  { %6501 = vmatmul.mubr.msk.bf16.vlgmr.msra.gmra.mrb[0].mxu0 %vm172_vm0, %v572_v28  ;;  %v1092_v28 = vld [vmem:[%s11173_s0 + $0x23] sm:$0xff] }
  0xe3   :  { %6553 = vmatpush3.bf16.msra.mxu0 %v8301_v29  ;;  %6504 = vmatprep.mubr.msk.bf16.mxu0 %vm8366_vm1, %v11181_v0  ;;  %v8310_v29 = vld [vmem:[%s11172_s2 + $0xa8] sm:$0xff]   ;;  %v1115_v30 = vpack.c.bf16 %v1092_v28, %v1091_v27  ;;  %v1374_v27 = vld [vmem:[%s11173_s0 + $0x7c] sm:$0xff] }
  0xe4   :  { %6554 = vmatprep.subr.bf16.mxu0 %v11181_v0  ;;  %v9247_v28 = vld [vmem:[%s11173_s0 + $0x84] sm:$0xff] }
  0xe7   :  { %6555 = vmatpush3.bf16.msra.mxu0 %v8302_v32  ;;  %v1093_v32 = vld [vmem:[%s11173_s0 + $0x2b] sm:$0xff] }
  0xe8   :  { %6556 = vmatprep.subr.bf16.mxu0 %v11181_v0 }
  0xea   :  { %6505 = vmatmul.mubr.msk.bf16.gmra.mrb[4].mxu0 %vm172_vm0, %v573_v33  ;;  %v1094_v33 = vld [vmem:[%s11173_s0 + $0x33] sm:$0xff] }
  0xeb   :  { %6508 = vmatprep.mubr.msk.bf16.mxu0 %vm8366_vm1, %v11181_v0  ;;  %6557 = vmatpush3.bf16.msra.mxu0 %v8303_v34  ;;  %v8312_v34 = vld [vmem:[%s11172_s2 + $0xb8] sm:$0xff]   ;;  %v1116_v35 = vpack.c.bf16 %v1094_v33, %v1093_v32 }
  0xec   :  { %6558 = vmatprep.subr.bf16.mxu0 %v11181_v0  ;;  %v1378_v33 = vld [vmem:[%s11173_s0 + $0x9c] sm:$0xff] }
  0xef   :  { %6559 = vmatpush3.bf16.msra.mxu0 %v8304_v37  ;;  %v1096_v37 = vld [vmem:[%s11173_s0 + $0x43] sm:$0xff] }
  0xf0   :  { %6612 = vmatprep.subr.bf16.mxu0 %v11181_v0 }
  0xf2   :  { %6509 = vmatmul.mubr.msk.bf16.gmra.mrb[8].mxu0 %vm172_vm0, %v574_v38  ;;  %v1117_v38 = vpack.c.bf16 %v1096_v37, %v1095_v36  ;;  %v1380_v36 = vld [vmem:[%s11173_s0 + $0xac] sm:$0xff]  ;;  %v1381_v37 = vld [vmem:[%s11173_s0 + $0xb4] sm:$0xff] }
  0xf3   :  { %6512 = vmatprep.mubr.msk.bf16.mxu0 %vm8366_vm1, %v11181_v0 }
  0xfa   :  { %6513 = vmatmul.mubr.msk.bf16.gmra.mrb[12].mxu0 %vm172_vm0, %v575_v41  ;;  %v1118_v41 = vpack.c.bf16 %v1098_v40, %v1097_v39  ;;  %v1382_v39 = vld [vmem:[%s11173_s0 + $0xbc] sm:$0xff]  ;;  %v1383_v40 = vld [vmem:[%s11173_s0 + $0xc4] sm:$0xff] }
  0xfb   :  { %6516 = vmatprep.mubr.msk.bf16.mxu0 %vm8366_vm1, %v11181_v0 }
 0x102   :  { %6517 = vmatmul.mubr.msk.bf16.gmra.mrb[16].mxu0 %vm172_vm0, %v576_v44  ;;  %v1119_v44 = vpack.c.bf16 %v1100_v43, %v1099_v42  ;;  %v1384_v42 = vld [vmem:[%s11173_s0 + $0xcc] sm:$0xff] }
 0x103   :  { %6520 = vmatprep.mubr.msk.bf16.mxu0 %vm8366_vm1, %v11181_v0  ;;  %v1397_v43 = vpack.c.bf16 %v1384_v42, %v1384_v42 }
 0x10a   :  { %6521 = vmatmul.mubr.msk.bf16.gmra.mrb[20].mxu0 %vm172_vm0, %v577_v47  ;;  %v1120_v47 = vpack.c.bf16 %v1102_v46, %v1101_v45  ;;  %v8317_v45 = vld [vmem:[%s11172_s2 + $0xe0] sm:$0xff]   ;;  %v8318_v46 = vld [vmem:[%s11172_s2 + $0xe8] sm:$0xff]  }
 0x10b   :  { %6524 = vmatprep.mubr.msk.bf16.mxu0 %vm8366_vm1, %v11181_v0 }
 0x112   :  { %6525 = vmatmul.mubr.msk.bf16.gmra.mrb[24].mxu0 %vm172_vm0, %v578_v50  ;;  %v1121_v50 = vpack.c.bf16 %v1104_v49, %v1103_v48  ;;  %v8319_v48 = vld [vmem:[%s11172_s2 + $0xf0] sm:$0xff]   ;;  %v8320_v49 = vld [vmem:[%s11172_s2 + $0xf8] sm:$0xff]  }
 0x113   :  { %6528 = vmatprep.mubr.msk.bf16.mxu0 %vm8366_vm1, %v11181_v0 }
 0x11a   :  { %6529 = vmatmul.mubr.msk.bf16.gmra.mrb[28].mxu0 %vm172_vm0, %v579_v53  ;;  %v1122_v53 = vpack.c.bf16 %v1106_v52, %v1105_v51 }
 0x11b   :  { %6532 = vmatprep.mubr.msk.bf16.mxu0 %vm8366_vm1, %v11181_v0 }
 0x122   :  { %6533 = vmatmul.mubr.msk.bf16.gmra.mrb[32].mxu0 %vm172_vm0, %v580_v56  ;;  %v1123_v56 = vpack.c.bf16 %v1108_v55, %v1107_v54 }
 0x123   :  { %6536 = vmatprep.mubr.msk.bf16.mxu0 %vm8366_vm1, %v11181_v0 }
 0x12a   :  { %6537 = vmatmul.mubr.msk.bf16.gmra.mrb[36].mxu0 %vm172_vm0, %v581_v59  ;;  %v1124_v59 = vpack.c.bf16 %v1110_v58, %v1109_v57  ;;  %v1666_v58 = vpack.c.bf16 %v1382_v39, %v1381_v37 }
 0x12b   :  { %6540 = vmatprep.mubr.msk.bf16.mxu0 %vm8366_vm1, %v11181_v0 }
 0x132   :  { %6541 = vmatmul.mubr.msk.bf16.gmra.mrb[40].mxu0 %vm172_vm0, %v582_v62  ;;  %v1125_v62 = vpack.c.bf16 %v1112_v61, %v1111_v60  ;;  %v1655_v60 = vld [vmem:[%s11173_s0 + $0xd4] sm:$0xff] }
 0x133   :  { %6544 = vmatprep.mubr.msk.bf16.mxu0 %vm8366_vm1, %v11181_v0  ;;  %v1668_v61 = vpack.c.bf16 %v1655_v60, %v1655_v60  ;;  %v47_v60 = vld [vmem:[%s11174_s1 + $0x88] sm:$0xff] }
 0x13a   :  { %6545 = vmatmul.mubr.msk.bf16.gmra.mrb[44].mxu0 %vm172_vm0, %v583_v2  ;;  %v1360_v2 = vld [vmem:[%s11173_s0 + $0xc] sm:$0xff] }
 0x13b   :  { %6548 = vmatprep.mubr.msk.bf16.mxu0 %vm8366_vm1, %v11181_v0 }
 0x142   :  { %6549 = vmatmul.mubr.msk.bf16.gmra.mrb[48].mxu0 %vm172_vm0, %v584_v4  ;;  %v1385_v4 = vpack.c.bf16 %v9129_v3, %v1360_v2  ;;  %v8321_v2 = vld [vmem:[%s11172_s2 + $0x100] sm:$0xff]  }
 0x143   :  { %6560 = vmatprep.mubr.msk.bf16.mxu0 %vm8366_vm1, %v11181_v0 }
 0x14a   :  { %6561 = vmatmul.mubr.msk.bf16.vlgmr.msra.gmra.mrb[0].mxu0 %vm172_vm0, %v843_v5  ;;  %v8313_v5 = vld [vmem:[%s11172_s2 + $0xc0] sm:$0xff]  }
 0x14b   :  { %6613 = vmatpush3.bf16.msra.mxu0 %v8305_v6  ;;  %6564 = vmatprep.mubr.msk.bf16.mxu0 %vm8366_vm1, %v11181_v0  ;;  %v9141_v6 = vld [vmem:[%s11173_s0 + $0x1c] sm:$0xff] }
 0x14c   :  { %6614 = vmatprep.subr.bf16.mxu0 %v11181_v0 }
 0x14f   :  { %6615 = vmatpush3.bf16.msra.mxu0 %v8306_v7  ;;  %v9146_v7 = vld [vmem:[%s11173_s0 + $0x24] sm:$0xff] }
 0x150   :  { %6616 = vmatprep.subr.bf16.mxu0 %v11181_v0 }
 0x152   :  { %6565 = vmatmul.mubr.msk.bf16.gmra.mrb[4].mxu0 %vm172_vm0, %v844_v8  ;;  %v8314_v8 = vld [vmem:[%s11172_s2 + $0xc8] sm:$0xff]  }
 0x153   :  { %6568 = vmatprep.mubr.msk.bf16.mxu0 %vm8366_vm1, %v11181_v0  ;;  %6617 = vmatpush3.bf16.msra.mxu0 %v8307_v9  ;;  %v1386_v9 = vpack.c.bf16 %v9146_v7, %v9141_v6 }
 0x154   :  { %6618 = vmatprep.subr.bf16.mxu0 %v11181_v0 }
 0x157   :  { %6619 = vmatpush3.bf16.msra.mxu0 %v8308_v10  ;;  %v8315_v10 = vld [vmem:[%s11172_s2 + $0xd0] sm:$0xff]  }
 0x158   :  { %6672 = vmatprep.subr.bf16.mxu0 %v11181_v0 }
 0x15a   :  { %6569 = vmatmul.mubr.msk.bf16.gmra.mrb[8].mxu0 %vm172_vm0, %v845_v11  ;;  %v9164_v11 = vld [vmem:[%s11173_s0 + $0x2c] sm:$0xff] }
 0x15b   :  { %6572 = vmatprep.mubr.msk.bf16.mxu0 %vm8366_vm1, %v11181_v0 }
 0x162   :  { %6573 = vmatmul.mubr.msk.bf16.gmra.mrb[12].mxu0 %vm172_vm0, %v846_v12  ;;  %v9169_v12 = vld [vmem:[%s11173_s0 + $0x34] sm:$0xff] }
 0x163   :  { %6576 = vmatprep.mubr.msk.bf16.mxu0 %vm8366_vm1, %v11181_v0 }
 0x16a   :  { %6577 = vmatmul.mubr.msk.bf16.gmra.mrb[16].mxu0 %vm172_vm0, %v847_v13  ;;  %v8316_v13 = vld [vmem:[%s11172_s2 + $0xd8] sm:$0xff]  }
 0x16b   :  { %6580 = vmatprep.mubr.msk.bf16.mxu0 %vm8366_vm1, %v11181_v0 }
 0x172   :  { %6581 = vmatmul.mubr.msk.bf16.gmra.mrb[20].mxu0 %vm172_vm0, %v848_v14  ;;  %v1387_v14 = vpack.c.bf16 %v9169_v12, %v9164_v11 }
 0x173   :  { %6584 = vmatprep.mubr.msk.bf16.mxu0 %vm8366_vm1, %v11181_v0 }
 0x17a   :  { %6585 = vmatmul.mubr.msk.bf16.gmra.mrb[24].mxu0 %vm172_vm0, %v849_v15  ;;  %v9184_v15 = vld [vmem:[%s11173_s0 + $0x3c] sm:$0xff] }
 0x17b   :  { %6588 = vmatprep.mubr.msk.bf16.mxu0 %vm8366_vm1, %v11181_v0 }
 0x182   :  { %6589 = vmatmul.mubr.msk.bf16.gmra.mrb[28].mxu0 %vm172_vm0, %v850_v16  ;;  %v9189_v16 = vld [vmem:[%s11173_s0 + $0x44] sm:$0xff] }
 0x183   :  { %6592 = vmatprep.mubr.msk.bf16.mxu0 %vm8366_vm1, %v11181_v0 }
 0x18a   :  { %6593 = vmatmul.mubr.msk.bf16.gmra.mrb[32].mxu0 %vm172_vm0, %v851_v17  ;;  %v1388_v17 = vpack.c.bf16 %v9189_v16, %v9184_v15 }
 0x18b   :  { %6596 = vmatprep.mubr.msk.bf16.mxu0 %vm8366_vm1, %v11181_v0 }
 0x192   :  { %6597 = vmatmul.mubr.msk.bf16.gmra.mrb[36].mxu0 %vm172_vm0, %v852_v18  ;;  %v9199_v18 = vld [vmem:[%s11173_s0 + $0x4c] sm:$0xff] }
 0x193   :  { %6600 = vmatprep.mubr.msk.bf16.mxu0 %vm8366_vm1, %v11181_v0  ;;  %v1659_v51 = vpack.c.bf16 %v9199_v18, %v9189_v16  ;;  %v1911_v16 = vld [vmem:[%s11173_s0 + $0x5d] sm:$0xff] }
 0x19a   :  { %6601 = vmatmul.mubr.msk.bf16.gmra.mrb[40].mxu0 %vm172_vm0, %v853_v19  ;;  %v9204_v19 = vld [vmem:[%s11173_s0 + $0x54] sm:$0xff] }
 0x19b   :  { %6604 = vmatprep.mubr.msk.bf16.mxu0 %vm8366_vm1, %v11181_v0  ;;  %v1660_v52 = vpack.c.bf16 %v9214_v21, %v9204_v19 }
 0x1a2   :  { %6605 = vmatmul.mubr.msk.bf16.gmra.mrb[44].mxu0 %vm172_vm0, %v854_v20  ;;  %v1389_v20 = vpack.c.bf16 %v9204_v19, %v9199_v18  ;;  %v1912_v18 = vld [vmem:[%s11173_s0 + $0x65] sm:$0xff]  ;;  %v1913_v19 = vld [vmem:[%s11173_s0 + $0x6d] sm:$0xff] }
 0x1a3   :  { %6608 = vmatprep.mubr.msk.bf16.mxu0 %vm8366_vm1, %v11181_v0 }
 0x1aa   :  { %6609 = vmatmul.mubr.msk.bf16.gmra.mrb[48].mxu0 %vm172_vm0, %v855_v22  ;;  %v9219_v22 = vld [vmem:[%s11173_s0 + $0x64] sm:$0xff] }
 0x1ab   :  { %6620 = vmatprep.mubr.msk.bf16.mxu0 %vm8366_vm1, %v11181_v0  ;;  %v1390_v23 = vpack.c.bf16 %v9219_v22, %v9214_v21  ;;  %v1914_v21 = vld [vmem:[%s11173_s0 + $0x75] sm:$0xff] }
 0x1b2   :  { %6621 = vmatmul.mubr.msk.bf16.vlgmr.msra.gmra.mrb[0].mxu0 %vm172_vm0, %v1114_v25  ;;  %v9234_v25 = vld [vmem:[%s11173_s0 + $0x74] sm:$0xff] }
 0x1b3   :  { %6673 = vmatpush3.bf16.msra.mxu0 %v8309_v26  ;;  %6624 = vmatprep.mubr.msk.bf16.mxu0 %vm8366_vm1, %v11181_v0  ;;  %v1391_v26 = vpack.c.bf16 %v9234_v25, %v9229_v24  ;;  %v1662_v54 = vpack.c.bf16 %v1374_v27, %v9234_v25  ;;  %v1917_v25 = vld [vmem:[%s11173_s0 + $0x8d] sm:$0xff] }
 0x1b4   :  { %6674 = vmatprep.subr.bf16.mxu0 %v11181_v0 }
 0x1b7   :  { %6675 = vmatpush3.bf16.msra.mxu0 %v8310_v29  ;;  %v1392_v29 = vpack.c.bf16 %v9247_v28, %v1374_v27  ;;  %v1918_v27 = vld [vmem:[%s11173_s0 + $0x95] sm:$0xff] }
 0x1b8   :  { %6676 = vmatprep.subr.bf16.mxu0 %v11181_v0 }
 0x1ba   :  { %6625 = vmatmul.mubr.msk.bf16.gmra.mrb[4].mxu0 %vm172_vm0, %v1115_v30  ;;  %v1376_v30 = vld [vmem:[%s11173_s0 + $0x8c] sm:$0xff] }
 0x1bb   :  { %6628 = vmatprep.mubr.msk.bf16.mxu0 %vm8366_vm1, %v11181_v0  ;;  %6677 = vmatpush3.bf16.msra.mxu0 %v8311_v31  ;;  %v1377_v31 = vld [vmem:[%s11173_s0 + $0x94] sm:$0xff]  ;;  %v1663_v55 = vpack.c.bf16 %v1376_v30, %v9247_v28  ;;  %v1919_v28 = vld [vmem:[%s11173_s0 + $0x9d] sm:$0xff] }
 0x1bc   :  { %6678 = vmatprep.subr.bf16.mxu0 %v11181_v0  ;;  %v1393_v32 = vpack.c.bf16 %v1377_v31, %v1376_v30  ;;  %v30_v30 = vld [vmem:[%s11174_s1] sm:$0xff] }
 0x1bf   :  { %6679 = vmatpush3.bf16.msra.mxu0 %v8312_v34  ;;  %v1379_v34 = vld [vmem:[%s11173_s0 + $0xa4] sm:$0xff] }
 0x1c0   :  { %6732 = vmatprep.subr.bf16.mxu0 %v11181_v0  ;;  %v1665_v57 = vpack.c.bf16 %v1380_v36, %v1379_v34 }
 0x1c2   :  { %6629 = vmatmul.mubr.msk.bf16.gmra.mrb[8].mxu0 %vm172_vm0, %v1116_v35  ;;  %v1394_v35 = vpack.c.bf16 %v1379_v34, %v1378_v33  ;;  %v34_v34 = vld [vmem:[%s11174_s1 + $0x20] sm:$0xff] }
 0x1c3   :  { %6632 = vmatprep.mubr.msk.bf16.mxu0 %vm8366_vm1, %v11181_v0 }
 0x1ca   :  { %6633 = vmatmul.mubr.msk.bf16.gmra.mrb[12].mxu0 %vm172_vm0, %v1117_v38  ;;  %v1395_v38 = vpack.c.bf16 %v1381_v37, %v1380_v36  ;;  %v1921_v36 = vld [vmem:[%s11173_s0 + $0xad] sm:$0xff]  ;;  %v33_v37 = vld [vmem:[%s11174_s1 + $0x18] sm:$0xff] }
 0x1cb   :  { %6636 = vmatprep.mubr.msk.bf16.mxu0 %vm8366_vm1, %v11181_v0 }
 0x1d2   :  { %6637 = vmatmul.mubr.msk.bf16.gmra.mrb[16].mxu0 %vm172_vm0, %v1118_v41  ;;  %v1396_v41 = vpack.c.bf16 %v1383_v40, %v1382_v39 }
 0x1d3   :  { %6640 = vmatprep.mubr.msk.bf16.mxu0 %vm8366_vm1, %v11181_v0 }
 0x1da   :  { %6641 = vmatmul.mubr.msk.bf16.gmra.mrb[20].mxu0 %vm172_vm0, %v1119_v44  ;;  %v1656_v44 = vpack.c.bf16 %v9141_v6, %v9129_v3  ;;  %v1904_v3 = vld [vmem:[%s11173_s0 + $0x25] sm:$0xff] }
 0x1db   :  { %6644 = vmatprep.mubr.msk.bf16.mxu0 %vm8366_vm1, %v11181_v0 }
 0x1e2   :  { %6645 = vmatmul.mubr.msk.bf16.gmra.mrb[24].mxu0 %vm172_vm0, %v1120_v47  ;;  %v1657_v47 = vpack.c.bf16 %v9164_v11, %v9146_v7  ;;  %v8323_v7 = vld [vmem:[%s11172_s2 + $0x110] sm:$0xff]  }
 0x1e3   :  { %6648 = vmatprep.mubr.msk.bf16.mxu0 %vm8366_vm1, %v11181_v0 }
 0x1ea   :  { %6649 = vmatmul.mubr.msk.bf16.gmra.mrb[28].mxu0 %vm172_vm0, %v1121_v50  ;;  %v1658_v50 = vpack.c.bf16 %v9184_v15, %v9169_v12  ;;  %v1908_v12 = vld [vmem:[%s11173_s0 + $0x45] sm:$0xff]  ;;  %v1910_v15 = vld [vmem:[%s11173_s0 + $0x55] sm:$0xff] }
 0x1eb   :  { %6652 = vmatprep.mubr.msk.bf16.mxu0 %vm8366_vm1, %v11181_v0 }
 0x1f2   :  { %6653 = vmatmul.mubr.msk.bf16.gmra.mrb[32].mxu0 %vm172_vm0, %v1122_v53  ;;  %v1661_v53 = vpack.c.bf16 %v9229_v24, %v9219_v22  ;;  %v1915_v22 = vld [vmem:[%s11173_s0 + $0x7d] sm:$0xff]  ;;  %v1916_v24 = vld [vmem:[%s11173_s0 + $0x85] sm:$0xff] }
 0x1f3   :  { %6656 = vmatprep.mubr.msk.bf16.mxu0 %vm8366_vm1, %v11181_v0 }
 0x1fa   :  { %6657 = vmatmul.mubr.msk.bf16.gmra.mrb[36].mxu0 %vm172_vm0, %v1123_v56  ;;  %v1664_v56 = vpack.c.bf16 %v1378_v33, %v1377_v31  ;;  %v31_v31 = vld [vmem:[%s11174_s1 + $0x8] sm:$0xff]  ;;  %v32_v33 = vld [vmem:[%s11174_s1 + $0x10] sm:$0xff] }
 0x1fb   :  { %6660 = vmatprep.mubr.msk.bf16.mxu0 %vm8366_vm1, %v11181_v0 }
 0x202   :  { %6661 = vmatmul.mubr.msk.bf16.gmra.mrb[40].mxu0 %vm172_vm0, %v1124_v59  ;;  %v1667_v59 = vpack.c.bf16 %v1384_v42, %v1383_v40  ;;  %v35_v40 = vld [vmem:[%s11174_s1 + $0x28] sm:$0xff]  ;;  %v1922_v42 = vld [vmem:[%s11173_s0 + $0xb5] sm:$0xff] }
 0x203   :  { %6664 = vmatprep.mubr.msk.bf16.mxu0 %vm8366_vm1, %v11181_v0 }
 0x20a   :  { %6665 = vmatmul.mubr.msk.bf16.gmra.mrb[44].mxu0 %vm172_vm0, %v1125_v62  ;;  %v1902_v62 = vld [vmem:[%s11173_s0 + $0x15] sm:$0xff] }
 0x20b   :  { %6668 = vmatprep.mubr.msk.bf16.mxu0 %vm8366_vm1, %v11181_v0 }
 0x212   :  { %6669 = vmatmul.mubr.msk.bf16.gmra.mrb[48].mxu0 %vm172_vm0, %v1126_v1  ;;  %v1927_v1 = vpack.c.bf16 %v1903_v63, %v1902_v62  ;;  %v2173_v62 = vld [vmem:[%s11173_s0 + $0x16] sm:$0xff]  ;;  %v2174_v63 = vld [vmem:[%s11173_s0 + $0x1e] sm:$0xff] }
 0x213   :  { %6680 = vmatprep.mubr.msk.bf16.mxu0 %vm8366_vm1, %v11181_v0 }
 0x21a   :  { %6681 = vmatmul.mubr.msk.bf16.vlgmr.msra.gmra.mrb[0].mxu0 %vm172_vm0, %v1385_v4  ;;  %v1905_v4 = vld [vmem:[%s11173_s0 + $0x2d] sm:$0xff] }
 0x21b   :  { %6733 = vmatpush3.bf16.msra.mxu0 %v8313_v5  ;;  %6684 = vmatprep.mubr.msk.bf16.mxu0 %vm8366_vm1, %v11181_v0  ;;  %v8322_v5 = vld [vmem:[%s11172_s2 + $0x108] sm:$0xff]   ;;  %v1928_v6 = vpack.c.bf16 %v1905_v4, %v1904_v3  ;;  %v2198_v3 = vpack.c.bf16 %v2174_v63, %v2173_v62 }
 0x21c   :  { %6734 = vmatprep.subr.bf16.mxu0 %v11181_v0  ;;  %v51_v4 = vld [vmem:[%s11174_s1 + $0xa8] sm:$0xff] }
 0x21f   :  { %6735 = vmatpush3.bf16.msra.mxu0 %v8314_v8  ;;  %v1906_v8 = vld [vmem:[%s11173_s0 + $0x35] sm:$0xff] }
 0x220   :  { %6736 = vmatprep.subr.bf16.mxu0 %v11181_v0 }
 0x222   :  { %6685 = vmatmul.mubr.msk.bf16.gmra.mrb[4].mxu0 %vm172_vm0, %v1386_v9  ;;  %v1907_v9 = vld [vmem:[%s11173_s0 + $0x3d] sm:$0xff] }
 0x223   :  { %6688 = vmatprep.mubr.msk.bf16.mxu0 %vm8366_vm1, %v11181_v0  ;;  %6737 = vmatpush3.bf16.msra.mxu0 %v8315_v10  ;;  %v8324_v10 = vld [vmem:[%s11172_s2 + $0x118] sm:$0xff]   ;;  %v1929_v11 = vpack.c.bf16 %v1907_v9, %v1906_v8 }
 0x224   :  { %6738 = vmatprep.subr.bf16.mxu0 %v11181_v0  ;;  %v53_v8 = vld [vmem:[%s11174_s1 + $0xb8] sm:$0xff] }
 0x227   :  { %6739 = vmatpush3.bf16.msra.mxu0 %v8316_v13  ;;  %v1909_v13 = vld [vmem:[%s11173_s0 + $0x4d] sm:$0xff] }
 0x228   :  { %6792 = vmatprep.subr.bf16.mxu0 %v11181_v0 }
 0x22a   :  { %6689 = vmatmul.mubr.msk.bf16.gmra.mrb[8].mxu0 %vm172_vm0, %v1387_v14  ;;  %v1930_v14 = vpack.c.bf16 %v1909_v13, %v1908_v12  ;;  %v2179_v13 = vld [vmem:[%s11173_s0 + $0x46] sm:$0xff] }
 0x22b   :  { %6692 = vmatprep.mubr.msk.bf16.mxu0 %vm8366_vm1, %v11181_v0 }
 0x232   :  { %6693 = vmatmul.mubr.msk.bf16.gmra.mrb[12].mxu0 %vm172_vm0, %v1388_v17  ;;  %v1931_v17 = vpack.c.bf16 %v1911_v16, %v1910_v15  ;;  %v2181_v16 = vld [vmem:[%s11173_s0 + $0x56] sm:$0xff] }
 0x233   :  { %6696 = vmatprep.mubr.msk.bf16.mxu0 %vm8366_vm1, %v11181_v0 }
 0x23a   :  { %6697 = vmatmul.mubr.msk.bf16.gmra.mrb[16].mxu0 %vm172_vm0, %v1389_v20  ;;  %v1932_v20 = vpack.c.bf16 %v1913_v19, %v1912_v18  ;;  %v2183_v19 = vld [vmem:[%s11173_s0 + $0x66] sm:$0xff] }
 0x23b   :  { %6700 = vmatprep.mubr.msk.bf16.mxu0 %vm8366_vm1, %v11181_v0 }
 0x242   :  { %6701 = vmatmul.mubr.msk.bf16.gmra.mrb[20].mxu0 %vm172_vm0, %v1390_v23  ;;  %v1933_v23 = vpack.c.bf16 %v1915_v22, %v1914_v21  ;;  %v2185_v22 = vld [vmem:[%s11173_s0 + $0x76] sm:$0xff] }
 0x243   :  { %6704 = vmatprep.mubr.msk.bf16.mxu0 %vm8366_vm1, %v11181_v0 }
 0x24a   :  { %6705 = vmatmul.mubr.msk.bf16.gmra.mrb[24].mxu0 %vm172_vm0, %v1391_v26  ;;  %v1934_v26 = vpack.c.bf16 %v1917_v25, %v1916_v24  ;;  %v2187_v25 = vld [vmem:[%s11173_s0 + $0x86] sm:$0xff] }
 0x24b   :  { %6708 = vmatprep.mubr.msk.bf16.mxu0 %vm8366_vm1, %v11181_v0 }
 0x252   :  { %6709 = vmatmul.mubr.msk.bf16.gmra.mrb[28].mxu0 %vm172_vm0, %v1392_v29  ;;  %v8367_v29 = vmov 0  }
 0x253   :  { %6712 = vmatprep.mubr.msk.bf16.mxu0 %vm8366_vm1, %v11181_v0  ;;  %8287 = vset.pattern.permute.xlu0 %v8367_v29 }
 0x254   :  { %2448 = vperm.xlu0 %8287, %v30_v30   ;;  %8288 = vset.pattern.permute.xlu1 %v8367_v29  ;;  %v2190_v29 = vld [vmem:[%s11173_s0 + $0x9e] sm:$0xff] }
 0x255   :  { %2458 = vperm.xlu1 %8288, %v32_v33  }
 0x258   :  { %2453 = vperm.xlu0 %8287, %v31_v31   ;;  %v2191_v31 = vld [vmem:[%s11173_s0 + $0xa6] sm:$0xff] }
 0x259   :  { %2463 = vperm.xlu1 %8288, %v33_v37   ;;  %v2195_v37 = vld [vmem:[%s11173_s0 + $0xc6] sm:$0xff] }
 0x25a   :  { %6713 = vmatmul.mubr.msk.bf16.gmra.mrb[32].mxu0 %vm172_vm0, %v1393_v32  ;;  %v1935_v32 = vpack.c.bf16 %v1919_v28, %v1918_v27  ;;  %v2189_v28 = vld [vmem:[%s11173_s0 + $0x96] sm:$0xff] }
 0x25b   :  { %6716 = vmatprep.mubr.msk.bf16.mxu0 %vm8366_vm1, %v11181_v0  ;;  %v2206_v30 = vpack.c.bf16 %v2190_v29, %v2189_v28 }
 0x25c   :  { %2468 = vperm.xlu0 %8287, %v34_v34   ;;  %v2193_v34 = vld [vmem:[%s11173_s0 + $0xb6] sm:$0xff] }
 0x25d   :  { %2473 = vperm.xlu1 %8288, %v35_v40   ;;  %v2197_v40 = vld [vmem:[%s11173_s0 + $0xd6] sm:$0xff] }
 0x262   :  { %6717 = vmatmul.mubr.msk.bf16.gmra.mrb[36].mxu0 %vm172_vm0, %v1394_v35  ;;  %v1920_v35 = vld [vmem:[%s11173_s0 + $0xa5] sm:$0xff] }
 0x263   :  { %6720 = vmatprep.mubr.msk.bf16.mxu0 %vm8366_vm1, %v11181_v0  ;;  %v1936_v39 = vpack.c.bf16 %v1921_v36, %v1920_v35  ;;  %v2194_v35 = vld [vmem:[%s11173_s0 + $0xbe] sm:$0xff] }
 0x264   :  { %v2208_v36 = vpack.c.bf16 %v2194_v35, %v2193_v34 }
 0x26a   :  { %6721 = vmatmul.mubr.msk.bf16.gmra.mrb[40].mxu0 %vm172_vm0, %v1395_v38  ;;  %v36_v38 = vld [vmem:[%s11174_s1 + $0x30] sm:$0xff] }
 0x26b   :  { %6724 = vmatprep.mubr.msk.bf16.mxu0 %vm8366_vm1, %v11181_v0  ;;  %2478 = vperm.xlu0 %8287, %v36_v38   ;;  %v2196_v38 = vld [vmem:[%s11173_s0 + $0xce] sm:$0xff] }
 0x272   :  { %6725 = vmatmul.mubr.msk.bf16.gmra.mrb[44].mxu0 %vm172_vm0, %v1396_v41  ;;  %v38_v41 = vld [vmem:[%s11174_s1 + $0x40] sm:$0xff] }
 0x273   :  { %6728 = vmatprep.mubr.msk.bf16.mxu0 %vm8366_vm1, %v11181_v0  ;;  %2488 = vperm.xlu0 %8287, %v38_v41   ;;  %v2210_v41 = vpack.c.bf16 %v2197_v40, %v2197_v40 }
 0x27a   :  { %6729 = vmatmul.mubr.msk.bf16.gmra.mrb[48].mxu0 %vm172_vm0, %v1397_v43  ;;  %v1923_v43 = vld [vmem:[%s11173_s0 + $0xbd] sm:$0xff] }
 0x27b   :  { %6740 = vmatprep.mubr.msk.bf16.mxu0 %vm8366_vm1, %v11181_v0 }
 0x282   :  { %6741 = vmatmul.mubr.msk.bf16.vlgmr.msra.gmra.mrb[0].mxu0 %vm172_vm0, %v1656_v44  ;;  %v37_v44 = vld [vmem:[%s11174_s1 + $0x38] sm:$0xff] }
 0x283   :  { %6793 = vmatpush3.bf16.msra.mxu0 %v8317_v45  ;;  %6744 = vmatprep.mubr.msk.bf16.mxu0 %vm8366_vm1, %v11181_v0  ;;  %v40_v45 = vld [vmem:[%s11174_s1 + $0x50] sm:$0xff] }
 0x284   :  { %6794 = vmatprep.subr.bf16.mxu0 %v11181_v0  ;;  %2483 = vperm.xlu1 %8288, %v37_v44  }
 0x285   :  { %2498 = vperm.xlu0 %8287, %v40_v45  }
 0x287   :  { %6795 = vmatpush3.bf16.msra.mxu0 %v8318_v46  ;;  %v1937_v46 = vpack.c.bf16 %v1923_v43, %v1922_v42 }
 0x288   :  { %6796 = vmatprep.subr.bf16.mxu0 %v11181_v0 }
 0x28a   :  { %6745 = vmatmul.mubr.msk.bf16.gmra.mrb[4].mxu0 %vm172_vm0, %v1657_v47  ;;  %v39_v47 = vld [vmem:[%s11174_s1 + $0x48] sm:$0xff] }
 0x28b   :  { %6748 = vmatprep.mubr.msk.bf16.mxu0 %vm8366_vm1, %v11181_v0  ;;  %6797 = vmatpush3.bf16.msra.mxu0 %v8319_v48  ;;  %v42_v48 = vld [vmem:[%s11174_s1 + $0x60] sm:$0xff] }
 0x28c   :  { %6798 = vmatprep.subr.bf16.mxu0 %v11181_v0  ;;  %2493 = vperm.xlu1 %8288, %v39_v47  }
 0x28d   :  { %2508 = vperm.xlu0 %8287, %v42_v48  }
 0x28f   :  { %6799 = vmatpush3.bf16.msra.mxu0 %v8320_v49  ;;  %v1924_v49 = vld [vmem:[%s11173_s0 + $0xc5] sm:$0xff] }
 0x290   :  { %6852 = vmatprep.subr.bf16.mxu0 %v11181_v0 }
 0x292   :  { %6749 = vmatmul.mubr.msk.bf16.gmra.mrb[8].mxu0 %vm172_vm0, %v1658_v50  ;;  %v1925_v50 = vld [vmem:[%s11173_s0 + $0xcd] sm:$0xff] }
 0x293   :  { %6752 = vmatprep.mubr.msk.bf16.mxu0 %vm8366_vm1, %v11181_v0 }
 0x29a   :  { %6753 = vmatmul.mubr.msk.bf16.gmra.mrb[12].mxu0 %vm172_vm0, %v1659_v51  ;;  %v41_v51 = vld [vmem:[%s11174_s1 + $0x58] sm:$0xff] }
 0x29b   :  { %6756 = vmatprep.mubr.msk.bf16.mxu0 %vm8366_vm1, %v11181_v0  ;;  %2503 = vperm.xlu1 %8288, %v41_v51  }
 0x2a2   :  { %6757 = vmatmul.mubr.msk.bf16.gmra.mrb[16].mxu0 %vm172_vm0, %v1660_v52  ;;  %v44_v52 = vld [vmem:[%s11174_s1 + $0x70] sm:$0xff] }
 0x2a3   :  { %6760 = vmatprep.mubr.msk.bf16.mxu0 %vm8366_vm1, %v11181_v0  ;;  %2518 = vperm.xlu0 %8287, %v44_v52  }
 0x2aa   :  { %6761 = vmatmul.mubr.msk.bf16.gmra.mrb[20].mxu0 %vm172_vm0, %v1661_v53  ;;  %v1938_v53 = vpack.c.bf16 %v1925_v50, %v1924_v49 }
 0x2ab   :  { %6764 = vmatprep.mubr.msk.bf16.mxu0 %vm8366_vm1, %v11181_v0 }
 0x2b2   :  { %6765 = vmatmul.mubr.msk.bf16.gmra.mrb[24].mxu0 %vm172_vm0, %v1662_v54  ;;  %v43_v54 = vld [vmem:[%s11174_s1 + $0x68] sm:$0xff] }
 0x2b3   :  { %6768 = vmatprep.mubr.msk.bf16.mxu0 %vm8366_vm1, %v11181_v0  ;;  %2513 = vperm.xlu1 %8288, %v43_v54  }
 0x2ba   :  { %6769 = vmatmul.mubr.msk.bf16.gmra.mrb[28].mxu0 %vm172_vm0, %v1663_v55  ;;  %v46_v55 = vld [vmem:[%s11174_s1 + $0x80] sm:$0xff] }
 0x2bb   :  { %6772 = vmatprep.mubr.msk.bf16.mxu0 %vm8366_vm1, %v11181_v0  ;;  %2528 = vperm.xlu0 %8287, %v46_v55  }
 0x2c2   :  { %6773 = vmatmul.mubr.msk.bf16.gmra.mrb[32].mxu0 %vm172_vm0, %v1664_v56  ;;  %v1926_v56 = vld [vmem:[%s11173_s0 + $0xd5] sm:$0xff] }
 0x2c3   :  { %6776 = vmatprep.mubr.msk.bf16.mxu0 %vm8366_vm1, %v11181_v0 }
 0x2ca   :  { %6777 = vmatmul.mubr.msk.bf16.gmra.mrb[36].mxu0 %vm172_vm0, %v1665_v57  ;;  %v45_v57 = vld [vmem:[%s11174_s1 + $0x78] sm:$0xff] }
 0x2cb   :  { %6780 = vmatprep.mubr.msk.bf16.mxu0 %vm8366_vm1, %v11181_v0  ;;  %2523 = vperm.xlu1 %8288, %v45_v57  }
 0x2cf   :  { %2533 = vperm.xlu1 %8288, %v47_v60  }
 0x2d2   :  { %6781 = vmatmul.mubr.msk.bf16.gmra.mrb[40].mxu0 %vm172_vm0, %v1666_v58  ;;  %v48_v58 = vld [vmem:[%s11174_s1 + $0x90] sm:$0xff] }
 0x2d3   :  { %6784 = vmatprep.mubr.msk.bf16.mxu0 %vm8366_vm1, %v11181_v0  ;;  %2538 = vperm.xlu0 %8287, %v48_v58   ;;  %v9683_v42 = vpop.permute.xlu0 %2448 }
 0x2d4   :  { %v9693_v48 = vpop.permute.xlu1 %2458 }
 0x2d7   :  { %v9687_v44 = vpop.permute.xlu0 %2453 }
 0x2d8   :  { %v9705_v60 = vpop.permute.xlu1 %2463 }
 0x2da   :  { %6785 = vmatmul.mubr.msk.bf16.gmra.mrb[44].mxu0 %vm172_vm0, %v1667_v59  ;;  %v1939_v59 = vpack.c.bf16 %v1926_v56, %v1926_v56 }
 0x2db   :  { %6788 = vmatprep.mubr.msk.bf16.mxu0 %vm8366_vm1, %v11181_v0 }
 0x2e2   :  { %6789 = vmatmul.mubr.msk.bf16.gmra.mrb[48].mxu0 %vm172_vm0, %v1668_v61  ;;  %v50_v61 = vld [vmem:[%s11174_s1 + $0xa0] sm:$0xff] }
 0x2e3   :  { %6800 = vmatprep.mubr.msk.bf16.mxu0 %vm8366_vm1, %v11181_v0  ;;  %2548 = vperm.xlu0 %8287, %v50_v61  }
 0x2ea   :  { %6801 = vmatmul.mubr.msk.bf16.vlgmr.msra.gmra.mrb[0].mxu0 %vm172_vm0, %v1927_v1  ;;  %v49_v1 = vld [vmem:[%s11174_s1 + $0x98] sm:$0xff] }
 0x2eb   :  { %6853 = vmatpush3.bf16.msra.mxu0 %v8321_v2  ;;  %6804 = vmatprep.mubr.msk.bf16.mxu0 %vm8366_vm1, %v11181_v0  ;;  %v52_v2 = vld [vmem:[%s11174_s1 + $0xb0] sm:$0xff] }
 0x2ec   :  { %6854 = vmatprep.subr.bf16.mxu0 %v11181_v0  ;;  %2543 = vperm.xlu1 %8288, %v49_v1  }
 0x2ed   :  { %2558 = vperm.xlu0 %8287, %v52_v2  }
 0x2ef   :  { %6855 = vmatpush3.bf16.msra.mxu0 %v8322_v5  ;;  %v54_v5 = vld [vmem:[%s11174_s1 + $0xc0] sm:$0xff] }
 0x2f0   :  { %6856 = vmatprep.subr.bf16.mxu0 %v11181_v0  ;;  %2553 = vperm.xlu1 %8288, %v51_v4  }
 0x2f1   :  { %2568 = vperm.xlu0 %8287, %v54_v5  }
 0x2f2   :  { %6805 = vmatmul.mubr.msk.bf16.gmra.mrb[4].mxu0 %vm172_vm0, %v1928_v6  ;;  %v2175_v6 = vld [vmem:[%s11173_s0 + $0x26] sm:$0xff] }
 0x2f3   :  { %6808 = vmatprep.mubr.msk.bf16.mxu0 %vm8366_vm1, %v11181_v0  ;;  %6857 = vmatpush3.bf16.msra.mxu0 %v8323_v7  ;;  %v2176_v7 = vld [vmem:[%s11173_s0 + $0x2e] sm:$0xff] }
 0x2f4   :  { %6858 = vmatprep.subr.bf16.mxu0 %v11181_v0  ;;  %v2199_v9 = vpack.c.bf16 %v2176_v7, %v2175_v6  ;;  %2563 = vperm.xlu1 %8288, %v53_v8  }
 0x2f7   :  { %6859 = vmatpush3.bf16.msra.mxu0 %v8324_v10  ;;  %v2177_v10 = vld [vmem:[%s11173_s0 + $0x36] sm:$0xff] }
 0x2fa   :  { %6809 = vmatmul.mubr.msk.bf16.gmra.mrb[8].mxu0 %vm172_vm0, %v1929_v11  ;;  %v2178_v11 = vld [vmem:[%s11173_s0 + $0x3e] sm:$0xff] }
 0x2fb   :  { %6812 = vmatprep.mubr.msk.bf16.mxu0 %vm8366_vm1, %v11181_v0  ;;  %v2200_v12 = vpack.c.bf16 %v2178_v11, %v2177_v10  ;;  %v8325_v11 = vld [vmem:[%s11175_s5 + $0x20] sm:$0xff]  }
 0x2fc   :  { %6913 = vmatpush3.bf16.msra.mxu1 %v8325_v11 }
 0x2fd   :  { %6914 = vmatprep.subr.bf16.mxu1 %v11181_v0 }
 0x302   :  { %6813 = vmatmul.mubr.msk.bf16.gmra.mrb[12].mxu0 %vm172_vm0, %v1930_v14  ;;  %v2180_v14 = vld [vmem:[%s11173_s0 + $0x4e] sm:$0xff] }
 0x303   :  { %6816 = vmatprep.mubr.msk.bf16.mxu0 %vm8366_vm1, %v11181_v0  ;;  %v2201_v15 = vpack.c.bf16 %v2180_v14, %v2179_v13  ;;  %v9722_v13 = vpop.permute.xlu0 %2468 }
 0x30a   :  { %6817 = vmatmul.mubr.msk.bf16.gmra.mrb[16].mxu0 %vm172_vm0, %v1931_v17  ;;  %v2182_v17 = vld [vmem:[%s11173_s0 + $0x5e] sm:$0xff] }
 0x30b   :  { %6820 = vmatprep.mubr.msk.bf16.mxu0 %vm8366_vm1, %v11181_v0  ;;  %v2202_v18 = vpack.c.bf16 %v2182_v17, %v2181_v16 }
 0x312   :  { %6821 = vmatmul.mubr.msk.bf16.gmra.mrb[20].mxu0 %vm172_vm0, %v1932_v20  ;;  %v2184_v20 = vld [vmem:[%s11173_s0 + $0x6e] sm:$0xff] }
 0x313   :  { %6824 = vmatprep.mubr.msk.bf16.mxu0 %vm8366_vm1, %v11181_v0  ;;  %v2203_v21 = vpack.c.bf16 %v2184_v20, %v2183_v19  ;;  %v9732_v19 = vpop.permute.xlu1 %2473 }
 0x314   :  { %11214 = vst [vmem:[#allocation3_spill] sm:$0xff] %v9732_v19 }
 0x31a   :  { %6825 = vmatmul.mubr.msk.bf16.gmra.mrb[24].mxu0 %vm172_vm0, %v1933_v23  ;;  %v2186_v23 = vld [vmem:[%s11173_s0 + $0x7e] sm:$0xff] }
 0x31b   :  { %6828 = vmatprep.mubr.msk.bf16.mxu0 %vm8366_vm1, %v11181_v0  ;;  %v2204_v24 = vpack.c.bf16 %v2186_v23, %v2185_v22 }
 0x322   :  { %6829 = vmatmul.mubr.msk.bf16.gmra.mrb[28].mxu0 %vm172_vm0, %v1934_v26  ;;  %v2188_v26 = vld [vmem:[%s11173_s0 + $0x8e] sm:$0xff] }
 0x323   :  { %6832 = vmatprep.mubr.msk.bf16.mxu0 %vm8366_vm1, %v11181_v0  ;;  %v2205_v27 = vpack.c.bf16 %v2188_v26, %v2187_v25  ;;  %v8327_v26 = vld [vmem:[%s11175_s5 + $0x30] sm:$0xff]  }
 0x32a   :  { %6833 = vmatmul.mubr.msk.bf16.gmra.mrb[32].mxu0 %vm172_vm0, %v1935_v32  ;;  %v2192_v32 = vld [vmem:[%s11173_s0 + $0xae] sm:$0xff] }
 0x32b   :  { %6836 = vmatprep.mubr.msk.bf16.mxu0 %vm8366_vm1, %v11181_v0  ;;  %v2207_v33 = vpack.c.bf16 %v2192_v32, %v2191_v31 }
 0x332   :  { %6837 = vmatmul.mubr.msk.bf16.gmra.mrb[36].mxu0 %vm172_vm0, %v1936_v39  ;;  %v2209_v39 = vpack.c.bf16 %v2196_v38, %v2195_v37 }
 0x333   :  { %6840 = vmatprep.mubr.msk.bf16.mxu0 %vm8366_vm1, %v11181_v0 }
 0x33a   :  { %6841 = vmatmul.mubr.msk.bf16.gmra.mrb[40].mxu0 %vm172_vm0, %v1937_v46 }
 0x33b   :  { %6844 = vmatprep.mubr.msk.bf16.mxu0 %vm8366_vm1, %v11181_v0 }
 0x342   :  { %6845 = vmatmul.mubr.msk.bf16.gmra.mrb[44].mxu0 %vm172_vm0, %v1938_v53 }
 0x343   :  { %6848 = vmatprep.mubr.msk.bf16.mxu0 %vm8366_vm1, %v11181_v0 }
 0x34a   :  { %6849 = vmatmul.mubr.msk.bf16.gmra.mrb[48].mxu0 %vm172_vm0, %v1939_v59 }
 0x34b   :  { %6860 = vmatprep.mubr.msk.bf16.mxu0 %vm8366_vm1, %v11181_v0 }
 0x352   :  { %6861 = vmatmul.mubr.msk.bf16.vlgmr.msra.gmra.mrb[0].mxu0 %vm172_vm0, %v2198_v3 }
 0x353   :  { %6864 = vmatprep.mubr.msk.bf16.mxu0 %vm8366_vm1, %v11181_v0 }
 0x35a   :  { %6865 = vmatmul.mubr.msk.bf16.gmra.mrb[4].mxu0 %vm172_vm0, %v2199_v9 }
 0x35b   :  { %6868 = vmatprep.mubr.msk.bf16.mxu0 %vm8366_vm1, %v11181_v0 }
 0x362   :  { %6869 = vmatmul.mubr.msk.bf16.gmra.mrb[8].mxu0 %vm172_vm0, %v2200_v12 }
 0x363   :  { %6872 = vmatprep.mubr.msk.bf16.mxu0 %vm8366_vm1, %v11181_v0 }
 0x36a   :  { %6873 = vmatmul.mubr.msk.bf16.gmra.mrb[12].mxu0 %vm172_vm0, %v2201_v15 }
 0x36b   :  { %6876 = vmatprep.mubr.msk.bf16.mxu0 %vm8366_vm1, %v11181_v0 }
 0x372   :  { %6877 = vmatmul.mubr.msk.bf16.gmra.mrb[16].mxu0 %vm172_vm0, %v2202_v18  ;;  %v8326_v18 = vld [vmem:[%s11175_s5 + $0x28] sm:$0xff]  }
 0x373   :  { %6880 = vmatprep.mubr.msk.bf16.mxu0 %vm8366_vm1, %v11181_v0  ;;  %6915 = vmatpush3.bf16.msra.mxu1 %v8326_v18 }
 0x374   :  { %6916 = vmatprep.subr.bf16.mxu1 %v11181_v0 }
 0x377   :  { %6917 = vmatpush3.bf16.msra.mxu1 %v8327_v26 }
 0x378   :  { %6918 = vmatprep.subr.bf16.mxu1 %v11181_v0 }
 0x37a   :  { %6881 = vmatmul.mubr.msk.bf16.gmra.mrb[20].mxu0 %vm172_vm0, %v2203_v21 }
 0x37b   :  { %6884 = vmatprep.mubr.msk.bf16.mxu0 %vm8366_vm1, %v11181_v0 }
 0x382   :  { %6885 = vmatmul.mubr.msk.bf16.gmra.mrb[24].mxu0 %vm172_vm0, %v2204_v24 }
 0x383   :  { %6888 = vmatprep.mubr.msk.bf16.mxu0 %vm8366_vm1, %v11181_v0 }
 0x38a   :  { %6889 = vmatmul.mubr.msk.bf16.gmra.mrb[28].mxu0 %vm172_vm0, %v2205_v27 }
 0x38b   :  { %6892 = vmatprep.mubr.msk.bf16.mxu0 %vm8366_vm1, %v11181_v0 }
 0x392   :  { %6893 = vmatmul.mubr.msk.bf16.gmra.mrb[32].mxu0 %vm172_vm0, %v2206_v30 }
 0x393   :  { %6896 = vmatprep.mubr.msk.bf16.mxu0 %vm8366_vm1, %v11181_v0 }
 0x39a   :  { %6897 = vmatmul.mubr.msk.bf16.gmra.mrb[36].mxu0 %vm172_vm0, %v2207_v33  ;;  %v9748_v33 = vpop.permute.xlu0 %2478 }
 0x39b   :  { %6900 = vmatprep.mubr.msk.bf16.mxu0 %vm8366_vm1, %v11181_v0  ;;  %11215 = vst [vmem:[#allocation4_spill] sm:$0xff] %v9748_v33 }
 0x3a2   :  { %6901 = vmatmul.mubr.msk.bf16.gmra.mrb[40].mxu0 %vm172_vm0, %v2208_v36  ;;  %v8328_v36 = vld [vmem:[%s11175_s5 + $0x38] sm:$0xff]  }
 0x3a3   :  { %6904 = vmatprep.mubr.msk.bf16.mxu0 %vm8366_vm1, %v11181_v0  ;;  %6919 = vmatpush3.bf16.msra.mxu1 %v8328_v36 }
 0x3a4   :  { %6972 = vmatprep.subr.bf16.mxu1 %v11181_v0 }
 0x3aa   :  { %6905 = vmatmul.mubr.msk.bf16.gmra.mrb[44].mxu0 %vm172_vm0, %v2209_v39  ;;  %v9758_v39 = vpop.permute.xlu1 %2483 }
 0x3ab   :  { %6908 = vmatprep.mubr.msk.bf16.mxu0 %vm8366_vm1, %v11181_v0  ;;  %11216 = vst [vmem:[#allocation5_spill] sm:$0xff] %v9758_v39 }
 0x3b2   :  { %6909 = vmatmul.mubr.msk.bf16.gmra.mrb[48].mxu0 %vm172_vm0, %v2210_v41 }
 0x425   :  { %v9685_v43 = vpop.f32.mrb[0].mxu0 }
 0x426   :  { %v2571_v45 = vmul.f32 %v9683_v42, %v9685_v43  ;;  %v6862_v46 = vpop.f32.mrb[1].mxu0 }
 0x427   :  { %v9691_v47 = vpop.f32.mrb[2].mxu0 }
 0x428   :  { %v2653_v49 = vmul.f32 %v2571_v45, %v9685_v43  ;;  %v2572_v50 = vmul.f32 %v9687_v44, %v9691_v47  ;;  %v6863_v51 = vpop.f32.mrb[3].mxu0  ;;  %v2596_v52 = vsel %vm172_vm0, %v2571_v45, 0.0 }
 0x42a   :  { %v2597_v53 = vsel %vm172_vm0, %v2572_v50, 0.0  ;;  %v2654_v54 = vmul.f32 %v2572_v50, %v9691_v47  ;;  %v2678_v56 = vsel %vm172_vm0, %v2653_v49, 0.0 }
 0x42b   :  { %v2598_v55 = vadd.f32 %v2597_v53, %v2596_v52 }
 0x42c   :  { %v2679_v57 = vsel %vm172_vm0, %v2654_v54, 0.0 }
 0x42d   :  { %v2680_v58 = vadd.f32 %v2679_v57, %v2678_v56  ;;  %v9703_v59 = vpop.f32.mrb[4].mxu0  ;;  %v9771_v57 = vpop.permute.xlu0 %2488 }
 0x42e   :  { %v2573_v61 = vmul.f32 %v9693_v48, %v9703_v59  ;;  %v6866_v62 = vpop.f32.mrb[5].mxu0  ;;  %11217 = vst [vmem:[#allocation6_spill] sm:$0xff] %v9771_v57 }
 0x42f   :  { %v9709_v63 = vpop.f32.mrb[6].mxu0 }
 0x430   :  { %v2599_v1 = vsel %vm172_vm0, %v2573_v61, 0.0  ;;  %v2655_v2 = vmul.f32 %v2573_v61, %v9703_v59  ;;  %v2574_v3 = vmul.f32 %v9705_v60, %v9709_v63  ;;  %v6867_v4 = vpop.f32.mrb[7].mxu0 }
 0x431   :  { %v2600_v5 = vadd.f32 %v2599_v1, %v2598_v55 }
 0x432   :  { %v2681_v6 = vsel %vm172_vm0, %v2655_v2, 0.0  ;;  %v2601_v7 = vsel %vm172_vm0, %v2574_v3, 0.0  ;;  %v2656_v8 = vmul.f32 %v2574_v3, %v9709_v63  ;;  %v9777_v2 = vpop.permute.xlu1 %2493 }
 0x433   :  { %v2682_v9 = vadd.f32 %v2681_v6, %v2680_v58  ;;  %v2602_v10 = vadd.f32 %v2601_v7, %v2600_v5  ;;  %11218 = vst [vmem:[#allocation7_spill] sm:$0xff] %v9777_v2 }
 0x434   :  { %v2683_v12 = vsel %vm172_vm0, %v2656_v8, 0.0 }
 0x435   :  { %v2684_v14 = vadd.f32 %v2683_v12, %v2682_v9  ;;  %v9724_v15 = vpop.f32.mrb[8].mxu0 }
 0x436   :  { %v2575_v16 = vmul.f32 %v9722_v13, %v9724_v15  ;;  %v6870_v17 = vpop.f32.mrb[9].mxu0 }
 0x437   :  { %v9734_v20 = vpop.f32.mrb[10].mxu0  ;;  %v9789_v17 = vpop.permute.xlu0 %2498 }
 0x438   :  { %v2603_v21 = vsel %vm172_vm0, %v2575_v16, 0.0  ;;  %v2657_v22 = vmul.f32 %v2575_v16, %v9724_v15  ;;  %v2576_v23 = vmul.f32 %v9732_v19, %v9734_v20  ;;  %v6871_v24 = vpop.f32.mrb[11].mxu0  ;;  %11219 = vst [vmem:[#allocation8_spill] sm:$0xff] %v9789_v17 }
 0x439   :  { %v2604_v25 = vadd.f32 %v2603_v21, %v2602_v10  ;;  %v9795_v24 = vpop.permute.xlu1 %2503 }
 0x43a   :  { %v2685_v27 = vsel %vm172_vm0, %v2657_v22, 0.0  ;;  %v2605_v28 = vsel %vm172_vm0, %v2576_v23, 0.0  ;;  %v2658_v29 = vmul.f32 %v2576_v23, %v9734_v20  ;;  %11220 = vst [vmem:[#allocation9_spill] sm:$0xff] %v9795_v24 }
 0x43b   :  { %v2686_v30 = vadd.f32 %v2685_v27, %v2684_v14  ;;  %v2606_v31 = vadd.f32 %v2605_v28, %v2604_v25 }
 0x43c   :  { %v2687_v32 = vsel %vm172_vm0, %v2658_v29, 0.0 }
 0x43d   :  { %v2688_v34 = vadd.f32 %v2687_v32, %v2686_v30  ;;  %v9750_v35 = vpop.f32.mrb[12].mxu0 }
 0x43e   :  { %v2577_v37 = vmul.f32 %v9748_v33, %v9750_v35  ;;  %v6874_v38 = vpop.f32.mrb[13].mxu0 }
 0x43f   :  { %v9760_v40 = vpop.f32.mrb[14].mxu0 }
 0x440   :  { %v2607_v41 = vsel %vm172_vm0, %v2577_v37, 0.0  ;;  %v2659_v45 = vmul.f32 %v2577_v37, %v9750_v35  ;;  %v2578_v46 = vmul.f32 %v9758_v39, %v9760_v40  ;;  %v6875_v49 = vpop.f32.mrb[15].mxu0 }
 0x441   :  { %v2608_v50 = vadd.f32 %v2607_v41, %v2606_v31  ;;  %v9807_v41 = vpop.permute.xlu0 %2508 }
 0x442   :  { %v2689_v51 = vsel %vm172_vm0, %v2659_v45, 0.0  ;;  %v2609_v52 = vsel %vm172_vm0, %v2578_v46, 0.0  ;;  %v2660_v53 = vmul.f32 %v2578_v46, %v9760_v40  ;;  %11221 = vst [vmem:[#allocation10_spill] sm:$0xff] %v9807_v41 }
 0x443   :  { %v2690_v54 = vadd.f32 %v2689_v51, %v2688_v34  ;;  %v2610_v55 = vadd.f32 %v2609_v52, %v2608_v50  ;;  %v9813_v51 = vpop.permute.xlu1 %2513 }
 0x444   :  { %v2691_v56 = vsel %vm172_vm0, %v2660_v53, 0.0  ;;  %11222 = vst [vmem:[#allocation11_spill] sm:$0xff] %v9813_v51 }
 0x445   :  { %v2692_v58 = vadd.f32 %v2691_v56, %v2690_v54  ;;  %v9773_v61 = vpop.f32.mrb[16].mxu0 }
 0x446   :  { %v2579_v62 = vmul.f32 %v9771_v57, %v9773_v61  ;;  %v6878_v1 = vpop.f32.mrb[17].mxu0 }
 0x447   :  { %v9779_v3 = vpop.f32.mrb[18].mxu0 }
 0x448   :  { %v2611_v4 = vsel %vm172_vm0, %v2579_v62, 0.0  ;;  %v2661_v5 = vmul.f32 %v2579_v62, %v9773_v61  ;;  %v2580_v6 = vmul.f32 %v9777_v2, %v9779_v3  ;;  %v6879_v7 = vpop.f32.mrb[19].mxu0 }
 0x449   :  { %v2612_v8 = vadd.f32 %v2611_v4, %v2610_v55 }
 0x44a   :  { %v2693_v9 = vsel %vm172_vm0, %v2661_v5, 0.0  ;;  %v2613_v10 = vsel %vm172_vm0, %v2580_v6, 0.0  ;;  %v2662_v11 = vmul.f32 %v2580_v6, %v9779_v3 }
 0x44b   :  { %v2694_v12 = vadd.f32 %v2693_v9, %v2692_v58  ;;  %v2614_v14 = vadd.f32 %v2613_v10, %v2612_v8  ;;  %v9825_v8 = vpop.permute.xlu0 %2518 }
 0x44c   :  { %v2695_v16 = vsel %vm172_vm0, %v2662_v11, 0.0  ;;  %11223 = vst [vmem:[#allocation12_spill] sm:$0xff] %v9825_v8 }
 0x44d   :  { %v2696_v18 = vadd.f32 %v2695_v16, %v2694_v12  ;;  %v9791_v21 = vpop.f32.mrb[20].mxu0 }
 0x44e   :  { %v2581_v22 = vmul.f32 %v9789_v17, %v9791_v21  ;;  %v6882_v23 = vpop.f32.mrb[21].mxu0 }
 0x44f   :  { %v9797_v25 = vpop.f32.mrb[22].mxu0 }
 0x450   :  { %v2615_v26 = vsel %vm172_vm0, %v2581_v22, 0.0  ;;  %v2663_v27 = vmul.f32 %v2581_v22, %v9791_v21  ;;  %v2582_v28 = vmul.f32 %v9795_v24, %v9797_v25  ;;  %v6883_v29 = vpop.f32.mrb[23].mxu0 }
 0x451   :  { %v2616_v30 = vadd.f32 %v2615_v26, %v2614_v14  ;;  %v9831_v14 = vpop.permute.xlu1 %2523 }
 0x452   :  { %v2697_v31 = vsel %vm172_vm0, %v2663_v27, 0.0  ;;  %v2617_v32 = vsel %vm172_vm0, %v2582_v28, 0.0  ;;  %v2664_v34 = vmul.f32 %v2582_v28, %v9797_v25  ;;  %11224 = vst [vmem:[#allocation13_spill] sm:$0xff] %v9831_v14 }
 0x453   :  { %v2698_v36 = vadd.f32 %v2697_v31, %v2696_v18  ;;  %v2618_v37 = vadd.f32 %v2617_v32, %v2616_v30 }
 0x454   :  { %v2699_v38 = vsel %vm172_vm0, %v2664_v34, 0.0 }
 0x455   :  { %v2700_v45 = vadd.f32 %v2699_v38, %v2698_v36  ;;  %v9809_v46 = vpop.f32.mrb[24].mxu0  ;;  %v9843_v36 = vpop.permute.xlu0 %2528 }
 0x456   :  { %v2583_v49 = vmul.f32 %v9807_v41, %v9809_v46  ;;  %v6886_v50 = vpop.f32.mrb[25].mxu0  ;;  %11225 = vst [vmem:[#allocation14_spill] sm:$0xff] %v9843_v36 }
 0x457   :  { %v9815_v52 = vpop.f32.mrb[26].mxu0  ;;  %v9849_v50 = vpop.permute.xlu1 %2533 }
 0x458   :  { %v2619_v53 = vsel %vm172_vm0, %v2583_v49, 0.0  ;;  %v2665_v54 = vmul.f32 %v2583_v49, %v9809_v46  ;;  %v2584_v55 = vmul.f32 %v9813_v51, %v9815_v52  ;;  %v6887_v56 = vpop.f32.mrb[27].mxu0  ;;  %11226 = vst [vmem:[#allocation15_spill] sm:$0xff] %v9849_v50 }
 0x459   :  { %v2620_v58 = vadd.f32 %v2619_v53, %v2618_v37 }
 0x45a   :  { %v2701_v62 = vsel %vm172_vm0, %v2665_v54, 0.0  ;;  %v2621_v1 = vsel %vm172_vm0, %v2584_v55, 0.0  ;;  %v2666_v4 = vmul.f32 %v2584_v55, %v9815_v52 }
 0x45b   :  { %v2702_v5 = vadd.f32 %v2701_v62, %v2700_v45  ;;  %v2622_v6 = vadd.f32 %v2621_v1, %v2620_v58 }
 0x45c   :  { %v2703_v7 = vsel %vm172_vm0, %v2666_v4, 0.0 }
 0x45d   :  { %v2704_v9 = vadd.f32 %v2703_v7, %v2702_v5  ;;  %v9827_v10 = vpop.f32.mrb[28].mxu0 }
 0x45e   :  { %v2585_v11 = vmul.f32 %v9825_v8, %v9827_v10  ;;  %v6890_v12 = vpop.f32.mrb[29].mxu0 }
 0x45f   :  { %v9833_v16 = vpop.f32.mrb[30].mxu0 }
 0x460   :  { %v2623_v18 = vsel %vm172_vm0, %v2585_v11, 0.0  ;;  %v2667_v22 = vmul.f32 %v2585_v11, %v9827_v10  ;;  %v2586_v23 = vmul.f32 %v9831_v14, %v9833_v16  ;;  %v6891_v26 = vpop.f32.mrb[31].mxu0  ;;  %v9861_v11 = vpop.permute.xlu0 %2538 }
 0x461   :  { %v2624_v27 = vadd.f32 %v2623_v18, %v2622_v6  ;;  %11227 = vst [vmem:[#allocation16_spill] sm:$0xff] %v9861_v11  ;;  %v9867_v26 = vpop.permute.xlu1 %2543 }
 0x462   :  { %v2705_v28 = vsel %vm172_vm0, %v2667_v22, 0.0  ;;  %v2625_v29 = vsel %vm172_vm0, %v2586_v23, 0.0  ;;  %v2668_v30 = vmul.f32 %v2586_v23, %v9833_v16  ;;  %11228 = vst [vmem:[#allocation17_spill] sm:$0xff] %v9867_v26 }
 0x463   :  { %v2706_v31 = vadd.f32 %v2705_v28, %v2704_v9  ;;  %v2626_v32 = vadd.f32 %v2625_v29, %v2624_v27 }
 0x464   :  { %v2707_v34 = vsel %vm172_vm0, %v2668_v30, 0.0 }
 0x465   :  { %v2708_v37 = vadd.f32 %v2707_v34, %v2706_v31  ;;  %v9845_v38 = vpop.f32.mrb[32].mxu0 }
 0x466   :  { %v2587_v45 = vmul.f32 %v9843_v36, %v9845_v38  ;;  %v6894_v49 = vpop.f32.mrb[33].mxu0 }
 0x467   :  { %v9851_v53 = vpop.f32.mrb[34].mxu0 }
 0x468   :  { %v2627_v54 = vsel %vm172_vm0, %v2587_v45, 0.0  ;;  %v2669_v55 = vmul.f32 %v2587_v45, %v9845_v38  ;;  %v2588_v56 = vmul.f32 %v9849_v50, %v9851_v53  ;;  %v6895_v58 = vpop.f32.mrb[35].mxu0 }
 0x469   :  { %v2628_v62 = vadd.f32 %v2627_v54, %v2626_v32 }
 0x46a   :  { %v2709_v1 = vsel %vm172_vm0, %v2669_v55, 0.0  ;;  %v2629_v4 = vsel %vm172_vm0, %v2588_v56, 0.0  ;;  %v2670_v5 = vmul.f32 %v2588_v56, %v9851_v53  ;;  %v9879_v56 = vpop.permute.xlu0 %2548 }
 0x46b   :  { %v2710_v6 = vadd.f32 %v2709_v1, %v2708_v37  ;;  %v2630_v7 = vadd.f32 %v2629_v4, %v2628_v62  ;;  %11230 = vst [vmem:[#allocation19_spill] sm:$0xff] %v9879_v56 }
 0x46c   :  { %v2711_v9 = vsel %vm172_vm0, %v2670_v5, 0.0  ;;  %v9885_v5 = vpop.permute.xlu1 %2553 }
 0x46d   :  { %v2712_v12 = vadd.f32 %v2711_v9, %v2710_v6  ;;  %v9863_v18 = vpop.f32.mrb[36].mxu0  ;;  %11232 = vst [vmem:[#allocation21_spill] sm:$0xff] %v9885_v5 }
 0x46e   :  { %v2589_v22 = vmul.f32 %v9861_v11, %v9863_v18  ;;  %v6898_v23 = vpop.f32.mrb[37].mxu0 }
 0x46f   :  { %v9869_v27 = vpop.f32.mrb[38].mxu0 }
 0x470   :  { %11229 = vst [vmem:[#allocation18_spill] sm:$0xff] %v9869_v27  ;;  %v2631_v28 = vsel %vm172_vm0, %v2589_v22, 0.0  ;;  %v2671_v29 = vmul.f32 %v2589_v22, %v9863_v18  ;;  %v2590_v30 = vmul.f32 %v9867_v26, %v9869_v27  ;;  %v6899_v31 = vpop.f32.mrb[39].mxu0 }
 0x471   :  { %v2632_v32 = vadd.f32 %v2631_v28, %v2630_v7 }
 0x472   :  { %v2713_v34 = vsel %vm172_vm0, %v2671_v29, 0.0  ;;  %v2633_v37 = vsel %vm172_vm0, %v2590_v30, 0.0  ;;  %v2672_v45 = vmul.f32 %v2590_v30, %v9869_v27 }
 0x473   :  { %v2714_v49 = vadd.f32 %v2713_v34, %v2712_v12  ;;  %v2634_v54 = vadd.f32 %v2633_v37, %v2632_v32  ;;  %v9897_v37 = vpop.permute.xlu0 %2558 }
 0x474   :  { %v2715_v55 = vsel %vm172_vm0, %v2672_v45, 0.0  ;;  %11233 = vst [vmem:[#allocation22_spill] sm:$0xff] %v9897_v37 }
 0x475   :  { %v2716_v58 = vadd.f32 %v2715_v55, %v2714_v49  ;;  %v9881_v62 = vpop.f32.mrb[40].mxu0 }
 0x476   :  { %11231 = vst [vmem:[#allocation20_spill] sm:$0xff] %v9881_v62  ;;  %v2591_v1 = vmul.f32 %v9879_v56, %v9881_v62  ;;  %v6902_v4 = vpop.f32.mrb[41].mxu0 }
 0x477   :  { %v9887_v6 = vpop.f32.mrb[42].mxu0  ;;  %v9900_v4 = vpop.permute.xlu1 %2563 }
 0x478   :  { %v2635_v7 = vsel %vm172_vm0, %v2591_v1, 0.0  ;;  %v2673_v9 = vmul.f32 %v2591_v1, %v9881_v62  ;;  %v2592_v12 = vmul.f32 %v9885_v5, %v9887_v6  ;;  %v6903_v22 = vpop.f32.mrb[43].mxu0  ;;  %11234 = vst [vmem:[#allocation23_spill] sm:$0xff] %v9900_v4 }
 0x479   :  { %v2636_v23 = vadd.f32 %v2635_v7, %v2634_v54 }
 0x47a   :  { %v2717_v28 = vsel %vm172_vm0, %v2673_v9, 0.0  ;;  %v2637_v29 = vsel %vm172_vm0, %v2592_v12, 0.0  ;;  %v2674_v30 = vmul.f32 %v2592_v12, %v9887_v6 }
 0x47b   :  { %v2718_v31 = vadd.f32 %v2717_v28, %v2716_v58  ;;  %v2638_v32 = vadd.f32 %v2637_v29, %v2636_v23 }
 0x47c   :  { %v2719_v34 = vsel %vm172_vm0, %v2674_v30, 0.0 }
 0x47d   :  { %v2720_v45 = vadd.f32 %v2719_v34, %v2718_v31  ;;  %v2405_v49 = vpop.f32.mrb[44].mxu0 }
 0x47e   :  { %v2593_v55 = vmul.f32 %v9897_v37, %v2405_v49  ;;  %v6906_v1 = vpop.f32.mrb[45].mxu0 }
 0x47f   :  { %v2408_v54 = vpop.f32.mrb[46].mxu0  ;;  %v9907_v1 = vpop.permute.xlu0 %2568 }
 0x480   :  { %v2639_v7 = vsel %vm172_vm0, %v2593_v55, 0.0  ;;  %v2675_v9 = vmul.f32 %v2593_v55, %v2405_v49  ;;  %v2594_v22 = vmul.f32 %v9900_v4, %v2408_v54  ;;  %v6907_v12 = vpop.f32.mrb[47].mxu0  ;;  %11235 = vst [vmem:[#allocation24_spill] sm:$0xff] %v9907_v1 }
 0x481   :  { %v2640_v58 = vadd.f32 %v2639_v7, %v2638_v32 }
 0x482   :  { %v2721_v23 = vsel %vm172_vm0, %v2675_v9, 0.0  ;;  %v2641_v28 = vsel %vm172_vm0, %v2594_v22, 0.0  ;;  %v2676_v29 = vmul.f32 %v2594_v22, %v2408_v54 }
 0x483   :  { %v2722_v30 = vadd.f32 %v2721_v23, %v2720_v45  ;;  %v2642_v31 = vadd.f32 %v2641_v28, %v2640_v58 }
 0x484   :  { %v2723_v34 = vsel %vm172_vm0, %v2676_v29, 0.0 }
 0x485   :  { %v2724_v0 = vadd.f32 %v2723_v34, %v2722_v30  ;;  %v2413_v56 = vpop.f32.mrb[48].mxu0 }
 0x486   :  { %v2595_v26 = vmul.f32 %v9907_v1, %v2413_v56  ;;  %v6910_v55 = vpop.f32.mrb[49].mxu0 }
 0x487   :  { %v2416_v11 = vpop.f32.mrb[50].mxu0 }
 0x488   :  { %v2643_v12 = vsel %vm172_vm0, %v2595_v26, 0.0  ;;  %v2677_v32 = vmul.f32 %v2595_v26, %v2413_v56  ;;  %v6911_v7 = vpop.f32.mrb[51].mxu0 }
 0x489   :  { %v2644_v9 = vadd.f32 %v2643_v12, %v2642_v31  ;;  %v2740_v12 = vlaneseq }
 0x48a   :  { %v2725_v50 = vsel %vm172_vm0, %v2677_v32, 0.0 }
 0x48b   :  { %v2645_v22 = vrot.slane %v2644_v9, 4  ;;  %v2726_v45 = vadd.f32 %v2725_v50, %v2724_v0  ;;  %v2741_v32 = vshrl.u32 %v2740_v12, 7  ;;  %v2444_v0 = vld [vmem:[%s11176_s3] sm:$0x1] }
 0x48d   :  { %v2646_v58 = vadd.f32 %v2645_v22, %v2644_v9  ;;  %v2727_v23 = vrot.slane %v2726_v45, 4  ;;  %v9915_v50 = vsub.s32 0, %v2741_v32 }
 0x48f   :  { %v2647_v28 = vrot.slane %v2646_v58, 2  ;;  %v2728_v29 = vadd.f32 %v2727_v23, %v2726_v45  ;;  %11236 = vst [vmem:[#allocation25_spill] sm:$0xff] %v9915_v50 }
 0x491   :  { %v2648_v36 = vadd.f32 %v2647_v28, %v2646_v58  ;;  %v2729_v30 = vrot.slane %v2728_v29, 2 }
 0x493   :  { %v2649_v34 = vrot.slane %v2648_v36, 1  ;;  %v2730_v14 = vadd.f32 %v2729_v30, %v2728_v29 }
 0x495   :  { %v2650_v8 = vadd.f32 %v2649_v34, %v2648_v36  ;;  %v2731_v55 = vrot.slane %v2730_v14, 1 }
 0x497   :  { %v2652_v11 = vmul.f32 0.0078125, %v2650_v8  ;;  %v2732_v62 = vadd.f32 %v2731_v55, %v2730_v14  ;;  %v2445_v8 = vld [vmem:[%s11177_s4] sm:$0x1] }
 0x499   :  { %v2733_v27 = vmul.f32 0.0078125, %v2732_v62  ;;  %v2734_v26 = vmul.f32 %v2652_v11, %v2652_v11 }
 0x49b   :  { %v2735_v7 = vsub.f32 %v2733_v27, %v2734_v26 }
 0x49d   :  { %v2736_v31 = vadd.f32 1e-05, %v2735_v7 }
 0x49f   :  { %8361 = vrsqrt.f32 %v2736_v31 }
 0x4a9   :  { %v8362_v9 = vpop.eup %8361 }
 0x4aa   :  { %v2738_v22 = vmul.f32 %v8362_v9, %v2444_v0 }
 0x4ac   :  { %v9921_v14 = vrot.slane %v2738_v22, %v9915_v50  ;;  %v2770_v36 = vmul.f32 %v2738_v22, %v2652_v11 }
 0x4ae   :  { %v2766_v27 = vmul.f32 %v9921_v14, %v9887_v6  ;;  %v2767_v62 = vmul.f32 %v9921_v14, %v2405_v49  ;;  %v2768_v45 = vmul.f32 %v9921_v14, %v2408_v54  ;;  %v2769_v58 = vmul.f32 %v9921_v14, %v2413_v56 }
 0x4af   :  { %v2771_v23 = vsub.f32 %v2445_v8, %v2770_v36  ;;  %v2745_v28 = vmul.f32 %v9921_v14, %v9685_v43  ;;  %v2746_v29 = vmul.f32 %v9921_v14, %v9691_v47  ;;  %v2747_v30 = vmul.f32 %v9921_v14, %v9703_v59 }
 0x4b0   :  { %v2748_v34 = vmul.f32 %v9921_v14, %v9709_v63  ;;  %v2749_v6 = vmul.f32 %v9921_v14, %v9724_v15  ;;  %v2750_v49 = vmul.f32 %v9921_v14, %v9734_v20  ;;  %v2751_v56 = vmul.f32 %v9921_v14, %v9750_v35 }
 0x4b1   :  { %v9943_v43 = vrot.slane %v2771_v23, %v9915_v50  ;;  %v2752_v47 = vmul.f32 %v9921_v14, %v9760_v40  ;;  %v2753_v59 = vmul.f32 %v9921_v14, %v9773_v61  ;;  %v2754_v63 = vmul.f32 %v9921_v14, %v9779_v3 }
 0x4b2   :  { %v2755_v15 = vmul.f32 %v9921_v14, %v9791_v21  ;;  %v2756_v20 = vmul.f32 %v9921_v14, %v9797_v25  ;;  %v2757_v35 = vmul.f32 %v9921_v14, %v9809_v46  ;;  %v9959_v54 = vmul.f32 %v9921_v14, %v9815_v52 }
 0x4b3   :  { %v2799_v40 = vadd.f32 %v9943_v43, %v2766_v27  ;;  %v2800_v61 = vadd.f32 %v9943_v43, %v2767_v62  ;;  %v2801_v55 = vadd.f32 %v9943_v43, %v2768_v45  ;;  %v2802_v3 = vadd.f32 %v9943_v43, %v2769_v58 }
 0x4b4   :  { %v2778_v21 = vadd.f32 %v9943_v43, %v2745_v28  ;;  %v2779_v11 = vadd.f32 %v9943_v43, %v2746_v29  ;;  %v2780_v25 = vadd.f32 %v9943_v43, %v2747_v30  ;;  %v2781_v46 = vadd.f32 %v9943_v43, %v2748_v34 }
 0x4b5   :  { %v2824_v26 = vmax.f32 %v2799_v40, 0.0  ;;  %v2825_v7 = vmax.f32 %v2800_v61, 0.0  ;;  %v2826_v52 = vmax.f32 %v2801_v55, 0.0  ;;  %v2827_v31 = vmax.f32 %v2802_v3, 0.0 }
 0x4b6   :  { %v2803_v12 = vmax.f32 %v2778_v21, 0.0  ;;  %v2804_v32 = vmax.f32 %v2779_v11, 0.0  ;;  %v2805_v0 = vmax.f32 %v2780_v25, 0.0  ;;  %v2782_v9 = vadd.f32 %v9943_v43, %v2749_v6 }
 0x4b7   :  { %v2849_v22 = vmul.f32 %v2824_v26, %v9885_v5  ;;  %v2850_v8 = vmul.f32 %v2825_v7, %v9897_v37  ;;  %v2851_v36 = vmul.f32 %v2826_v52, %v9900_v4  ;;  %v2852_v27 = vmul.f32 %v2827_v31, %v9907_v1 }
 0x4b8   :  { %v2828_v62 = vmul.f32 %v2803_v12, %v9683_v42  ;;  %v2829_v45 = vmul.f32 %v2804_v32, %v9687_v44  ;;  %v2830_v58 = vmul.f32 %v2805_v0, %v9693_v48  ;;  %v2806_v23 = vmax.f32 %v2781_v46, 0.0  ;;  %v2953_v32 = vld [vmem:[#allocation2 + $0x1] sm:$0xff] }
 0x4b9   :  { %2903 = vst.msk [vmem:[#allocation2 + $0xb3] sm:$0xff] %vm172_vm0, %v2849_v22  ;;  %2904 = vst.msk [vmem:[#allocation2 + $0xbb] sm:$0xff] %vm172_vm0, %v2850_v8  ;;  %v2807_v28 = vmax.f32 %v2782_v9, 0.0  ;;  %v2783_v29 = vadd.f32 %v9943_v43, %v2750_v49  ;;  %v2784_v30 = vadd.f32 %v9943_v43, %v2751_v56  ;;  %v2785_v34 = vadd.f32 %v9943_v43, %v2752_v47 }
 0x4ba   :  { %2905 = vst.msk [vmem:[#allocation2 + $0xc3] sm:$0xff] %vm172_vm0, %v2851_v36  ;;  %2906 = vst.msk [vmem:[#allocation2 + $0xcb] sm:$0xff] %vm172_vm0, %v2852_v27  ;;  %v2831_v6 = vmul.f32 %v2806_v23, %v9705_v60  ;;  %v2786_v40 = vadd.f32 %v9943_v43, %v2753_v59  ;;  %v2787_v61 = vadd.f32 %v9943_v43, %v2754_v63 }
 0x4bb   :  { %2882 = vst.msk [vmem:[#allocation2 + $0xb] sm:$0xff] %vm172_vm0, %v2828_v62  ;;  %2883 = vst.msk [vmem:[#allocation2 + $0x13] sm:$0xff] %vm172_vm0, %v2829_v45  ;;  %v2788_v55 = vadd.f32 %v9943_v43, %v2755_v15  ;;  %v2832_v49 = vmul.f32 %v2807_v28, %v9722_v13  ;;  %v2808_v3 = vmax.f32 %v2783_v29, 0.0  ;;  %v2809_v56 = vmax.f32 %v2784_v30, 0.0 }
 0x4bc   :  { %2884 = vst.msk [vmem:[#allocation2 + $0x1b] sm:$0xff] %vm172_vm0, %v2830_v58  ;;  %v2810_v21 = vmax.f32 %v2785_v34, 0.0  ;;  %2885 = vst.msk [vmem:[#allocation2 + $0x23] sm:$0xff] %vm172_vm0, %v2831_v6  ;;  %v2811_v47 = vmax.f32 %v2786_v40, 0.0  ;;  %v2812_v11 = vmax.f32 %v2787_v61, 0.0  ;;  %v2789_v46 = vadd.f32 %v9943_v43, %v2756_v20  ;;  %v11237_v40 = vld [vmem:[#allocation18_spill] sm:$0xff] }
 0x4bd   :  { %v2813_v25 = vmax.f32 %v2788_v55, 0.0  ;;  %2886 = vst.msk [vmem:[#allocation2 + $0x2b] sm:$0xff] %vm172_vm0, %v2832_v49  ;;  %v2833_v59 = vmul.f32 %v2808_v3, %v9732_v19  ;;  %v2834_v63 = vmul.f32 %v2809_v56, %v9748_v33  ;;  %v2790_v26 = vadd.f32 %v9943_v43, %v2757_v35  ;;  %v11238_v55 = vld [vmem:[#allocation20_spill] sm:$0xff] }
 0x4be   :  { %v2835_v15 = vmul.f32 %v2810_v21, %v9758_v39  ;;  %v2836_v7 = vmul.f32 %v2811_v47, %v9771_v57  ;;  %v2837_v52 = vmul.f32 %v2812_v11, %v9777_v2  ;;  %v2814_v12 = vmax.f32 %v2789_v46, 0.0  ;;  %v8330_v56 = vld [vmem:[%s11175_s5 + $0x8] sm:$0xff]   ;;  %v11241_v11 = vld [vmem:[#allocation13_spill] sm:$0xff] }
 0x4bf   :  { %v2838_v31 = vmul.f32 %v2813_v25, %v9789_v17  ;;  %2887 = vst.msk [vmem:[#allocation2 + $0x33] sm:$0xff] %vm172_vm0, %v2833_v59  ;;  %2888 = vst.msk [vmem:[#allocation2 + $0x3b] sm:$0xff] %vm172_vm0, %v2834_v63  ;;  %v2815_v20 = vmax.f32 %v2790_v26, 0.0  ;;  %v2759_v0 = vmul.f32 %v9921_v14, %v9827_v10  ;;  %v2791_v35 = vadd.f32 %v9943_v43, %v9959_v54  ;;  %v11240_v21 = vld [vmem:[#allocation12_spill] sm:$0xff]  ;;  %v11242_v59 = vld [vmem:[#allocation14_spill] sm:$0xff] }
 0x4c0   :  { %2889 = vst.msk [vmem:[#allocation2 + $0x43] sm:$0xff] %vm172_vm0, %v2835_v15  ;;  %v2760_v9 = vmul.f32 %v9921_v14, %v9833_v16  ;;  %2890 = vst.msk [vmem:[#allocation2 + $0x4b] sm:$0xff] %vm172_vm0, %v2836_v7  ;;  %v2839_v22 = vmul.f32 %v2814_v12, %v9795_v24  ;;  %v2761_v8 = vmul.f32 %v9921_v14, %v9845_v38  ;;  %v8329_v16 = vld [vmem:[%s11175_s5] sm:$0xff]   ;;  %v11239_v3 = vmov 0.0   ;;  %v11244_v12 = vld [vmem:[#allocation16_spill] sm:$0xff] }
 0x4c1   :  { %2891 = vst.msk [vmem:[#allocation2 + $0x53] sm:$0xff] %vm172_vm0, %v2837_v52  ;;  %2892 = vst.msk [vmem:[#allocation2 + $0x5b] sm:$0xff] %vm172_vm0, %v2838_v31  ;;  %v2762_v10 = vmul.f32 %v9921_v14, %v9851_v53  ;;  %v2763_v54 = vmul.f32 %v9921_v14, %v9863_v18  ;;  %v2840_v27 = vmul.f32 %v2815_v20, %v9807_v41  ;;  %v2816_v45 = vmax.f32 %v2791_v35, 0.0  ;;  %v10212_v41 = vld [vmem:[#allocation2 + $0xbc] sm:$0xff]  ;;  %v10216_v24 = vld [vmem:[#allocation2 + $0xc4] sm:$0xff] }
 0x4c2   :  { %v2954_v36 = vld [vmem:[#allocation2 + $0x9] sm:$0xff]  ;;  %v2792_v62 = vadd.f32 %v9943_v43, %v2759_v0  ;;  %v2793_v58 = vadd.f32 %v9943_v43, %v2760_v9  ;;  %2893 = vst.msk [vmem:[#allocation2 + $0x63] sm:$0xff] %vm172_vm0, %v2839_v22  ;;  %v2794_v38 = vadd.f32 %v9943_v43, %v2761_v8  ;;  %v2764_v61 = vmul.f32 %v9921_v14, %v11237_v40  ;;  %v2955_v52 = vld [vmem:[#allocation2 + $0x11] sm:$0xff] }
 0x4c3   :  { %v2978_v23 = vpack.c.bf16 %v2954_v36, %v2953_v32  ;;  %v2795_v53 = vadd.f32 %v9943_v43, %v2762_v10  ;;  %2894 = vst.msk [vmem:[#allocation2 + $0x6b] sm:$0xff] %vm172_vm0, %v2840_v27  ;;  %v2841_v28 = vmul.f32 %v2816_v45, %v9813_v51  ;;  %v2796_v30 = vadd.f32 %v9943_v43, %v2763_v54  ;;  %v2956_v31 = vld [vmem:[#allocation2 + $0x19] sm:$0xff]  ;;  %v10056_v35 = vld [vmem:[#allocation2 + $0xa] sm:$0xff]  ;;  %v10069_v27 = vld [vmem:[#allocation2 + $0x22] sm:$0xff] }
 0x4c4   :  { %v2817_v18 = vmax.f32 %v2792_v62, 0.0  ;;  %v2818_v29 = vmax.f32 %v2793_v58, 0.0  ;;  %v2819_v34 = vmax.f32 %v2794_v38, 0.0  ;;  %v2765_v49 = vmul.f32 %v9921_v14, %v11238_v55  ;;  %v11243_v14 = vld [vmem:[#allocation15_spill] sm:$0xff]  ;;  %v10058_v9 = vld [vmem:[#allocation2 + $0x12] sm:$0xff]  ;;  %v10071_v62 = vld [vmem:[#allocation2 + $0x2a] sm:$0xff] }
 0x4c5   :  { %6921 = vmatmul.mubr.msk.bf16.vlgmr.msra.gmra.mrb[0].mxu1 %vm172_vm0, %v2978_v23  ;;  %v2820_v6 = vmax.f32 %v2795_v53, 0.0  ;;  %2895 = vst.msk [vmem:[#allocation2 + $0x73] sm:$0xff] %vm172_vm0, %v2841_v28  ;;  %v2821_v46 = vmax.f32 %v2796_v30, 0.0  ;;  %v2797_v26 = vadd.f32 %v9943_v43, %v2764_v61  ;;  %v10064_v22 = vld [vmem:[#allocation2 + $0x1a] sm:$0xff]  ;;  %v2979_v8 = vpack.c.bf16 %v2956_v31, %v2955_v52  ;;  %v11245_v10 = vld [vmem:[#allocation17_spill] sm:$0xff]  ;;  %v10155_v28 = vld [vmem:[#allocation2 + $0x24] sm:$0xff] }
 0x4c6   :  { %6973 = vmatpush3.bf16.msra.mxu1 %v8329_v16  ;;  %6924 = vmatprep.mubr.msk.bf16.mxu1 %vm8366_vm1, %v11239_v3  ;;  %v2842_v47 = vmul.f32 %v2817_v18, %v11240_v21  ;;  %v2843_v25 = vmul.f32 %v2818_v29, %v11241_v11  ;;  %v2844_v63 = vmul.f32 %v2819_v34, %v11242_v59  ;;  %v11246_v36 = vld [vmem:[#allocation19_spill] sm:$0xff]  ;;  %v10078_v58 = vld [vmem:[#allocation2 + $0x32] sm:$0xff]  ;;  %v2958_v34 = vld [vmem:[#allocation2 + $0x29] sm:$0xff] }
 0x4c7   :  { %6974 = vmatprep.subr.bf16.mxu1 %v11239_v3  ;;  %v2845_v15 = vmul.f32 %v2820_v6, %v11243_v14  ;;  %v2798_v7 = vadd.f32 %v9943_v43, %v2765_v49  ;;  %v2846_v32 = vmul.f32 %v2821_v46, %v11244_v12  ;;  %v2822_v20 = vmax.f32 %v2797_v26, 0.0  ;;  %v8331_v43 = vld [vmem:[%s11175_s5 + $0x10] sm:$0xff]   ;;  %v8332_v38 = vld [vmem:[%s11175_s5 + $0x18] sm:$0xff]   ;;  %v10089_v18 = vld [vmem:[#allocation2 + $0x42] sm:$0xff]  ;;  %2881 = vst.msk [vmem:[#allocation2 + $0xd8] sm:$0x3f] %vm2880_vm2, %v11239_v3 }
 0x4c8   :  { %2896 = vst.msk [vmem:[#allocation2 + $0x7b] sm:$0xff] %vm172_vm0, %v2842_v47  ;;  %2897 = vst.msk [vmem:[#allocation2 + $0x83] sm:$0xff] %vm172_vm0, %v2843_v25  ;;  %v10087_v53 = vld [vmem:[#allocation2 + $0x3a] sm:$0xff]  ;;  %v10096_v6 = vld [vmem:[#allocation2 + $0x4a] sm:$0xff] }
 0x4c9   :  { %2898 = vst.msk [vmem:[#allocation2 + $0x8b] sm:$0xff] %vm172_vm0, %v2844_v63  ;;  %2899 = vst.msk [vmem:[#allocation2 + $0x93] sm:$0xff] %vm172_vm0, %v2845_v15  ;;  %v2823_v0 = vmax.f32 %v2798_v7, 0.0  ;;  %v2847_v54 = vmul.f32 %v2822_v20, %v11245_v10  ;;  %v2957_v30 = vld [vmem:[#allocation2 + $0x21] sm:$0xff]  ;;  %v10098_v40 = vld [vmem:[#allocation2 + $0x52] sm:$0xff] }
 0x4ca   :  { %6975 = vmatpush3.bf16.msra.mxu1 %v8330_v56  ;;  %2900 = vst.msk [vmem:[#allocation2 + $0x9b] sm:$0xff] %vm172_vm0, %v2846_v32  ;;  %v10100_v61 = vld [vmem:[#allocation2 + $0x5a] sm:$0xff]  ;;  %v2980_v55 = vpack.c.bf16 %v2958_v34, %v2957_v30  ;;  %v10103_v49 = vld [vmem:[#allocation2 + $0x62] sm:$0xff]  ;;  %v10105_v56 = vld [vmem:[#allocation2 + $0x6a] sm:$0xff] }
 0x4cb   :  { %6976 = vmatprep.subr.bf16.mxu1 %v11239_v3  ;;  %v2848_v16 = vmul.f32 %v2823_v0, %v11246_v36  ;;  %2901 = vst.msk [vmem:[#allocation2 + $0xa3] sm:$0xff] %vm172_vm0, %v2847_v54  ;;  %v2959_v15 = vld [vmem:[#allocation2 + $0x31] sm:$0xff]  ;;  %v2960_v26 = vld [vmem:[#allocation2 + $0x39] sm:$0xff]  ;;  %v10142_v34 = vld [vmem:[#allocation2 + $0xc2] sm:$0xff] }
 0x4cc   :  { %v10107_v47 = vld [vmem:[#allocation2 + $0x72] sm:$0xff]  ;;  %v2981_v63 = vpack.c.bf16 %v2960_v26, %v2959_v15  ;;  %v2961_v46 = vld [vmem:[#allocation2 + $0x41] sm:$0xff]  ;;  %v2962_v25 = vld [vmem:[#allocation2 + $0x49] sm:$0xff] }
 0x4cd   :  { %6925 = vmatmul.mubr.msk.bf16.gmra.mrb[4].mxu1 %vm172_vm0, %v2979_v8  ;;  %2902 = vst.msk [vmem:[#allocation2 + $0xab] sm:$0xff] %vm172_vm0, %v2848_v16  ;;  %v10136_v16 = vld [vmem:[#allocation2 + $0xba] sm:$0xff]  ;;  %v2982_v29 = vpack.c.bf16 %v2962_v25, %v2961_v46  ;;  %v10157_v23 = vld [vmem:[#allocation2 + $0x2c] sm:$0xff]  ;;  %v10163_v15 = vld [vmem:[#allocation2 + $0x44] sm:$0xff] }
 0x4ce   :  { %6928 = vmatprep.mubr.msk.bf16.mxu1 %vm8366_vm1, %v11239_v3  ;;  %6977 = vmatpush3.bf16.msra.mxu1 %v8331_v43  ;;  %v10153_v30 = vld [vmem:[#allocation2 + $0x1c] sm:$0xff]  ;;  %v10170_v25 = vld [vmem:[#allocation2 + $0x4c] sm:$0xff]  ;;  %v10172_v46 = vld [vmem:[#allocation2 + $0x54] sm:$0xff] }
 0x4cf   :  { %6978 = vmatprep.subr.bf16.mxu1 %v11239_v3  ;;  %v10118_v7 = vld [vmem:[#allocation2 + $0x7a] sm:$0xff]  ;;  %v10120_v52 = vld [vmem:[#allocation2 + $0x82] sm:$0xff]  ;;  %v2963_v1 = vld [vmem:[#allocation2 + $0x51] sm:$0xff] }
 0x4d0   :  { %v10122_v31 = vld [vmem:[#allocation2 + $0x8a] sm:$0xff]  ;;  %v10124_v32 = vld [vmem:[#allocation2 + $0x92] sm:$0xff]  ;;  %v10161_v43 = vld [vmem:[#allocation2 + $0x3c] sm:$0xff] }
 0x4d1   :  { %v10126_v20 = vld [vmem:[#allocation2 + $0x9a] sm:$0xff]  ;;  %v10182_v37 = vld [vmem:[#allocation2 + $0x6c] sm:$0xff]  ;;  %v10192_v50 = vld [vmem:[#allocation2 + $0x84] sm:$0xff] }
 0x4d2   :  { %6979 = vmatpush3.bf16.msra.mxu1 %v8332_v38  ;;  %v10128_v0 = vld [vmem:[#allocation2 + $0xa2] sm:$0xff]  ;;  %v10151_v38 = vld [vmem:[#allocation2 + $0x14] sm:$0xff]  ;;  %v10194_v10 = vld [vmem:[#allocation2 + $0x8c] sm:$0xff] }
 0x4d3   :  { %7032 = vmatprep.subr.bf16.mxu1 %v11239_v3  ;;  %v10174_v45 = vld [vmem:[#allocation2 + $0x5c] sm:$0xff]  ;;  %v10184_v26 = vld [vmem:[#allocation2 + $0x74] sm:$0xff]  ;;  %v10218_v17 = vld [vmem:[#allocation2 + $0xcc] sm:$0xff] }
 0x4d4   :  { %v10132_v8 = vld [vmem:[#allocation2 + $0xaa] sm:$0xff]  ;;  %v10134_v54 = vld [vmem:[#allocation2 + $0xb2] sm:$0xff]  ;;  %v10190_v36 = vld [vmem:[#allocation2 + $0x7c] sm:$0xff] }
 0x4d5   :  { %6929 = vmatmul.mubr.msk.bf16.gmra.mrb[8].mxu1 %vm172_vm0, %v2980_v55  ;;  %v10159_v55 = vld [vmem:[#allocation2 + $0x34] sm:$0xff]  ;;  %v10200_v59 = vld [vmem:[#allocation2 + $0x9c] sm:$0xff]  ;;  %v10202_v11 = vld [vmem:[#allocation2 + $0xa4] sm:$0xff] }
 0x4d6   :  { %6932 = vmatprep.mubr.msk.bf16.mxu1 %vm8366_vm1, %v11239_v3  ;;  %v2964_v4 = vld [vmem:[#allocation2 + $0x59] sm:$0xff]  ;;  %v10208_v21 = vld [vmem:[#allocation2 + $0xac] sm:$0xff]  ;;  %v2965_v12 = vld [vmem:[#allocation2 + $0x61] sm:$0xff] }
 0x4d7   :  { %v10198_v14 = vld [vmem:[#allocation2 + $0x94] sm:$0xff]  ;;  %v2983_v5 = vpack.c.bf16 %v2964_v4, %v2963_v1  ;;  %v2966_v39 = vld [vmem:[#allocation2 + $0x69] sm:$0xff] }
 0x4d8   :  { %v10210_v51 = vld [vmem:[#allocation2 + $0xb4] sm:$0xff]  ;;  %v2984_v33 = vpack.c.bf16 %v2966_v39, %v2965_v12  ;;  %v2970_v4 = vld [vmem:[#allocation2 + $0x89] sm:$0xff] }
 0x4d9   :  { %v2967_v2 = vld [vmem:[#allocation2 + $0x71] sm:$0xff]  ;;  %v2968_v19 = vld [vmem:[#allocation2 + $0x79] sm:$0xff] }
 0x4da   :  { %v2972_v39 = vld [vmem:[#allocation2 + $0x99] sm:$0xff] }
 0x4dd   :  { %6933 = vmatmul.mubr.msk.bf16.gmra.mrb[12].mxu1 %vm172_vm0, %v2981_v63  ;;  %v10180_v63 = vld [vmem:[#allocation2 + $0x64] sm:$0xff] }
 0x4de   :  { %6936 = vmatprep.mubr.msk.bf16.mxu1 %vm8366_vm1, %v11239_v3 }
 0x4e5   :  { %6937 = vmatmul.mubr.msk.bf16.gmra.mrb[16].mxu1 %vm172_vm0, %v2982_v29  ;;  %v2985_v29 = vpack.c.bf16 %v2968_v19, %v2967_v2  ;;  %v2973_v19 = vld [vmem:[#allocation2 + $0xa1] sm:$0xff]  ;;  %v2974_v2 = vld [vmem:[#allocation2 + $0xa9] sm:$0xff] }
 0x4e6   :  { %6940 = vmatprep.mubr.msk.bf16.mxu1 %vm8366_vm1, %v11239_v3 }
 0x4ed   :  { %6941 = vmatmul.mubr.msk.bf16.gmra.mrb[20].mxu1 %vm172_vm0, %v2983_v5  ;;  %v2969_v5 = vld [vmem:[#allocation2 + $0x81] sm:$0xff] }
 0x4ee   :  { %6944 = vmatprep.mubr.msk.bf16.mxu1 %vm8366_vm1, %v11239_v3  ;;  %v2986_v1 = vpack.c.bf16 %v2970_v4, %v2969_v5  ;;  %v2975_v5 = vld [vmem:[#allocation2 + $0xb1] sm:$0xff]  ;;  %v2976_v4 = vld [vmem:[#allocation2 + $0xb9] sm:$0xff] }
 0x4f5   :  { %6945 = vmatmul.mubr.msk.bf16.gmra.mrb[24].mxu1 %vm172_vm0, %v2984_v33  ;;  %v2971_v33 = vld [vmem:[#allocation2 + $0x91] sm:$0xff] }
 0x4f6   :  { %6948 = vmatprep.mubr.msk.bf16.mxu1 %vm8366_vm1, %v11239_v3  ;;  %v2987_v12 = vpack.c.bf16 %v2972_v39, %v2971_v33  ;;  %v2977_v33 = vld [vmem:[#allocation2 + $0xc1] sm:$0xff] }
 0x4f7   :  { %v2990_v39 = vpack.c.bf16 %v2977_v33, %v2977_v33  ;;  %v8335_v33 = vld [vmem:[%s11175_s5 + $0x50] sm:$0xff]  }
 0x4fd   :  { %6949 = vmatmul.mubr.msk.bf16.gmra.mrb[28].mxu1 %vm172_vm0, %v2985_v29  ;;  %v2988_v29 = vpack.c.bf16 %v2974_v2, %v2973_v19  ;;  %v2908_v19 = vld [vmem:[#allocation2 + $0x8] sm:$0xff]  ;;  %v8333_v2 = vld [vmem:[%s11175_s5 + $0x40] sm:$0xff]  }
 0x4fe   :  { %6952 = vmatprep.mubr.msk.bf16.mxu1 %vm8366_vm1, %v11239_v3 }
 0x505   :  { %6953 = vmatmul.mubr.msk.bf16.gmra.mrb[32].mxu1 %vm172_vm0, %v2986_v1  ;;  %v2989_v1 = vpack.c.bf16 %v2976_v4, %v2975_v5  ;;  %v8334_v5 = vld [vmem:[%s11175_s5 + $0x48] sm:$0xff]   ;;  %v2909_v4 = vld [vmem:[#allocation2 + $0x10] sm:$0xff] }
 0x506   :  { %6956 = vmatprep.mubr.msk.bf16.mxu1 %vm8366_vm1, %v11239_v3 }
 0x50d   :  { %6957 = vmatmul.mubr.msk.bf16.gmra.mrb[36].mxu1 %vm172_vm0, %v2987_v12  ;;  %v2907_v12 = vld [vmem:[#allocation2] sm:$0xff] }
 0x50e   :  { %6960 = vmatprep.mubr.msk.bf16.mxu1 %vm8366_vm1, %v11239_v3 }
 0x515   :  { %6961 = vmatmul.mubr.msk.bf16.gmra.mrb[40].mxu1 %vm172_vm0, %v2988_v29  ;;  %v2932_v29 = vpack.c.bf16 %v2908_v19, %v2907_v12  ;;  %v8336_v12 = vld [vmem:[%s11175_s5 + $0x58] sm:$0xff]   ;;  %v2911_v19 = vld [vmem:[#allocation2 + $0x20] sm:$0xff] }
 0x516   :  { %6964 = vmatprep.mubr.msk.bf16.mxu1 %vm8366_vm1, %v11239_v3 }
 0x51d   :  { %6965 = vmatmul.mubr.msk.bf16.gmra.mrb[44].mxu1 %vm172_vm0, %v2989_v1  ;;  %v2910_v1 = vld [vmem:[#allocation2 + $0x18] sm:$0xff] }
 0x51e   :  { %6968 = vmatprep.mubr.msk.bf16.mxu1 %vm8366_vm1, %v11239_v3 }
 0x525   :  { %6969 = vmatmul.mubr.msk.bf16.gmra.mrb[48].mxu1 %vm172_vm0, %v2990_v39  ;;  %v2933_v39 = vpack.c.bf16 %v2910_v1, %v2909_v4  ;;  %v2914_v4 = vld [vmem:[#allocation2 + $0x38] sm:$0xff] }
 0x526   :  { %6980 = vmatprep.mubr.msk.bf16.mxu1 %vm8366_vm1, %v11239_v3 }
 0x52d   :  { %6981 = vmatmul.mubr.msk.bf16.vlgmr.msra.gmra.mrb[0].mxu1 %vm172_vm0, %v2932_v29 }
 0x52e   :  { %7033 = vmatpush3.bf16.msra.mxu1 %v8333_v2  ;;  %6984 = vmatprep.mubr.msk.bf16.mxu1 %vm8366_vm1, %v11239_v3  ;;  %v2912_v2 = vld [vmem:[#allocation2 + $0x28] sm:$0xff] }
 0x52f   :  { %7034 = vmatprep.subr.bf16.mxu1 %v11239_v3  ;;  %v2934_v29 = vpack.c.bf16 %v2912_v2, %v2911_v19  ;;  %v2918_v19 = vld [vmem:[#allocation2 + $0x58] sm:$0xff] }
 0x532   :  { %7035 = vmatpush3.bf16.msra.mxu1 %v8334_v5  ;;  %v2913_v5 = vld [vmem:[#allocation2 + $0x30] sm:$0xff] }
 0x533   :  { %7036 = vmatprep.subr.bf16.mxu1 %v11239_v3  ;;  %v2935_v1 = vpack.c.bf16 %v2914_v4, %v2913_v5  ;;  %v2920_v5 = vld [vmem:[#allocation2 + $0x68] sm:$0xff] }
 0x535   :  { %6985 = vmatmul.mubr.msk.bf16.gmra.mrb[4].mxu1 %vm172_vm0, %v2933_v39  ;;  %v2916_v39 = vld [vmem:[#allocation2 + $0x48] sm:$0xff] }
 0x536   :  { %6988 = vmatprep.mubr.msk.bf16.mxu1 %vm8366_vm1, %v11239_v3  ;;  %7037 = vmatpush3.bf16.msra.mxu1 %v8335_v33  ;;  %v2915_v33 = vld [vmem:[#allocation2 + $0x40] sm:$0xff] }
 0x537   :  { %7038 = vmatprep.subr.bf16.mxu1 %v11239_v3  ;;  %v2936_v57 = vpack.c.bf16 %v2916_v39, %v2915_v33  ;;  %v2923_v39 = vld [vmem:[#allocation2 + $0x80] sm:$0xff] }
 0x53a   :  { %7039 = vmatpush3.bf16.msra.mxu1 %v8336_v12  ;;  %v2917_v12 = vld [vmem:[#allocation2 + $0x50] sm:$0xff] }
 0x53b   :  { %7092 = vmatprep.subr.bf16.mxu1 %v11239_v3  ;;  %v2937_v2 = vpack.c.bf16 %v2918_v19, %v2917_v12  ;;  %v2924_v12 = vld [vmem:[#allocation2 + $0x88] sm:$0xff] }
 0x53c   :  { %v2940_v19 = vpack.c.bf16 %v2924_v12, %v2923_v39  ;;  %v2930_v39 = vld [vmem:[#allocation2 + $0xb8] sm:$0xff] }
 0x53d   :  { %6989 = vmatmul.mubr.msk.bf16.gmra.mrb[8].mxu1 %vm172_vm0, %v2934_v29  ;;  %v2919_v29 = vld [vmem:[#allocation2 + $0x60] sm:$0xff] }
 0x53e   :  { %6992 = vmatprep.mubr.msk.bf16.mxu1 %vm8366_vm1, %v11239_v3  ;;  %v2938_v4 = vpack.c.bf16 %v2920_v5, %v2919_v29  ;;  %v2926_v29 = vld [vmem:[#allocation2 + $0x98] sm:$0xff] }
 0x545   :  { %6993 = vmatmul.mubr.msk.bf16.gmra.mrb[12].mxu1 %vm172_vm0, %v2935_v1  ;;  %v2922_v1 = vld [vmem:[#allocation2 + $0x78] sm:$0xff] }
 0x546   :  { %6996 = vmatprep.mubr.msk.bf16.mxu1 %vm8366_vm1, %v11239_v3 }
 0x54d   :  { %6997 = vmatmul.mubr.msk.bf16.gmra.mrb[16].mxu1 %vm172_vm0, %v2936_v57  ;;  %v2921_v57 = vld [vmem:[#allocation2 + $0x70] sm:$0xff] }
 0x54e   :  { %7000 = vmatprep.mubr.msk.bf16.mxu1 %vm8366_vm1, %v11239_v3  ;;  %v2939_v33 = vpack.c.bf16 %v2922_v1, %v2921_v57  ;;  %v2928_v57 = vld [vmem:[#allocation2 + $0xa8] sm:$0xff] }
 0x555   :  { %7001 = vmatmul.mubr.msk.bf16.gmra.mrb[20].mxu1 %vm172_vm0, %v2937_v2  ;;  %v2925_v2 = vld [vmem:[#allocation2 + $0x90] sm:$0xff] }
 0x556   :  { %7004 = vmatprep.mubr.msk.bf16.mxu1 %vm8366_vm1, %v11239_v3  ;;  %v2941_v5 = vpack.c.bf16 %v2926_v29, %v2925_v2  ;;  %v3398_v29 = vld [vmem:[#allocation2 + $0x2] sm:$0xff] }
 0x55d   :  { %7005 = vmatmul.mubr.msk.bf16.gmra.mrb[24].mxu1 %vm172_vm0, %v2938_v4  ;;  %v2927_v4 = vld [vmem:[#allocation2 + $0xa0] sm:$0xff] }
 0x55e   :  { %7008 = vmatprep.mubr.msk.bf16.mxu1 %vm8366_vm1, %v11239_v3  ;;  %v2942_v1 = vpack.c.bf16 %v2928_v57, %v2927_v4  ;;  %v3423_v4 = vpack.c.bf16 %v10056_v35, %v3398_v29  ;;  %v8338_v57 = vld [vmem:[%s11175_s5 + $0x68] sm:$0xff]   ;;  %v3428_v29 = vpack.c.bf16 %v10100_v61, %v10098_v40 }
 0x565   :  { %7009 = vmatmul.mubr.msk.bf16.gmra.mrb[28].mxu1 %vm172_vm0, %v2939_v33  ;;  %v2929_v33 = vld [vmem:[#allocation2 + $0xb0] sm:$0xff] }
 0x566   :  { %7012 = vmatprep.mubr.msk.bf16.mxu1 %vm8366_vm1, %v11239_v3  ;;  %v2943_v12 = vpack.c.bf16 %v2930_v39, %v2929_v33  ;;  %v3424_v33 = vpack.c.bf16 %v10064_v22, %v10058_v9  ;;  %v8340_v39 = vld [vmem:[%s11175_s5 + $0x78] sm:$0xff]  }
 0x56d   :  { %7013 = vmatmul.mubr.msk.bf16.gmra.mrb[32].mxu1 %vm172_vm0, %v2940_v19  ;;  %v2931_v19 = vld [vmem:[#allocation2 + $0xc0] sm:$0xff] }
 0x56e   :  { %7016 = vmatprep.mubr.msk.bf16.mxu1 %vm8366_vm1, %v11239_v3  ;;  %v2944_v2 = vpack.c.bf16 %v2931_v19, %v2931_v19  ;;  %v3426_v19 = vpack.c.bf16 %v10087_v53, %v10078_v58 }
 0x575   :  { %7017 = vmatmul.mubr.msk.bf16.gmra.mrb[36].mxu1 %vm172_vm0, %v2941_v5  ;;  %v8337_v5 = vld [vmem:[%s11175_s5 + $0x60] sm:$0xff]  }
 0x576   :  { %7020 = vmatprep.mubr.msk.bf16.mxu1 %vm8366_vm1, %v11239_v3 }
 0x57d   :  { %7021 = vmatmul.mubr.msk.bf16.gmra.mrb[40].mxu1 %vm172_vm0, %v2942_v1  ;;  %v8339_v1 = vld [vmem:[%s11175_s5 + $0x70] sm:$0xff]  }
 0x57e   :  { %7024 = vmatprep.mubr.msk.bf16.mxu1 %vm8366_vm1, %v11239_v3 }
 0x585   :  { %7025 = vmatmul.mubr.msk.bf16.gmra.mrb[44].mxu1 %vm172_vm0, %v2943_v12  ;;  %v3425_v12 = vpack.c.bf16 %v10071_v62, %v10069_v27 }
 0x586   :  { %7028 = vmatprep.mubr.msk.bf16.mxu1 %vm8366_vm1, %v11239_v3 }
 0x58d   :  { %7029 = vmatmul.mubr.msk.bf16.gmra.mrb[48].mxu1 %vm172_vm0, %v2944_v2  ;;  %v3427_v2 = vpack.c.bf16 %v10096_v6, %v10089_v18 }
 0x58e   :  { %7040 = vmatprep.mubr.msk.bf16.mxu1 %vm8366_vm1, %v11239_v3 }
 0x595   :  { %7041 = vmatmul.mubr.msk.bf16.vlgmr.msra.gmra.mrb[0].mxu1 %vm172_vm0, %v3423_v4  ;;  %v3430_v4 = vpack.c.bf16 %v10118_v7, %v10107_v47 }
 0x596   :  { %7093 = vmatpush3.bf16.msra.mxu1 %v8337_v5  ;;  %7044 = vmatprep.mubr.msk.bf16.mxu1 %vm8366_vm1, %v11239_v3  ;;  %v3429_v5 = vpack.c.bf16 %v10105_v56, %v10103_v49 }
 0x597   :  { %7094 = vmatprep.subr.bf16.mxu1 %v11239_v3 }
 0x59a   :  { %7095 = vmatpush3.bf16.msra.mxu1 %v8338_v57  ;;  %v3431_v57 = vpack.c.bf16 %v10122_v31, %v10120_v52 }
 0x59b   :  { %7096 = vmatprep.subr.bf16.mxu1 %v11239_v3 }
 0x59d   :  { %7045 = vmatmul.mubr.msk.bf16.gmra.mrb[4].mxu1 %vm172_vm0, %v3424_v33  ;;  %v3433_v33 = vpack.c.bf16 %v10132_v8, %v10128_v0 }
 0x59e   :  { %7048 = vmatprep.mubr.msk.bf16.mxu1 %vm8366_vm1, %v11239_v3  ;;  %7097 = vmatpush3.bf16.msra.mxu1 %v8339_v1  ;;  %v3432_v1 = vpack.c.bf16 %v10126_v20, %v10124_v32 }
 0x59f   :  { %7098 = vmatprep.subr.bf16.mxu1 %v11239_v3 }
 0x5a2   :  { %7099 = vmatpush3.bf16.msra.mxu1 %v8340_v39  ;;  %v3434_v39 = vpack.c.bf16 %v10136_v16, %v10134_v54 }
 0x5a3   :  { %7152 = vmatprep.subr.bf16.mxu1 %v11239_v3 }
 0x5a5   :  { %7049 = vmatmul.mubr.msk.bf16.gmra.mrb[8].mxu1 %vm172_vm0, %v3425_v12  ;;  %v3435_v12 = vpack.c.bf16 %v10142_v34, %v10142_v34 }
 0x5a6   :  { %7052 = vmatprep.mubr.msk.bf16.mxu1 %vm8366_vm1, %v11239_v3 }
 0x5ad   :  { %7053 = vmatmul.mubr.msk.bf16.gmra.mrb[12].mxu1 %vm172_vm0, %v3426_v19  ;;  %v8341_v19 = vld [vmem:[%s11175_s5 + $0x80] sm:$0xff]  }
 0x5ae   :  { %7056 = vmatprep.mubr.msk.bf16.mxu1 %vm8366_vm1, %v11239_v3 }
 0x5b5   :  { %7057 = vmatmul.mubr.msk.bf16.gmra.mrb[16].mxu1 %vm172_vm0, %v3427_v2  ;;  %v11247_v2 = vpack.c.bf16 %v10058_v9, %v10056_v35  ;;  %v11248_v35 = vpack.c.bf16 %v10069_v27, %v10064_v22  ;;  %v8344_v9 = vld [vmem:[%s11175_s5 + $0x98] sm:$0xff]   ;;  %v11250_v22 = vpack.c.bf16 %v10089_v18, %v10087_v53  ;;  %v11251_v27 = vpack.c.bf16 %v10098_v40, %v10096_v6 }
 0x5b6   :  { %7060 = vmatprep.mubr.msk.bf16.mxu1 %vm8366_vm1, %v11239_v3  ;;  %v11254_v53 = vpack.c.bf16 %v10120_v52, %v10118_v7  ;;  %v11255_v18 = vpack.c.bf16 %v10124_v32, %v10122_v31  ;;  %v11256_v6 = vpack.c.bf16 %v10128_v0, %v10126_v20  ;;  %v11257_v40 = vpack.c.bf16 %v10134_v54, %v10132_v8  ;;  %v3941_v7 = vld [vmem:[#allocation2 + $0x13] sm:$0xff]  ;;  %v8345_v52 = vld [vmem:[%s11175_s5 + $0xa0] sm:$0xff]   ;;  %v8346_v32 = vld [vmem:[%s11175_s5 + $0xa8] sm:$0xff]  }
 0x5b7   :  { %v3942_v20 = vld [vmem:[#allocation2 + $0x1b] sm:$0xff]  ;;  %v3943_v0 = vld [vmem:[#allocation2 + $0x23] sm:$0xff]  ;;  %v8347_v8 = vld [vmem:[%s11175_s5 + $0xb0] sm:$0xff]  }
 0x5b8   :  { %v3966_v54 = vpack.c.bf16 %v3943_v0, %v3942_v20  ;;  %v3964_v0 = vld [vmem:[#allocation2 + $0xcb] sm:$0xff] }
 0x5bd   :  { %7061 = vmatmul.mubr.msk.bf16.gmra.mrb[20].mxu1 %vm172_vm0, %v3428_v29  ;;  %v8342_v29 = vld [vmem:[%s11175_s5 + $0x88] sm:$0xff]  }
 0x5be   :  { %7064 = vmatprep.mubr.msk.bf16.mxu1 %vm8366_vm1, %v11239_v3 }
 0x5c5   :  { %7065 = vmatmul.mubr.msk.bf16.gmra.mrb[24].mxu1 %vm172_vm0, %v3429_v5  ;;  %v8343_v5 = vld [vmem:[%s11175_s5 + $0x90] sm:$0xff]  }
 0x5c6   :  { %7068 = vmatprep.mubr.msk.bf16.mxu1 %vm8366_vm1, %v11239_v3 }
 0x5cd   :  { %7069 = vmatmul.mubr.msk.bf16.gmra.mrb[28].mxu1 %vm172_vm0, %v3430_v4  ;;  %v11249_v4 = vpack.c.bf16 %v10078_v58, %v10071_v62  ;;  %v11252_v62 = vpack.c.bf16 %v10103_v49, %v10100_v61  ;;  %v11253_v58 = vpack.c.bf16 %v10107_v47, %v10105_v56  ;;  %v11258_v61 = vpack.c.bf16 %v10142_v34, %v10136_v16  ;;  %v3693_v49 = vld [vmem:[#allocation2 + $0xca] sm:$0xff]  ;;  %v8348_v16 = vld [vmem:[%s11175_s5 + $0xb8] sm:$0xff]  }
 0x5ce   :  { %7072 = vmatprep.mubr.msk.bf16.mxu1 %vm8366_vm1, %v11239_v3  ;;  %v3706_v56 = vpack.c.bf16 %v3693_v49, %v3693_v49  ;;  %v3940_v47 = vld [vmem:[#allocation2 + $0xb] sm:$0xff]  ;;  %v3959_v49 = vld [vmem:[#allocation2 + $0xa3] sm:$0xff] }
 0x5cf   :  { %v3965_v31 = vpack.c.bf16 %v3941_v7, %v3940_v47  ;;  %v3944_v34 = vld [vmem:[#allocation2 + $0x2b] sm:$0xff]  ;;  %v3961_v7 = vld [vmem:[#allocation2 + $0xb3] sm:$0xff] }
 0x5d0   :  { %v3960_v47 = vld [vmem:[#allocation2 + $0xab] sm:$0xff] }
 0x5d5   :  { %7073 = vmatmul.mubr.msk.bf16.gmra.mrb[32].mxu1 %vm172_vm0, %v3431_v57  ;;  %v3945_v57 = vld [vmem:[#allocation2 + $0x33] sm:$0xff] }
 0x5d6   :  { %7076 = vmatprep.mubr.msk.bf16.mxu1 %vm8366_vm1, %v11239_v3 }
 0x5dd   :  { %7077 = vmatmul.mubr.msk.bf16.gmra.mrb[36].mxu1 %vm172_vm0, %v3432_v1  ;;  %v3967_v1 = vpack.c.bf16 %v3945_v57, %v3944_v34  ;;  %v8350_v57 = vld [vmem:[%s11175_s5 + $0xc8] sm:$0xff]  }
 0x5de   :  { %7080 = vmatprep.mubr.msk.bf16.mxu1 %vm8366_vm1, %v11239_v3 }
 0x5e5   :  { %7081 = vmatmul.mubr.msk.bf16.gmra.mrb[40].mxu1 %vm172_vm0, %v3433_v33  ;;  %v3946_v33 = vld [vmem:[#allocation2 + $0x3b] sm:$0xff] }
 0x5e6   :  { %7084 = vmatprep.mubr.msk.bf16.mxu1 %vm8366_vm1, %v11239_v3 }
 0x5ed   :  { %7085 = vmatmul.mubr.msk.bf16.gmra.mrb[44].mxu1 %vm172_vm0, %v3434_v39  ;;  %v3947_v39 = vld [vmem:[#allocation2 + $0x43] sm:$0xff] }
 0x5ee   :  { %7088 = vmatprep.mubr.msk.bf16.mxu1 %vm8366_vm1, %v11239_v3 }
 0x5f5   :  { %7089 = vmatmul.mubr.msk.bf16.gmra.mrb[48].mxu1 %vm172_vm0, %v3435_v12  ;;  %v3968_v12 = vpack.c.bf16 %v3947_v39, %v3946_v33  ;;  %v4237_v33 = vpack.c.bf16 %v10155_v28, %v10153_v30  ;;  %v8352_v39 = vld [vmem:[%s11175_s5 + $0xd8] sm:$0xff]  }
 0x5f6   :  { %7100 = vmatprep.mubr.msk.bf16.mxu1 %vm8366_vm1, %v11239_v3 }
 0x5fd   :  { %7101 = vmatmul.mubr.msk.bf16.vlgmr.msra.gmra.mrb[0].mxu1 %vm172_vm0, %v11247_v2  ;;  %v3949_v2 = vld [vmem:[#allocation2 + $0x53] sm:$0xff] }
 0x5fe   :  { %7153 = vmatpush3.bf16.msra.mxu1 %v8341_v19  ;;  %7104 = vmatprep.mubr.msk.bf16.mxu1 %vm8366_vm1, %v11239_v3  ;;  %v3948_v19 = vld [vmem:[#allocation2 + $0x4b] sm:$0xff] }
 0x5ff   :  { %7154 = vmatprep.subr.bf16.mxu1 %v11239_v3 }
 0x602   :  { %7155 = vmatpush3.bf16.msra.mxu1 %v8342_v29  ;;  %v3969_v29 = vpack.c.bf16 %v3949_v2, %v3948_v19  ;;  %v4239_v19 = vpack.c.bf16 %v10163_v15, %v10161_v43  ;;  %v4240_v2 = vpack.c.bf16 %v10172_v46, %v10170_v25 }
 0x603   :  { %7156 = vmatprep.subr.bf16.mxu1 %v11239_v3 }
 0x605   :  { %7105 = vmatmul.mubr.msk.bf16.gmra.mrb[4].mxu1 %vm172_vm0, %v11248_v35  ;;  %v3951_v35 = vld [vmem:[#allocation2 + $0x63] sm:$0xff] }
 0x606   :  { %7108 = vmatprep.mubr.msk.bf16.mxu1 %vm8366_vm1, %v11239_v3  ;;  %7157 = vmatpush3.bf16.msra.mxu1 %v8343_v5  ;;  %v3950_v5 = vld [vmem:[#allocation2 + $0x5b] sm:$0xff] }
 0x607   :  { %7158 = vmatprep.subr.bf16.mxu1 %v11239_v3 }
 0x60a   :  { %7159 = vmatpush3.bf16.msra.mxu1 %v8344_v9  ;;  %v3970_v9 = vpack.c.bf16 %v3951_v35, %v3950_v5  ;;  %v4242_v5 = vpack.c.bf16 %v10184_v26, %v10182_v37  ;;  %v4243_v35 = vpack.c.bf16 %v10192_v50, %v10190_v36 }
 0x60b   :  { %7212 = vmatprep.subr.bf16.mxu1 %v11239_v3 }
 0x60d   :  { %7109 = vmatmul.mubr.msk.bf16.gmra.mrb[8].mxu1 %vm172_vm0, %v11249_v4  ;;  %v3952_v4 = vld [vmem:[#allocation2 + $0x6b] sm:$0xff] }
 0x60e   :  { %7112 = vmatprep.mubr.msk.bf16.mxu1 %vm8366_vm1, %v11239_v3 }
 0x615   :  { %7113 = vmatmul.mubr.msk.bf16.gmra.mrb[12].mxu1 %vm172_vm0, %v11250_v22  ;;  %v3953_v22 = vld [vmem:[#allocation2 + $0x73] sm:$0xff] }
 0x616   :  { %7116 = vmatprep.mubr.msk.bf16.mxu1 %vm8366_vm1, %v11239_v3 }
 0x61d   :  { %7117 = vmatmul.mubr.msk.bf16.gmra.mrb[16].mxu1 %vm172_vm0, %v11251_v27  ;;  %v3971_v27 = vpack.c.bf16 %v3953_v22, %v3952_v4  ;;  %v4245_v4 = vpack.c.bf16 %v10202_v11, %v10200_v59  ;;  %v4246_v22 = vpack.c.bf16 %v10210_v51, %v10208_v21 }
 0x61e   :  { %7120 = vmatprep.mubr.msk.bf16.mxu1 %vm8366_vm1, %v11239_v3 }
 0x625   :  { %7121 = vmatmul.mubr.msk.bf16.gmra.mrb[20].mxu1 %vm172_vm0, %v11252_v62  ;;  %v3954_v62 = vld [vmem:[#allocation2 + $0x7b] sm:$0xff] }
 0x626   :  { %7124 = vmatprep.mubr.msk.bf16.mxu1 %vm8366_vm1, %v11239_v3 }
 0x62d   :  { %7125 = vmatmul.mubr.msk.bf16.gmra.mrb[24].mxu1 %vm172_vm0, %v11253_v58  ;;  %v3955_v58 = vld [vmem:[#allocation2 + $0x83] sm:$0xff] }
 0x62e   :  { %7128 = vmatprep.mubr.msk.bf16.mxu1 %vm8366_vm1, %v11239_v3 }
 0x635   :  { %7129 = vmatmul.mubr.msk.bf16.gmra.mrb[28].mxu1 %vm172_vm0, %v11254_v53  ;;  %v3972_v53 = vpack.c.bf16 %v3955_v58, %v3954_v62  ;;  %v4248_v62 = vpack.c.bf16 %v10218_v17, %v10218_v17  ;;  %v8353_v58 = vld [vmem:[%s11175_s5 + $0xe0] sm:$0xff]  }
 0x636   :  { %7132 = vmatprep.mubr.msk.bf16.mxu1 %vm8366_vm1, %v11239_v3 }
 0x63d   :  { %7133 = vmatmul.mubr.msk.bf16.gmra.mrb[32].mxu1 %vm172_vm0, %v11255_v18  ;;  %v3956_v18 = vld [vmem:[#allocation2 + $0x8b] sm:$0xff] }
 0x63e   :  { %7136 = vmatprep.mubr.msk.bf16.mxu1 %vm8366_vm1, %v11239_v3 }
 0x645   :  { %7137 = vmatmul.mubr.msk.bf16.gmra.mrb[36].mxu1 %vm172_vm0, %v11256_v6  ;;  %v3957_v6 = vld [vmem:[#allocation2 + $0x93] sm:$0xff] }
 0x646   :  { %7140 = vmatprep.mubr.msk.bf16.mxu1 %vm8366_vm1, %v11239_v3 }
 0x64d   :  { %7141 = vmatmul.mubr.msk.bf16.gmra.mrb[40].mxu1 %vm172_vm0, %v11257_v40  ;;  %v3973_v40 = vpack.c.bf16 %v3957_v6, %v3956_v18  ;;  %v8354_v18 = vld [vmem:[%s11175_s5 + $0xe8] sm:$0xff]   ;;  %v8355_v6 = vld [vmem:[%s11175_s5 + $0xf0] sm:$0xff]  }
 0x64e   :  { %7144 = vmatprep.mubr.msk.bf16.mxu1 %vm8366_vm1, %v11239_v3 }
 0x655   :  { %7145 = vmatmul.mubr.msk.bf16.gmra.mrb[44].mxu1 %vm172_vm0, %v11258_v61  ;;  %v3958_v61 = vld [vmem:[#allocation2 + $0x9b] sm:$0xff] }
 0x656   :  { %7148 = vmatprep.mubr.msk.bf16.mxu1 %vm8366_vm1, %v11239_v3 }
 0x65d   :  { %7149 = vmatmul.mubr.msk.bf16.gmra.mrb[48].mxu1 %vm172_vm0, %v3706_v56  ;;  %v3974_v56 = vpack.c.bf16 %v3959_v49, %v3958_v61  ;;  %v4758_v61 = vld [vmem:[#allocation2 + $0x3d] sm:$0xff] }
 0x65e   :  { %7160 = vmatprep.mubr.msk.bf16.mxu1 %vm8366_vm1, %v11239_v3 }
 0x665   :  { %7161 = vmatmul.mubr.msk.bf16.vlgmr.msra.gmra.mrb[0].mxu1 %vm172_vm0, %v3965_v31  ;;  %v3962_v31 = vld [vmem:[#allocation2 + $0xbb] sm:$0xff] }
 0x666   :  { %7213 = vmatpush3.bf16.msra.mxu1 %v8345_v52  ;;  %7164 = vmatprep.mubr.msk.bf16.mxu1 %vm8366_vm1, %v11239_v3  ;;  %v3975_v52 = vpack.c.bf16 %v3961_v7, %v3960_v47  ;;  %v4760_v47 = vld [vmem:[#allocation2 + $0x4d] sm:$0xff] }
 0x667   :  { %7214 = vmatprep.subr.bf16.mxu1 %v11239_v3 }
 0x66a   :  { %7215 = vmatpush3.bf16.msra.mxu1 %v8346_v32  ;;  %v3963_v32 = vld [vmem:[#allocation2 + $0xc3] sm:$0xff] }
 0x66b   :  { %7216 = vmatprep.subr.bf16.mxu1 %v11239_v3  ;;  %v3976_v20 = vpack.c.bf16 %v3963_v32, %v3962_v31  ;;  %v4762_v31 = vld [vmem:[#allocation2 + $0x5d] sm:$0xff] }
 0x66d   :  { %7165 = vmatmul.mubr.msk.bf16.gmra.mrb[4].mxu1 %vm172_vm0, %v3966_v54  ;;  %v4211_v54 = vld [vmem:[#allocation2 + $0xc] sm:$0xff] }
 0x66e   :  { %7168 = vmatprep.mubr.msk.bf16.mxu1 %vm8366_vm1, %v11239_v3  ;;  %7217 = vmatpush3.bf16.msra.mxu1 %v8347_v8  ;;  %v3977_v8 = vpack.c.bf16 %v3964_v0, %v3964_v0  ;;  %v4236_v34 = vpack.c.bf16 %v10151_v38, %v4211_v54  ;;  %v4764_v0 = vld [vmem:[#allocation2 + $0x6d] sm:$0xff]  ;;  %v4765_v54 = vld [vmem:[#allocation2 + $0x75] sm:$0xff] }
 0x66f   :  { %7218 = vmatprep.subr.bf16.mxu1 %v11239_v3 }
 0x672   :  { %7219 = vmatpush3.bf16.msra.mxu1 %v8348_v16  ;;  %v8349_v16 = vld [vmem:[%s11175_s5 + $0xc0] sm:$0xff]  }
 0x673   :  { %7272 = vmatprep.subr.bf16.mxu1 %v11239_v3 }
 0x675   :  { %7169 = vmatmul.mubr.msk.bf16.gmra.mrb[8].mxu1 %vm172_vm0, %v3967_v1  ;;  %v8351_v1 = vld [vmem:[%s11175_s5 + $0xd0] sm:$0xff]  }
 0x676   :  { %7172 = vmatprep.mubr.msk.bf16.mxu1 %vm8366_vm1, %v11239_v3 }
 0x67d   :  { %7173 = vmatmul.mubr.msk.bf16.gmra.mrb[12].mxu1 %vm172_vm0, %v3968_v12  ;;  %v4238_v12 = vpack.c.bf16 %v10159_v55, %v10157_v23 }
 0x67e   :  { %7176 = vmatprep.mubr.msk.bf16.mxu1 %vm8366_vm1, %v11239_v3 }
 0x685   :  { %7177 = vmatmul.mubr.msk.bf16.gmra.mrb[16].mxu1 %vm172_vm0, %v3969_v29  ;;  %v4241_v29 = vpack.c.bf16 %v10180_v63, %v10174_v45 }
 0x686   :  { %7180 = vmatprep.mubr.msk.bf16.mxu1 %vm8366_vm1, %v11239_v3 }
 0x68d   :  { %7181 = vmatmul.mubr.msk.bf16.gmra.mrb[20].mxu1 %vm172_vm0, %v3970_v9  ;;  %v4244_v9 = vpack.c.bf16 %v10198_v14, %v10194_v10 }
 0x68e   :  { %7184 = vmatprep.mubr.msk.bf16.mxu1 %vm8366_vm1, %v11239_v3 }
 0x695   :  { %7185 = vmatmul.mubr.msk.bf16.gmra.mrb[24].mxu1 %vm172_vm0, %v3971_v27  ;;  %v4247_v27 = vpack.c.bf16 %v10216_v24, %v10212_v41 }
 0x696   :  { %7188 = vmatprep.mubr.msk.bf16.mxu1 %vm8366_vm1, %v11239_v3 }
 0x69d   :  { %7189 = vmatmul.mubr.msk.bf16.gmra.mrb[28].mxu1 %vm172_vm0, %v3972_v53  ;;  %v11259_v53 = vpack.c.bf16 %v10153_v30, %v10151_v38  ;;  %v11260_v38 = vpack.c.bf16 %v10157_v23, %v10155_v28  ;;  %v8356_v30 = vld [vmem:[%s11175_s5 + $0xf8] sm:$0xff]   ;;  %v11262_v23 = vpack.c.bf16 %v10170_v25, %v10163_v15  ;;  %v11263_v28 = vpack.c.bf16 %v10174_v45, %v10172_v46  ;;  %v4756_v15 = vld [vmem:[#allocation2 + $0x2d] sm:$0xff] }
 0x69e   :  { %7192 = vmatprep.mubr.msk.bf16.mxu1 %vm8366_vm1, %v11239_v3  ;;  %v11266_v45 = vpack.c.bf16 %v10194_v10, %v10192_v50  ;;  %v11269_v50 = vpack.c.bf16 %v10212_v41, %v10210_v51  ;;  %v4753_v41 = vld [vmem:[#allocation2 + $0x15] sm:$0xff]  ;;  %v4754_v51 = vld [vmem:[#allocation2 + $0x1d] sm:$0xff] }
 0x69f   :  { %v4778_v10 = vpack.c.bf16 %v4754_v51, %v4753_v41  ;;  %v8360_v25 = vld [vmem:[%s11175_s5 + $0x118] sm:$0xff]   ;;  %v5035_v41 = vld [vmem:[#allocation2 + $0x6e] sm:$0xff] }
 0x6a0   :  { %v4757_v46 = vld [vmem:[#allocation2 + $0x35] sm:$0xff] }
 0x6a1   :  { %v4780_v49 = vpack.c.bf16 %v4758_v61, %v4757_v46  ;;  %v5042_v61 = vld [vmem:[#allocation2 + $0xa6] sm:$0xff] }
 0x6a5   :  { %7193 = vmatmul.mubr.msk.bf16.gmra.mrb[32].mxu1 %vm172_vm0, %v3973_v40  ;;  %v11261_v40 = vpack.c.bf16 %v10161_v43, %v10159_v55  ;;  %v11264_v43 = vpack.c.bf16 %v10182_v37, %v10180_v63  ;;  %v11265_v55 = vpack.c.bf16 %v10190_v36, %v10184_v26  ;;  %v11267_v37 = vpack.c.bf16 %v10200_v59, %v10198_v14  ;;  %v8357_v14 = vld [vmem:[%s11175_s5 + $0x100] sm:$0xff]   ;;  %v8359_v63 = vld [vmem:[%s11175_s5 + $0x110] sm:$0xff]  }
 0x6a6   :  { %7196 = vmatprep.mubr.msk.bf16.mxu1 %vm8366_vm1, %v11239_v3  ;;  %v11268_v36 = vpack.c.bf16 %v10208_v21, %v10202_v11  ;;  %v11270_v59 = vpack.c.bf16 %v10218_v17, %v10216_v24  ;;  %v4506_v21 = vld [vmem:[#allocation2 + $0xd4] sm:$0xff]  ;;  %v8358_v17 = vld [vmem:[%s11175_s5 + $0x108] sm:$0xff]  }
 0x6a7   :  { %v4519_v11 = vpack.c.bf16 %v4506_v21, %v4506_v21  ;;  %v4755_v24 = vld [vmem:[#allocation2 + $0x25] sm:$0xff] }
 0x6a8   :  { %v4779_v26 = vpack.c.bf16 %v4756_v15, %v4755_v24  ;;  %v5038_v24 = vld [vmem:[#allocation2 + $0x86] sm:$0xff]  ;;  %v5039_v15 = vld [vmem:[#allocation2 + $0x8e] sm:$0xff] }
 0x6ad   :  { %7197 = vmatmul.mubr.msk.bf16.gmra.mrb[36].mxu1 %vm172_vm0, %v3974_v56  ;;  %v4759_v56 = vld [vmem:[#allocation2 + $0x45] sm:$0xff] }
 0x6ae   :  { %7200 = vmatprep.mubr.msk.bf16.mxu1 %vm8366_vm1, %v11239_v3  ;;  %v4781_v7 = vpack.c.bf16 %v4760_v47, %v4759_v56  ;;  %v5044_v47 = vld [vmem:[#allocation2 + $0xb6] sm:$0xff] }
 0x6b5   :  { %7201 = vmatmul.mubr.msk.bf16.gmra.mrb[40].mxu1 %vm172_vm0, %v3975_v52  ;;  %v4761_v52 = vld [vmem:[#allocation2 + $0x55] sm:$0xff] }
 0x6b6   :  { %7204 = vmatprep.mubr.msk.bf16.mxu1 %vm8366_vm1, %v11239_v3  ;;  %v4782_v32 = vpack.c.bf16 %v4762_v31, %v4761_v52  ;;  %v5046_v31 = vld [vmem:[#allocation2 + $0xc6] sm:$0xff] }
 0x6bd   :  { %7205 = vmatmul.mubr.msk.bf16.gmra.mrb[44].mxu1 %vm172_vm0, %v3976_v20  ;;  %v4763_v20 = vld [vmem:[#allocation2 + $0x65] sm:$0xff] }
 0x6be   :  { %7208 = vmatprep.mubr.msk.bf16.mxu1 %vm8366_vm1, %v11239_v3 }
 0x6c5   :  { %7209 = vmatmul.mubr.msk.bf16.gmra.mrb[48].mxu1 %vm172_vm0, %v3977_v8  ;;  %v4783_v8 = vpack.c.bf16 %v4764_v0, %v4763_v20  ;;  %v5048_v0 = vld [vmem:[#allocation2 + $0xd6] sm:$0xff] }
 0x6c6   :  { %7220 = vmatprep.mubr.msk.bf16.mxu1 %vm8366_vm1, %v11239_v3 }
 0x6cd   :  { %7221 = vmatmul.mubr.msk.bf16.vlgmr.msra.gmra.mrb[0].mxu1 %vm172_vm0, %v4236_v34 }
 0x6ce   :  { %7273 = vmatpush3.bf16.msra.mxu1 %v8349_v16  ;;  %7224 = vmatprep.mubr.msk.bf16.mxu1 %vm8366_vm1, %v11239_v3  ;;  %v4766_v16 = vld [vmem:[#allocation2 + $0x7d] sm:$0xff] }
 0x6cf   :  { %7274 = vmatprep.subr.bf16.mxu1 %v11239_v3  ;;  %v4784_v34 = vpack.c.bf16 %v4766_v16, %v4765_v54 }
 0x6d2   :  { %7275 = vmatpush3.bf16.msra.mxu1 %v8350_v57  ;;  %v4767_v57 = vld [vmem:[#allocation2 + $0x85] sm:$0xff] }
 0x6d3   :  { %7276 = vmatprep.subr.bf16.mxu1 %v11239_v3 }
 0x6d5   :  { %7225 = vmatmul.mubr.msk.bf16.gmra.mrb[4].mxu1 %vm172_vm0, %v4237_v33 }
 0x6d6   :  { %7228 = vmatprep.mubr.msk.bf16.mxu1 %vm8366_vm1, %v11239_v3  ;;  %7277 = vmatpush3.bf16.msra.mxu1 %v8351_v1  ;;  %v4768_v1 = vld [vmem:[#allocation2 + $0x8d] sm:$0xff] }
 0x6d7   :  { %7278 = vmatprep.subr.bf16.mxu1 %v11239_v3  ;;  %v4785_v33 = vpack.c.bf16 %v4768_v1, %v4767_v57 }
 0x6da   :  { %7279 = vmatpush3.bf16.msra.mxu1 %v8352_v39  ;;  %v4769_v39 = vld [vmem:[#allocation2 + $0x95] sm:$0xff] }
 0x6db   :  { %7332 = vmatprep.subr.bf16.mxu1 %v11239_v3 }
 0x6dd   :  { %7229 = vmatmul.mubr.msk.bf16.gmra.mrb[8].mxu1 %vm172_vm0, %v4238_v12  ;;  %v4770_v12 = vld [vmem:[#allocation2 + $0x9d] sm:$0xff] }
 0x6de   :  { %7232 = vmatprep.mubr.msk.bf16.mxu1 %vm8366_vm1, %v11239_v3 }
 0x6e5   :  { %7233 = vmatmul.mubr.msk.bf16.gmra.mrb[12].mxu1 %vm172_vm0, %v4239_v19  ;;  %v4786_v19 = vpack.c.bf16 %v4770_v12, %v4769_v39 }
 0x6e6   :  { %7236 = vmatprep.mubr.msk.bf16.mxu1 %vm8366_vm1, %v11239_v3 }
 0x6ed   :  { %7237 = vmatmul.mubr.msk.bf16.gmra.mrb[16].mxu1 %vm172_vm0, %v4240_v2  ;;  %v4771_v2 = vld [vmem:[#allocation2 + $0xa5] sm:$0xff] }
 0x6ee   :  { %7240 = vmatprep.mubr.msk.bf16.mxu1 %vm8366_vm1, %v11239_v3 }
 0x6f5   :  { %7241 = vmatmul.mubr.msk.bf16.gmra.mrb[20].mxu1 %vm172_vm0, %v4241_v29  ;;  %v4772_v29 = vld [vmem:[#allocation2 + $0xad] sm:$0xff] }
 0x6f6   :  { %7244 = vmatprep.mubr.msk.bf16.mxu1 %vm8366_vm1, %v11239_v3 }
 0x6fd   :  { %7245 = vmatmul.mubr.msk.bf16.gmra.mrb[24].mxu1 %vm172_vm0, %v4242_v5  ;;  %v4787_v5 = vpack.c.bf16 %v4772_v29, %v4771_v2 }
 0x6fe   :  { %7248 = vmatprep.mubr.msk.bf16.mxu1 %vm8366_vm1, %v11239_v3 }
 0x705   :  { %7249 = vmatmul.mubr.msk.bf16.gmra.mrb[28].mxu1 %vm172_vm0, %v4243_v35  ;;  %v4773_v35 = vld [vmem:[#allocation2 + $0xb5] sm:$0xff] }
 0x706   :  { %7252 = vmatprep.mubr.msk.bf16.mxu1 %vm8366_vm1, %v11239_v3 }
 0x70d   :  { %7253 = vmatmul.mubr.msk.bf16.gmra.mrb[32].mxu1 %vm172_vm0, %v4244_v9  ;;  %v4774_v9 = vld [vmem:[#allocation2 + $0xbd] sm:$0xff] }
 0x70e   :  { %7256 = vmatprep.mubr.msk.bf16.mxu1 %vm8366_vm1, %v11239_v3 }
 0x715   :  { %7257 = vmatmul.mubr.msk.bf16.gmra.mrb[36].mxu1 %vm172_vm0, %v4245_v4  ;;  %v4788_v4 = vpack.c.bf16 %v4774_v9, %v4773_v35 }
 0x716   :  { %7260 = vmatprep.mubr.msk.bf16.mxu1 %vm8366_vm1, %v11239_v3 }
 0x71d   :  { %7261 = vmatmul.mubr.msk.bf16.gmra.mrb[40].mxu1 %vm172_vm0, %v4246_v22  ;;  %v4775_v22 = vld [vmem:[#allocation2 + $0xc5] sm:$0xff] }
 0x71e   :  { %7264 = vmatprep.mubr.msk.bf16.mxu1 %vm8366_vm1, %v11239_v3 }
 0x725   :  { %7265 = vmatmul.mubr.msk.bf16.gmra.mrb[44].mxu1 %vm172_vm0, %v4247_v27  ;;  %v4776_v27 = vld [vmem:[#allocation2 + $0xcd] sm:$0xff] }
 0x726   :  { %7268 = vmatprep.mubr.msk.bf16.mxu1 %vm8366_vm1, %v11239_v3 }
 0x72d   :  { %7269 = vmatmul.mubr.msk.bf16.gmra.mrb[48].mxu1 %vm172_vm0, %v4248_v62  ;;  %v4789_v62 = vpack.c.bf16 %v4776_v27, %v4775_v22 }
 0x72e   :  { %7280 = vmatprep.mubr.msk.bf16.mxu1 %vm8366_vm1, %v11239_v3 }
 0x735   :  { %7281 = vmatmul.mubr.msk.bf16.vlgmr.msra.gmra.mrb[0].mxu1 %vm172_vm0, %v11259_v53 }
 0x736   :  { %7333 = vmatpush3.bf16.msra.mxu1 %v8353_v58  ;;  %7284 = vmatprep.mubr.msk.bf16.mxu1 %vm8366_vm1, %v11239_v3  ;;  %v4777_v58 = vld [vmem:[#allocation2 + $0xd5] sm:$0xff] }
 0x737   :  { %7334 = vmatprep.subr.bf16.mxu1 %v11239_v3  ;;  %v4790_v53 = vpack.c.bf16 %v4777_v58, %v4777_v58 }
 0x73a   :  { %7335 = vmatpush3.bf16.msra.mxu1 %v8354_v18  ;;  %v5024_v18 = vld [vmem:[#allocation2 + $0x16] sm:$0xff] }
 0x73b   :  { %7336 = vmatprep.subr.bf16.mxu1 %v11239_v3 }
 0x73d   :  { %7285 = vmatmul.mubr.msk.bf16.gmra.mrb[4].mxu1 %vm172_vm0, %v11260_v38 }
 0x73e   :  { %7288 = vmatprep.mubr.msk.bf16.mxu1 %vm8366_vm1, %v11239_v3  ;;  %7337 = vmatpush3.bf16.msra.mxu1 %v8355_v6  ;;  %v5025_v6 = vld [vmem:[#allocation2 + $0x1e] sm:$0xff] }
 0x73f   :  { %7338 = vmatprep.subr.bf16.mxu1 %v11239_v3  ;;  %v5049_v38 = vpack.c.bf16 %v5025_v6, %v5024_v18 }
 0x742   :  { %7339 = vmatpush3.bf16.msra.mxu1 %v8356_v30  ;;  %v5026_v30 = vld [vmem:[#allocation2 + $0x26] sm:$0xff] }
 0x743   :  { %7392 = vmatprep.subr.bf16.mxu1 %v11239_v3 }
 0x745   :  { %7289 = vmatmul.mubr.msk.bf16.gmra.mrb[8].mxu1 %vm172_vm0, %v11261_v40  ;;  %v5027_v40 = vld [vmem:[#allocation2 + $0x2e] sm:$0xff] }
 0x746   :  { %7292 = vmatprep.mubr.msk.bf16.mxu1 %vm8366_vm1, %v11239_v3 }
 0x74d   :  { %7293 = vmatmul.mubr.msk.bf16.gmra.mrb[12].mxu1 %vm172_vm0, %v11262_v23  ;;  %v5050_v23 = vpack.c.bf16 %v5027_v40, %v5026_v30 }
 0x74e   :  { %7296 = vmatprep.mubr.msk.bf16.mxu1 %vm8366_vm1, %v11239_v3 }
 0x755   :  { %7297 = vmatmul.mubr.msk.bf16.gmra.mrb[16].mxu1 %vm172_vm0, %v11263_v28  ;;  %v5028_v28 = vld [vmem:[#allocation2 + $0x36] sm:$0xff] }
 0x756   :  { %7300 = vmatprep.mubr.msk.bf16.mxu1 %vm8366_vm1, %v11239_v3 }
 0x75d   :  { %7301 = vmatmul.mubr.msk.bf16.gmra.mrb[20].mxu1 %vm172_vm0, %v11264_v43  ;;  %v5029_v43 = vld [vmem:[#allocation2 + $0x3e] sm:$0xff] }
 0x75e   :  { %7304 = vmatprep.mubr.msk.bf16.mxu1 %vm8366_vm1, %v11239_v3 }
 0x765   :  { %7305 = vmatmul.mubr.msk.bf16.gmra.mrb[24].mxu1 %vm172_vm0, %v11265_v55  ;;  %v5051_v55 = vpack.c.bf16 %v5029_v43, %v5028_v28 }
 0x766   :  { %7308 = vmatprep.mubr.msk.bf16.mxu1 %vm8366_vm1, %v11239_v3 }
 0x76d   :  { %7309 = vmatmul.mubr.msk.bf16.gmra.mrb[28].mxu1 %vm172_vm0, %v11266_v45  ;;  %v5030_v45 = vld [vmem:[#allocation2 + $0x46] sm:$0xff] }
 0x76e   :  { %7312 = vmatprep.mubr.msk.bf16.mxu1 %vm8366_vm1, %v11239_v3 }
 0x775   :  { %7313 = vmatmul.mubr.msk.bf16.gmra.mrb[32].mxu1 %vm172_vm0, %v11267_v37  ;;  %v5031_v37 = vld [vmem:[#allocation2 + $0x4e] sm:$0xff] }
 0x776   :  { %7316 = vmatprep.mubr.msk.bf16.mxu1 %vm8366_vm1, %v11239_v3 }
 0x77d   :  { %7317 = vmatmul.mubr.msk.bf16.gmra.mrb[36].mxu1 %vm172_vm0, %v11268_v36  ;;  %v5052_v36 = vpack.c.bf16 %v5031_v37, %v5030_v45 }
 0x77e   :  { %7320 = vmatprep.mubr.msk.bf16.mxu1 %vm8366_vm1, %v11239_v3 }
 0x785   :  { %7321 = vmatmul.mubr.msk.bf16.gmra.mrb[40].mxu1 %vm172_vm0, %v11269_v50  ;;  %v5032_v50 = vld [vmem:[#allocation2 + $0x56] sm:$0xff] }
 0x786   :  { %7324 = vmatprep.mubr.msk.bf16.mxu1 %vm8366_vm1, %v11239_v3 }
 0x78d   :  { %7325 = vmatmul.mubr.msk.bf16.gmra.mrb[44].mxu1 %vm172_vm0, %v11270_v59  ;;  %v5033_v59 = vld [vmem:[#allocation2 + $0x5e] sm:$0xff] }
 0x78e   :  { %7328 = vmatprep.mubr.msk.bf16.mxu1 %vm8366_vm1, %v11239_v3  ;;  %v5053_v21 = vpack.c.bf16 %v5033_v59, %v5032_v50 }
 0x795   :  { %7329 = vmatmul.mubr.msk.bf16.gmra.mrb[48].mxu1 %vm172_vm0, %v4519_v11  ;;  %v5034_v11 = vld [vmem:[#allocation2 + $0x66] sm:$0xff] }
 0x796   :  { %7340 = vmatprep.mubr.msk.bf16.mxu1 %vm8366_vm1, %v11239_v3  ;;  %v5054_v51 = vpack.c.bf16 %v5035_v41, %v5034_v11 }
 0x79d   :  { %7341 = vmatmul.mubr.msk.bf16.vlgmr.msra.gmra.mrb[0].mxu1 %vm172_vm0, %v4778_v10  ;;  %v5037_v10 = vld [vmem:[#allocation2 + $0x7e] sm:$0xff] }
 0x79e   :  { %7393 = vmatpush3.bf16.msra.mxu1 %v8357_v14  ;;  %7344 = vmatprep.mubr.msk.bf16.mxu1 %vm8366_vm1, %v11239_v3  ;;  %v5036_v14 = vld [vmem:[#allocation2 + $0x76] sm:$0xff] }
 0x79f   :  { %7394 = vmatprep.subr.bf16.mxu1 %v11239_v3 }
 0x7a2   :  { %7395 = vmatpush3.bf16.msra.mxu1 %v8358_v17  ;;  %v5055_v17 = vpack.c.bf16 %v5037_v10, %v5036_v14 }
 0x7a3   :  { %7396 = vmatprep.subr.bf16.mxu1 %v11239_v3 }
 0x7a5   :  { %7345 = vmatmul.mubr.msk.bf16.gmra.mrb[4].mxu1 %vm172_vm0, %v4779_v26  ;;  %v5040_v26 = vld [vmem:[#allocation2 + $0x96] sm:$0xff] }
 0x7a6   :  { %7348 = vmatprep.mubr.msk.bf16.mxu1 %vm8366_vm1, %v11239_v3  ;;  %7397 = vmatpush3.bf16.msra.mxu1 %v8359_v63  ;;  %v5056_v63 = vpack.c.bf16 %v5039_v15, %v5038_v24  ;;  %v11272_v15 = vld [vmem:[#allocation4_spill] sm:$0xff] }
 0x7a7   :  { %7398 = vmatprep.subr.bf16.mxu1 %v11239_v3 }
 0x7aa   :  { %7399 = vmatpush3.bf16.msra.mxu1 %v8360_v25  ;;  %v5041_v25 = vld [vmem:[#allocation2 + $0x9e] sm:$0xff] }
 0x7ab   :  { %v5057_v46 = vpack.c.bf16 %v5041_v25, %v5040_v26 }
 0x7ad   :  { %7349 = vmatmul.mubr.msk.bf16.gmra.mrb[8].mxu1 %vm172_vm0, %v4780_v49  ;;  %v5043_v49 = vld [vmem:[#allocation2 + $0xae] sm:$0xff] }
 0x7ae   :  { %7352 = vmatprep.mubr.msk.bf16.mxu1 %vm8366_vm1, %v11239_v3  ;;  %v5058_v56 = vpack.c.bf16 %v5043_v49, %v5042_v61  ;;  %v11273_v49 = vld [vmem:[#allocation5_spill] sm:$0xff] }
 0x7b5   :  { %7353 = vmatmul.mubr.msk.bf16.gmra.mrb[12].mxu1 %vm172_vm0, %v4781_v7  ;;  %v5045_v7 = vld [vmem:[#allocation2 + $0xbe] sm:$0xff] }
 0x7b6   :  { %7356 = vmatprep.mubr.msk.bf16.mxu1 %vm8366_vm1, %v11239_v3  ;;  %v5059_v52 = vpack.c.bf16 %v5045_v7, %v5044_v47 }
 0x7bd   :  { %7357 = vmatmul.mubr.msk.bf16.gmra.mrb[16].mxu1 %vm172_vm0, %v4782_v32  ;;  %v5047_v32 = vld [vmem:[#allocation2 + $0xce] sm:$0xff] }
 0x7be   :  { %7360 = vmatprep.mubr.msk.bf16.mxu1 %vm8366_vm1, %v11239_v3  ;;  %v5060_v20 = vpack.c.bf16 %v5047_v32, %v5046_v31 }
 0x7c5   :  { %7361 = vmatmul.mubr.msk.bf16.gmra.mrb[20].mxu1 %vm172_vm0, %v4783_v8  ;;  %v5061_v8 = vpack.c.bf16 %v5048_v0, %v5048_v0 }
 0x7c6   :  { %7364 = vmatprep.mubr.msk.bf16.mxu1 %vm8366_vm1, %v11239_v3 }
 0x7cd   :  { %7365 = vmatmul.mubr.msk.bf16.gmra.mrb[24].mxu1 %vm172_vm0, %v4784_v34 }
 0x7ce   :  { %7368 = vmatprep.mubr.msk.bf16.mxu1 %vm8366_vm1, %v11239_v3 }
 0x7d5   :  { %7369 = vmatmul.mubr.msk.bf16.gmra.mrb[28].mxu1 %vm172_vm0, %v4785_v33 }
 0x7d6   :  { %7372 = vmatprep.mubr.msk.bf16.mxu1 %vm8366_vm1, %v11239_v3 }
 0x7dd   :  { %7373 = vmatmul.mubr.msk.bf16.gmra.mrb[32].mxu1 %vm172_vm0, %v4786_v19 }
 0x7de   :  { %7376 = vmatprep.mubr.msk.bf16.mxu1 %vm8366_vm1, %v11239_v3 }
 0x7e5   :  { %7377 = vmatmul.mubr.msk.bf16.gmra.mrb[36].mxu1 %vm172_vm0, %v4787_v5 }
 0x7e6   :  { %7380 = vmatprep.mubr.msk.bf16.mxu1 %vm8366_vm1, %v11239_v3 }
 0x7ed   :  { %7381 = vmatmul.mubr.msk.bf16.gmra.mrb[40].mxu1 %vm172_vm0, %v4788_v4 }
 0x7ee   :  { %7384 = vmatprep.mubr.msk.bf16.mxu1 %vm8366_vm1, %v11239_v3 }
 0x7f5   :  { %7385 = vmatmul.mubr.msk.bf16.gmra.mrb[44].mxu1 %vm172_vm0, %v4789_v62 }
 0x7f6   :  { %7388 = vmatprep.mubr.msk.bf16.mxu1 %vm8366_vm1, %v11239_v3 }
 0x7fd   :  { %7389 = vmatmul.mubr.msk.bf16.gmra.mrb[48].mxu1 %vm172_vm0, %v4790_v53 }
 0x7fe   :  { %7400 = vmatprep.mubr.msk.bf16.mxu1 %vm8366_vm1, %v11239_v3 }
 0x805   :  { %7401 = vmatmul.mubr.msk.bf16.vlgmr.msra.gmra.mrb[0].mxu1 %vm172_vm0, %v5049_v38 }
 0x806   :  { %7404 = vmatprep.mubr.msk.bf16.mxu1 %vm8366_vm1, %v11239_v3 }
 0x80d   :  { %7405 = vmatmul.mubr.msk.bf16.gmra.mrb[4].mxu1 %vm172_vm0, %v5050_v23 }
 0x80e   :  { %7408 = vmatprep.mubr.msk.bf16.mxu1 %vm8366_vm1, %v11239_v3 }
 0x815   :  { %7409 = vmatmul.mubr.msk.bf16.gmra.mrb[8].mxu1 %vm172_vm0, %v5051_v55 }
 0x816   :  { %7412 = vmatprep.mubr.msk.bf16.mxu1 %vm8366_vm1, %v11239_v3 }
 0x81d   :  { %7413 = vmatmul.mubr.msk.bf16.gmra.mrb[12].mxu1 %vm172_vm0, %v5052_v36  ;;  %v11271_v36 = vld [vmem:[#allocation3_spill] sm:$0xff] }
 0x81e   :  { %7416 = vmatprep.mubr.msk.bf16.mxu1 %vm8366_vm1, %v11239_v3 }
 0x825   :  { %7417 = vmatmul.mubr.msk.bf16.gmra.mrb[16].mxu1 %vm172_vm0, %v5053_v21 }
 0x826   :  { %7420 = vmatprep.mubr.msk.bf16.mxu1 %vm8366_vm1, %v11239_v3 }
 0x82d   :  { %7421 = vmatmul.mubr.msk.bf16.gmra.mrb[20].mxu1 %vm172_vm0, %v5054_v51 }
 0x82e   :  { %7424 = vmatprep.mubr.msk.bf16.mxu1 %vm8366_vm1, %v11239_v3 }
 0x835   :  { %7425 = vmatmul.mubr.msk.bf16.gmra.mrb[24].mxu1 %vm172_vm0, %v5055_v17 }
 0x836   :  { %7428 = vmatprep.mubr.msk.bf16.mxu1 %vm8366_vm1, %v11239_v3 }
 0x83d   :  { %7429 = vmatmul.mubr.msk.bf16.gmra.mrb[28].mxu1 %vm172_vm0, %v5056_v63 }
 0x83e   :  { %7432 = vmatprep.mubr.msk.bf16.mxu1 %vm8366_vm1, %v11239_v3 }
 0x845   :  { %7433 = vmatmul.mubr.msk.bf16.gmra.mrb[32].mxu1 %vm172_vm0, %v5057_v46 }
 0x846   :  { %7436 = vmatprep.mubr.msk.bf16.mxu1 %vm8366_vm1, %v11239_v3 }
 0x84d   :  { %7437 = vmatmul.mubr.msk.bf16.gmra.mrb[36].mxu1 %vm172_vm0, %v5058_v56 }
 0x84e   :  { %7440 = vmatprep.mubr.msk.bf16.mxu1 %vm8366_vm1, %v11239_v3 }
 0x855   :  { %7441 = vmatmul.mubr.msk.bf16.gmra.mrb[40].mxu1 %vm172_vm0, %v5059_v52 }
 0x856   :  { %7444 = vmatprep.mubr.msk.bf16.mxu1 %vm8366_vm1, %v11239_v3 }
 0x85d   :  { %7445 = vmatmul.mubr.msk.bf16.gmra.mrb[44].mxu1 %vm172_vm0, %v5060_v20 }
 0x85e   :  { %7448 = vmatprep.mubr.msk.bf16.mxu1 %vm8366_vm1, %v11239_v3 }
 0x865   :  { %7449 = vmatmul.mubr.msk.bf16.gmra.mrb[48].mxu1 %vm172_vm0, %v5061_v8 }
 0x8d8   :  { %v10794_v54 = vpop.f32.mrb[0].mxu1 }
 0x8d9   :  { %v5297_v16 = vmul.f32 %v10794_v54, %v9683_v42  ;;  %v7402_v34 = vpop.f32.mrb[1].mxu1 }
 0x8da   :  { %v10798_v57 = vpop.f32.mrb[2].mxu1 }
 0x8db   :  { %v5378_v1 = vmul.f32 %v5297_v16, %v10794_v54  ;;  %v5298_v33 = vmul.f32 %v10798_v57, %v9687_v44  ;;  %v7403_v39 = vpop.f32.mrb[3].mxu1  ;;  %v5322_v3 = vsel %vm172_vm0, %v5297_v16, 0.0 }
 0x8dd   :  { %v5323_v12 = vsel %vm172_vm0, %v5298_v33, 0.0  ;;  %v5379_v19 = vmul.f32 %v5298_v33, %v10798_v57  ;;  %v5403_v29 = vsel %vm172_vm0, %v5378_v1, 0.0  ;;  %v11274_v1 = vld [vmem:[#allocation6_spill] sm:$0xff] }
 0x8de   :  { %v5324_v2 = vadd.f32 %v5323_v12, %v5322_v3 }
 0x8df   :  { %v5404_v42 = vsel %vm172_vm0, %v5379_v19, 0.0 }
 0x8e0   :  { %v5405_v5 = vadd.f32 %v5404_v42, %v5403_v29  ;;  %v10808_v35 = vpop.f32.mrb[4].mxu1 }
 0x8e1   :  { %v5299_v9 = vmul.f32 %v10808_v35, %v9693_v48  ;;  %v7406_v4 = vpop.f32.mrb[5].mxu1 }
 0x8e2   :  { %v10812_v44 = vpop.f32.mrb[6].mxu1 }
 0x8e3   :  { %v5325_v22 = vsel %vm172_vm0, %v5299_v9, 0.0  ;;  %v5380_v27 = vmul.f32 %v5299_v9, %v10808_v35  ;;  %v5300_v62 = vmul.f32 %v10812_v44, %v9705_v60  ;;  %v7407_v58 = vpop.f32.mrb[7].mxu1 }
 0x8e4   :  { %v5326_v53 = vadd.f32 %v5325_v22, %v5324_v2  ;;  %v11275_v2 = vld [vmem:[#allocation7_spill] sm:$0xff] }
 0x8e5   :  { %v5406_v18 = vsel %vm172_vm0, %v5380_v27, 0.0  ;;  %v5327_v6 = vsel %vm172_vm0, %v5300_v62, 0.0  ;;  %v5381_v38 = vmul.f32 %v5300_v62, %v10812_v44 }
 0x8e6   :  { %v5407_v30 = vadd.f32 %v5406_v18, %v5405_v5  ;;  %v5328_v48 = vadd.f32 %v5327_v6, %v5326_v53  ;;  %v11276_v6 = vld [vmem:[#allocation8_spill] sm:$0xff] }
 0x8e7   :  { %v5408_v40 = vsel %vm172_vm0, %v5381_v38, 0.0 }
 0x8e8   :  { %v5409_v23 = vadd.f32 %v5408_v40, %v5407_v30  ;;  %v10822_v28 = vpop.f32.mrb[8].mxu1 }
 0x8e9   :  { %v5301_v43 = vmul.f32 %v10822_v28, %v9722_v13  ;;  %v7410_v55 = vpop.f32.mrb[9].mxu1 }
 0x8ea   :  { %v10826_v60 = vpop.f32.mrb[10].mxu1 }
 0x8eb   :  { %v5329_v45 = vsel %vm172_vm0, %v5301_v43, 0.0  ;;  %v5382_v37 = vmul.f32 %v5301_v43, %v10822_v28  ;;  %v5302_v50 = vmul.f32 %v10826_v60, %v11271_v36  ;;  %v7411_v59 = vpop.f32.mrb[11].mxu1  ;;  %v11277_v43 = vld [vmem:[#allocation9_spill] sm:$0xff] }
 0x8ec   :  { %v5330_v21 = vadd.f32 %v5329_v45, %v5328_v48 }
 0x8ed   :  { %v5410_v11 = vsel %vm172_vm0, %v5382_v37, 0.0  ;;  %v5331_v41 = vsel %vm172_vm0, %v5302_v50, 0.0  ;;  %v5383_v51 = vmul.f32 %v5302_v50, %v10826_v60 }
 0x8ee   :  { %v5411_v14 = vadd.f32 %v5410_v11, %v5409_v23  ;;  %v5332_v13 = vadd.f32 %v5331_v41, %v5330_v21 }
 0x8ef   :  { %v5412_v10 = vsel %vm172_vm0, %v5383_v51, 0.0 }
 0x8f0   :  { %v5413_v17 = vadd.f32 %v5412_v10, %v5411_v14  ;;  %v10836_v24 = vpop.f32.mrb[12].mxu1 }
 0x8f1   :  { %v5303_v63 = vmul.f32 %v10836_v24, %v11272_v15  ;;  %v7414_v26 = vpop.f32.mrb[13].mxu1 }
 0x8f2   :  { %v10840_v25 = vpop.f32.mrb[14].mxu1 }
 0x8f3   :  { %v5333_v46 = vsel %vm172_vm0, %v5303_v63, 0.0  ;;  %v5384_v61 = vmul.f32 %v5303_v63, %v10836_v24  ;;  %v5304_v56 = vmul.f32 %v10840_v25, %v11273_v49  ;;  %v7415_v47 = vpop.f32.mrb[15].mxu1 }
 0x8f4   :  { %v5334_v7 = vadd.f32 %v5333_v46, %v5332_v13  ;;  %v11278_v13 = vld [vmem:[#allocation10_spill] sm:$0xff]  ;;  %v11279_v46 = vld [vmem:[#allocation11_spill] sm:$0xff] }
 0x8f5   :  { %v5414_v52 = vsel %vm172_vm0, %v5384_v61, 0.0  ;;  %v5335_v31 = vsel %vm172_vm0, %v5304_v56, 0.0  ;;  %v5385_v32 = vmul.f32 %v5304_v56, %v10840_v25 }
 0x8f6   :  { %v5415_v20 = vadd.f32 %v5414_v52, %v5413_v17  ;;  %v5336_v0 = vadd.f32 %v5335_v31, %v5334_v7 }
 0x8f7   :  { %v5416_v8 = vsel %vm172_vm0, %v5385_v32, 0.0 }
 0x8f8   :  { %v5417_v16 = vadd.f32 %v5416_v8, %v5415_v20  ;;  %v10850_v34 = vpop.f32.mrb[16].mxu1 }
 0x8f9   :  { %v5305_v33 = vmul.f32 %v10850_v34, %v11274_v1  ;;  %v7418_v39 = vpop.f32.mrb[17].mxu1 }
 0x8fa   :  { %v10854_v3 = vpop.f32.mrb[18].mxu1 }
 0x8fb   :  { %v5337_v12 = vsel %vm172_vm0, %v5305_v33, 0.0  ;;  %v5386_v19 = vmul.f32 %v5305_v33, %v10850_v34  ;;  %v5306_v29 = vmul.f32 %v10854_v3, %v11275_v2  ;;  %v7419_v42 = vpop.f32.mrb[19].mxu1  ;;  %v11281_v2 = vld [vmem:[#allocation13_spill] sm:$0xff] }
 0x8fc   :  { %v5338_v5 = vadd.f32 %v5337_v12, %v5336_v0 }
 0x8fd   :  { %v5418_v9 = vsel %vm172_vm0, %v5386_v19, 0.0  ;;  %v5339_v4 = vsel %vm172_vm0, %v5306_v29, 0.0  ;;  %v5387_v22 = vmul.f32 %v5306_v29, %v10854_v3 }
 0x8fe   :  { %v5419_v27 = vadd.f32 %v5418_v9, %v5417_v16  ;;  %v5340_v62 = vadd.f32 %v5339_v4, %v5338_v5  ;;  %v11280_v16 = vld [vmem:[#allocation12_spill] sm:$0xff] }
 0x8ff   :  { %v5420_v58 = vsel %vm172_vm0, %v5387_v22, 0.0 }
 0x900   :  { %v5421_v53 = vadd.f32 %v5420_v58, %v5419_v27  ;;  %v10864_v18 = vpop.f32.mrb[20].mxu1 }
 0x901   :  { %v5307_v38 = vmul.f32 %v10864_v18, %v11276_v6  ;;  %v7422_v30 = vpop.f32.mrb[21].mxu1 }
 0x902   :  { %v10868_v48 = vpop.f32.mrb[22].mxu1 }
 0x903   :  { %v5341_v40 = vsel %vm172_vm0, %v5307_v38, 0.0  ;;  %v5388_v23 = vmul.f32 %v5307_v38, %v10864_v18  ;;  %v5308_v55 = vmul.f32 %v10868_v48, %v11277_v43  ;;  %v7423_v45 = vpop.f32.mrb[23].mxu1  ;;  %v11282_v38 = vld [vmem:[#allocation14_spill] sm:$0xff] }
 0x904   :  { %v5342_v37 = vadd.f32 %v5341_v40, %v5340_v62  ;;  %v11283_v45 = vld [vmem:[#allocation15_spill] sm:$0xff] }
 0x905   :  { %v5422_v36 = vsel %vm172_vm0, %v5388_v23, 0.0  ;;  %v5343_v50 = vsel %vm172_vm0, %v5308_v55, 0.0  ;;  %v5389_v59 = vmul.f32 %v5308_v55, %v10868_v48 }
 0x906   :  { %v5423_v21 = vadd.f32 %v5422_v36, %v5421_v53  ;;  %v5344_v11 = vadd.f32 %v5343_v50, %v5342_v37 }
 0x907   :  { %v5424_v41 = vsel %vm172_vm0, %v5389_v59, 0.0 }
 0x908   :  { %v5425_v51 = vadd.f32 %v5424_v41, %v5423_v21  ;;  %v10878_v14 = vpop.f32.mrb[24].mxu1 }
 0x909   :  { %v5309_v10 = vmul.f32 %v10878_v14, %v11278_v13  ;;  %v7426_v17 = vpop.f32.mrb[25].mxu1 }
 0x90a   :  { %v10882_v15 = vpop.f32.mrb[26].mxu1 }
 0x90b   :  { %v5345_v63 = vsel %vm172_vm0, %v5309_v10, 0.0  ;;  %v5390_v26 = vmul.f32 %v5309_v10, %v10878_v14  ;;  %v5310_v61 = vmul.f32 %v10882_v15, %v11279_v46  ;;  %v7427_v49 = vpop.f32.mrb[27].mxu1 }
 0x90c   :  { %v5346_v56 = vadd.f32 %v5345_v63, %v5344_v11  ;;  %v11284_v63 = vld [vmem:[#allocation16_spill] sm:$0xff] }
 0x90d   :  { %v5426_v47 = vsel %vm172_vm0, %v5390_v26, 0.0  ;;  %v5347_v7 = vsel %vm172_vm0, %v5310_v61, 0.0  ;;  %v5391_v52 = vmul.f32 %v5310_v61, %v10882_v15 }
 0x90e   :  { %v5427_v31 = vadd.f32 %v5426_v47, %v5425_v51  ;;  %v5348_v32 = vadd.f32 %v5347_v7, %v5346_v56  ;;  %v11285_v47 = vld [vmem:[#allocation17_spill] sm:$0xff] }
 0x90f   :  { %v5428_v20 = vsel %vm172_vm0, %v5391_v52, 0.0 }
 0x910   :  { %v5429_v0 = vadd.f32 %v5428_v20, %v5427_v31  ;;  %v10892_v8 = vpop.f32.mrb[28].mxu1 }
 0x911   :  { %v5311_v1 = vmul.f32 %v10892_v8, %v11280_v16  ;;  %v7430_v33 = vpop.f32.mrb[29].mxu1 }
 0x912   :  { %v10896_v39 = vpop.f32.mrb[30].mxu1 }
 0x913   :  { %v5349_v12 = vsel %vm172_vm0, %v5311_v1, 0.0  ;;  %v5392_v19 = vmul.f32 %v5311_v1, %v10892_v8  ;;  %v5312_v29 = vmul.f32 %v10896_v39, %v11281_v2  ;;  %v7431_v42 = vpop.f32.mrb[31].mxu1  ;;  %v11286_v2 = vld [vmem:[#allocation19_spill] sm:$0xff] }
 0x914   :  { %v5350_v5 = vadd.f32 %v5349_v12, %v5348_v32 }
 0x915   :  { %v5430_v9 = vsel %vm172_vm0, %v5392_v19, 0.0  ;;  %v5351_v4 = vsel %vm172_vm0, %v5312_v29, 0.0  ;;  %v5393_v22 = vmul.f32 %v5312_v29, %v10896_v39 }
 0x916   :  { %v5431_v27 = vadd.f32 %v5430_v9, %v5429_v0  ;;  %v5352_v62 = vadd.f32 %v5351_v4, %v5350_v5 }
 0x917   :  { %v5432_v58 = vsel %vm172_vm0, %v5393_v22, 0.0  ;;  %v11287_v22 = vld [vmem:[#allocation21_spill] sm:$0xff] }
 0x918   :  { %v5433_v53 = vadd.f32 %v5432_v58, %v5431_v27  ;;  %v10906_v6 = vpop.f32.mrb[32].mxu1 }
 0x919   :  { %v5313_v30 = vmul.f32 %v10906_v6, %v11282_v38  ;;  %v7434_v40 = vpop.f32.mrb[33].mxu1 }
 0x91a   :  { %v10910_v23 = vpop.f32.mrb[34].mxu1 }
 0x91b   :  { %v5353_v43 = vsel %vm172_vm0, %v5313_v30, 0.0  ;;  %v5394_v55 = vmul.f32 %v5313_v30, %v10906_v6  ;;  %v5314_v37 = vmul.f32 %v10910_v23, %v11283_v45  ;;  %v7435_v36 = vpop.f32.mrb[35].mxu1 }
 0x91c   :  { %v5354_v50 = vadd.f32 %v5353_v43, %v5352_v62  ;;  %v11288_v36 = vld [vmem:[#allocation22_spill] sm:$0xff] }
 0x91d   :  { %v5434_v59 = vsel %vm172_vm0, %v5394_v55, 0.0  ;;  %v5355_v21 = vsel %vm172_vm0, %v5314_v37, 0.0  ;;  %v5395_v11 = vmul.f32 %v5314_v37, %v10910_v23 }
 0x91e   :  { %v5435_v41 = vadd.f32 %v5434_v59, %v5433_v53  ;;  %v5356_v51 = vadd.f32 %v5355_v21, %v5354_v50 }
 0x91f   :  { %v5436_v13 = vsel %vm172_vm0, %v5395_v11, 0.0 }
 0x920   :  { %v5437_v10 = vadd.f32 %v5436_v13, %v5435_v41  ;;  %v10920_v17 = vpop.f32.mrb[36].mxu1 }
 0x921   :  { %v5315_v26 = vmul.f32 %v10920_v17, %v11284_v63  ;;  %v7438_v46 = vpop.f32.mrb[37].mxu1 }
 0x922   :  { %v10924_v61 = vpop.f32.mrb[38].mxu1 }
 0x923   :  { %v5357_v49 = vsel %vm172_vm0, %v5315_v26, 0.0  ;;  %v5396_v56 = vmul.f32 %v5315_v26, %v10920_v17  ;;  %v5316_v7 = vmul.f32 %v10924_v61, %v11285_v47  ;;  %v7439_v52 = vpop.f32.mrb[39].mxu1 }
 0x924   :  { %v5358_v31 = vadd.f32 %v5357_v49, %v5356_v51  ;;  %v11289_v51 = vld [vmem:[#allocation23_spill] sm:$0xff] }
 0x925   :  { %v5438_v32 = vsel %vm172_vm0, %v5396_v56, 0.0  ;;  %v5359_v20 = vsel %vm172_vm0, %v5316_v7, 0.0  ;;  %v5397_v0 = vmul.f32 %v5316_v7, %v10924_v61 }
 0x926   :  { %v5439_v16 = vadd.f32 %v5438_v32, %v5437_v10  ;;  %v5360_v1 = vadd.f32 %v5359_v20, %v5358_v31  ;;  %v11290_v32 = vld [vmem:[#allocation24_spill] sm:$0xff] }
 0x927   :  { %v5440_v33 = vsel %vm172_vm0, %v5397_v0, 0.0 }
 0x928   :  { %v5441_v12 = vadd.f32 %v5440_v33, %v5439_v16  ;;  %v10934_v19 = vpop.f32.mrb[40].mxu1 }
 0x929   :  { %v5317_v29 = vmul.f32 %v10934_v19, %v11286_v2  ;;  %v7442_v42 = vpop.f32.mrb[41].mxu1 }
 0x92a   :  { %v10938_v5 = vpop.f32.mrb[42].mxu1 }
 0x92b   :  { %v5361_v9 = vsel %vm172_vm0, %v5317_v29, 0.0  ;;  %v5398_v4 = vmul.f32 %v5317_v29, %v10934_v19  ;;  %v5318_v27 = vmul.f32 %v10938_v5, %v11287_v22  ;;  %v7443_v62 = vpop.f32.mrb[43].mxu1 }
 0x92c   :  { %v5362_v58 = vadd.f32 %v5361_v9, %v5360_v1 }
 0x92d   :  { %v5442_v53 = vsel %vm172_vm0, %v5398_v4, 0.0  ;;  %v5363_v38 = vsel %vm172_vm0, %v5318_v27, 0.0  ;;  %v5399_v30 = vmul.f32 %v5318_v27, %v10938_v5 }
 0x92e   :  { %v5443_v40 = vadd.f32 %v5442_v53, %v5441_v12  ;;  %v5364_v43 = vadd.f32 %v5363_v38, %v5362_v58 }
 0x92f   :  { %v5444_v55 = vsel %vm172_vm0, %v5399_v30, 0.0 }
 0x930   :  { %v5445_v45 = vadd.f32 %v5444_v55, %v5443_v40  ;;  %v10948_v37 = vpop.f32.mrb[44].mxu1 }
 0x931   :  { %v5319_v50 = vmul.f32 %v10948_v37, %v11288_v36  ;;  %v7446_v59 = vpop.f32.mrb[45].mxu1 }
 0x932   :  { %v10952_v21 = vpop.f32.mrb[46].mxu1 }
 0x933   :  { %v5365_v11 = vsel %vm172_vm0, %v5319_v50, 0.0  ;;  %v5400_v41 = vmul.f32 %v5319_v50, %v10948_v37  ;;  %v5320_v13 = vmul.f32 %v10952_v21, %v11289_v51  ;;  %v7447_v10 = vpop.f32.mrb[47].mxu1 }
 0x934   :  { %v5366_v63 = vadd.f32 %v5365_v11, %v5364_v43  ;;  %v11291_v10 = vld [vmem:[#allocation25_spill] sm:$0xff] }
 0x935   :  { %v5446_v26 = vsel %vm172_vm0, %v5400_v41, 0.0  ;;  %v5367_v46 = vsel %vm172_vm0, %v5320_v13, 0.0  ;;  %v5401_v49 = vmul.f32 %v5320_v13, %v10952_v21  ;;  %v5295_v41 = vld [vmem:[%s11178_s6] sm:$0x1] }
 0x936   :  { %v5447_v56 = vadd.f32 %v5446_v26, %v5445_v45  ;;  %v5368_v47 = vadd.f32 %v5367_v46, %v5366_v63 }
 0x937   :  { %v5448_v7 = vsel %vm172_vm0, %v5401_v49, 0.0 }
 0x938   :  { %v5449_v52 = vadd.f32 %v5448_v7, %v5447_v56  ;;  %v5264_v31 = vpop.f32.mrb[48].mxu1 }
 0x939   :  { %v5321_v20 = vmul.f32 %v5264_v31, %v11290_v32  ;;  %v7450_v0 = vpop.f32.mrb[49].mxu1 }
 0x93a   :  { %v5267_v16 = vpop.f32.mrb[50].mxu1 }
 0x93b   :  { %v5369_v1 = vsel %vm172_vm0, %v5321_v20, 0.0  ;;  %v5402_v33 = vmul.f32 %v5321_v20, %v5264_v31  ;;  %v7451_v12 = vpop.f32.mrb[51].mxu1 }
 0x93c   :  { %v5370_v2 = vadd.f32 %v5369_v1, %v5368_v47 }
 0x93d   :  { %v5450_v29 = vsel %vm172_vm0, %v5402_v33, 0.0 }
 0x93e   :  { %v5371_v42 = vrot.slane %v5370_v2, 4  ;;  %v5451_v9 = vadd.f32 %v5450_v29, %v5449_v52 }
 0x940   :  { %v5372_v4 = vadd.f32 %v5371_v42, %v5370_v2  ;;  %v5452_v22 = vrot.slane %v5451_v9, 4 }
 0x942   :  { %v5373_v27 = vrot.slane %v5372_v4, 2  ;;  %v5453_v62 = vadd.f32 %v5452_v22, %v5451_v9  ;;  %v5531_v22 = vld [vmem:[%s11173_s0 + $0x23] sm:$0xff] }
 0x944   :  { %v5374_v58 = vadd.f32 %v5373_v27, %v5372_v4  ;;  %v5454_v53 = vrot.slane %v5453_v62, 2  ;;  %v5530_v4 = vld [vmem:[%s11173_s0 + $0x1b] sm:$0xff]  ;;  %v5532_v27 = vld [vmem:[%s11173_s0 + $0x2b] sm:$0xff] }
 0x946   :  { %v5375_v38 = vrot.slane %v5374_v58, 1  ;;  %v5455_v30 = vadd.f32 %v5454_v53, %v5453_v62 }
 0x948   :  { %v5376_v40 = vadd.f32 %v5375_v38, %v5374_v58  ;;  %v5456_v43 = vrot.slane %v5455_v30, 1 }
 0x94a   :  { %v5377_v55 = vmul.f32 0.0078125, %v5376_v40  ;;  %v5457_v45 = vadd.f32 %v5456_v43, %v5455_v30  ;;  %v5533_v30 = vld [vmem:[%s11173_s0 + $0x33] sm:$0xff]  ;;  %v5534_v40 = vld [vmem:[%s11173_s0 + $0x3b] sm:$0xff]  ;;  %v5535_v43 = vld [vmem:[%s11173_s0 + $0x43] sm:$0xff] }
 0x94c   :  { %v5458_v36 = vmul.f32 0.0078125, %v5457_v45  ;;  %v5459_v50 = vmul.f32 %v5377_v55, %v5377_v55 }
 0x94e   :  { %v5460_v59 = vsub.f32 %v5458_v36, %v5459_v50 }
 0x950   :  { %v5461_v11 = vadd.f32 1e-05, %v5460_v59  ;;  %v5536_v59 = vld [vmem:[%s11173_s0 + $0x4b] sm:$0xff] }
 0x952   :  { %8363 = vrsqrt.f32 %v5461_v11  ;;  %v5537_v11 = vld [vmem:[%s11173_s0 + $0x53] sm:$0xff] }
 0x95c   :  { %v8364_v51 = vpop.eup %8363 }
 0x95d   :  { %v5463_v13 = vmul.f32 %v8364_v51, %v5295_v41  ;;  %v5538_v41 = vld [vmem:[%s11173_s0 + $0x5b] sm:$0xff] }
 0x95f   :  { %v5468_v63 = vrot.slane %v5463_v13, %v11291_v10  ;;  %v5495_v26 = vmul.f32 %v5463_v13, %v5377_v55 }
 0x961   :  { %v5470_v46 = vmul.f32 %v5468_v63, %v10794_v54  ;;  %v5471_v49 = vmul.f32 %v5468_v63, %v10798_v57  ;;  %v5472_v56 = vmul.f32 %v5468_v63, %v10808_v35  ;;  %v5473_v47 = vmul.f32 %v5468_v63, %v10812_v44  ;;  %v5296_v35 = vld [vmem:[%s11179_s7] sm:$0x1] }
 0x962   :  { %v5474_v7 = vmul.f32 %v5468_v63, %v10822_v28  ;;  %v5475_v52 = vmul.f32 %v5468_v63, %v10826_v60  ;;  %v5476_v32 = vmul.f32 %v5468_v63, %v10836_v24  ;;  %v5477_v20 = vmul.f32 %v5468_v63, %v10840_v25 }
 0x963   :  { %v5478_v0 = vmul.f32 %v5468_v63, %v10850_v34  ;;  %v5479_v16 = vmul.f32 %v5468_v63, %v10854_v3  ;;  %v5480_v54 = vmul.f32 %v5468_v63, %v10864_v18  ;;  %v5481_v57 = vmul.f32 %v5468_v63, %v10868_v48 }
 0x964   :  { %v5482_v44 = vmul.f32 %v5468_v63, %v10878_v14  ;;  %v5483_v28 = vmul.f32 %v5468_v63, %v10882_v15  ;;  %v5484_v60 = vmul.f32 %v5468_v63, %v10892_v8  ;;  %v5485_v24 = vmul.f32 %v5468_v63, %v10896_v39 }
 0x965   :  { %v5486_v25 = vmul.f32 %v5468_v63, %v10906_v6  ;;  %v5487_v34 = vmul.f32 %v5468_v63, %v10910_v23  ;;  %v5488_v3 = vmul.f32 %v5468_v63, %v10920_v17  ;;  %v5489_v18 = vmul.f32 %v5468_v63, %v10924_v61 }
 0x966   :  { %v5490_v48 = vmul.f32 %v5468_v63, %v10934_v19  ;;  %v5491_v1 = vmul.f32 %v5468_v63, %v10938_v5  ;;  %v5492_v14 = vmul.f32 %v5468_v63, %v10948_v37  ;;  %v5493_v15 = vmul.f32 %v5468_v63, %v10952_v21  ;;  %v5528_v19 = vld [vmem:[%s11173_s0 + $0xb] sm:$0xff]  ;;  %v5529_v5 = vld [vmem:[%s11173_s0 + $0x13] sm:$0xff] }
 0x967   :  { %v5494_v33 = vmul.f32 %v5468_v63, %v5264_v31  ;;  %v5496_v8 = vsub.f32 %v5296_v35, %v5495_v26  ;;  %v5539_v26 = vld [vmem:[%s11173_s0 + $0x63] sm:$0xff] }
 0x969   :  { %v5501_v39 = vrot.slane %v5496_v8, %v11291_v10 }
 0x96b   :  { %v5503_v12 = vadd.f32 %v5501_v39, %v5470_v46  ;;  %v5504_v6 = vadd.f32 %v5501_v39, %v5471_v49  ;;  %v5505_v2 = vadd.f32 %v5501_v39, %v5472_v56  ;;  %v5506_v23 = vadd.f32 %v5501_v39, %v5473_v47  ;;  %v5540_v46 = vld [vmem:[%s11173_s0 + $0x6b] sm:$0xff]  ;;  %v5541_v49 = vld [vmem:[%s11173_s0 + $0x73] sm:$0xff]  ;;  %v5542_v47 = vld [vmem:[%s11173_s0 + $0x7b] sm:$0xff] }
 0x96c   :  { %v5507_v29 = vadd.f32 %v5501_v39, %v5474_v7  ;;  %v5508_v17 = vadd.f32 %v5501_v39, %v5475_v52  ;;  %v5509_v42 = vadd.f32 %v5501_v39, %v5476_v32  ;;  %v5510_v61 = vadd.f32 %v5501_v39, %v5477_v20  ;;  %v5543_v7 = vld [vmem:[%s11173_s0 + $0x83] sm:$0xff]  ;;  %v5544_v52 = vld [vmem:[%s11173_s0 + $0x8b] sm:$0xff] }
 0x96d   :  { %v5511_v37 = vadd.f32 %v5501_v39, %v5478_v0  ;;  %v5512_v21 = vadd.f32 %v5501_v39, %v5479_v16  ;;  %v5513_v31 = vadd.f32 %v5501_v39, %v5480_v54  ;;  %v5514_v9 = vadd.f32 %v5501_v39, %v5481_v57  ;;  %v5545_v16 = vld [vmem:[%s11173_s0 + $0x93] sm:$0xff]  ;;  %v5546_v54 = vld [vmem:[%s11173_s0 + $0x9b] sm:$0xff]  ;;  %v5547_v57 = vld [vmem:[%s11173_s0 + $0xa3] sm:$0xff] }
 0x96e   :  { %v5515_v62 = vadd.f32 %v5501_v39, %v5482_v44  ;;  %v5516_v58 = vadd.f32 %v5501_v39, %v5483_v28  ;;  %v5517_v53 = vadd.f32 %v5501_v39, %v5484_v60  ;;  %v5518_v38 = vadd.f32 %v5501_v39, %v5485_v24  ;;  %v5548_v24 = vld [vmem:[%s11173_s0 + $0xab] sm:$0xff] }
 0x96f   :  { %v5519_v55 = vadd.f32 %v5501_v39, %v5486_v25  ;;  %v5520_v45 = vadd.f32 %v5501_v39, %v5487_v34  ;;  %v5521_v36 = vadd.f32 %v5501_v39, %v5488_v3  ;;  %v5522_v50 = vadd.f32 %v5501_v39, %v5489_v18  ;;  %v5549_v25 = vld [vmem:[%s11173_s0 + $0xb3] sm:$0xff]  ;;  %v5550_v34 = vld [vmem:[%s11173_s0 + $0xbb] sm:$0xff] }
 0x970   :  { %v5523_v51 = vadd.f32 %v5501_v39, %v5490_v48  ;;  %v5524_v13 = vadd.f32 %v5501_v39, %v5491_v1  ;;  %v5525_v10 = vadd.f32 %v5501_v39, %v5492_v14  ;;  %v5526_v63 = vadd.f32 %v5501_v39, %v5493_v15  ;;  %v5551_v14 = vld [vmem:[%s11173_s0 + $0xc3] sm:$0xff]  ;;  %v5552_v15 = vld [vmem:[%s11173_s0 + $0xcb] sm:$0xff] }
 0x971   :  { %v5527_v56 = vadd.f32 %v5501_v39, %v5494_v33  ;;  %v5553_v32 = vadd.f32 %v5528_v19, %v5503_v12  ;;  %v5554_v20 = vadd.f32 %v5529_v5, %v5504_v6  ;;  %v5555_v0 = vadd.f32 %v5530_v4, %v5505_v2 }
 0x972   :  { %v5556_v35 = vadd.f32 %v5531_v22, %v5506_v23  ;;  %v5557_v44 = vadd.f32 %v5532_v27, %v5507_v29  ;;  %v5558_v28 = vadd.f32 %v5533_v30, %v5508_v17  ;;  %v5559_v60 = vadd.f32 %v5534_v40, %v5509_v42 }
 0x973   :  { %v5560_v3 = vadd.f32 %v5535_v43, %v5510_v61  ;;  %v5561_v18 = vadd.f32 %v5536_v59, %v5511_v37  ;;  %v5562_v48 = vadd.f32 %v5537_v11, %v5512_v21  ;;  %v5563_v1 = vadd.f32 %v5538_v41, %v5513_v31 }
 0x974   :  { %v5564_v33 = vadd.f32 %v5539_v26, %v5514_v9  ;;  %v5565_v8 = vadd.f32 %v5540_v46, %v5515_v62  ;;  %v5566_v39 = vadd.f32 %v5541_v49, %v5516_v58  ;;  %v5567_v12 = vadd.f32 %v5542_v47, %v5517_v53 }
 0x975   :  { %v5568_v6 = vadd.f32 %v5543_v7, %v5518_v38  ;;  %v5569_v2 = vadd.f32 %v5544_v52, %v5519_v55  ;;  %v5570_v23 = vadd.f32 %v5545_v16, %v5520_v45  ;;  %v5571_v29 = vadd.f32 %v5546_v54, %v5521_v36 }
 0x976   :  { %v5572_v17 = vadd.f32 %v5547_v57, %v5522_v50  ;;  %v5573_v42 = vadd.f32 %v5548_v24, %v5523_v51  ;;  %v5574_v61 = vadd.f32 %v5549_v25, %v5524_v13  ;;  %v5575_v19 = vadd.f32 %v5550_v34, %v5525_v10 }
 0x977   :  { %v5576_v5 = vadd.f32 %v5551_v14, %v5526_v63  ;;  %v5577_v37 = vadd.f32 %v5552_v15, %v5527_v56  ;;  %v5578_v21 = vmax.f32 %v5553_v32, 0.0  ;;  %v5579_v31 = vmax.f32 %v5554_v20, 0.0 }
 0x978   :  { %v5580_v4 = vmax.f32 %v5555_v0, 0.0  ;;  %v5581_v22 = vmax.f32 %v5556_v35, 0.0  ;;  %v5582_v27 = vmax.f32 %v5557_v44, 0.0  ;;  %v5583_v30 = vmax.f32 %v5558_v28, 0.0 }
 0x979   :  { %v5584_v9 = vmax.f32 %v5559_v60, 0.0  ;;  %v5585_v62 = vmax.f32 %v5560_v3, 0.0  ;;  %v5586_v58 = vmax.f32 %v5561_v18, 0.0  ;;  %v5587_v53 = vmax.f32 %v5562_v48, 0.0  ;;  %5603 = vst.msk [vmem:[%s11180_s8] sm:$0xff] %vm172_vm0, %v5578_v21  ;;  %5604 = vst.msk [vmem:[%s11180_s8 + $0x8] sm:$0xff] %vm172_vm0, %v5579_v31 }
 0x97a   :  { %v5588_v38 = vmax.f32 %v5563_v1, 0.0  ;;  %v5589_v40 = vmax.f32 %v5564_v33, 0.0  ;;  %v5590_v43 = vmax.f32 %v5565_v8, 0.0  ;;  %v5591_v55 = vmax.f32 %v5566_v39, 0.0  ;;  %5605 = vst.msk [vmem:[%s11180_s8 + $0x10] sm:$0xff] %vm172_vm0, %v5580_v4  ;;  %5606 = vst.msk [vmem:[%s11180_s8 + $0x18] sm:$0xff] %vm172_vm0, %v5581_v22 }
 0x97b   :  { %5607 = vst.msk [vmem:[%s11180_s8 + $0x20] sm:$0xff] %vm172_vm0, %v5582_v27  ;;  %5608 = vst.msk [vmem:[%s11180_s8 + $0x28] sm:$0xff] %vm172_vm0, %v5583_v30  ;;  %v5592_v45 = vmax.f32 %v5567_v12, 0.0  ;;  %v5593_v36 = vmax.f32 %v5568_v6, 0.0  ;;  %v5594_v50 = vmax.f32 %v5569_v2, 0.0  ;;  %v5595_v59 = vmax.f32 %v5570_v23, 0.0 }
 0x97c   :  { %5609 = vst.msk [vmem:[%s11180_s8 + $0x30] sm:$0xff] %vm172_vm0, %v5584_v9  ;;  %5610 = vst.msk [vmem:[%s11180_s8 + $0x38] sm:$0xff] %vm172_vm0, %v5585_v62  ;;  %v5596_v11 = vmax.f32 %v5571_v29, 0.0  ;;  %v5597_v41 = vmax.f32 %v5572_v17, 0.0  ;;  %v5598_v51 = vmax.f32 %v5573_v42, 0.0  ;;  %v5599_v13 = vmax.f32 %v5574_v61, 0.0 }
 0x97d   :  { %5611 = vst.msk [vmem:[%s11180_s8 + $0x40] sm:$0xff] %vm172_vm0, %v5586_v58  ;;  %5612 = vst.msk [vmem:[%s11180_s8 + $0x48] sm:$0xff] %vm172_vm0, %v5587_v53  ;;  %v5600_v10 = vmax.f32 %v5575_v19, 0.0  ;;  %v5601_v63 = vmax.f32 %v5576_v5, 0.0  ;;  %v5602_v26 = vmax.f32 %v5577_v37, 0.0 }
 0x97e   :  { %5613 = vst.msk [vmem:[%s11180_s8 + $0x50] sm:$0xff] %vm172_vm0, %v5588_v38  ;;  %5614 = vst.msk [vmem:[%s11180_s8 + $0x58] sm:$0xff] %vm172_vm0, %v5589_v40 }
 0x97f   :  { %5615 = vst.msk [vmem:[%s11180_s8 + $0x60] sm:$0xff] %vm172_vm0, %v5590_v43  ;;  %5616 = vst.msk [vmem:[%s11180_s8 + $0x68] sm:$0xff] %vm172_vm0, %v5591_v55 }
 0x980   :  { %5617 = vst.msk [vmem:[%s11180_s8 + $0x70] sm:$0xff] %vm172_vm0, %v5592_v45  ;;  %5618 = vst.msk [vmem:[%s11180_s8 + $0x78] sm:$0xff] %vm172_vm0, %v5593_v36 }
 0x981   :  { %5619 = vst.msk [vmem:[%s11180_s8 + $0x80] sm:$0xff] %vm172_vm0, %v5594_v50  ;;  %5620 = vst.msk [vmem:[%s11180_s8 + $0x88] sm:$0xff] %vm172_vm0, %v5595_v59 }
 0x982   :  { %5621 = vst.msk [vmem:[%s11180_s8 + $0x90] sm:$0xff] %vm172_vm0, %v5596_v11  ;;  %5622 = vst.msk [vmem:[%s11180_s8 + $0x98] sm:$0xff] %vm172_vm0, %v5597_v41 }
 0x983   :  { %5623 = vst.msk [vmem:[%s11180_s8 + $0xa0] sm:$0xff] %vm172_vm0, %v5598_v51  ;;  %5624 = vst.msk [vmem:[%s11180_s8 + $0xa8] sm:$0xff] %vm172_vm0, %v5599_v13 }
 0x984   :  { %5625 = vst.msk [vmem:[%s11180_s8 + $0xb0] sm:$0xff] %vm172_vm0, %v5600_v10  ;;  %5626 = vst.msk [vmem:[%s11180_s8 + $0xb8] sm:$0xff] %vm172_vm0, %v5601_v63 }
 0x985   :  { %5627 = vst.msk [vmem:[%s11180_s8 + $0xc0] sm:$0xff] %vm172_vm0, %v5602_v26 }

// kernel: resnet18_forward.9
= control target key start
LH: loop header
LB: loop body
LE: loop exit
PB: predicated region body
PF: predicated region fallthrough
CT: control target
= control target key end

     0   :  { %v3712_v1 = vmov 0.0   ;;  %vm3713_vm0 = vmmov 0   ;;  %v3714_v17 = vmov 0   ;;  %vm409_vm1 = vcmask 523264   ;;  %s4974_s3 = inlined_call_operand.vmem [shape: bf16[576,128], index: 3, kind: input, shape index: {}]   ;;  %s4975_s0 = inlined_call_operand.vmem [shape: f32[72,576], index: 0, kind: input, shape index: {}]   ;;  %s4976_s2 = inlined_call_operand.vmem [shape: f32[72,1], index: 2, kind: input, shape index: {}]   ;;  %s4977_s6 = inlined_call_operand.vmem [shape: bf16[9,128,128], index: 6, kind: input, shape index: {}]   ;;  %s4978_s9 = inlined_call_operand.vmem [shape: bf16[64,128], index: 9, kind: input, shape index: {}]   ;;  %s4979_s4 = inlined_call_operand.vmem [shape: f32[1,128], index: 4, kind: input, shape index: {}]   ;;  %s4980_s5 = inlined_call_operand.vmem [shape: f32[1,128], index: 5, kind: input, shape index: {}]   ;;  %s4981_s1 = inlined_call_operand.vmem [shape: f32[72,64], index: 1, kind: input, shape index: {}]   ;;  %s4982_s10 = inlined_call_operand.vmem [shape: f32[1,128], index: 10, kind: input, shape index: {}]   ;;  %s4983_s11 = inlined_call_operand.vmem [shape: f32[1,128], index: 11, kind: input, shape index: {}]   ;;  %s4984_s7 = inlined_call_operand.vmem [shape: f32[1,128], index: 7, kind: input, shape index: {}]   ;;  %s4985_s8 = inlined_call_operand.vmem [shape: f32[1,128], index: 8, kind: input, shape index: {}]   ;;  %s4986_s12 = inlined_call_operand.vmem [shape: f32[72,128], index: 12, kind: output, shape index: {}]  }
   0x1   :  { %v3594_v0 = vld [vmem:[%s4974_s3 + $0x40] sm:$0xff]   ;;  %792 = vst [vmem:[#allocation2] sm:$0xff] %v3712_v1  ;;  %793 = vst [vmem:[#allocation2 + $0x8] sm:$0xff] %v3712_v1  ;;  %3148 = vmatprep.subr.bf16.mxu1 %v3712_v1  ;;  %3164 = vmatprep.mubr.msk.bf16.mxu1 %vm3713_vm0, %v3712_v1  ;;  %v3596_v3 = vld [vmem:[%s4974_s3 + $0x48] sm:$0xff]  }
   0x2   :  { %794 = vst [vmem:[#allocation2 + $0x10] sm:$0xff] %v3712_v1  ;;  %795 = vst [vmem:[#allocation2 + $0x18] sm:$0xff] %v3712_v1  ;;  %v3595_v2 = vld [vmem:[%s4974_s3] sm:$0xff]   ;;  %2821 = vmatprep.subr.bf16.mxu0 %v3594_v0  ;;  %v3597_v4 = vld [vmem:[%s4974_s3 + $0x8] sm:$0xff]   ;;  %3592 = vset.pattern.permute.xlu0 %v3714_v17 }
   0x3   :  { %796 = vst [vmem:[#allocation2 + $0x20] sm:$0xff] %v3712_v1  ;;  %797 = vst [vmem:[#allocation2 + $0x28] sm:$0xff] %v3712_v1  ;;  %2822 = vmatpush3.bf16.msra.mxu0 %v3595_v2  ;;  %v3598_v5 = vld [vmem:[%s4974_s3 + $0x50] sm:$0xff]   ;;  %v3600_v7 = vld [vmem:[%s4974_s3 + $0x58] sm:$0xff]   ;;  %3593 = vset.pattern.permute.xlu1 %v3714_v17 }
   0x4   :  { %798 = vst [vmem:[#allocation2 + $0x30] sm:$0xff] %v3712_v1  ;;  %799 = vst [vmem:[#allocation2 + $0x38] sm:$0xff] %v3712_v1  ;;  %2823 = vmatprep.subr.bf16.mxu0 %v3596_v3  ;;  %v3599_v6 = vld [vmem:[%s4974_s3 + $0x10] sm:$0xff]   ;;  %v3601_v8 = vld [vmem:[%s4974_s3 + $0x18] sm:$0xff]  }
   0x5   :  { %800 = vst [vmem:[#allocation2 + $0x40] sm:$0xff] %v3712_v1  ;;  %801 = vst [vmem:[#allocation2 + $0x48] sm:$0xff] %v3712_v1  ;;  %v3602_v9 = vld [vmem:[%s4974_s3 + $0x60] sm:$0xff]   ;;  %v3604_v11 = vld [vmem:[%s4974_s3 + $0x68] sm:$0xff]  }
   0x6   :  { %802 = vst [vmem:[#allocation2 + $0x50] sm:$0x3f] %v3712_v1  ;;  %v3603_v10 = vld [vmem:[%s4974_s3 + $0x20] sm:$0xff]   ;;  %v52_v12 = vld [vmem:[%s4975_s0 + $0x8] sm:$0xff]  ;;  %v57_v13 = vld [vmem:[%s4975_s0 + $0x30] sm:$0xff] }
   0x7   :  { %2824 = vmatpush3.bf16.msra.mxu0 %v3597_v4  ;;  %v97_v14 = vpack.c.bf16 %v57_v13, %v52_v12  ;;  %v3605_v15 = vld [vmem:[%s4974_s3 + $0x28] sm:$0xff]   ;;  %v3606_v16 = vld [vmem:[%s4974_s3 + $0x70] sm:$0xff]   ;;  %v3608_v19 = vld [vmem:[%s4974_s3 + $0x78] sm:$0xff]  }
   0x8   :  { %2825 = vmatprep.subr.bf16.mxu0 %v3598_v5  ;;  %v3607_v18 = vld [vmem:[%s4974_s3 + $0x30] sm:$0xff]   ;;  %v3609_v20 = vld [vmem:[%s4974_s3 + $0x38] sm:$0xff]   ;;  %v51_v21 = vld [vmem:[%s4975_s0] sm:$0xff] }
   0x9   :  { %457 = vmatprep.mubr.bf16.mxu0 %v97_v14  ;;  %v56_v22 = vld [vmem:[%s4975_s0 + $0x28] sm:$0xff]  ;;  %v3610_v23 = vld [vmem:[%s4974_s3 + $0xc0] sm:$0xff]   ;;  %v62_v24 = vld [vmem:[%s4975_s0 + $0x58] sm:$0xff] }
   0xa   :  { %v67_v25 = vld [vmem:[%s4975_s0 + $0x80] sm:$0xff]  ;;  %v96_v26 = vpack.c.bf16 %v56_v22, %v51_v21  ;;  %v3612_v29 = vld [vmem:[%s4974_s3 + $0xc8] sm:$0xff]   ;;  %v61_v31 = vld [vmem:[%s4975_s0 + $0x50] sm:$0xff] }
   0xb   :  { %2826 = vmatpush3.bf16.msra.mxu0 %v3599_v6  ;;  %v3611_v27 = vld [vmem:[%s4974_s3 + $0x80] sm:$0xff]   ;;  %v102_v28 = vpack.c.bf16 %v67_v25, %v62_v24  ;;  %v3613_v30 = vld [vmem:[%s4974_s3 + $0x88] sm:$0xff]   ;;  %v66_v32 = vld [vmem:[%s4975_s0 + $0x78] sm:$0xff] }
   0xc   :  { %2827 = vmatprep.subr.bf16.mxu0 %v3600_v7  ;;  %v3614_v33 = vld [vmem:[%s4974_s3 + $0xd0] sm:$0xff]   ;;  %v72_v34 = vld [vmem:[%s4975_s0 + $0xa8] sm:$0xff]  ;;  %v101_v36 = vpack.c.bf16 %v66_v32, %v61_v31  ;;  %v3616_v39 = vld [vmem:[%s4974_s3 + $0xd8] sm:$0xff]  }
   0xd   :  { %v77_v35 = vld [vmem:[%s4975_s0 + $0xd0] sm:$0xff]  ;;  %v71_v40 = vld [vmem:[%s4975_s0 + $0xa0] sm:$0xff]  ;;  %v76_v41 = vld [vmem:[%s4975_s0 + $0xc8] sm:$0xff] }
   0xe   :  { %v3615_v37 = vld [vmem:[%s4974_s3 + $0x90] sm:$0xff]   ;;  %v107_v38 = vpack.c.bf16 %v77_v35, %v72_v34  ;;  %v3617_v42 = vld [vmem:[%s4974_s3 + $0x98] sm:$0xff]   ;;  %v3618_v43 = vld [vmem:[%s4974_s3 + $0xe0] sm:$0xff]   ;;  %v106_v46 = vpack.c.bf16 %v76_v41, %v71_v40 }
   0xf   :  { %2828 = vmatpush3.bf16.msra.mxu0 %v3601_v8  ;;  %v82_v44 = vld [vmem:[%s4975_s0 + $0xf8] sm:$0xff]  ;;  %v87_v45 = vld [vmem:[%s4975_s0 + $0x120] sm:$0xff]  ;;  %v3620_v49 = vld [vmem:[%s4974_s3 + $0xe8] sm:$0xff]  }
  0x10   :  { %2829 = vmatprep.subr.bf16.mxu0 %v3602_v9  ;;  %v3619_v47 = vld [vmem:[%s4974_s3 + $0xa0] sm:$0xff]   ;;  %v112_v48 = vpack.c.bf16 %v87_v45, %v82_v44  ;;  %v81_v50 = vld [vmem:[%s4975_s0 + $0xf0] sm:$0xff]  ;;  %v86_v51 = vld [vmem:[%s4975_s0 + $0x118] sm:$0xff] }
  0x11   :  { %v3621_v52 = vld [vmem:[%s4974_s3 + $0xa8] sm:$0xff]   ;;  %v42_v53 = vld [vmem:[%s4976_s2] sm:$0xff]  ;;  %v44_v54 = vld [vmem:[%s4976_s2 + $0x10] sm:$0xff]  ;;  %v111_v58 = vpack.c.bf16 %v86_v51, %v81_v50 }
  0x12   :  { %v3622_v55 = vld [vmem:[%s4974_s3 + $0xf0] sm:$0xff]   ;;  %v92_v56 = vld [vmem:[%s4975_s0 + $0x148] sm:$0xff]  ;;  %645 = vperm.xlu0 %3592, %v42_v53   ;;  %655 = vperm.xlu1 %3593, %v44_v54   ;;  %v45_v59 = vld [vmem:[%s4976_s2 + $0x18] sm:$0xff] }
  0x13   :  { %2830 = vmatpush3.bf16.msra.mxu0 %v3603_v10  ;;  %v43_v57 = vld [vmem:[%s4976_s2 + $0x8] sm:$0xff]  ;;  %v117_v60 = vpack.c.bf16 %v92_v56, %v92_v56  ;;  %v3623_v61 = vld [vmem:[%s4974_s3 + $0xb0] sm:$0xff]   ;;  %v3624_v62 = vld [vmem:[%s4974_s3 + $0xf8] sm:$0xff]  }
  0x14   :  { %2831 = vmatprep.subr.bf16.mxu0 %v3604_v11  ;;  %v46_v63 = vld [vmem:[%s4976_s2 + $0x20] sm:$0xff]  ;;  %v47_v0 = vld [vmem:[%s4976_s2 + $0x28] sm:$0xff]  ;;  %v3625_v3 = vld [vmem:[%s4974_s3 + $0xb8] sm:$0xff]  }
  0x15   :  { %v91_v2 = vld [vmem:[%s4975_s0 + $0x140] sm:$0xff]  ;;  %v54_v4 = vld [vmem:[%s4975_s0 + $0x18] sm:$0xff]  ;;  %v48_v6 = vld [vmem:[%s4976_s2 + $0x30] sm:$0xff] }
  0x16   :  { %650 = vperm.xlu0 %3592, %v43_v57   ;;  %660 = vperm.xlu1 %3593, %v45_v59   ;;  %v59_v5 = vld [vmem:[%s4975_s0 + $0x40] sm:$0xff]  ;;  %v116_v7 = vpack.c.bf16 %v91_v2, %v91_v2  ;;  %v49_v8 = vld [vmem:[%s4976_s2 + $0x38] sm:$0xff]  ;;  %v53_v11 = vld [vmem:[%s4975_s0 + $0x10] sm:$0xff] }
  0x17   :  { %2832 = vmatpush3.bf16.msra.mxu0 %v3605_v15  ;;  %v99_v9 = vpack.c.bf16 %v59_v5, %v54_v4  ;;  %v50_v10 = vld [vmem:[%s4976_s2 + $0x40] sm:$0xff]  ;;  %v58_v12 = vld [vmem:[%s4975_s0 + $0x38] sm:$0xff]  ;;  %v64_v13 = vld [vmem:[%s4975_s0 + $0x68] sm:$0xff] }
  0x18   :  { %2833 = vmatprep.subr.bf16.mxu0 %v3606_v16  ;;  %v69_v14 = vld [vmem:[%s4975_s0 + $0x90] sm:$0xff]  ;;  %v98_v15 = vpack.c.bf16 %v58_v12, %v53_v11  ;;  %v3626_v16 = vld [vmem:[%s4974_s3 + $0x100] sm:$0xff]   ;;  %v74_v21 = vld [vmem:[%s4975_s0 + $0xb8] sm:$0xff] }
  0x19   :  { %v104_v17 = vpack.c.bf16 %v69_v14, %v64_v13  ;;  %v79_v22 = vld [vmem:[%s4975_s0 + $0xe0] sm:$0xff]  ;;  %v3628_v25 = vld [vmem:[%s4974_s3 + $0x110] sm:$0xff]   ;;  %v88_v34 = vld [vmem:[%s4975_s0 + $0x128] sm:$0xff] }
  0x1a   :  { %665 = vperm.xlu0 %3592, %v46_v63   ;;  %670 = vperm.xlu1 %3593, %v47_v0   ;;  %v109_v24 = vpack.c.bf16 %v79_v22, %v74_v21  ;;  %v94_v35 = vld [vmem:[%s4975_s0 + $0x158] sm:$0xff]  ;;  %v55_v40 = vld [vmem:[%s4975_s0 + $0x20] sm:$0xff]  ;;  %v60_v41 = vld [vmem:[%s4975_s0 + $0x48] sm:$0xff] }
  0x1b   :  { %2834 = vmatpush3.bf16.msra.mxu0 %v3607_v18  ;;  %v63_v18 = vld [vmem:[%s4975_s0 + $0x60] sm:$0xff]  ;;  %v70_v44 = vld [vmem:[%s4975_s0 + $0x98] sm:$0xff]  ;;  %v3633_v11 = vld [vmem:[%s4977_s6 + $0x88] sm:$0xff]  }
  0x1c   :  { %2835 = vmatprep.subr.bf16.mxu0 %v3608_v19  ;;  %v68_v19 = vld [vmem:[%s4975_s0 + $0x88] sm:$0xff]  ;;  %v90_v50 = vld [vmem:[%s4975_s0 + $0x138] sm:$0xff]  ;;  %v3631_v5 = vld [vmem:[%s4977_s6 + $0x80] sm:$0xff]  }
  0x1d   :  { %3149 = vmatpush3.bf16.msra.mxu1 %v3631_v5  ;;  %v3634_v13 = vld [vmem:[%s4977_s6 + $0x50] sm:$0xff]   ;;  %v3637_v21 = vld [vmem:[%s4977_s6 + $0x98] sm:$0xff]  }
  0x1e   :  { %675 = vperm.xlu0 %3592, %v48_v6   ;;  %680 = vperm.xlu1 %3593, %v49_v8   ;;  %v3635_v14 = vld [vmem:[%s4977_s6 + $0x90] sm:$0xff]  }
  0x1f   :  { %2836 = vmatpush3.bf16.msra.mxu0 %v3609_v20  ;;  %v3627_v20 = vld [vmem:[%s4974_s3 + $0x108] sm:$0xff]   ;;  %3150 = vmatprep.subr.bf16.mxu1 %v3712_v1 }
  0x20   :  { %2867 = vmatprep.subr.bf16.mxu0 %v3610_v23  ;;  %v103_v23 = vpack.c.bf16 %v68_v19, %v63_v18 }
  0x21   :  { %3151 = vmatpush3.bf16.msra.mxu1 %v3633_v11 }
  0x22   :  { %458 = vmatmul.mubr.bf16.vlgmr.msra.gmra.mrb[0].mxu0 %v96_v26  ;;  %685 = vperm.xlu0 %3592, %v50_v10   ;;  %v73_v26 = vld [vmem:[%s4975_s0 + $0xb0] sm:$0xff]  ;;  %v3632_v10 = vld [vmem:[%s4977_s6 + $0x48] sm:$0xff]  }
  0x23   :  { %2868 = vmatpush3.bf16.msra.mxu0 %v3611_v27  ;;  %465 = vmatprep.mubr.bf16.mxu0 %v102_v28  ;;  %v78_v27 = vld [vmem:[%s4975_s0 + $0xd8] sm:$0xff] }
  0x24   :  { %2869 = vmatprep.subr.bf16.mxu0 %v3612_v29  ;;  %v3629_v28 = vld [vmem:[%s4974_s3 + $0x118] sm:$0xff]   ;;  %v84_v29 = vld [vmem:[%s4975_s0 + $0x108] sm:$0xff]  ;;  %v108_v31 = vpack.c.bf16 %v78_v27, %v73_v26  ;;  %3152 = vmatprep.subr.bf16.mxu1 %v3712_v1 }
  0x25   :  { %3153 = vmatpush3.bf16.msra.mxu1 %v3635_v14 }
  0x26   :  { %3154 = vmatprep.subr.bf16.mxu1 %v3712_v1 }
  0x27   :  { %2870 = vmatpush3.bf16.msra.mxu0 %v3613_v30  ;;  %v89_v30 = vld [vmem:[%s4975_s0 + $0x130] sm:$0xff] }
  0x28   :  { %2871 = vmatprep.subr.bf16.mxu0 %v3614_v33  ;;  %v114_v32 = vpack.c.bf16 %v89_v30, %v84_v29  ;;  %v83_v33 = vld [vmem:[%s4975_s0 + $0x100] sm:$0xff]  ;;  %v3640_v30 = vld [vmem:[%s4977_s6 + $0x68] sm:$0xff]  }
  0x29   :  { %3155 = vmatpush3.bf16.msra.mxu1 %v3637_v21 }
  0x2a   :  { %466 = vmatmul.mubr.bf16.gmra.mrb[4].mxu0 %v101_v36  ;;  %v113_v36 = vpack.c.bf16 %v88_v34, %v83_v33  ;;  %3156 = vmatprep.subr.bf16.mxu1 %v3712_v1  ;;  %v3643_v33 = vld [vmem:[%s4977_s6 + $0xb0] sm:$0xff]  }
  0x2b   :  { %2872 = vmatpush3.bf16.msra.mxu0 %v3615_v37  ;;  %473 = vmatprep.mubr.bf16.mxu0 %v107_v38  ;;  %v119_v37 = vpack.c.bf16 %v94_v35, %v94_v35  ;;  %v93_v38 = vld [vmem:[%s4975_s0 + $0x150] sm:$0xff] }
  0x2c   :  { %2873 = vmatprep.subr.bf16.mxu0 %v3616_v39  ;;  %v118_v39 = vpack.c.bf16 %v93_v38, %v93_v38 }
  0x2f   :  { %2874 = vmatpush3.bf16.msra.mxu0 %v3617_v42  ;;  %v100_v42 = vpack.c.bf16 %v60_v41, %v55_v40 }
  0x30   :  { %2875 = vmatprep.subr.bf16.mxu0 %v3618_v43  ;;  %v65_v43 = vld [vmem:[%s4975_s0 + $0x70] sm:$0xff] }
  0x31   :  { %v105_v45 = vpack.c.bf16 %v70_v44, %v65_v43 }
  0x32   :  { %474 = vmatmul.mubr.bf16.gmra.mrb[8].mxu0 %v106_v46  ;;  %v75_v46 = vld [vmem:[%s4975_s0 + $0xc0] sm:$0xff] }
  0x33   :  { %2876 = vmatpush3.bf16.msra.mxu0 %v3619_v47  ;;  %481 = vmatprep.mubr.bf16.mxu0 %v112_v48  ;;  %v80_v47 = vld [vmem:[%s4975_s0 + $0xe8] sm:$0xff] }
  0x34   :  { %2877 = vmatprep.subr.bf16.mxu0 %v3620_v49  ;;  %v110_v48 = vpack.c.bf16 %v80_v47, %v75_v46  ;;  %v85_v49 = vld [vmem:[%s4975_s0 + $0x110] sm:$0xff] }
  0x35   :  { %v115_v51 = vpack.c.bf16 %v90_v50, %v85_v49 }
  0x37   :  { %2878 = vmatpush3.bf16.msra.mxu0 %v3621_v52  ;;  %v95_v52 = vld [vmem:[%s4975_s0 + $0x160] sm:$0xff] }
  0x38   :  { %2879 = vmatprep.subr.bf16.mxu0 %v3622_v55  ;;  %v120_v53 = vpack.c.bf16 %v95_v52, %v95_v52 }
  0x3a   :  { %482 = vmatmul.mubr.bf16.gmra.mrb[12].mxu0 %v111_v58 }
  0x3b   :  { %489 = vmatprep.mubr.bf16.mxu0 %v117_v60  ;;  %2880 = vmatpush3.bf16.msra.mxu0 %v3623_v61 }
  0x3c   :  { %2881 = vmatprep.subr.bf16.mxu0 %v3624_v62 }
  0x3f   :  { %2882 = vmatpush3.bf16.msra.mxu0 %v3625_v3  ;;  %v3630_v3 = vld [vmem:[%s4977_s6 + $0x40] sm:$0xff]  }
  0x40   :  { %3048 = vmatprep.subr.bf16.mxu0 %v3712_v1 }
  0x42   :  { %490 = vmatmul.mubr.bf16.gmra.mrb[16].mxu0 %v116_v7 }
  0x43   :  { %529 = vmatprep.mubr.bf16.mxu0 %v99_v9 }
  0x4a   :  { %530 = vmatmul.mubr.bf16.vlgmr.msra.gmra.mrb[20].mxu0 %v98_v15 }
  0x4b   :  { %3049 = vmatpush3.bf16.msra.mxu0 %v3626_v16  ;;  %537 = vmatprep.mubr.bf16.mxu0 %v104_v17 }
  0x4c   :  { %3050 = vmatprep.subr.bf16.mxu0 %v3712_v1 }
  0x4f   :  { %3051 = vmatpush3.bf16.msra.mxu0 %v3627_v20  ;;  %v3636_v20 = vld [vmem:[%s4977_s6 + $0x58] sm:$0xff]  }
  0x50   :  { %3052 = vmatprep.subr.bf16.mxu0 %v3712_v1 }
  0x52   :  { %538 = vmatmul.mubr.bf16.gmra.mrb[24].mxu0 %v103_v23  ;;  %v3638_v23 = vld [vmem:[%s4977_s6 + $0x60] sm:$0xff]  }
  0x53   :  { %545 = vmatprep.mubr.bf16.mxu0 %v109_v24  ;;  %3053 = vmatpush3.bf16.msra.mxu0 %v3628_v25  ;;  %v3639_v24 = vld [vmem:[%s4977_s6 + $0xa0] sm:$0xff]  }
  0x54   :  { %3054 = vmatprep.subr.bf16.mxu0 %v3712_v1  ;;  %3157 = vmatpush3.bf16.msra.mxu1 %v3639_v24 }
  0x55   :  { %3158 = vmatprep.subr.bf16.mxu1 %v3712_v1 }
  0x57   :  { %3055 = vmatpush3.bf16.msra.mxu0 %v3629_v28 }
  0x58   :  { %3076 = vmatprep.subr.bf16.mxu0 %v3712_v1 }
  0x5a   :  { %546 = vmatmul.mubr.bf16.gmra.mrb[28].mxu0 %v108_v31  ;;  %v3641_v31 = vld [vmem:[%s4977_s6 + $0xa8] sm:$0xff]  }
  0x5b   :  { %553 = vmatprep.mubr.bf16.mxu0 %v114_v32  ;;  %3159 = vmatpush3.bf16.msra.mxu1 %v3641_v31  ;;  %v3642_v32 = vld [vmem:[%s4977_s6 + $0x70] sm:$0xff]  }
  0x5c   :  { %3160 = vmatprep.subr.bf16.mxu1 %v3712_v1 }
  0x5f   :  { %3161 = vmatpush3.bf16.msra.mxu1 %v3643_v33 }
  0x60   :  { %3162 = vmatprep.subr.bf16.mxu1 %v3712_v1 }
  0x62   :  { %554 = vmatmul.mubr.bf16.gmra.mrb[32].mxu0 %v113_v36  ;;  %v3644_v36 = vld [vmem:[%s4977_s6 + $0x78] sm:$0xff]  }
  0x63   :  { %561 = vmatprep.mubr.bf16.mxu0 %v119_v37 }
  0x6a   :  { %562 = vmatmul.mubr.bf16.gmra.mrb[36].mxu0 %v118_v39  ;;  %v3645_v39 = vld [vmem:[%s4977_s6 + $0xb8] sm:$0xff]  }
  0x6b   :  { %3056 = vmatprep.mubr.msk.bf16.mxu0 %vm3713_vm0, %v3712_v1  ;;  %3163 = vmatpush3.bf16.msra.mxu1 %v3645_v39 }
  0x6c   :  { %3184 = vmatprep.subr.bf16.mxu1 %v3712_v1 }
  0x72   :  { %3057 = vmatmul.mubr.msk.bf16.vlgmr.msra.gmra.mrb[40].mxu0 %vm409_vm1, %v100_v42 }
  0x73   :  { %3060 = vmatprep.mubr.msk.bf16.mxu0 %vm3713_vm0, %v3712_v1  ;;  %3077 = vmatpush3.bf16.msra.mxu0 %v3630_v3 }
  0x74   :  { %3078 = vmatprep.subr.bf16.mxu0 %v3712_v1 }
  0x77   :  { %3079 = vmatpush3.bf16.msra.mxu0 %v3632_v10 }
  0x78   :  { %3080 = vmatprep.subr.bf16.mxu0 %v3712_v1 }
  0x7a   :  { %3061 = vmatmul.mubr.msk.bf16.gmra.mrb[44].mxu0 %vm409_vm1, %v105_v45 }
  0x7b   :  { %3064 = vmatprep.mubr.msk.bf16.mxu0 %vm3713_vm0, %v3712_v1  ;;  %3081 = vmatpush3.bf16.msra.mxu0 %v3634_v13 }
  0x7c   :  { %3082 = vmatprep.subr.bf16.mxu0 %v3712_v1 }
  0x7f   :  { %3083 = vmatpush3.bf16.msra.mxu0 %v3636_v20 }
  0x80   :  { %3084 = vmatprep.subr.bf16.mxu0 %v3712_v1 }
  0x82   :  { %3065 = vmatmul.mubr.msk.bf16.gmra.mrb[48].mxu0 %vm409_vm1, %v110_v48 }
  0x83   :  { %3068 = vmatprep.mubr.msk.bf16.mxu0 %vm3713_vm0, %v3712_v1  ;;  %3085 = vmatpush3.bf16.msra.mxu0 %v3638_v23 }
  0x84   :  { %3086 = vmatprep.subr.bf16.mxu0 %v3712_v1 }
  0x87   :  { %3087 = vmatpush3.bf16.msra.mxu0 %v3640_v30 }
  0x88   :  { %3088 = vmatprep.subr.bf16.mxu0 %v3712_v1 }
  0x8a   :  { %3069 = vmatmul.mubr.msk.bf16.gmra.mrb[52].mxu0 %vm409_vm1, %v115_v51 }
  0x8b   :  { %3072 = vmatprep.mubr.msk.bf16.mxu0 %vm3713_vm0, %v3712_v1  ;;  %3089 = vmatpush3.bf16.msra.mxu0 %v3642_v32 }
  0x8c   :  { %3090 = vmatprep.subr.bf16.mxu0 %v3712_v1 }
  0x8f   :  { %3091 = vmatpush3.bf16.msra.mxu0 %v3644_v36 }
  0x90   :  { %3112 = vmatprep.subr.bf16.mxu0 %v3712_v1 }
  0x91   :  { %v4174_v11 = vpop.permute.xlu0 %645  ;;  %v4186_v20 = vpop.permute.xlu1 %655 }
  0x92   :  { %3073 = vmatmul.mubr.msk.bf16.gmra.mrb[56].mxu0 %vm409_vm1, %v120_v53 }
  0x93   :  { %3092 = vmatprep.mubr.msk.bf16.mxu0 %vm3713_vm0, %v3712_v1 }
  0x95   :  { %v4194_v30 = vpop.permute.xlu1 %660 }
  0xf5   :  { %v2837_v54 = vpop.f32.mrb[0].mxu0 }
  0xf6   :  { %v2838_v55 = vpop.f32.mrb[1].mxu0 }
  0xf7   :  { %v4086_v56 = vadd.f32 %v2838_v55, %v2837_v54  ;;  %v2840_v57 = vpop.f32.mrb[2].mxu0 }
  0xf8   :  { %v2841_v58 = vpop.f32.mrb[3].mxu0 }
  0xf9   :  { %v4088_v59 = vadd.f32 %v2841_v58, %v2840_v57 }
  0xfd   :  { %v2843_v60 = vpop.f32.mrb[4].mxu0 }
  0xfe   :  { %v2844_v61 = vpop.f32.mrb[5].mxu0 }
  0xff   :  { %v4090_v62 = vadd.f32 %v2844_v61, %v2843_v60  ;;  %v2846_v63 = vpop.f32.mrb[6].mxu0 }
 0x100   :  { %v2847_v0 = vpop.f32.mrb[7].mxu0 }
 0x101   :  { %v4092_v2 = vadd.f32 %v2847_v0, %v2846_v63 }
 0x105   :  { %v2849_v4 = vpop.f32.mrb[8].mxu0 }
 0x106   :  { %v2850_v6 = vpop.f32.mrb[9].mxu0 }
 0x107   :  { %v4100_v7 = vadd.f32 %v2850_v6, %v2849_v4  ;;  %v2852_v8 = vpop.f32.mrb[10].mxu0 }
 0x108   :  { %v2853_v9 = vpop.f32.mrb[11].mxu0 }
 0x109   :  { %v4110_v12 = vadd.f32 %v2853_v9, %v2852_v8 }
 0x10d   :  { %v2855_v15 = vpop.f32.mrb[12].mxu0 }
 0x10e   :  { %v2856_v16 = vpop.f32.mrb[13].mxu0 }
 0x10f   :  { %v4120_v17 = vadd.f32 %v2856_v16, %v2855_v15  ;;  %v2858_v18 = vpop.f32.mrb[14].mxu0  ;;  %v4180_v16 = vpop.permute.xlu0 %650 }
 0x110   :  { %v2859_v19 = vpop.f32.mrb[15].mxu0 }
 0x111   :  { %v4130_v22 = vadd.f32 %v2859_v19, %v2858_v18 }
 0x115   :  { %v2861_v25 = vpop.f32.mrb[16].mxu0 }
 0x116   :  { %v2862_v26 = vpop.f32.mrb[17].mxu0 }
 0x117   :  { %v2863_v27 = vadd.f32 %v2862_v26, %v2861_v25  ;;  %v2864_v28 = vpop.f32.mrb[18].mxu0 }
 0x118   :  { %v2865_v29 = vpop.f32.mrb[19].mxu0 }
 0x11d   :  { %v2883_v34 = vpop.f32.mrb[20].mxu0 }
 0x11e   :  { %v2884_v35 = vpop.f32.mrb[21].mxu0 }
 0x11f   :  { %v2885_v37 = vadd.f32 %v2884_v35, %v2883_v34  ;;  %v2886_v38 = vpop.f32.mrb[22].mxu0 }
 0x120   :  { %v2887_v40 = vpop.f32.mrb[23].mxu0 }
 0x121   :  { %v2888_v41 = vadd.f32 %v2887_v40, %v2886_v38  ;;  %v532_v42 = vadd.f32 %v2885_v37, %v4086_v56 }
 0x123   :  { %v535_v43 = vadd.f32 %v2888_v41, %v4088_v59 }
 0x125   :  { %v2889_v44 = vpop.f32.mrb[24].mxu0 }
 0x126   :  { %v2890_v45 = vpop.f32.mrb[25].mxu0 }
 0x127   :  { %v2891_v46 = vadd.f32 %v2890_v45, %v2889_v44  ;;  %v2892_v47 = vpop.f32.mrb[26].mxu0  ;;  %v4206_v44 = vpop.permute.xlu0 %665 }
 0x128   :  { %v2893_v48 = vpop.f32.mrb[27].mxu0 }
 0x129   :  { %v2894_v49 = vadd.f32 %v2893_v48, %v2892_v47  ;;  %v540_v50 = vadd.f32 %v2891_v46, %v4090_v62 }
 0x12b   :  { %v543_v51 = vadd.f32 %v2894_v49, %v4092_v2  ;;  %v4212_v49 = vpop.permute.xlu1 %670 }
 0x12d   :  { %v2895_v52 = vpop.f32.mrb[28].mxu0 }
 0x12e   :  { %v2896_v53 = vpop.f32.mrb[29].mxu0 }
 0x12f   :  { %v2897_v54 = vadd.f32 %v2896_v53, %v2895_v52  ;;  %v2898_v55 = vpop.f32.mrb[30].mxu0 }
 0x130   :  { %v2899_v56 = vpop.f32.mrb[31].mxu0 }
 0x131   :  { %v2900_v57 = vadd.f32 %v2899_v56, %v2898_v55  ;;  %v548_v58 = vadd.f32 %v2897_v54, %v4100_v7 }
 0x133   :  { %v551_v59 = vadd.f32 %v2900_v57, %v4110_v12 }
 0x135   :  { %v2901_v60 = vpop.f32.mrb[32].mxu0 }
 0x136   :  { %v2902_v61 = vpop.f32.mrb[33].mxu0 }
 0x137   :  { %v2903_v63 = vadd.f32 %v2902_v61, %v2901_v60  ;;  %v2904_v0 = vpop.f32.mrb[34].mxu0  ;;  %v4218_v61 = vpop.permute.xlu0 %675 }
 0x138   :  { %v2905_v3 = vpop.f32.mrb[35].mxu0 }
 0x139   :  { %v2906_v4 = vadd.f32 %v2905_v3, %v2904_v0  ;;  %v556_v62 = vadd.f32 %v2903_v63, %v4120_v17 }
 0x13b   :  { %v559_v2 = vadd.f32 %v2906_v4, %v4130_v22  ;;  %v4221_v4 = vpop.permute.xlu1 %680 }
 0x13d   :  { %v2907_v5 = vpop.f32.mrb[36].mxu0 }
 0x13e   :  { %v2908_v6 = vpop.f32.mrb[37].mxu0 }
 0x13f   :  { %v2909_v8 = vadd.f32 %v2908_v6, %v2907_v5  ;;  %v2910_v9 = vpop.f32.mrb[38].mxu0 }
 0x140   :  { %v2911_v10 = vpop.f32.mrb[39].mxu0 }
 0x141   :  { %v4176_v7 = vadd.f32 %v2909_v8, %v2863_v27 }
 0x145   :  { %v603_v12 = vpop.f32.mrb[40].mxu0 }
 0x146   :  { %v4178_v13 = vadd.f32 %v603_v12, %v532_v42  ;;  %v3058_v14 = vpop.f32.mrb[41].mxu0 }
 0x147   :  { %v606_v15 = vpop.f32.mrb[42].mxu0 }
 0x148   :  { %v688_v17 = vmul.f32 %v4174_v11, %v4178_v13  ;;  %v4184_v18 = vadd.f32 %v606_v15, %v535_v43  ;;  %v3059_v19 = vpop.f32.mrb[43].mxu0 }
 0x149   :  { %v4225_v19 = vpop.permute.xlu0 %685 }
 0x14a   :  { %v689_v21 = vmul.f32 %v4180_v16, %v4184_v18  ;;  %v713_v22 = vmul.f32 %v688_v17, %v4178_v13 }
 0x14c   :  { %v697_v23 = vadd.f32 %v689_v21, %v688_v17  ;;  %v714_v24 = vmul.f32 %v689_v21, %v4184_v18 }
 0x14d   :  { %v611_v25 = vpop.f32.mrb[44].mxu0 }
 0x14e   :  { %v4192_v26 = vadd.f32 %v611_v25, %v540_v50  ;;  %v722_v27 = vadd.f32 %v714_v24, %v713_v22  ;;  %v3062_v28 = vpop.f32.mrb[45].mxu0 }
 0x14f   :  { %v614_v29 = vpop.f32.mrb[46].mxu0 }
 0x150   :  { %v690_v31 = vmul.f32 %v4186_v20, %v4192_v26  ;;  %v4198_v32 = vadd.f32 %v614_v29, %v543_v51  ;;  %v3063_v33 = vpop.f32.mrb[47].mxu0 }
 0x152   :  { %v698_v34 = vadd.f32 %v697_v23, %v690_v31  ;;  %v715_v35 = vmul.f32 %v690_v31, %v4192_v26  ;;  %v691_v36 = vmul.f32 %v4194_v30, %v4198_v32 }
 0x154   :  { %v723_v37 = vadd.f32 %v722_v27, %v715_v35  ;;  %v699_v38 = vadd.f32 %v698_v34, %v691_v36  ;;  %v716_v39 = vmul.f32 %v691_v36, %v4198_v32 }
 0x155   :  { %v619_v40 = vpop.f32.mrb[48].mxu0 }
 0x156   :  { %v4204_v41 = vadd.f32 %v619_v40, %v548_v58  ;;  %v724_v42 = vadd.f32 %v723_v37, %v716_v39  ;;  %v3066_v43 = vpop.f32.mrb[49].mxu0 }
 0x157   :  { %v622_v45 = vpop.f32.mrb[50].mxu0 }
 0x158   :  { %v692_v46 = vmul.f32 %v4206_v44, %v4204_v41  ;;  %v4210_v47 = vadd.f32 %v622_v45, %v551_v59  ;;  %v3067_v48 = vpop.f32.mrb[51].mxu0 }
 0x159   :  { %v743_v48 = vlaneseq }
 0x15a   :  { %v700_v50 = vadd.f32 %v699_v38, %v692_v46  ;;  %v717_v51 = vmul.f32 %v692_v46, %v4204_v41  ;;  %v693_v52 = vmul.f32 %v4212_v49, %v4210_v47 }
 0x15c   :  { %v725_v53 = vadd.f32 %v724_v42, %v717_v51  ;;  %v701_v54 = vadd.f32 %v700_v50, %v693_v52  ;;  %v718_v55 = vmul.f32 %v693_v52, %v4210_v47  ;;  %v744_v50 = vshrl.u32 %v743_v48, 7  ;;  %v641_v51 = vld [vmem:[%s4979_s4] sm:$0x1] }
 0x15d   :  { %v627_v56 = vpop.f32.mrb[52].mxu0 }
 0x15e   :  { %v726_v57 = vadd.f32 %v725_v53, %v718_v55  ;;  %v628_v58 = vadd.f32 %v627_v56, %v556_v62  ;;  %v3070_v60 = vpop.f32.mrb[53].mxu0  ;;  %v4231_v52 = vsub.s32 0, %v744_v50  ;;  %v642_v55 = vld [vmem:[%s4980_s5] sm:$0x1] }
 0x15f   :  { %v630_v59 = vpop.f32.mrb[54].mxu0 }
 0x160   :  { %v694_v63 = vmul.f32 %v4218_v61, %v628_v58  ;;  %v631_v0 = vadd.f32 %v630_v59, %v559_v2  ;;  %v3071_v3 = vpop.f32.mrb[55].mxu0 }
 0x162   :  { %v702_v5 = vadd.f32 %v701_v54, %v694_v63  ;;  %v719_v6 = vmul.f32 %v694_v63, %v628_v58  ;;  %v695_v8 = vmul.f32 %v4221_v4, %v631_v0 }
 0x164   :  { %v727_v9 = vadd.f32 %v726_v57, %v719_v6  ;;  %v703_v10 = vadd.f32 %v702_v5, %v695_v8  ;;  %v720_v12 = vmul.f32 %v695_v8, %v631_v0 }
 0x165   :  { %v635_v14 = vpop.f32.mrb[56].mxu0 }
 0x166   :  { %v728_v15 = vadd.f32 %v727_v9, %v720_v12  ;;  %v636_v62 = vadd.f32 %v635_v14, %v4176_v7  ;;  %v3074_v17 = vpop.f32.mrb[57].mxu0 }
 0x167   :  { %v638_v21 = vpop.f32.mrb[58].mxu0 }
 0x168   :  { %v696_v2 = vmul.f32 %v4225_v19, %v636_v62  ;;  %v3075_v22 = vpop.f32.mrb[59].mxu0 }
 0x16a   :  { %v704_v23 = vadd.f32 %v703_v10, %v696_v2  ;;  %v721_v24 = vmul.f32 %v696_v2, %v636_v62 }
 0x16c   :  { %v705_v25 = vrot.slane %v704_v23, 4  ;;  %v729_v27 = vadd.f32 %v728_v15, %v721_v24 }
 0x16e   :  { %v706_v28 = vadd.f32 %v705_v25, %v704_v23  ;;  %v730_v29 = vrot.slane %v729_v27, 4 }
 0x170   :  { %v707_v31 = vrot.slane %v706_v28, 2  ;;  %v731_v33 = vadd.f32 %v730_v29, %v729_v27 }
 0x172   :  { %v708_v34 = vadd.f32 %v707_v31, %v706_v28  ;;  %v732_v35 = vrot.slane %v731_v33, 2 }
 0x174   :  { %v709_v36 = vrot.slane %v708_v34, 1  ;;  %v733_v37 = vadd.f32 %v732_v35, %v731_v33 }
 0x176   :  { %v710_v7 = vadd.f32 %v709_v36, %v708_v34  ;;  %v734_v38 = vrot.slane %v733_v37, 1 }
 0x178   :  { %v712_v39 = vmul.f32 0.03125, %v710_v7  ;;  %v735_v40 = vadd.f32 %v734_v38, %v733_v37 }
 0x17a   :  { %v736_v42 = vmul.f32 0.03125, %v735_v40  ;;  %v737_v43 = vmul.f32 %v712_v39, %v712_v39 }
 0x17c   :  { %v738_v45 = vsub.f32 %v736_v42, %v737_v43 }
 0x17e   :  { %v739_v46 = vadd.f32 1e-05, %v738_v45 }
 0x180   :  { %3706 = vrsqrt.f32 %v739_v46 }
 0x18a   :  { %v3707_v53 = vpop.eup %3706 }
 0x18b   :  { %v741_v54 = vmul.f32 %v3707_v53, %v641_v51  ;;  %v3646_v51 = vld [vmem:[%s4977_s6 + $0xc0] sm:$0xff]  }
 0x18d   :  { %v746_v56 = vrot.slane %v741_v54, %v4231_v52  ;;  %v757_v57 = vmul.f32 %v741_v54, %v712_v39  ;;  %v3648_v54 = vld [vmem:[%s4977_s6] sm:$0xff]  }
 0x18f   :  { %v751_v60 = vmul.f32 %v746_v56, %v4198_v32  ;;  %v752_v59 = vmul.f32 %v746_v56, %v4204_v41  ;;  %v753_v63 = vmul.f32 %v746_v56, %v4210_v47  ;;  %v754_v3 = vmul.f32 %v746_v56, %v628_v58 }
 0x190   :  { %v755_v5 = vmul.f32 %v746_v56, %v631_v0  ;;  %v756_v6 = vmul.f32 %v746_v56, %v636_v62  ;;  %v758_v8 = vsub.f32 %v642_v55, %v757_v57  ;;  %v748_v9 = vmul.f32 %v746_v56, %v4178_v13 }
 0x191   :  { %v749_v10 = vmul.f32 %v746_v56, %v4184_v18  ;;  %v750_v12 = vmul.f32 %v746_v56, %v4192_v26  ;;  %v3647_v56 = vld [vmem:[%s4977_s6 + $0xc8] sm:$0xff]  }
 0x192   :  { %v763_v14 = vrot.slane %v758_v8, %v4231_v52  ;;  %v3649_v8 = vld [vmem:[%s4977_s6 + $0xd0] sm:$0xff]  }
 0x194   :  { %v768_v15 = vadd.f32 %v763_v14, %v751_v60  ;;  %v769_v17 = vadd.f32 %v763_v14, %v752_v59  ;;  %v770_v21 = vadd.f32 %v763_v14, %v753_v63  ;;  %v771_v32 = vadd.f32 %v763_v14, %v754_v3  ;;  %v3650_v60 = vld [vmem:[%s4977_s6 + $0x8] sm:$0xff]  }
 0x195   :  { %v772_v2 = vadd.f32 %v763_v14, %v755_v5  ;;  %v773_v41 = vadd.f32 %v763_v14, %v756_v6  ;;  %v765_v22 = vadd.f32 %v763_v14, %v748_v9  ;;  %v766_v47 = vadd.f32 %v763_v14, %v749_v10 }
 0x196   :  { %v777_v58 = vmax.f32 %v768_v15, 0.0  ;;  %v778_v0 = vmax.f32 %v769_v17, 0.0  ;;  %v779_v62 = vmax.f32 %v770_v21, 0.0  ;;  %v780_v23 = vmax.f32 %v771_v32, 0.0 }
 0x197   :  { %v781_v24 = vmax.f32 %v772_v2, 0.0  ;;  %v782_v13 = vmax.f32 %v773_v41, 0.0  ;;  %v774_v25 = vmax.f32 %v765_v22, 0.0  ;;  %v775_v18 = vmax.f32 %v766_v47, 0.0 }
 0x198   :  { %v4245_v26 = vmul.f32 %v777_v58, %v4194_v30  ;;  %v4248_v27 = vmul.f32 %v778_v0, %v4206_v44  ;;  %v4251_v28 = vmul.f32 %v779_v62, %v4212_v49  ;;  %v4254_v29 = vmul.f32 %v780_v23, %v4218_v61 }
 0x199   :  { %v4257_v31 = vmul.f32 %v781_v24, %v4221_v4  ;;  %v4260_v33 = vmul.f32 %v782_v13, %v4225_v19  ;;  %v4263_v34 = vmul.f32 %v774_v25, %v4174_v11  ;;  %v4266_v35 = vmul.f32 %v775_v18, %v4180_v16  ;;  %v3651_v13 = vld [vmem:[%s4977_s6 + $0xd8] sm:$0xff]  }
 0x19a   :  { %806 = vst [vmem:[#allocation2 + $0x1f] sm:$0xff] %v4245_v26  ;;  %807 = vst [vmem:[#allocation2 + $0x27] sm:$0xff] %v4248_v27  ;;  %v767_v36 = vadd.f32 %v763_v14, %v750_v12  ;;  %v1444_v37 = vpack.c.bf16 %v4251_v28, %v4248_v27  ;;  %v3652_v12 = vld [vmem:[%s4977_s6 + $0x10] sm:$0xff]   ;;  %v3687_v27 = vld [vmem:[%s4977_s6 + $0x168] sm:$0xff]  }
 0x19b   :  { %808 = vst [vmem:[#allocation2 + $0x2f] sm:$0xff] %v4251_v28  ;;  %809 = vst [vmem:[#allocation2 + $0x37] sm:$0xff] %v4254_v29  ;;  %v1442_v7 = vpack.c.bf16 %v4266_v35, %v4263_v34  ;;  %v1445_v38 = vpack.c.bf16 %v4257_v31, %v4254_v29  ;;  %v3689_v29 = vld [vmem:[%s4977_s6 + $0x178] sm:$0xff]  }
 0x19c   :  { %810 = vst [vmem:[#allocation2 + $0x3f] sm:$0xff] %v4257_v31  ;;  %811 = vst [vmem:[#allocation2 + $0x47] sm:$0xff] %v4260_v33  ;;  %v776_v39 = vmax.f32 %v767_v36, 0.0 }
 0x19d   :  { %803 = vst [vmem:[#allocation2 + $0x7] sm:$0xff] %v4263_v34  ;;  %804 = vst [vmem:[#allocation2 + $0xf] sm:$0xff] %v4266_v35  ;;  %v3682_v34 = vld [vmem:[%s4978_s9 + $0x10] sm:$0xff]  }
 0x19e   :  { %v4283_v40 = vmul.f32 %v776_v39, %v4186_v20  ;;  %v3653_v39 = vld [vmem:[%s4977_s6 + $0x18] sm:$0xff]  }
 0x1a0   :  { %805 = vst [vmem:[#allocation2 + $0x17] sm:$0xff] %v4283_v40  ;;  %v1443_v42 = vpack.c.bf16 %v4245_v26, %v4283_v40  ;;  %v3685_v26 = vld [vmem:[%s4977_s6 + $0x158] sm:$0xff]  }
 0x1a1   :  { %v4315_v9 = vld [vmem:[#allocation2 + $0x20] sm:$0xff] }
 0x1a2   :  { %v4322_v14 = vld [vmem:[#allocation2 + $0x28] sm:$0xff]  ;;  %v4328_v32 = vld [vmem:[#allocation2 + $0x30] sm:$0xff] }
 0x1a3   :  { %v4324_v15 = vld [vmem:[#allocation2 + $0x2e] sm:$0xff]  ;;  %v4330_v2 = vld [vmem:[#allocation2 + $0x38] sm:$0xff]  ;;  %v4337_v58 = vld [vmem:[#allocation2 + $0x40] sm:$0xff]  ;;  %v1604_v62 = vpack.c.bf16 %v4328_v32, %v4322_v14 }
 0x1a4   :  { %v842_v43 = vld [vmem:[#allocation2 + $0x1] sm:$0xff]  ;;  %v843_v45 = vld [vmem:[#allocation2 + $0x9] sm:$0xff]  ;;  %v4332_v41 = vld [vmem:[#allocation2 + $0x36] sm:$0xff]  ;;  %v1605_v24 = vpack.c.bf16 %v4337_v58, %v4330_v2 }
 0x1a5   :  { %v1113_v46 = vld [vmem:[#allocation2 + $0x2] sm:$0xff]  ;;  %v851_v48 = vpack.c.bf16 %v843_v45, %v842_v43  ;;  %v1114_v50 = vld [vmem:[#allocation2 + $0xa] sm:$0xff]  ;;  %v2084_v23 = vpack.c.bf16 %v4332_v41, %v4324_v15 }
 0x1a6   :  { %v1122_v53 = vpack.c.bf16 %v1114_v50, %v1113_v46  ;;  %v4296_v55 = vld [vmem:[#allocation2 + $0x8] sm:$0xff]  ;;  %v4335_v47 = vld [vmem:[#allocation2 + $0x3e] sm:$0xff] }
 0x1a7   :  { %3093 = vmatmul.mubr.bf16.vlgmr.msra.gmra.mrb[60].mxu0 %v851_v48  ;;  %v844_v57 = vld [vmem:[#allocation2 + $0x11] sm:$0xff]  ;;  %v845_v59 = vld [vmem:[#allocation2 + $0x19] sm:$0xff]  ;;  %v4339_v0 = vld [vmem:[#allocation2 + $0x46] sm:$0xff] }
 0x1a8   :  { %3165 = vmatmul.mubr.bf16.vlgmr.msra.gmra.mrb[0].mxu1 %v1122_v53  ;;  %3096 = vmatprep.mubr.msk.bf16.mxu0 %vm3713_vm0, %v3712_v1  ;;  %v4307_v63 = vld [vmem:[#allocation2 + $0x10] sm:$0xff]  ;;  %v4309_v3 = vld [vmem:[#allocation2 + $0x18] sm:$0xff]  ;;  %v852_v21 = vpack.c.bf16 %v845_v59, %v844_v57  ;;  %v2085_v25 = vpack.c.bf16 %v4339_v0, %v4335_v47  ;;  %v846_v18 = vld [vmem:[#allocation2 + $0x21] sm:$0xff] }
 0x1a9   :  { %3185 = vmatpush3.bf16.msra.mxu1 %v3646_v51  ;;  %3168 = vmatprep.mubr.msk.bf16.mxu1 %vm3713_vm0, %v3712_v1  ;;  %v1115_v5 = vld [vmem:[#allocation2 + $0x12] sm:$0xff]  ;;  %v1116_v6 = vld [vmem:[#allocation2 + $0x1a] sm:$0xff]  ;;  %v1602_v10 = vpack.c.bf16 %v4307_v63, %v4296_v55  ;;  %v1603_v17 = vpack.c.bf16 %v4315_v9, %v4309_v3  ;;  %v847_v36 = vld [vmem:[#allocation2 + $0x29] sm:$0xff] }
 0x1aa   :  { %3186 = vmatprep.subr.bf16.mxu1 %v3712_v1  ;;  %3113 = vmatpush3.bf16.msra.mxu0 %v3648_v54  ;;  %v1123_v22 = vpack.c.bf16 %v1116_v6, %v1115_v5  ;;  %v1117_v43 = vld [vmem:[#allocation2 + $0x22] sm:$0xff]  ;;  %v1118_v45 = vld [vmem:[#allocation2 + $0x2a] sm:$0xff]  ;;  %v853_v46 = vpack.c.bf16 %v847_v36, %v846_v18  ;;  %v1120_v59 = vld [vmem:[#allocation2 + $0x3a] sm:$0xff] }
 0x1ab   :  { %3114 = vmatprep.subr.bf16.mxu0 %v3712_v1  ;;  %v3654_v48 = vld [vmem:[%s4977_s6 + $0xe0] sm:$0xff]   ;;  %v1124_v50 = vpack.c.bf16 %v1118_v45, %v1117_v43  ;;  %v3656_v53 = vld [vmem:[%s4977_s6 + $0xe8] sm:$0xff]   ;;  %v848_v54 = vld [vmem:[#allocation2 + $0x31] sm:$0xff] }
 0x1ac   :  { %v3655_v51 = vld [vmem:[%s4977_s6 + $0x20] sm:$0xff]   ;;  %v3657_v57 = vld [vmem:[%s4977_s6 + $0x28] sm:$0xff]   ;;  %v3658_v6 = vld [vmem:[%s4977_s6 + $0xf0] sm:$0xff]  }
 0x1ad   :  { %3187 = vmatpush3.bf16.msra.mxu1 %v3647_v56  ;;  %v849_v56 = vld [vmem:[#allocation2 + $0x39] sm:$0xff]  ;;  %v1121_v18 = vld [vmem:[#allocation2 + $0x42] sm:$0xff] }
 0x1ae   :  { %3188 = vmatprep.subr.bf16.mxu1 %v3712_v1  ;;  %3115 = vmatpush3.bf16.msra.mxu0 %v3650_v60  ;;  %v1119_v60 = vld [vmem:[#allocation2 + $0x32] sm:$0xff]  ;;  %v854_v5 = vpack.c.bf16 %v849_v56, %v848_v54  ;;  %v812_v43 = vld [vmem:[#allocation2] sm:$0xff]  ;;  %v3663_v54 = vld [vmem:[%s4977_s6 + $0x108] sm:$0xff]  }
 0x1af   :  { %3097 = vmatmul.mubr.bf16.gmra.mrb[64].mxu0 %v852_v21  ;;  %3116 = vmatprep.subr.bf16.mxu0 %v3712_v1  ;;  %v3660_v21 = vld [vmem:[%s4977_s6 + $0xf8] sm:$0xff]   ;;  %v1273_v45 = vld [vmem:[#allocation2 + $0x6] sm:$0xff] }
 0x1b0   :  { %3169 = vmatmul.mubr.bf16.gmra.mrb[4].mxu1 %v1123_v22  ;;  %3100 = vmatprep.mubr.msk.bf16.mxu0 %vm3713_vm0, %v3712_v1  ;;  %v850_v22 = vld [vmem:[#allocation2 + $0x41] sm:$0xff] }
 0x1b1   :  { %3189 = vmatpush3.bf16.msra.mxu1 %v3649_v8  ;;  %3172 = vmatprep.mubr.msk.bf16.mxu1 %vm3713_vm0, %v3712_v1  ;;  %v1125_v8 = vpack.c.bf16 %v1120_v59, %v1119_v60  ;;  %v855_v36 = vpack.c.bf16 %v850_v22, %v850_v22  ;;  %v4432_v56 = vld [vmem:[%s4977_s6 + $0x208] sm:$0xff]   ;;  %v4436_v60 = vld [vmem:[#allocation2 + $0x1e] sm:$0xff]  ;;  %v822_v59 = vpack.c.bf16 %v4309_v3, %v4307_v63 }
 0x1b2   :  { %3190 = vmatprep.subr.bf16.mxu1 %v3712_v1  ;;  %3117 = vmatpush3.bf16.msra.mxu0 %v3652_v12  ;;  %v3659_v12 = vld [vmem:[%s4977_s6 + $0x30] sm:$0xff]   ;;  %v4468_v22 = vld [vmem:[#allocation2 + $0x26] sm:$0xff]  ;;  %v3693_v63 = vld [vmem:[%s4977_s6 + $0x198] sm:$0xff]  }
 0x1b3   :  { %3118 = vmatprep.subr.bf16.mxu0 %v3712_v1  ;;  %v2083_v35 = vpack.c.bf16 %v4468_v22, %v4436_v60  ;;  %v3695_v3 = vld [vmem:[%s4977_s6 + $0x1a8] sm:$0xff]  }
 0x1b5   :  { %3191 = vmatpush3.bf16.msra.mxu1 %v3651_v13  ;;  %v3661_v13 = vld [vmem:[%s4977_s6 + $0x38] sm:$0xff]  }
 0x1b6   :  { %3192 = vmatprep.subr.bf16.mxu1 %v3712_v1  ;;  %3119 = vmatpush3.bf16.msra.mxu0 %v3653_v39  ;;  %v1126_v39 = vpack.c.bf16 %v1121_v18, %v1121_v18  ;;  %v3669_v18 = vld [vmem:[%s4977_s6 + $0x120] sm:$0xff]  }
 0x1b7   :  { %3101 = vmatmul.mubr.bf16.gmra.mrb[68].mxu0 %v853_v46  ;;  %3120 = vmatprep.subr.bf16.mxu0 %v3712_v1  ;;  %v4408_v46 = vld [vmem:[#allocation2 + $0xe] sm:$0xff] }
 0x1b8   :  { %3173 = vmatmul.mubr.bf16.gmra.mrb[8].mxu1 %v1124_v50  ;;  %3104 = vmatprep.mubr.msk.bf16.mxu0 %vm3713_vm0, %v3712_v1  ;;  %v3662_v50 = vld [vmem:[%s4977_s6 + $0x100] sm:$0xff]  }
 0x1b9   :  { %3193 = vmatpush3.bf16.msra.mxu1 %v3654_v48  ;;  %3176 = vmatprep.mubr.msk.bf16.mxu1 %vm3713_vm0, %v3712_v1  ;;  %v821_v48 = vpack.c.bf16 %v4296_v55, %v812_v43  ;;  %v3672_v43 = vld [vmem:[%s4977_s6 + $0x128] sm:$0xff]   ;;  %v3692_v55 = vld [vmem:[%s4977_s6 + $0x190] sm:$0xff]  }
 0x1ba   :  { %3121 = vmatpush3.bf16.msra.mxu0 %v3655_v51  ;;  %3194 = vmatprep.subr.bf16.mxu1 %v3712_v1  ;;  %v1282_v51 = vpack.c.bf16 %v4408_v46, %v1273_v45  ;;  %v4498_v45 = vld [vmem:[%s4977_s6 + $0x228] sm:$0xff]  }
 0x1bb   :  { %3122 = vmatprep.subr.bf16.mxu0 %v3712_v1 }
 0x1bd   :  { %3195 = vmatpush3.bf16.msra.mxu1 %v3656_v53  ;;  %v4418_v53 = vld [vmem:[%s4977_s6 + $0x200] sm:$0xff]  }
 0x1be   :  { %3123 = vmatpush3.bf16.msra.mxu0 %v3657_v57  ;;  %3196 = vmatprep.subr.bf16.mxu1 %v3712_v1  ;;  %v4434_v57 = vld [vmem:[#allocation2 + $0x16] sm:$0xff] }
 0x1bf   :  { %3105 = vmatmul.mubr.bf16.gmra.mrb[72].mxu0 %v854_v5  ;;  %3124 = vmatprep.subr.bf16.mxu0 %v3712_v1  ;;  %v3665_v5 = vld [vmem:[%s4977_s6 + $0x110] sm:$0xff]  }
 0x1c0   :  { %3177 = vmatmul.mubr.bf16.gmra.mrb[12].mxu1 %v1125_v8  ;;  %3108 = vmatprep.mubr.msk.bf16.mxu0 %vm3713_vm0, %v3712_v1  ;;  %v4451_v8 = vld [vmem:[%s4977_s6 + $0x210] sm:$0xff]  }
 0x1c1   :  { %3180 = vmatprep.mubr.msk.bf16.mxu1 %vm3713_vm0, %v3712_v1  ;;  %3197 = vmatpush3.bf16.msra.mxu1 %v3658_v6  ;;  %v1283_v6 = vpack.c.bf16 %v4436_v60, %v4434_v57  ;;  %v2320_v60 = vld [vmem:[%s4981_s1] sm:$0xff] }
 0x1c2   :  { %3125 = vmatpush3.bf16.msra.mxu0 %v3659_v12  ;;  %3198 = vmatprep.subr.bf16.mxu1 %v3712_v1  ;;  %v3667_v12 = vld [vmem:[%s4977_s6 + $0x118] sm:$0xff]  }
 0x1c3   :  { %3126 = vmatprep.subr.bf16.mxu0 %v3712_v1 }
 0x1c5   :  { %3199 = vmatpush3.bf16.msra.mxu1 %v3660_v21  ;;  %v4466_v21 = vld [vmem:[%s4977_s6 + $0x218] sm:$0xff]  }
 0x1c6   :  { %3127 = vmatpush3.bf16.msra.mxu0 %v3661_v13  ;;  %3220 = vmatprep.subr.bf16.mxu1 %v3712_v1  ;;  %v823_v13 = vpack.c.bf16 %v4322_v14, %v4315_v9  ;;  %v3696_v9 = vld [vmem:[%s4977_s6 + $0x1b0] sm:$0xff]   ;;  %v3697_v14 = vld [vmem:[%s4977_s6 + $0x1b8] sm:$0xff]  }
 0x1c7   :  { %3109 = vmatmul.mubr.bf16.gmra.mrb[76].mxu0 %v855_v36  ;;  %3364 = vmatprep.subr.bf16.mxu0 %v3712_v1  ;;  %v1284_v36 = vpack.c.bf16 %v4324_v15, %v4468_v22  ;;  %v2321_v22 = vld [vmem:[%s4981_s1 + $0x8] sm:$0xff] }
 0x1c8   :  { %3181 = vmatmul.mubr.bf16.gmra.mrb[16].mxu1 %v1126_v39  ;;  %3128 = vmatprep.mubr.msk.bf16.mxu0 %vm3713_vm0, %v3712_v1  ;;  %v4483_v39 = vld [vmem:[%s4977_s6 + $0x220] sm:$0xff]   ;;  %v2329_v40 = vpack.c.bf16 %v2321_v22, %v2320_v60  ;;  %v3701_v60 = vld [vmem:[%s4977_s6 + $0x1d8] sm:$0xff]   ;;  %v1757_v22 = vld [vmem:[#allocation2 + $0x2c] sm:$0xff] }
 0x1c9   :  { %3200 = vmatprep.mubr.msk.bf16.mxu1 %vm3713_vm0, %v3712_v1 }
 0x1cf   :  { %3129 = vmatmul.mubr.bf16.vlgmr.msra.gmra.mrb[60].mxu0 %v821_v48  ;;  %v824_v48 = vpack.c.bf16 %v4330_v2, %v4328_v32  ;;  %v1753_v2 = vld [vmem:[#allocation2 + $0xc] sm:$0xff] }
 0x1d0   :  { %3201 = vmatmul.mubr.bf16.vlgmr.msra.gmra.mrb[0].mxu1 %v1282_v51  ;;  %3132 = vmatprep.mubr.msk.bf16.mxu0 %vm3713_vm0, %v3712_v1  ;;  %v1285_v51 = vpack.c.bf16 %v4335_v47, %v4332_v41 }
 0x1d1   :  { %3221 = vmatpush3.bf16.msra.mxu1 %v3662_v50  ;;  %3204 = vmatprep.mubr.msk.bf16.mxu1 %vm3713_vm0, %v3712_v1  ;;  %v3674_v50 = vld [vmem:[%s4977_s6 + $0x130] sm:$0xff]  }
 0x1d2   :  { %3222 = vmatprep.subr.bf16.mxu1 %v3712_v1  ;;  %3365 = vmatpush3.bf16.msra.mxu0 %v4418_v53 }
 0x1d3   :  { %3366 = vmatprep.subr.bf16.mxu0 %v3712_v1 }
 0x1d5   :  { %3223 = vmatpush3.bf16.msra.mxu1 %v3663_v54  ;;  %v4513_v54 = vld [vmem:[%s4977_s6 + $0x230] sm:$0xff]  }
 0x1d6   :  { %3224 = vmatprep.subr.bf16.mxu1 %v3712_v1  ;;  %3367 = vmatpush3.bf16.msra.mxu0 %v4432_v56 }
 0x1d7   :  { %3133 = vmatmul.mubr.bf16.gmra.mrb[64].mxu0 %v822_v59  ;;  %3368 = vmatprep.subr.bf16.mxu0 %v3712_v1  ;;  %v3676_v59 = vld [vmem:[%s4977_s6 + $0x138] sm:$0xff]  }
 0x1d8   :  { %3205 = vmatmul.mubr.bf16.gmra.mrb[4].mxu1 %v1283_v6  ;;  %3136 = vmatprep.mubr.msk.bf16.mxu0 %vm3713_vm0, %v3712_v1  ;;  %v825_v6 = vpack.c.bf16 %v4337_v58, %v4337_v58  ;;  %v1754_v58 = vld [vmem:[#allocation2 + $0x14] sm:$0xff] }
 0x1d9   :  { %3225 = vmatpush3.bf16.msra.mxu1 %v3665_v5  ;;  %3208 = vmatprep.mubr.msk.bf16.mxu1 %vm3713_vm0, %v3712_v1  ;;  %v4528_v5 = vld [vmem:[%s4977_s6 + $0x238] sm:$0xff]  }
 0x1da   :  { %3226 = vmatprep.subr.bf16.mxu1 %v3712_v1  ;;  %3369 = vmatpush3.bf16.msra.mxu0 %v4451_v8 }
 0x1db   :  { %3370 = vmatprep.subr.bf16.mxu0 %v3712_v1 }
 0x1dd   :  { %3227 = vmatpush3.bf16.msra.mxu1 %v3667_v12  ;;  %v1286_v12 = vpack.c.bf16 %v4339_v0, %v4339_v0 }
 0x1de   :  { %3228 = vmatprep.subr.bf16.mxu1 %v3712_v1  ;;  %3371 = vmatpush3.bf16.msra.mxu0 %v4466_v21 }
 0x1df   :  { %3137 = vmatmul.mubr.bf16.gmra.mrb[68].mxu0 %v823_v13  ;;  %3372 = vmatprep.subr.bf16.mxu0 %v3712_v1  ;;  %v3679_v13 = vld [vmem:[%s4978_s9] sm:$0xff]  }
 0x1e0   :  { %3209 = vmatmul.mubr.bf16.gmra.mrb[8].mxu1 %v1284_v36  ;;  %3140 = vmatprep.mubr.msk.bf16.mxu0 %vm3713_vm0, %v3712_v1  ;;  %v3678_v36 = vld [vmem:[%s4977_s6 + $0x140] sm:$0xff]  }
 0x1e1   :  { %3229 = vmatpush3.bf16.msra.mxu1 %v3669_v18  ;;  %3212 = vmatprep.mubr.msk.bf16.mxu1 %vm3713_vm0, %v3712_v1  ;;  %v2082_v18 = vpack.c.bf16 %v4434_v57, %v4408_v46  ;;  %v3681_v46 = vld [vmem:[%s4977_s6 + $0x148] sm:$0xff]   ;;  %v3684_v57 = vld [vmem:[%s4978_s9 + $0x18] sm:$0xff]  }
 0x1e2   :  { %3230 = vmatprep.subr.bf16.mxu1 %v3712_v1  ;;  %3373 = vmatpush3.bf16.msra.mxu0 %v4483_v39 }
 0x1e3   :  { %3374 = vmatprep.subr.bf16.mxu0 %v3712_v1 }
 0x1e5   :  { %3231 = vmatpush3.bf16.msra.mxu1 %v3672_v43  ;;  %v3680_v43 = vld [vmem:[%s4978_s9 + $0x8] sm:$0xff]  }
 0x1e6   :  { %3375 = vmatpush3.bf16.msra.mxu0 %v4498_v45  ;;  %3232 = vmatprep.subr.bf16.mxu1 %v3712_v1 }
 0x1e7   :  { %3141 = vmatmul.mubr.bf16.gmra.mrb[72].mxu0 %v824_v48  ;;  %3376 = vmatprep.subr.bf16.mxu0 %v3712_v1  ;;  %v2322_v48 = vld [vmem:[%s4981_s1 + $0x10] sm:$0xff] }
 0x1e8   :  { %3213 = vmatmul.mubr.bf16.gmra.mrb[12].mxu1 %v1285_v51  ;;  %3144 = vmatprep.mubr.msk.bf16.mxu0 %vm3713_vm0, %v3712_v1  ;;  %v2324_v51 = vld [vmem:[%s4981_s1 + $0x20] sm:$0xff] }
 0x1e9   :  { %3216 = vmatprep.mubr.msk.bf16.mxu1 %vm3713_vm0, %v3712_v1  ;;  %3233 = vmatpush3.bf16.msra.mxu1 %v3674_v50  ;;  %v2323_v50 = vld [vmem:[%s4981_s1 + $0x18] sm:$0xff] }
 0x1ea   :  { %3377 = vmatpush3.bf16.msra.mxu0 %v4513_v54  ;;  %3234 = vmatprep.subr.bf16.mxu1 %v3712_v1  ;;  %v2330_v28 = vpack.c.bf16 %v2323_v50, %v2322_v48  ;;  %v3703_v48 = vld [vmem:[%s4977_s6 + $0x1e8] sm:$0xff]   ;;  %v1759_v50 = vld [vmem:[#allocation2 + $0x3c] sm:$0xff] }
 0x1eb   :  { %3378 = vmatprep.subr.bf16.mxu0 %v3712_v1 }
 0x1ed   :  { %3235 = vmatpush3.bf16.msra.mxu1 %v3676_v59  ;;  %v2325_v59 = vld [vmem:[%s4981_s1 + $0x28] sm:$0xff] }
 0x1ee   :  { %3379 = vmatpush3.bf16.msra.mxu0 %v4528_v5  ;;  %3256 = vmatprep.subr.bf16.mxu1 %v3712_v1  ;;  %v2331_v31 = vpack.c.bf16 %v2325_v59, %v2324_v51  ;;  %v3705_v51 = vld [vmem:[%s4977_s6 + $0x1f8] sm:$0xff]   ;;  %v1761_v59 = vld [vmem:[#allocation2 + $0x4c] sm:$0xff] }
 0x1ef   :  { %3145 = vmatmul.mubr.bf16.gmra.mrb[76].mxu0 %v825_v6  ;;  %3400 = vmatprep.subr.bf16.mxu0 %v3712_v1  ;;  %v2326_v6 = vld [vmem:[%s4981_s1 + $0x30] sm:$0xff] }
 0x1f0   :  { %3217 = vmatmul.mubr.bf16.gmra.mrb[16].mxu1 %v1286_v12  ;;  %3380 = vmatprep.mubr.msk.bf16.mxu0 %vm3713_vm0, %v3712_v1  ;;  %v2327_v12 = vld [vmem:[%s4981_s1 + $0x38] sm:$0xff] }
 0x1f1   :  { %3236 = vmatprep.mubr.msk.bf16.mxu1 %vm3713_vm0, %v3712_v1 }
 0x1f7   :  { %3381 = vmatmul.mubr.bf16.vlgmr.msra.gmra.mrb[80].mxu0 %v2082_v18  ;;  %v2328_v18 = vld [vmem:[%s4981_s1 + $0x40] sm:$0xff] }
 0x1f8   :  { %3237 = vmatmul.mubr.bf16.vlgmr.msra.gmra.mrb[0].mxu1 %v1442_v7  ;;  %3401 = vmatpush3.bf16.msra.mxu0 %v3679_v13  ;;  %v3683_v7 = vld [vmem:[%s4977_s6 + $0x150] sm:$0xff]   ;;  %v3690_v13 = vld [vmem:[%s4977_s6 + $0x180] sm:$0xff]  }
 0x1f9   :  { %3257 = vmatpush3.bf16.msra.mxu1 %v3678_v36  ;;  %3402 = vmatprep.subr.bf16.mxu0 %v3712_v1  ;;  %v3691_v36 = vld [vmem:[%s4977_s6 + $0x188] sm:$0xff]  }
 0x1fa   :  { %3258 = vmatprep.subr.bf16.mxu1 %v3712_v1  ;;  %3240 = vmatprep.mubr.msk.bf16.mxu1 %vm3713_vm0, %v3712_v1 }
 0x1fb   :  { %3384 = vmatprep.mubr.msk.bf16.mxu0 %vm3713_vm0, %v3712_v1 }
 0x1fc   :  { %3403 = vmatpush3.bf16.msra.mxu0 %v3680_v43  ;;  %v2333_v43 = vpack.c.bf16 %v2328_v18, %v2328_v18  ;;  %v1918_v18 = vld [vmem:[#allocation2 + $0x35] sm:$0xff] }
 0x1fd   :  { %3259 = vmatpush3.bf16.msra.mxu1 %v3681_v46  ;;  %3404 = vmatprep.subr.bf16.mxu0 %v3712_v1  ;;  %v3699_v46 = vld [vmem:[%s4977_s6 + $0x1c8] sm:$0xff]  }
 0x1fe   :  { %3260 = vmatprep.subr.bf16.mxu1 %v3712_v1 }
 0x1ff   :  { %3385 = vmatmul.mubr.bf16.gmra.mrb[84].mxu0 %v2083_v35  ;;  %v1756_v35 = vld [vmem:[#allocation2 + $0x24] sm:$0xff] }
 0x200   :  { %3241 = vmatmul.mubr.bf16.gmra.mrb[4].mxu1 %v1443_v42  ;;  %3405 = vmatpush3.bf16.msra.mxu0 %v3682_v34  ;;  %v3686_v42 = vld [vmem:[%s4977_s6 + $0x160] sm:$0xff]  }
 0x201   :  { %3261 = vmatpush3.bf16.msra.mxu1 %v3683_v7  ;;  %3406 = vmatprep.subr.bf16.mxu0 %v3712_v1  ;;  %v1755_v34 = vld [vmem:[#allocation2 + $0x1c] sm:$0xff]  ;;  %v3700_v7 = vld [vmem:[%s4977_s6 + $0x1d0] sm:$0xff]  }
 0x202   :  { %3244 = vmatprep.mubr.msk.bf16.mxu1 %vm3713_vm0, %v3712_v1  ;;  %3262 = vmatprep.subr.bf16.mxu1 %v3712_v1 }
 0x203   :  { %3408 = vmatprep.mubr.msk.bf16.mxu0 %vm3713_vm0, %v3712_v1 }
 0x204   :  { %3407 = vmatpush3.bf16.msra.mxu0 %v3684_v57  ;;  %v1763_v57 = vpack.c.bf16 %v1756_v35, %v1755_v34 }
 0x205   :  { %3263 = vmatpush3.bf16.msra.mxu1 %v3685_v26  ;;  %v1758_v26 = vld [vmem:[#allocation2 + $0x34] sm:$0xff] }
 0x206   :  { %3264 = vmatprep.subr.bf16.mxu1 %v3712_v1 }
 0x207   :  { %3409 = vmatmul.mubr.msk.bf16.vlgmr.msra.gmra.mrb[88].mxu0 %vm409_vm1, %v2329_v40  ;;  %v3702_v40 = vld [vmem:[%s4977_s6 + $0x1e0] sm:$0xff]  }
 0x208   :  { %3245 = vmatmul.mubr.bf16.gmra.mrb[8].mxu1 %v1444_v37  ;;  %3412 = vmatprep.mubr.msk.bf16.mxu0 %vm3713_vm0, %v3712_v1  ;;  %v3688_v37 = vld [vmem:[%s4977_s6 + $0x170] sm:$0xff]  }
 0x209   :  { %3265 = vmatpush3.bf16.msra.mxu1 %v3686_v42  ;;  %3248 = vmatprep.mubr.msk.bf16.mxu1 %vm3713_vm0, %v3712_v1  ;;  %v1764_v42 = vpack.c.bf16 %v1758_v26, %v1757_v22 }
 0x20a   :  { %3266 = vmatprep.subr.bf16.mxu1 %v3712_v1 }
 0x20d   :  { %3267 = vmatpush3.bf16.msra.mxu1 %v3687_v27  ;;  %v1760_v27 = vld [vmem:[#allocation2 + $0x44] sm:$0xff] }
 0x20e   :  { %3268 = vmatprep.subr.bf16.mxu1 %v3712_v1 }
 0x20f   :  { %3413 = vmatmul.mubr.msk.bf16.gmra.mrb[92].mxu0 %vm409_vm1, %v2330_v28  ;;  %v3704_v28 = vld [vmem:[%s4977_s6 + $0x1f0] sm:$0xff]  }
 0x210   :  { %3249 = vmatmul.mubr.bf16.gmra.mrb[12].mxu1 %v1445_v38  ;;  %3416 = vmatprep.mubr.msk.bf16.mxu0 %vm3713_vm0, %v3712_v1  ;;  %v1446_v38 = vpack.c.bf16 %v4260_v33, %v4260_v33  ;;  %v2332_v33 = vpack.c.bf16 %v2327_v12, %v2326_v6  ;;  %v1915_v12 = vld [vmem:[#allocation2 + $0x1d] sm:$0xff] }
 0x211   :  { %3252 = vmatprep.mubr.msk.bf16.mxu1 %vm3713_vm0, %v3712_v1  ;;  %3269 = vmatpush3.bf16.msra.mxu1 %v3688_v37  ;;  %v1765_v37 = vpack.c.bf16 %v1760_v27, %v1759_v50 }
 0x212   :  { %3270 = vmatprep.subr.bf16.mxu1 %v3712_v1 }
 0x215   :  { %3271 = vmatpush3.bf16.msra.mxu1 %v3689_v29  ;;  %v1766_v29 = vpack.c.bf16 %v1761_v59, %v1761_v59 }
 0x216   :  { %3292 = vmatprep.subr.bf16.mxu1 %v3712_v1 }
 0x217   :  { %3417 = vmatmul.mubr.msk.bf16.gmra.mrb[96].mxu0 %vm409_vm1, %v2331_v31  ;;  %v1913_v31 = vld [vmem:[#allocation2 + $0xd] sm:$0xff] }
 0x218   :  { %3253 = vmatmul.mubr.bf16.gmra.mrb[16].mxu1 %v1446_v38  ;;  %3420 = vmatprep.mubr.msk.bf16.mxu0 %vm3713_vm0, %v3712_v1  ;;  %v1914_v38 = vld [vmem:[#allocation2 + $0x15] sm:$0xff] }
 0x219   :  { %3272 = vmatprep.mubr.msk.bf16.mxu1 %vm3713_vm0, %v3712_v1  ;;  %v1922_v6 = vpack.c.bf16 %v1914_v38, %v1913_v31 }
 0x21f   :  { %3421 = vmatmul.mubr.msk.bf16.gmra.mrb[100].mxu0 %vm409_vm1, %v2332_v33  ;;  %v1916_v33 = vld [vmem:[#allocation2 + $0x25] sm:$0xff] }
 0x220   :  { %3273 = vmatmul.mubr.bf16.vlgmr.msra.gmra.mrb[0].mxu1 %v1602_v10  ;;  %3424 = vmatprep.mubr.msk.bf16.mxu0 %vm3713_vm0, %v3712_v1  ;;  %v3694_v10 = vld [vmem:[%s4977_s6 + $0x1a0] sm:$0xff]  }
 0x221   :  { %3293 = vmatpush3.bf16.msra.mxu1 %v3690_v13  ;;  %3276 = vmatprep.mubr.msk.bf16.mxu1 %vm3713_vm0, %v3712_v1  ;;  %v1923_v13 = vpack.c.bf16 %v1916_v33, %v1915_v12 }
 0x222   :  { %3294 = vmatprep.subr.bf16.mxu1 %v3712_v1 }
 0x225   :  { %3295 = vmatpush3.bf16.msra.mxu1 %v3691_v36 }
 0x226   :  { %3296 = vmatprep.subr.bf16.mxu1 %v3712_v1 }
 0x227   :  { %3425 = vmatmul.mubr.msk.bf16.gmra.mrb[104].mxu0 %vm409_vm1, %v2333_v43 }
 0x228   :  { %3277 = vmatmul.mubr.bf16.gmra.mrb[4].mxu1 %v1603_v17  ;;  %v1601_v17 = vld [vmem:[#allocation2 + $0x48] sm:$0xff] }
 0x229   :  { %3297 = vmatpush3.bf16.msra.mxu1 %v3692_v55  ;;  %3280 = vmatprep.mubr.msk.bf16.mxu1 %vm3713_vm0, %v3712_v1  ;;  %v1606_v32 = vpack.c.bf16 %v1601_v17, %v1601_v17 }
 0x22a   :  { %3298 = vmatprep.subr.bf16.mxu1 %v3712_v1 }
 0x22d   :  { %3299 = vmatpush3.bf16.msra.mxu1 %v3693_v63 }
 0x22e   :  { %3300 = vmatprep.subr.bf16.mxu1 %v3712_v1 }
 0x230   :  { %3281 = vmatmul.mubr.bf16.gmra.mrb[8].mxu1 %v1604_v62  ;;  %v3698_v62 = vld [vmem:[%s4977_s6 + $0x1c0] sm:$0xff]  }
 0x231   :  { %3301 = vmatpush3.bf16.msra.mxu1 %v3694_v10  ;;  %3284 = vmatprep.mubr.msk.bf16.mxu1 %vm3713_vm0, %v3712_v1 }
 0x232   :  { %3302 = vmatprep.subr.bf16.mxu1 %v3712_v1 }
 0x235   :  { %3303 = vmatpush3.bf16.msra.mxu1 %v3695_v3 }
 0x236   :  { %3304 = vmatprep.subr.bf16.mxu1 %v3712_v1 }
 0x238   :  { %3285 = vmatmul.mubr.bf16.gmra.mrb[12].mxu1 %v1605_v24  ;;  %v1762_v24 = vpack.c.bf16 %v1754_v58, %v1753_v2 }
 0x239   :  { %3288 = vmatprep.mubr.msk.bf16.mxu1 %vm3713_vm0, %v3712_v1  ;;  %3305 = vmatpush3.bf16.msra.mxu1 %v3696_v9 }
 0x23a   :  { %3306 = vmatprep.subr.bf16.mxu1 %v3712_v1 }
 0x23d   :  { %3307 = vmatpush3.bf16.msra.mxu1 %v3697_v14 }
 0x23e   :  { %3328 = vmatprep.subr.bf16.mxu1 %v3712_v1 }
 0x240   :  { %3289 = vmatmul.mubr.bf16.gmra.mrb[16].mxu1 %v1606_v32 }
 0x241   :  { %3308 = vmatprep.mubr.msk.bf16.mxu1 %vm3713_vm0, %v3712_v1 }
 0x248   :  { %3309 = vmatmul.mubr.bf16.vlgmr.msra.gmra.mrb[0].mxu1 %v1762_v24 }
 0x249   :  { %3329 = vmatpush3.bf16.msra.mxu1 %v3698_v62  ;;  %3312 = vmatprep.mubr.msk.bf16.mxu1 %vm3713_vm0, %v3712_v1 }
 0x24a   :  { %3330 = vmatprep.subr.bf16.mxu1 %v3712_v1 }
 0x24d   :  { %3331 = vmatpush3.bf16.msra.mxu1 %v3699_v46 }
 0x24e   :  { %3332 = vmatprep.subr.bf16.mxu1 %v3712_v1 }
 0x250   :  { %3313 = vmatmul.mubr.bf16.gmra.mrb[4].mxu1 %v1763_v57 }
 0x251   :  { %3333 = vmatpush3.bf16.msra.mxu1 %v3700_v7  ;;  %3316 = vmatprep.mubr.msk.bf16.mxu1 %vm3713_vm0, %v3712_v1 }
 0x252   :  { %3334 = vmatprep.subr.bf16.mxu1 %v3712_v1 }
 0x255   :  { %3335 = vmatpush3.bf16.msra.mxu1 %v3701_v60 }
 0x256   :  { %3336 = vmatprep.subr.bf16.mxu1 %v3712_v1 }
 0x258   :  { %3317 = vmatmul.mubr.bf16.gmra.mrb[8].mxu1 %v1764_v42 }
 0x259   :  { %3337 = vmatpush3.bf16.msra.mxu1 %v3702_v40  ;;  %3320 = vmatprep.mubr.msk.bf16.mxu1 %vm3713_vm0, %v3712_v1 }
 0x25a   :  { %3338 = vmatprep.subr.bf16.mxu1 %v3712_v1 }
 0x25d   :  { %3339 = vmatpush3.bf16.msra.mxu1 %v3703_v48 }
 0x25e   :  { %3340 = vmatprep.subr.bf16.mxu1 %v3712_v1 }
 0x260   :  { %3321 = vmatmul.mubr.bf16.gmra.mrb[12].mxu1 %v1765_v37 }
 0x261   :  { %3324 = vmatprep.mubr.msk.bf16.mxu1 %vm3713_vm0, %v3712_v1  ;;  %3341 = vmatpush3.bf16.msra.mxu1 %v3704_v28 }
 0x262   :  { %3342 = vmatprep.subr.bf16.mxu1 %v3712_v1 }
 0x265   :  { %3343 = vmatpush3.bf16.msra.mxu1 %v3705_v51 }
 0x266   :  { %3428 = vmatprep.subr.bf16.mxu1 %v3712_v1 }
 0x268   :  { %3325 = vmatmul.mubr.bf16.gmra.mrb[16].mxu1 %v1766_v29 }
 0x269   :  { %3344 = vmatprep.mubr.msk.bf16.mxu1 %vm3713_vm0, %v3712_v1 }
 0x270   :  { %3345 = vmatmul.mubr.bf16.vlgmr.msra.gmra.mrb[0].mxu1 %v1922_v6 }
 0x271   :  { %3436 = vmatpush3.bf16.msra.mxu1 %v4418_v53  ;;  %3348 = vmatprep.mubr.msk.bf16.mxu1 %vm3713_vm0, %v3712_v1  ;;  %v1917_v53 = vld [vmem:[#allocation2 + $0x2d] sm:$0xff] }
 0x272   :  { %3429 = vmatprep.subr.bf16.mxu1 %v3712_v1  ;;  %v1924_v36 = vpack.c.bf16 %v1918_v18, %v1917_v53 }
 0x275   :  { %3437 = vmatpush3.bf16.msra.mxu1 %v4432_v56  ;;  %v1919_v56 = vld [vmem:[#allocation2 + $0x3d] sm:$0xff] }
 0x276   :  { %3430 = vmatprep.subr.bf16.mxu1 %v3712_v1 }
 0x278   :  { %3349 = vmatmul.mubr.bf16.gmra.mrb[4].mxu1 %v1923_v13 }
 0x279   :  { %3438 = vmatpush3.bf16.msra.mxu1 %v4451_v8  ;;  %3352 = vmatprep.mubr.msk.bf16.mxu1 %vm3713_vm0, %v3712_v1  ;;  %v1920_v8 = vld [vmem:[#allocation2 + $0x45] sm:$0xff] }
 0x27a   :  { %3431 = vmatprep.subr.bf16.mxu1 %v3712_v1  ;;  %v1925_v43 = vpack.c.bf16 %v1920_v8, %v1919_v56 }
 0x27d   :  { %3439 = vmatpush3.bf16.msra.mxu1 %v4466_v21  ;;  %v1921_v21 = vld [vmem:[#allocation2 + $0x4d] sm:$0xff] }
 0x27e   :  { %3432 = vmatprep.subr.bf16.mxu1 %v3712_v1 }
 0x280   :  { %3353 = vmatmul.mubr.bf16.gmra.mrb[8].mxu1 %v1924_v36 }
 0x281   :  { %3440 = vmatpush3.bf16.msra.mxu1 %v4483_v39  ;;  %3356 = vmatprep.mubr.msk.bf16.mxu1 %vm3713_vm0, %v3712_v1  ;;  %v1926_v39 = vpack.c.bf16 %v1921_v21, %v1921_v21 }
 0x282   :  { %3433 = vmatprep.subr.bf16.mxu1 %v3712_v1 }
 0x285   :  { %3441 = vmatpush3.bf16.msra.mxu1 %v4498_v45 }
 0x286   :  { %3434 = vmatprep.subr.bf16.mxu1 %v3712_v1 }
 0x288   :  { %3357 = vmatmul.mubr.bf16.gmra.mrb[12].mxu1 %v1925_v43 }
 0x289   :  { %3360 = vmatprep.mubr.msk.bf16.mxu1 %vm3713_vm0, %v3712_v1  ;;  %3442 = vmatpush3.bf16.msra.mxu1 %v4513_v54 }
 0x28a   :  { %3435 = vmatprep.subr.bf16.mxu1 %v3712_v1 }
 0x28d   :  { %3443 = vmatpush3.bf16.msra.mxu1 %v4528_v5  ;;  %v2081_v5 = vld [vmem:[#allocation2 + $0x4e] sm:$0xff] }
 0x28e   :  { %v2086_v10 = vpack.c.bf16 %v2081_v5, %v2081_v5 }
 0x290   :  { %3361 = vmatmul.mubr.bf16.gmra.mrb[16].mxu1 %v1926_v39 }
 0x291   :  { %3388 = vmatprep.mubr.msk.bf16.mxu1 %vm3713_vm0, %v3712_v1 }
 0x298   :  { %3389 = vmatmul.mubr.bf16.vlgmr.msra.gmra.mrb[8].mxu1 %v2084_v23 }
 0x299   :  { %3392 = vmatprep.mubr.msk.bf16.mxu1 %vm3713_vm0, %v3712_v1 }
 0x2a0   :  { %3393 = vmatmul.mubr.bf16.gmra.mrb[12].mxu1 %v2085_v25 }
 0x2a1   :  { %3396 = vmatprep.mubr.msk.bf16.mxu1 %vm3713_vm0, %v3712_v1 }
 0x2a2   :  { %v4792_v45 = vpop.f32.mrb[60].mxu0 }
 0x2a3   :  { %v3130_v54 = vpop.f32.mrb[61].mxu0 }
 0x2a4   :  { %v4794_v55 = vpop.f32.mrb[62].mxu0 }
 0x2a5   :  { %v3131_v63 = vpop.f32.mrb[63].mxu0 }
 0x2a8   :  { %3397 = vmatmul.mubr.bf16.gmra.mrb[16].mxu1 %v2086_v10 }
 0x2aa   :  { %v4796_v15 = vpop.f32.mrb[64].mxu0 }
 0x2ab   :  { %v3134_v41 = vpop.f32.mrb[65].mxu0 }
 0x2ac   :  { %v4798_v23 = vpop.f32.mrb[66].mxu0 }
 0x2ad   :  { %v3135_v3 = vpop.f32.mrb[67].mxu0 }
 0x2b2   :  { %v4800_v47 = vpop.f32.mrb[68].mxu0 }
 0x2b3   :  { %v3138_v0 = vpop.f32.mrb[69].mxu0 }
 0x2b4   :  { %v4802_v25 = vpop.f32.mrb[70].mxu0 }
 0x2b5   :  { %v3139_v1 = vpop.f32.mrb[71].mxu0 }
 0x2ba   :  { %v4804_v9 = vpop.f32.mrb[72].mxu0 }
 0x2bb   :  { %v3142_v14 = vpop.f32.mrb[73].mxu0 }
 0x2bc   :  { %v4806_v17 = vpop.f32.mrb[74].mxu0 }
 0x2bd   :  { %v3143_v32 = vpop.f32.mrb[75].mxu0 }
 0x2c2   :  { %v4808_v2 = vpop.f32.mrb[76].mxu0 }
 0x2c3   :  { %v3146_v58 = vpop.f32.mrb[77].mxu0 }
 0x2c4   :  { %v1110_v62 = vpop.f32.mrb[78].mxu0 }
 0x2c5   :  { %v3147_v24 = vpop.f32.mrb[79].mxu0 }
 0x2ca   :  { %v4810_v46 = vpop.f32.mrb[80].mxu0 }
 0x2cb   :  { %v3382_v34 = vpop.f32.mrb[81].mxu0 }
 0x2cc   :  { %v4812_v35 = vpop.f32.mrb[82].mxu0 }
 0x2cd   :  { %v3383_v7 = vpop.f32.mrb[83].mxu0 }
 0x2d2   :  { %v4814_v57 = vpop.f32.mrb[84].mxu0 }
 0x2d3   :  { %v3386_v60 = vpop.f32.mrb[85].mxu0 }
 0x2d4   :  { %v4816_v22 = vpop.f32.mrb[86].mxu0 }
 0x2d5   :  { %v3387_v26 = vpop.f32.mrb[87].mxu0 }
 0x2da   :  { %v4818_v40 = vpop.f32.mrb[88].mxu0 }
 0x2db   :  { %v2455_v42 = vmul.f32 %v4818_v40, %v4174_v11  ;;  %v3410_v48 = vpop.f32.mrb[89].mxu0 }
 0x2dc   :  { %v4822_v50 = vpop.f32.mrb[90].mxu0 }
 0x2dd   :  { %v2456_v27 = vmul.f32 %v4822_v50, %v4180_v16  ;;  %v3411_v28 = vpop.f32.mrb[91].mxu0  ;;  %v2479_v37 = vmul.f32 %v2455_v42, %v4818_v40 }
 0x2df   :  { %v2464_v51 = vadd.f32 %v2456_v27, %v2455_v42  ;;  %v2480_v59 = vmul.f32 %v2456_v27, %v4822_v50 }
 0x2e1   :  { %v2488_v29 = vadd.f32 %v2480_v59, %v2479_v37 }
 0x2e2   :  { %v4828_v31 = vpop.f32.mrb[92].mxu0 }
 0x2e3   :  { %v2457_v38 = vmul.f32 %v4828_v31, %v4186_v20  ;;  %v3414_v6 = vpop.f32.mrb[93].mxu0 }
 0x2e4   :  { %v4832_v12 = vpop.f32.mrb[94].mxu0 }
 0x2e5   :  { %v2465_v33 = vadd.f32 %v2464_v51, %v2457_v38  ;;  %v2481_v13 = vmul.f32 %v2457_v38, %v4828_v31  ;;  %v2458_v53 = vmul.f32 %v4832_v12, %v4194_v30  ;;  %v3415_v18 = vpop.f32.mrb[95].mxu0 }
 0x2e7   :  { %v2489_v36 = vadd.f32 %v2488_v29, %v2481_v13  ;;  %v2466_v56 = vadd.f32 %v2465_v33, %v2458_v53  ;;  %v2482_v8 = vmul.f32 %v2458_v53, %v4832_v12 }
 0x2e9   :  { %v2490_v43 = vadd.f32 %v2489_v36, %v2482_v8 }
 0x2ea   :  { %v4838_v21 = vpop.f32.mrb[96].mxu0 }
 0x2eb   :  { %v2459_v39 = vmul.f32 %v4838_v21, %v4206_v44  ;;  %v3418_v54 = vpop.f32.mrb[97].mxu0 }
 0x2ec   :  { %v2434_v5 = vpop.f32.mrb[98].mxu0 }
 0x2ed   :  { %v2467_v63 = vadd.f32 %v2466_v56, %v2459_v39  ;;  %v2483_v10 = vmul.f32 %v2459_v39, %v4838_v21  ;;  %v2460_v41 = vmul.f32 %v2434_v5, %v4212_v49  ;;  %v3419_v3 = vpop.f32.mrb[99].mxu0 }
 0x2ef   :  { %v2491_v0 = vadd.f32 %v2490_v43, %v2483_v10  ;;  %v2468_v1 = vadd.f32 %v2467_v63, %v2460_v41  ;;  %v2484_v14 = vmul.f32 %v2460_v41, %v2434_v5 }
 0x2f1   :  { %v2492_v32 = vadd.f32 %v2491_v0, %v2484_v14 }
 0x2f2   :  { %v2439_v58 = vpop.f32.mrb[100].mxu0 }
 0x2f3   :  { %v2461_v62 = vmul.f32 %v2439_v58, %v4218_v61  ;;  %v3422_v24 = vpop.f32.mrb[101].mxu0 }
 0x2f4   :  { %v2442_v34 = vpop.f32.mrb[102].mxu0 }
 0x2f5   :  { %v2469_v7 = vadd.f32 %v2468_v1, %v2461_v62  ;;  %v2485_v60 = vmul.f32 %v2461_v62, %v2439_v58  ;;  %v2462_v26 = vmul.f32 %v2442_v34, %v4221_v4  ;;  %v3423_v42 = vpop.f32.mrb[103].mxu0 }
 0x2f6   :  { %v2454_v42 = vld [vmem:[%s4983_s11] sm:$0x1] }
 0x2f7   :  { %v2493_v48 = vadd.f32 %v2492_v32, %v2485_v60  ;;  %v2470_v27 = vadd.f32 %v2469_v7, %v2462_v26  ;;  %v2486_v28 = vmul.f32 %v2462_v26, %v2442_v34  ;;  %v2453_v7 = vld [vmem:[%s4982_s10] sm:$0x1] }
 0x2f9   :  { %v2494_v37 = vadd.f32 %v2493_v48, %v2486_v28 }
 0x2fa   :  { %v2447_v51 = vpop.f32.mrb[104].mxu0 }
 0x2fb   :  { %v2463_v59 = vmul.f32 %v2447_v51, %v4225_v19  ;;  %v3426_v29 = vpop.f32.mrb[105].mxu0 }
 0x2fc   :  { %v2450_v38 = vpop.f32.mrb[106].mxu0 }
 0x2fd   :  { %v2471_v6 = vadd.f32 %v2470_v27, %v2463_v59  ;;  %v2487_v33 = vmul.f32 %v2463_v59, %v2447_v51  ;;  %v3427_v13 = vpop.f32.mrb[107].mxu0 }
 0x2ff   :  { %v2472_v53 = vrot.slane %v2471_v6, 4  ;;  %v2495_v18 = vadd.f32 %v2494_v37, %v2487_v33 }
 0x301   :  { %v2473_v36 = vadd.f32 %v2472_v53, %v2471_v6  ;;  %v2496_v56 = vrot.slane %v2495_v18, 4 }
 0x303   :  { %v2474_v8 = vrot.slane %v2473_v36, 2  ;;  %v2497_v43 = vadd.f32 %v2496_v56, %v2495_v18 }
 0x305   :  { %v2475_v39 = vadd.f32 %v2474_v8, %v2473_v36  ;;  %v2498_v54 = vrot.slane %v2497_v43, 2 }
 0x307   :  { %v2476_v63 = vrot.slane %v2475_v39, 1  ;;  %v2499_v10 = vadd.f32 %v2498_v54, %v2497_v43 }
 0x309   :  { %v2477_v41 = vadd.f32 %v2476_v63, %v2475_v39  ;;  %v2500_v3 = vrot.slane %v2499_v10, 1 }
 0x30b   :  { %v2478_v0 = vmul.f32 0.03125, %v2477_v41  ;;  %v2501_v1 = vadd.f32 %v2500_v3, %v2499_v10 }
 0x30d   :  { %v2502_v14 = vmul.f32 0.03125, %v2501_v1  ;;  %v2503_v32 = vmul.f32 %v2478_v0, %v2478_v0 }
 0x30f   :  { %v2504_v62 = vsub.f32 %v2502_v14, %v2503_v32 }
 0x311   :  { %v2505_v24 = vadd.f32 1e-05, %v2504_v62 }
 0x313   :  { %3708 = vrsqrt.f32 %v2505_v24 }
 0x31d   :  { %v3709_v60 = vpop.eup %3708 }
 0x31e   :  { %v2507_v26 = vmul.f32 %v3709_v60, %v2453_v7 }
 0x320   :  { %v2512_v48 = vrot.slane %v2507_v26, %v4231_v52  ;;  %v2523_v27 = vmul.f32 %v2507_v26, %v2478_v0 }
 0x322   :  { %v2522_v28 = vmul.f32 %v2512_v48, %v2447_v51  ;;  %v2524_v37 = vsub.f32 %v2454_v42, %v2523_v27  ;;  %v2514_v59 = vmul.f32 %v2512_v48, %v4818_v40  ;;  %v2515_v29 = vmul.f32 %v2512_v48, %v4822_v50 }
 0x323   :  { %v2516_v38 = vmul.f32 %v2512_v48, %v4828_v31  ;;  %v2517_v6 = vmul.f32 %v2512_v48, %v4832_v12  ;;  %v2518_v33 = vmul.f32 %v2512_v48, %v4838_v21  ;;  %v2519_v13 = vmul.f32 %v2512_v48, %v2434_v5 }
 0x324   :  { %v2529_v53 = vrot.slane %v2524_v37, %v4231_v52  ;;  %v2520_v18 = vmul.f32 %v2512_v48, %v2439_v58  ;;  %v2521_v36 = vmul.f32 %v2512_v48, %v2442_v34 }
 0x326   :  { %v4860_v56 = vadd.f32 %v2529_v53, %v2522_v28  ;;  %v4862_v8 = vadd.f32 %v2529_v53, %v2514_v59  ;;  %v4864_v51 = vadd.f32 %v2529_v53, %v2515_v29  ;;  %v4866_v40 = vadd.f32 %v2529_v53, %v2516_v38 }
 0x327   :  { %v4868_v50 = vadd.f32 %v2529_v53, %v2517_v6  ;;  %v4870_v31 = vadd.f32 %v2529_v53, %v2518_v33  ;;  %v4872_v12 = vadd.f32 %v2529_v53, %v2519_v13  ;;  %v4874_v21 = vadd.f32 %v2529_v53, %v2520_v18 }
 0x328   :  { %v4876_v5 = vadd.f32 %v2529_v53, %v2521_v36 }
 0x343   :  { %v2026_v58 = vpop.f32.mrb[0].mxu1 }
 0x344   :  { %v3444_v34 = vadd.f32 %v2026_v58, %v4792_v45  ;;  %v3346_v43 = vpop.f32.mrb[1].mxu1 }
 0x345   :  { %v2029_v39 = vpop.f32.mrb[2].mxu1 }
 0x346   :  { %v4880_v54 = vadd.f32 %v3444_v34, %v4810_v46  ;;  %v3446_v63 = vadd.f32 %v2029_v39, %v4794_v55  ;;  %v3347_v10 = vpop.f32.mrb[3].mxu1 }
 0x348   :  { %v2235_v41 = vmul.f32 %v4880_v54, %v4174_v11  ;;  %v4886_v3 = vadd.f32 %v3446_v63, %v4812_v35 }
 0x34a   :  { %v2236_v0 = vmul.f32 %v4886_v3, %v4180_v16  ;;  %v2259_v45 = vmul.f32 %v4880_v54, %v2235_v41 }
 0x34b   :  { %v2034_v1 = vpop.f32.mrb[4].mxu1 }
 0x34c   :  { %v2244_v14 = vadd.f32 %v2236_v0, %v2235_v41  ;;  %v2260_v32 = vmul.f32 %v4886_v3, %v2236_v0  ;;  %v3448_v46 = vadd.f32 %v2034_v1, %v4796_v15  ;;  %v3350_v62 = vpop.f32.mrb[5].mxu1 }
 0x34d   :  { %v2037_v55 = vpop.f32.mrb[6].mxu1 }
 0x34e   :  { %v2268_v24 = vadd.f32 %v2260_v32, %v2259_v45  ;;  %v4894_v7 = vadd.f32 %v3448_v46, %v4814_v57  ;;  %v3450_v11 = vadd.f32 %v2037_v55, %v4798_v23  ;;  %v3351_v35 = vpop.f32.mrb[7].mxu1 }
 0x350   :  { %v2237_v16 = vmul.f32 %v4894_v7, %v4186_v20  ;;  %v4900_v60 = vadd.f32 %v3450_v11, %v4816_v22 }
 0x352   :  { %v2245_v26 = vadd.f32 %v2244_v14, %v2237_v16  ;;  %v2261_v42 = vmul.f32 %v4894_v7, %v2237_v16  ;;  %v2238_v15 = vmul.f32 %v4900_v60, %v4194_v30 }
 0x354   :  { %v2269_v48 = vadd.f32 %v2268_v24, %v2261_v42  ;;  %v2262_v27 = vmul.f32 %v4900_v60, %v2238_v15  ;;  %v2246_v57 = vadd.f32 %v2245_v26, %v2238_v15 }
 0x356   :  { %v2270_v28 = vadd.f32 %v2269_v48, %v2262_v27 }
 0x36b   :  { %v2202_v37 = vpop.f32.mrb[8].mxu1 }
 0x36c   :  { %v4907_v23 = vadd.f32 %v2202_v37, %v4800_v47  ;;  %v3390_v59 = vpop.f32.mrb[9].mxu1 }
 0x36d   :  { %v2205_v20 = vpop.f32.mrb[10].mxu1 }
 0x36e   :  { %v2239_v22 = vmul.f32 %v4907_v23, %v4206_v44  ;;  %v4912_v29 = vadd.f32 %v2205_v20, %v4802_v25  ;;  %v3391_v38 = vpop.f32.mrb[11].mxu1 }
 0x36f   :  { %v2233_v38 = vld [vmem:[%s4984_s7] sm:$0x1] }
 0x370   :  { %v2247_v6 = vadd.f32 %v2246_v57, %v2239_v22  ;;  %v2263_v30 = vmul.f32 %v4907_v23, %v2239_v22  ;;  %v2240_v33 = vmul.f32 %v4912_v29, %v4212_v49 }
 0x372   :  { %v2271_v13 = vadd.f32 %v2270_v28, %v2263_v30  ;;  %v2248_v53 = vadd.f32 %v2247_v6, %v2240_v33  ;;  %v2264_v47 = vmul.f32 %v4912_v29, %v2240_v33 }
 0x373   :  { %v2210_v18 = vpop.f32.mrb[12].mxu1 }
 0x374   :  { %v2272_v36 = vadd.f32 %v2271_v13, %v2264_v47  ;;  %v3454_v58 = vadd.f32 %v2210_v18, %v4804_v9  ;;  %v3394_v34 = vpop.f32.mrb[13].mxu1 }
 0x375   :  { %v2213_v44 = vpop.f32.mrb[14].mxu1 }
 0x376   :  { %v2241_v25 = vmul.f32 %v3454_v58, %v4218_v61  ;;  %v3455_v43 = vadd.f32 %v2213_v44, %v4806_v17  ;;  %v3395_v39 = vpop.f32.mrb[15].mxu1 }
 0x378   :  { %v2249_v63 = vadd.f32 %v2248_v53, %v2241_v25  ;;  %v2265_v10 = vmul.f32 %v3454_v58, %v2241_v25  ;;  %v2242_v41 = vmul.f32 %v3455_v43, %v4221_v4  ;;  %v2234_v53 = vld [vmem:[%s4985_s8] sm:$0x1] }
 0x37a   :  { %v2273_v49 = vadd.f32 %v2272_v36, %v2265_v10  ;;  %v2250_v0 = vadd.f32 %v2249_v63, %v2242_v41  ;;  %v2266_v1 = vmul.f32 %v3455_v43, %v2242_v41 }
 0x37b   :  { %v2218_v45 = vpop.f32.mrb[16].mxu1 }
 0x37c   :  { %v2274_v14 = vadd.f32 %v2273_v49, %v2266_v1  ;;  %v3456_v32 = vadd.f32 %v2218_v45, %v4808_v2  ;;  %v3398_v46 = vpop.f32.mrb[17].mxu1 }
 0x37d   :  { %v2221_v9 = vpop.f32.mrb[18].mxu1 }
 0x37e   :  { %v2243_v62 = vmul.f32 %v3456_v32, %v4225_v19  ;;  %v3399_v55 = vpop.f32.mrb[19].mxu1 }
 0x380   :  { %v2251_v61 = vadd.f32 %v2250_v0, %v2243_v62  ;;  %v2267_v24 = vmul.f32 %v3456_v32, %v2243_v62 }
 0x382   :  { %v2252_v17 = vrot.slane %v2251_v61, 4  ;;  %v2275_v11 = vadd.f32 %v2274_v14, %v2267_v24 }
 0x384   :  { %v2253_v35 = vadd.f32 %v2252_v17, %v2251_v61  ;;  %v2276_v16 = vrot.slane %v2275_v11, 4 }
 0x386   :  { %v2254_v26 = vrot.slane %v2253_v35, 2  ;;  %v2277_v4 = vadd.f32 %v2276_v16, %v2275_v11 }
 0x388   :  { %v2255_v42 = vadd.f32 %v2254_v26, %v2253_v35  ;;  %v2278_v15 = vrot.slane %v2277_v4, 2 }
 0x38a   :  { %v2256_v48 = vrot.slane %v2255_v42, 1  ;;  %v2279_v27 = vadd.f32 %v2278_v15, %v2277_v4 }
 0x38c   :  { %v2257_v57 = vadd.f32 %v2256_v48, %v2255_v42  ;;  %v2280_v28 = vrot.slane %v2279_v27, 1 }
 0x38e   :  { %v2258_v2 = vmul.f32 0.03125, %v2257_v57  ;;  %v2281_v37 = vadd.f32 %v2280_v28, %v2279_v27 }
 0x390   :  { %v2282_v59 = vmul.f32 0.03125, %v2281_v37  ;;  %v2283_v20 = vmul.f32 %v2258_v2, %v2258_v2 }
 0x392   :  { %v2284_v19 = vsub.f32 %v2282_v59, %v2283_v20 }
 0x394   :  { %v2285_v22 = vadd.f32 1e-05, %v2284_v19 }
 0x396   :  { %3710 = vrsqrt.f32 %v2285_v22 }
 0x3a0   :  { %v3711_v6 = vpop.eup %3710 }
 0x3a1   :  { %v2287_v30 = vmul.f32 %v3711_v6, %v2233_v38 }
 0x3a3   :  { %v2292_v33 = vrot.slane %v2287_v30, %v4231_v52  ;;  %v2303_v13 = vmul.f32 %v2287_v30, %v2258_v2 }
 0x3a5   :  { %v2294_v47 = vmul.f32 %v4880_v54, %v2292_v33  ;;  %v2295_v18 = vmul.f32 %v4886_v3, %v2292_v33  ;;  %v2296_v36 = vmul.f32 %v4894_v7, %v2292_v33  ;;  %v2297_v34 = vmul.f32 %v4900_v60, %v2292_v33 }
 0x3a6   :  { %v2298_v44 = vmul.f32 %v4907_v23, %v2292_v33  ;;  %v2299_v25 = vmul.f32 %v4912_v29, %v2292_v33  ;;  %v2300_v39 = vmul.f32 %v3454_v58, %v2292_v33  ;;  %v2301_v63 = vmul.f32 %v3455_v43, %v2292_v33 }
 0x3a7   :  { %v2302_v10 = vmul.f32 %v3456_v32, %v2292_v33  ;;  %v2304_v41 = vsub.f32 %v2234_v53, %v2303_v13 }
 0x3a9   :  { %v2309_v49 = vrot.slane %v2304_v41, %v4231_v52 }
 0x3ab   :  { %v2311_v0 = vadd.f32 %v2309_v49, %v2294_v47  ;;  %v2312_v1 = vadd.f32 %v2309_v49, %v2295_v18  ;;  %v2313_v45 = vadd.f32 %v2309_v49, %v2296_v36  ;;  %v2314_v54 = vadd.f32 %v2309_v49, %v2297_v34 }
 0x3ac   :  { %v2315_v14 = vadd.f32 %v2309_v49, %v2298_v44  ;;  %v2316_v3 = vadd.f32 %v2309_v49, %v2299_v25  ;;  %v2317_v46 = vadd.f32 %v2309_v49, %v2300_v39  ;;  %v2318_v7 = vadd.f32 %v2309_v49, %v2301_v63 }
 0x3ad   :  { %v2319_v9 = vadd.f32 %v2309_v49, %v2302_v10  ;;  %v2540_v60 = vadd.f32 %v4862_v8, %v2311_v0  ;;  %v2541_v23 = vadd.f32 %v4864_v51, %v2312_v1  ;;  %v2542_v29 = vadd.f32 %v4866_v40, %v2313_v45 }
 0x3ae   :  { %v2543_v58 = vadd.f32 %v4868_v50, %v2314_v54  ;;  %v2544_v43 = vadd.f32 %v4870_v31, %v2315_v14  ;;  %v2545_v52 = vadd.f32 %v4872_v12, %v2316_v3  ;;  %v2546_v32 = vadd.f32 %v4874_v21, %v2317_v46 }
 0x3af   :  { %v2547_v62 = vadd.f32 %v4876_v5, %v2318_v7  ;;  %v2548_v55 = vadd.f32 %v4860_v56, %v2319_v9  ;;  %v2549_v61 = vmax.f32 %v2540_v60, 0.0  ;;  %v2550_v24 = vmax.f32 %v2541_v23, 0.0 }
 0x3b0   :  { %v2551_v17 = vmax.f32 %v2542_v29, 0.0  ;;  %v2552_v8 = vmax.f32 %v2543_v58, 0.0  ;;  %v2553_v11 = vmax.f32 %v2544_v43, 0.0  ;;  %v2554_v51 = vmax.f32 %v2545_v52, 0.0 }
 0x3b1   :  { %v2555_v35 = vmax.f32 %v2546_v32, 0.0  ;;  %v2556_v40 = vmax.f32 %v2547_v62, 0.0  ;;  %v2557_v16 = vmax.f32 %v2548_v55, 0.0  ;;  %2558 = vst [vmem:[%s4986_s12] sm:$0xff] %v2549_v61  ;;  %2559 = vst [vmem:[%s4986_s12 + $0x8] sm:$0xff] %v2550_v24 }
 0x3b2   :  { %2560 = vst [vmem:[%s4986_s12 + $0x10] sm:$0xff] %v2551_v17  ;;  %2561 = vst [vmem:[%s4986_s12 + $0x18] sm:$0xff] %v2552_v8 }
 0x3b3   :  { %2562 = vst [vmem:[%s4986_s12 + $0x20] sm:$0xff] %v2553_v11  ;;  %2563 = vst [vmem:[%s4986_s12 + $0x28] sm:$0xff] %v2554_v51 }
 0x3b4   :  { %2564 = vst [vmem:[%s4986_s12 + $0x30] sm:$0xff] %v2555_v35  ;;  %2565 = vst [vmem:[%s4986_s12 + $0x38] sm:$0xff] %v2556_v40 }
 0x3b5   :  { %2566 = vst [vmem:[%s4986_s12 + $0x40] sm:$0xff] %v2557_v16 }

// kernel: resnet18_forward.10
= control target key start
LH: loop header
LB: loop body
LE: loop exit
PB: predicated region body
PF: predicated region fallthrough
CT: control target
= control target key end

     0   :  { %v4935_v0 = vmov 0.0   ;;  %vm4936_vm0 = vmmov 0   ;;  %s6346_s2 = inlined_call_operand.vmem [shape: bf16[9,128,128], index: 2, kind: input, shape index: {}]   ;;  %s6347_s0 = inlined_call_operand.vmem [shape: f32[86,128], index: 0, kind: input, shape index: {}]   ;;  %s6348_s1 = inlined_call_operand.vmem [shape: f32[72,1], index: 1, kind: input, shape index: {}]   ;;  %s6349_s5 = inlined_call_operand.vmem [shape: bf16[9,128,128], index: 5, kind: input, shape index: {}]   ;;  %s6350_s3 = inlined_call_operand.vmem [shape: f32[1,128], index: 3, kind: input, shape index: {}]   ;;  %s6351_s4 = inlined_call_operand.vmem [shape: f32[1,128], index: 4, kind: input, shape index: {}]   ;;  %s6352_s6 = inlined_call_operand.vmem [shape: f32[1,128], index: 6, kind: input, shape index: {}]   ;;  %s6353_s7 = inlined_call_operand.vmem [shape: f32[1,128], index: 7, kind: input, shape index: {}]   ;;  %s6354_s8 = inlined_call_operand.vmem [shape: f32[72,128], index: 8, kind: output, shape index: {}]  }
   0x1   :  { %3813 = vmatprep.subr.bf16.mxu0 %v4935_v0  ;;  %1611 = vst [vmem:[#allocation2] sm:$0xff] %v4935_v0  ;;  %1612 = vst [vmem:[#allocation2 + $0x8] sm:$0xff] %v4935_v0  ;;  %v4786_v1 = vld [vmem:[%s6346_s2 + $0x40] sm:$0xff]   ;;  %3829 = vmatprep.mubr.msk.bf16.mxu0 %vm4936_vm0, %v4935_v0  ;;  %v4787_v2 = vld [vmem:[%s6346_s2 + $0x48] sm:$0xff]  }
   0x2   :  { %1613 = vst [vmem:[#allocation2 + $0x10] sm:$0xff] %v4935_v0  ;;  %1614 = vst [vmem:[#allocation2 + $0x18] sm:$0xff] %v4935_v0  ;;  %4137 = vmatprep.subr.bf16.mxu1 %v4935_v0  ;;  %4153 = vmatprep.mubr.msk.bf16.mxu1 %vm4936_vm0, %v4935_v0  ;;  %v4788_v3 = vld [vmem:[%s6346_s2 + $0x50] sm:$0xff]   ;;  %v4789_v4 = vld [vmem:[%s6346_s2 + $0x58] sm:$0xff]  }
   0x3   :  { %1615 = vst [vmem:[#allocation2 + $0x20] sm:$0xff] %v4935_v0  ;;  %1616 = vst [vmem:[#allocation2 + $0x28] sm:$0xff] %v4935_v0  ;;  %3814 = vmatpush3.bf16.msra.mxu0 %v4786_v1  ;;  %v4790_v5 = vld [vmem:[%s6346_s2 + $0x60] sm:$0xff]   ;;  %v4791_v6 = vld [vmem:[%s6346_s2 + $0x68] sm:$0xff]  }
   0x4   :  { %1617 = vst [vmem:[#allocation2 + $0x30] sm:$0xff] %v4935_v0  ;;  %1618 = vst [vmem:[#allocation2 + $0x38] sm:$0xff] %v4935_v0  ;;  %3815 = vmatprep.subr.bf16.mxu0 %v4935_v0  ;;  %v4792_v7 = vld [vmem:[%s6346_s2 + $0x70] sm:$0xff]   ;;  %v4793_v8 = vld [vmem:[%s6346_s2 + $0x78] sm:$0xff]  }
   0x5   :  { %1619 = vst [vmem:[#allocation2 + $0x40] sm:$0xff] %v4935_v0  ;;  %1620 = vst [vmem:[#allocation2 + $0x48] sm:$0xff] %v4935_v0  ;;  %v69_v9 = vld [vmem:[%s6347_s0 + $0x1] sm:$0xff]  ;;  %v70_v10 = vld [vmem:[%s6347_s0 + $0x9] sm:$0xff] }
   0x6   :  { %1621 = vst [vmem:[#allocation2 + $0x50] sm:$0x3f] %v4935_v0  ;;  %v78_v11 = vpack.c.bf16 %v70_v10, %v69_v9  ;;  %v4794_v12 = vld [vmem:[%s6346_s2] sm:$0xff]   ;;  %v4795_v13 = vld [vmem:[%s6346_s2 + $0x8] sm:$0xff]   ;;  %v71_v14 = vld [vmem:[%s6347_s0 + $0x11] sm:$0xff] }
   0x7   :  { %3816 = vmatpush3.bf16.msra.mxu0 %v4787_v2  ;;  %v72_v15 = vld [vmem:[%s6347_s0 + $0x19] sm:$0xff]  ;;  %v4796_v17 = vld [vmem:[%s6346_s2 + $0x10] sm:$0xff]   ;;  %v73_v18 = vld [vmem:[%s6347_s0 + $0x21] sm:$0xff] }
   0x8   :  { %3817 = vmatprep.subr.bf16.mxu0 %v4935_v0  ;;  %v79_v16 = vpack.c.bf16 %v72_v15, %v71_v14  ;;  %v74_v19 = vld [vmem:[%s6347_s0 + $0x29] sm:$0xff]  ;;  %v4797_v20 = vld [vmem:[%s6346_s2 + $0x18] sm:$0xff]   ;;  %v4798_v22 = vld [vmem:[%s6346_s2 + $0x20] sm:$0xff]  }
   0x9   :  { %v80_v21 = vpack.c.bf16 %v74_v19, %v73_v18  ;;  %v75_v23 = vld [vmem:[%s6347_s0 + $0x31] sm:$0xff]  ;;  %v76_v24 = vld [vmem:[%s6347_s0 + $0x39] sm:$0xff]  ;;  %v4799_v25 = vld [vmem:[%s6346_s2 + $0x28] sm:$0xff]  }
   0xa   :  { %v4800_v26 = vld [vmem:[%s6346_s2 + $0x30] sm:$0xff]   ;;  %v81_v27 = vpack.c.bf16 %v76_v24, %v75_v23  ;;  %v77_v28 = vld [vmem:[%s6347_s0 + $0x41] sm:$0xff]  ;;  %v4801_v29 = vld [vmem:[%s6346_s2 + $0x38] sm:$0xff]  }
   0xb   :  { %3818 = vmatpush3.bf16.msra.mxu0 %v4788_v3  ;;  %v82_v30 = vpack.c.bf16 %v77_v28, %v77_v28  ;;  %v39_v31 = vld [vmem:[%s6347_s0] sm:$0xff]  ;;  %v5105_v32 = vld [vmem:[%s6347_s0 + $0x8] sm:$0xff]  ;;  %v5119_v36 = vld [vmem:[%s6347_s0 + $0x10] sm:$0xff] }
   0xc   :  { %3819 = vmatprep.subr.bf16.mxu0 %v4935_v0  ;;  %v48_v33 = vpack.c.bf16 %v5105_v32, %v39_v31  ;;  %v4802_v34 = vld [vmem:[%s6346_s2 + $0x80] sm:$0xff]   ;;  %v4803_v35 = vld [vmem:[%s6346_s2 + $0x88] sm:$0xff]   ;;  %v5124_v37 = vld [vmem:[%s6347_s0 + $0x18] sm:$0xff] }
   0xd   :  { %v49_v38 = vpack.c.bf16 %v5124_v37, %v5119_v36  ;;  %v4804_v39 = vld [vmem:[%s6346_s2 + $0x90] sm:$0xff]   ;;  %v5140_v40 = vld [vmem:[%s6347_s0 + $0x20] sm:$0xff]  ;;  %v5145_v41 = vld [vmem:[%s6347_s0 + $0x28] sm:$0xff] }
   0xe   :  { %v4805_v42 = vld [vmem:[%s6346_s2 + $0x98] sm:$0xff]   ;;  %v50_v43 = vpack.c.bf16 %v5145_v41, %v5140_v40  ;;  %v4806_v44 = vld [vmem:[%s6346_s2 + $0xa0] sm:$0xff]   ;;  %v5162_v45 = vld [vmem:[%s6347_s0 + $0x30] sm:$0xff] }
   0xf   :  { %3820 = vmatpush3.bf16.msra.mxu0 %v4789_v4  ;;  %v5167_v46 = vld [vmem:[%s6347_s0 + $0x38] sm:$0xff]  ;;  %v4807_v47 = vld [vmem:[%s6346_s2 + $0xa8] sm:$0xff]   ;;  %v4808_v49 = vld [vmem:[%s6346_s2 + $0xb0] sm:$0xff]  }
  0x10   :  { %3821 = vmatprep.subr.bf16.mxu0 %v4935_v0  ;;  %v51_v48 = vpack.c.bf16 %v5167_v46, %v5162_v45  ;;  %v5184_v50 = vld [vmem:[%s6347_s0 + $0x40] sm:$0xff]  ;;  %v4809_v51 = vld [vmem:[%s6346_s2 + $0xb8] sm:$0xff]   ;;  %v341_v54 = vld [vmem:[%s6347_s0 + $0xa] sm:$0xff] }
  0x11   :  { %v52_v52 = vpack.c.bf16 %v5184_v50, %v5184_v50  ;;  %v340_v53 = vld [vmem:[%s6347_s0 + $0x2] sm:$0xff]  ;;  %v342_v58 = vld [vmem:[%s6347_s0 + $0x12] sm:$0xff]  ;;  %v343_v59 = vld [vmem:[%s6347_s0 + $0x1a] sm:$0xff] }
  0x12   :  { %v349_v55 = vpack.c.bf16 %v341_v54, %v340_v53  ;;  %v4810_v56 = vld [vmem:[%s6346_s2 + $0xc0] sm:$0xff]   ;;  %v4811_v57 = vld [vmem:[%s6346_s2 + $0xc8] sm:$0xff]   ;;  %v350_v60 = vpack.c.bf16 %v343_v59, %v342_v58  ;;  %v4812_v61 = vld [vmem:[%s6346_s2 + $0xd0] sm:$0xff]  }
  0x13   :  { %3822 = vmatpush3.bf16.msra.mxu0 %v4790_v5  ;;  %v344_v62 = vld [vmem:[%s6347_s0 + $0x22] sm:$0xff]  ;;  %v345_v63 = vld [vmem:[%s6347_s0 + $0x2a] sm:$0xff]  ;;  %v4813_v1 = vld [vmem:[%s6346_s2 + $0xd8] sm:$0xff]  }
  0x14   :  { %3823 = vmatprep.subr.bf16.mxu0 %v4935_v0  ;;  %v351_v2 = vpack.c.bf16 %v345_v63, %v344_v62  ;;  %v4814_v3 = vld [vmem:[%s6346_s2 + $0xe0] sm:$0xff]   ;;  %v346_v4 = vld [vmem:[%s6347_s0 + $0x32] sm:$0xff]  ;;  %v4823_v28 = vld [vmem:[%s6346_s2 + $0x128] sm:$0xff]  }
  0x15   :  { %v347_v5 = vld [vmem:[%s6347_s0 + $0x3a] sm:$0xff]  ;;  %v348_v9 = vld [vmem:[%s6347_s0 + $0x42] sm:$0xff] }
  0x16   :  { %v4817_v10 = vld [vmem:[%s6346_s2 + $0xf8] sm:$0xff]   ;;  %v4818_v15 = vld [vmem:[%s6346_s2 + $0x100] sm:$0xff]   ;;  %v4831_v58 = vld [vmem:[%s6346_s2 + $0x168] sm:$0xff]  }
  0x17   :  { %3824 = vmatpush3.bf16.msra.mxu0 %v4791_v6  ;;  %v4815_v6 = vld [vmem:[%s6346_s2 + $0xe8] sm:$0xff]   ;;  %v5289_v18 = vld [vmem:[%s6347_s0 + $0x1e] sm:$0xff] }
  0x18   :  { %3825 = vmatprep.subr.bf16.mxu0 %v4935_v0  ;;  %v4821_v23 = vld [vmem:[%s6346_s2 + $0x118] sm:$0xff]   ;;  %v5347_v31 = vld [vmem:[%s6347_s0 + $0x46] sm:$0xff] }
  0x19   :  { %v4829_v53 = vld [vmem:[%s6346_s2 + $0x158] sm:$0xff]  }
  0x1a   :  { %v4833_v62 = vld [vmem:[%s6346_s2 + $0x178] sm:$0xff]  }
  0x1b   :  { %3826 = vmatpush3.bf16.msra.mxu0 %v4792_v7  ;;  %v352_v7 = vpack.c.bf16 %v347_v5, %v346_v4  ;;  %v830_v4 = vpack.c.bf16 %v5140_v40, %v5124_v37  ;;  %v831_v37 = vpack.c.bf16 %v5162_v45, %v5145_v41  ;;  %v4838_v40 = vld [vmem:[%s6346_s2 + $0x1a0] sm:$0xff]   ;;  %v4839_v5 = vld [vmem:[%s6346_s2 + $0x1a8] sm:$0xff]   ;;  %v832_v41 = vpack.c.bf16 %v5184_v50, %v5167_v46  ;;  %v4840_v45 = vld [vmem:[%s6346_s2 + $0x1b0] sm:$0xff]  }
  0x1c   :  { %3827 = vmatprep.subr.bf16.mxu0 %v4935_v0  ;;  %v4841_v46 = vld [vmem:[%s6346_s2 + $0x1b8] sm:$0xff]   ;;  %v30_v50 = vld [vmem:[%s6348_s1] sm:$0xff] }
  0x1f   :  { %3828 = vmatpush3.bf16.msra.mxu0 %v4793_v8  ;;  %v4816_v8 = vld [vmem:[%s6346_s2 + $0xf0] sm:$0xff]  }
  0x20   :  { %3849 = vmatprep.subr.bf16.mxu0 %v4935_v0 }
  0x22   :  { %3830 = vmatmul.mubr.bf16.vlgmr.msra.gmra.mrb[0].mxu0 %v78_v11  ;;  %v353_v11 = vpack.c.bf16 %v348_v9, %v348_v9 }
  0x23   :  { %3850 = vmatpush3.bf16.msra.mxu0 %v4794_v12  ;;  %3833 = vmatprep.mubr.msk.bf16.mxu0 %vm4936_vm0, %v4935_v0  ;;  %v500_v12 = vld [vmem:[%s6347_s0 + $0x6] sm:$0xff] }
  0x24   :  { %3851 = vmatprep.subr.bf16.mxu0 %v4935_v0 }
  0x27   :  { %3852 = vmatpush3.bf16.msra.mxu0 %v4795_v13  ;;  %v5270_v13 = vld [vmem:[%s6347_s0 + $0xe] sm:$0xff] }
  0x28   :  { %3853 = vmatprep.subr.bf16.mxu0 %v4935_v0  ;;  %v509_v14 = vpack.c.bf16 %v5270_v13, %v500_v12  ;;  %v34_v12 = vld [vmem:[%s6348_s1 + $0x20] sm:$0xff] }
  0x2a   :  { %3834 = vmatmul.mubr.bf16.gmra.mrb[4].mxu0 %v79_v16  ;;  %v4819_v16 = vld [vmem:[%s6346_s2 + $0x108] sm:$0xff]  }
  0x2b   :  { %3854 = vmatpush3.bf16.msra.mxu0 %v4796_v17  ;;  %3837 = vmatprep.mubr.msk.bf16.mxu0 %vm4936_vm0, %v4935_v0  ;;  %v5284_v17 = vld [vmem:[%s6347_s0 + $0x16] sm:$0xff] }
  0x2c   :  { %3855 = vmatprep.subr.bf16.mxu0 %v4935_v0  ;;  %v510_v19 = vpack.c.bf16 %v5289_v18, %v5284_v17 }
  0x2f   :  { %3856 = vmatpush3.bf16.msra.mxu0 %v4797_v20  ;;  %v4820_v20 = vld [vmem:[%s6346_s2 + $0x110] sm:$0xff]  }
  0x30   :  { %3857 = vmatprep.subr.bf16.mxu0 %v4935_v0 }
  0x32   :  { %3838 = vmatmul.mubr.bf16.gmra.mrb[8].mxu0 %v80_v21  ;;  %v5303_v21 = vld [vmem:[%s6347_s0 + $0x26] sm:$0xff] }
  0x33   :  { %3858 = vmatpush3.bf16.msra.mxu0 %v4798_v22  ;;  %3841 = vmatprep.mubr.msk.bf16.mxu0 %vm4936_vm0, %v4935_v0  ;;  %v5308_v22 = vld [vmem:[%s6347_s0 + $0x2e] sm:$0xff] }
  0x34   :  { %3859 = vmatprep.subr.bf16.mxu0 %v4935_v0  ;;  %v511_v24 = vpack.c.bf16 %v5308_v22, %v5303_v21 }
  0x37   :  { %3860 = vmatpush3.bf16.msra.mxu0 %v4799_v25  ;;  %v4822_v25 = vld [vmem:[%s6346_s2 + $0x120] sm:$0xff]  }
  0x38   :  { %3861 = vmatprep.subr.bf16.mxu0 %v4935_v0 }
  0x3a   :  { %3842 = vmatmul.mubr.bf16.gmra.mrb[12].mxu0 %v81_v27  ;;  %v5330_v27 = vld [vmem:[%s6347_s0 + $0x3e] sm:$0xff] }
  0x3b   :  { %3845 = vmatprep.mubr.msk.bf16.mxu0 %vm4936_vm0, %v4935_v0  ;;  %3862 = vmatpush3.bf16.msra.mxu0 %v4800_v26  ;;  %v5325_v26 = vld [vmem:[%s6347_s0 + $0x36] sm:$0xff] }
  0x3c   :  { %3863 = vmatprep.subr.bf16.mxu0 %v4935_v0 }
  0x3f   :  { %3864 = vmatpush3.bf16.msra.mxu0 %v4801_v29  ;;  %v512_v29 = vpack.c.bf16 %v5330_v27, %v5325_v26 }
  0x40   :  { %3885 = vmatprep.subr.bf16.mxu0 %v4935_v0 }
  0x42   :  { %3846 = vmatmul.mubr.bf16.gmra.mrb[16].mxu0 %v82_v30  ;;  %v4824_v30 = vld [vmem:[%s6346_s2 + $0x130] sm:$0xff]  }
  0x43   :  { %3865 = vmatprep.mubr.msk.bf16.mxu0 %vm4936_vm0, %v4935_v0 }
  0x4a   :  { %3866 = vmatmul.mubr.bf16.vlgmr.msra.gmra.mrb[0].mxu0 %v48_v33  ;;  %v4825_v33 = vld [vmem:[%s6346_s2 + $0x138] sm:$0xff]  }
  0x4b   :  { %3886 = vmatpush3.bf16.msra.mxu0 %v4802_v34  ;;  %3869 = vmatprep.mubr.msk.bf16.mxu0 %vm4936_vm0, %v4935_v0  ;;  %v513_v34 = vpack.c.bf16 %v5347_v31, %v5347_v31 }
  0x4c   :  { %3887 = vmatprep.subr.bf16.mxu0 %v4935_v0 }
  0x4f   :  { %3888 = vmatpush3.bf16.msra.mxu0 %v4803_v35  ;;  %v660_v35 = vld [vmem:[%s6347_s0 + $0x7] sm:$0xff] }
  0x50   :  { %3889 = vmatprep.subr.bf16.mxu0 %v4935_v0 }
  0x52   :  { %3870 = vmatmul.mubr.bf16.gmra.mrb[4].mxu0 %v49_v38  ;;  %v661_v38 = vld [vmem:[%s6347_s0 + $0xf] sm:$0xff] }
  0x53   :  { %3890 = vmatpush3.bf16.msra.mxu0 %v4804_v39  ;;  %3873 = vmatprep.mubr.msk.bf16.mxu0 %vm4936_vm0, %v4935_v0  ;;  %v669_v39 = vpack.c.bf16 %v661_v38, %v660_v35  ;;  %v984_v35 = vld [vmem:[%s6347_s0 + $0x2c] sm:$0xff]  ;;  %v985_v38 = vld [vmem:[%s6347_s0 + $0x34] sm:$0xff] }
  0x54   :  { %3891 = vmatprep.subr.bf16.mxu0 %v4935_v0 }
  0x57   :  { %3892 = vmatpush3.bf16.msra.mxu0 %v4805_v42  ;;  %v4826_v42 = vld [vmem:[%s6346_s2 + $0x140] sm:$0xff]  }
  0x58   :  { %3893 = vmatprep.subr.bf16.mxu0 %v4935_v0 }
  0x5a   :  { %3874 = vmatmul.mubr.bf16.gmra.mrb[8].mxu0 %v50_v43  ;;  %v4827_v43 = vld [vmem:[%s6346_s2 + $0x148] sm:$0xff]  }
  0x5b   :  { %3894 = vmatpush3.bf16.msra.mxu0 %v4806_v44  ;;  %3877 = vmatprep.mubr.msk.bf16.mxu0 %vm4936_vm0, %v4935_v0  ;;  %v662_v44 = vld [vmem:[%s6347_s0 + $0x17] sm:$0xff] }
  0x5c   :  { %3895 = vmatprep.subr.bf16.mxu0 %v4935_v0 }
  0x5f   :  { %3896 = vmatpush3.bf16.msra.mxu0 %v4807_v47  ;;  %v663_v47 = vld [vmem:[%s6347_s0 + $0x1f] sm:$0xff] }
  0x60   :  { %3897 = vmatprep.subr.bf16.mxu0 %v4935_v0 }
  0x62   :  { %3878 = vmatmul.mubr.bf16.gmra.mrb[12].mxu0 %v51_v48  ;;  %v670_v48 = vpack.c.bf16 %v663_v47, %v662_v44  ;;  %v5548_v44 = vld [vmem:[#allocation2] sm:$0xff] }
  0x63   :  { %3881 = vmatprep.mubr.msk.bf16.mxu0 %vm4936_vm0, %v4935_v0  ;;  %3898 = vmatpush3.bf16.msra.mxu0 %v4808_v49  ;;  %v4828_v49 = vld [vmem:[%s6346_s2 + $0x150] sm:$0xff]   ;;  %v986_v47 = vld [vmem:[%s6347_s0 + $0x3c] sm:$0xff] }
  0x64   :  { %3899 = vmatprep.subr.bf16.mxu0 %v4935_v0 }
  0x67   :  { %3900 = vmatpush3.bf16.msra.mxu0 %v4809_v51  ;;  %v664_v51 = vld [vmem:[%s6347_s0 + $0x27] sm:$0xff] }
  0x68   :  { %3921 = vmatprep.subr.bf16.mxu0 %v4935_v0 }
  0x6a   :  { %3882 = vmatmul.mubr.bf16.gmra.mrb[16].mxu0 %v52_v52  ;;  %v665_v52 = vld [vmem:[%s6347_s0 + $0x2f] sm:$0xff] }
  0x6b   :  { %3901 = vmatprep.mubr.msk.bf16.mxu0 %vm4936_vm0, %v4935_v0  ;;  %v671_v54 = vpack.c.bf16 %v665_v52, %v664_v51  ;;  %v4848_v51 = vld [vmem:[%s6346_s2 + $0x1f0] sm:$0xff]  }
  0x6c   :  { %v988_v52 = vld [vmem:[%s6347_s0 + $0x4c] sm:$0xff] }
  0x72   :  { %3902 = vmatmul.mubr.bf16.vlgmr.msra.gmra.mrb[0].mxu0 %v349_v55  ;;  %v4830_v55 = vld [vmem:[%s6346_s2 + $0x160] sm:$0xff]  }
  0x73   :  { %3922 = vmatpush3.bf16.msra.mxu0 %v4810_v56  ;;  %3905 = vmatprep.mubr.msk.bf16.mxu0 %vm4936_vm0, %v4935_v0  ;;  %v666_v56 = vld [vmem:[%s6347_s0 + $0x37] sm:$0xff] }
  0x74   :  { %3923 = vmatprep.subr.bf16.mxu0 %v4935_v0 }
  0x77   :  { %3924 = vmatpush3.bf16.msra.mxu0 %v4811_v57  ;;  %v667_v57 = vld [vmem:[%s6347_s0 + $0x3f] sm:$0xff] }
  0x78   :  { %3925 = vmatprep.subr.bf16.mxu0 %v4935_v0  ;;  %v672_v59 = vpack.c.bf16 %v667_v57, %v666_v56  ;;  %v1141_v56 = vld [vmem:[%s6347_s0 + $0x15] sm:$0xff] }
  0x7a   :  { %3906 = vmatmul.mubr.bf16.gmra.mrb[4].mxu0 %v350_v60  ;;  %v4832_v60 = vld [vmem:[%s6346_s2 + $0x170] sm:$0xff]  }
  0x7b   :  { %3926 = vmatpush3.bf16.msra.mxu0 %v4812_v61  ;;  %3909 = vmatprep.mubr.msk.bf16.mxu0 %vm4936_vm0, %v4935_v0  ;;  %v668_v61 = vld [vmem:[%s6347_s0 + $0x47] sm:$0xff] }
  0x7c   :  { %3927 = vmatprep.subr.bf16.mxu0 %v4935_v0  ;;  %v673_v63 = vpack.c.bf16 %v668_v61, %v668_v61  ;;  %v1143_v61 = vld [vmem:[%s6347_s0 + $0x25] sm:$0xff] }
  0x7f   :  { %3928 = vmatpush3.bf16.msra.mxu0 %v4813_v1  ;;  %v829_v1 = vpack.c.bf16 %v5119_v36, %v5105_v32  ;;  %v4836_v32 = vld [vmem:[%s6346_s2 + $0x190] sm:$0xff]   ;;  %v4837_v36 = vld [vmem:[%s6346_s2 + $0x198] sm:$0xff]  }
  0x80   :  { %3929 = vmatprep.subr.bf16.mxu0 %v4935_v0 }
  0x82   :  { %3910 = vmatmul.mubr.bf16.gmra.mrb[8].mxu0 %v351_v2  ;;  %v4834_v2 = vld [vmem:[%s6346_s2 + $0x180] sm:$0xff]  }
  0x83   :  { %3930 = vmatpush3.bf16.msra.mxu0 %v4814_v3  ;;  %3913 = vmatprep.mubr.msk.bf16.mxu0 %vm4936_vm0, %v4935_v0  ;;  %v4835_v3 = vld [vmem:[%s6346_s2 + $0x188] sm:$0xff]  }
  0x84   :  { %3931 = vmatprep.subr.bf16.mxu0 %v4935_v0 }
  0x87   :  { %3932 = vmatpush3.bf16.msra.mxu0 %v4815_v6  ;;  %v828_v6 = vld [vmem:[%s6347_s0 + $0x48] sm:$0xff] }
  0x88   :  { %3933 = vmatprep.subr.bf16.mxu0 %v4935_v0  ;;  %v833_v9 = vpack.c.bf16 %v828_v6, %v828_v6  ;;  %v4857_v6 = vld [vmem:[%s6346_s2 + $0x238] sm:$0xff]  }
  0x8a   :  { %3914 = vmatmul.mubr.bf16.gmra.mrb[12].mxu0 %v352_v7  ;;  %v32_v7 = vld [vmem:[%s6348_s1 + $0x10] sm:$0xff] }
  0x8b   :  { %3917 = vmatprep.mubr.msk.bf16.mxu0 %vm4936_vm0, %v4935_v0  ;;  %3934 = vmatpush3.bf16.msra.mxu0 %v4816_v8  ;;  %v4937_v8 = vmov 0  }
  0x8c   :  { %3935 = vmatprep.subr.bf16.mxu0 %v4935_v0  ;;  %4784 = vset.pattern.permute.xlu0 %v4937_v8 }
  0x8d   :  { %1464 = vperm.xlu0 %4784, %v30_v50   ;;  %4785 = vset.pattern.permute.xlu1 %v4937_v8  ;;  %v1309_v50 = vpack.c.bf16 %v5284_v17, %v5270_v13  ;;  %v1311_v8 = vpack.c.bf16 %v5325_v26, %v5308_v22  ;;  %v1312_v13 = vpack.c.bf16 %v5347_v31, %v5330_v27  ;;  %v1308_v17 = vld [vmem:[%s6347_s0 + $0x4e] sm:$0xff]  ;;  %v4861_v27 = vld [vmem:[%s6349_s5 + $0x58] sm:$0xff]   ;;  %v4862_v31 = vld [vmem:[%s6349_s5 + $0x60] sm:$0xff]  }
  0x8e   :  { %1474 = vperm.xlu1 %4785, %v32_v7   ;;  %v1310_v7 = vpack.c.bf16 %v5303_v21, %v5289_v18  ;;  %v1313_v18 = vpack.c.bf16 %v1308_v17, %v1308_v17  ;;  %v4858_v21 = vld [vmem:[%s6349_s5 + $0x40] sm:$0xff]   ;;  %v4859_v22 = vld [vmem:[%s6349_s5 + $0x48] sm:$0xff]   ;;  %v4860_v26 = vld [vmem:[%s6349_s5 + $0x50] sm:$0xff]  }
  0x8f   :  { %3936 = vmatpush3.bf16.msra.mxu0 %v4817_v10  ;;  %v31_v10 = vld [vmem:[%s6348_s1 + $0x8] sm:$0xff]  ;;  %4138 = vmatpush3.bf16.msra.mxu1 %v4858_v21 }
  0x90   :  { %3957 = vmatprep.subr.bf16.mxu0 %v4935_v0  ;;  %4139 = vmatprep.subr.bf16.mxu1 %v5548_v44 }
  0x91   :  { %1469 = vperm.xlu0 %4784, %v31_v10   ;;  %v4864_v10 = vld [vmem:[%s6349_s5 + $0x70] sm:$0xff]  }
  0x92   :  { %3918 = vmatmul.mubr.bf16.gmra.mrb[16].mxu0 %v353_v11  ;;  %v33_v11 = vld [vmem:[%s6348_s1 + $0x18] sm:$0xff] }
  0x93   :  { %3937 = vmatprep.mubr.msk.bf16.mxu0 %vm4936_vm0, %v4935_v0  ;;  %1479 = vperm.xlu1 %4785, %v33_v11   ;;  %v4865_v11 = vld [vmem:[%s6349_s5 + $0x78] sm:$0xff]  }
  0x94   :  { %4140 = vmatpush3.bf16.msra.mxu1 %v4859_v22 }
  0x95   :  { %1484 = vperm.xlu0 %4784, %v34_v12   ;;  %4141 = vmatprep.subr.bf16.mxu1 %v5548_v44 }
  0x98   :  { %4142 = vmatpush3.bf16.msra.mxu1 %v4860_v26 }
  0x99   :  { %4143 = vmatprep.subr.bf16.mxu1 %v5548_v44 }
  0x9a   :  { %3938 = vmatmul.mubr.bf16.vlgmr.msra.gmra.mrb[0].mxu0 %v509_v14  ;;  %v980_v14 = vld [vmem:[%s6347_s0 + $0xc] sm:$0xff] }
  0x9b   :  { %3958 = vmatpush3.bf16.msra.mxu0 %v4818_v15  ;;  %3941 = vmatprep.mubr.msk.bf16.mxu0 %vm4936_vm0, %v4935_v0  ;;  %v981_v15 = vld [vmem:[%s6347_s0 + $0x14] sm:$0xff] }
  0x9c   :  { %3959 = vmatprep.subr.bf16.mxu0 %v4935_v0  ;;  %4144 = vmatpush3.bf16.msra.mxu1 %v4861_v27 }
  0x9d   :  { %4145 = vmatprep.subr.bf16.mxu1 %v5548_v44 }
  0x9f   :  { %3960 = vmatpush3.bf16.msra.mxu0 %v4819_v16  ;;  %v35_v16 = vld [vmem:[%s6348_s1 + $0x28] sm:$0xff] }
  0xa0   :  { %3961 = vmatprep.subr.bf16.mxu0 %v4935_v0  ;;  %1489 = vperm.xlu1 %4785, %v35_v16  }
  0xa1   :  { %4146 = vmatpush3.bf16.msra.mxu1 %v4862_v31 }
  0xa2   :  { %3942 = vmatmul.mubr.bf16.gmra.mrb[4].mxu0 %v510_v19  ;;  %v989_v19 = vpack.c.bf16 %v981_v15, %v980_v14  ;;  %4147 = vmatprep.subr.bf16.mxu1 %v5548_v44 }
  0xa3   :  { %3962 = vmatpush3.bf16.msra.mxu0 %v4820_v20  ;;  %3945 = vmatprep.mubr.msk.bf16.mxu0 %vm4936_vm0, %v4935_v0  ;;  %v36_v20 = vld [vmem:[%s6348_s1 + $0x30] sm:$0xff] }
  0xa4   :  { %3963 = vmatprep.subr.bf16.mxu0 %v4935_v0  ;;  %1494 = vperm.xlu0 %4784, %v36_v20  }
  0xa7   :  { %3964 = vmatpush3.bf16.msra.mxu0 %v4821_v23  ;;  %v4842_v23 = vld [vmem:[%s6346_s2 + $0x1c0] sm:$0xff]  }
  0xa8   :  { %3965 = vmatprep.subr.bf16.mxu0 %v4935_v0 }
  0xaa   :  { %3946 = vmatmul.mubr.bf16.gmra.mrb[8].mxu0 %v511_v24  ;;  %v37_v24 = vld [vmem:[%s6348_s1 + $0x38] sm:$0xff] }
  0xab   :  { %3966 = vmatpush3.bf16.msra.mxu0 %v4822_v25  ;;  %3949 = vmatprep.mubr.msk.bf16.mxu0 %vm4936_vm0, %v4935_v0  ;;  %v38_v25 = vld [vmem:[%s6348_s1 + $0x40] sm:$0xff] }
  0xac   :  { %3967 = vmatprep.subr.bf16.mxu0 %v4935_v0  ;;  %1499 = vperm.xlu1 %4785, %v37_v24  }
  0xad   :  { %1504 = vperm.xlu0 %4784, %v38_v25  }
  0xaf   :  { %3968 = vmatpush3.bf16.msra.mxu0 %v4823_v28  ;;  %v4843_v28 = vld [vmem:[%s6346_s2 + $0x1c8] sm:$0xff]  }
  0xb0   :  { %3969 = vmatprep.subr.bf16.mxu0 %v4935_v0 }
  0xb2   :  { %3950 = vmatmul.mubr.bf16.gmra.mrb[12].mxu0 %v512_v29  ;;  %v982_v29 = vld [vmem:[%s6347_s0 + $0x1c] sm:$0xff] }
  0xb3   :  { %3953 = vmatprep.mubr.msk.bf16.mxu0 %vm4936_vm0, %v4935_v0  ;;  %3970 = vmatpush3.bf16.msra.mxu0 %v4824_v30  ;;  %v983_v30 = vld [vmem:[%s6347_s0 + $0x24] sm:$0xff] }
  0xb4   :  { %3971 = vmatprep.subr.bf16.mxu0 %v4935_v0 }
  0xb7   :  { %3972 = vmatpush3.bf16.msra.mxu0 %v4825_v33  ;;  %v990_v33 = vpack.c.bf16 %v983_v30, %v982_v29 }
  0xb8   :  { %3993 = vmatprep.subr.bf16.mxu0 %v4935_v0 }
  0xba   :  { %3954 = vmatmul.mubr.bf16.gmra.mrb[16].mxu0 %v513_v34  ;;  %v4844_v34 = vld [vmem:[%s6346_s2 + $0x1d0] sm:$0xff]  }
  0xbb   :  { %3973 = vmatprep.mubr.msk.bf16.mxu0 %vm4936_vm0, %v4935_v0 }
  0xc2   :  { %3974 = vmatmul.mubr.bf16.vlgmr.msra.gmra.mrb[0].mxu0 %v669_v39  ;;  %v4845_v39 = vld [vmem:[%s6346_s2 + $0x1d8] sm:$0xff]  }
  0xc3   :  { %3994 = vmatpush3.bf16.msra.mxu0 %v4826_v42  ;;  %3977 = vmatprep.mubr.msk.bf16.mxu0 %vm4936_vm0, %v4935_v0  ;;  %v991_v42 = vpack.c.bf16 %v985_v38, %v984_v35 }
  0xc4   :  { %3995 = vmatprep.subr.bf16.mxu0 %v4935_v0 }
  0xc7   :  { %3996 = vmatpush3.bf16.msra.mxu0 %v4827_v43  ;;  %v4846_v43 = vld [vmem:[%s6346_s2 + $0x1e0] sm:$0xff]  }
  0xc8   :  { %3997 = vmatprep.subr.bf16.mxu0 %v4935_v0 }
  0xca   :  { %3978 = vmatmul.mubr.bf16.gmra.mrb[4].mxu0 %v670_v48  ;;  %v987_v48 = vld [vmem:[%s6347_s0 + $0x44] sm:$0xff] }
  0xcb   :  { %3998 = vmatpush3.bf16.msra.mxu0 %v4828_v49  ;;  %3981 = vmatprep.mubr.msk.bf16.mxu0 %vm4936_vm0, %v4935_v0  ;;  %v4847_v49 = vld [vmem:[%s6346_s2 + $0x1e8] sm:$0xff]  }
  0xcc   :  { %3999 = vmatprep.subr.bf16.mxu0 %v4935_v0 }
  0xcf   :  { %4000 = vmatpush3.bf16.msra.mxu0 %v4829_v53  ;;  %v4849_v53 = vld [vmem:[%s6346_s2 + $0x1f8] sm:$0xff]  }
  0xd0   :  { %4001 = vmatprep.subr.bf16.mxu0 %v4935_v0 }
  0xd2   :  { %3982 = vmatmul.mubr.bf16.gmra.mrb[8].mxu0 %v671_v54  ;;  %v993_v54 = vpack.c.bf16 %v988_v52, %v988_v52 }
  0xd3   :  { %4002 = vmatpush3.bf16.msra.mxu0 %v4830_v55  ;;  %3985 = vmatprep.mubr.msk.bf16.mxu0 %vm4936_vm0, %v4935_v0  ;;  %v1140_v55 = vld [vmem:[%s6347_s0 + $0xd] sm:$0xff] }
  0xd4   :  { %4003 = vmatprep.subr.bf16.mxu0 %v4935_v0  ;;  %v1149_v57 = vpack.c.bf16 %v1141_v56, %v1140_v55 }
  0xd7   :  { %4004 = vmatpush3.bf16.msra.mxu0 %v4831_v58  ;;  %v4850_v58 = vld [vmem:[%s6346_s2 + $0x200] sm:$0xff]  }
  0xd8   :  { %4005 = vmatprep.subr.bf16.mxu0 %v4935_v0 }
  0xda   :  { %3986 = vmatmul.mubr.bf16.gmra.mrb[12].mxu0 %v672_v59  ;;  %v4851_v59 = vld [vmem:[%s6346_s2 + $0x208] sm:$0xff]  }
  0xdb   :  { %3989 = vmatprep.mubr.msk.bf16.mxu0 %vm4936_vm0, %v4935_v0  ;;  %4006 = vmatpush3.bf16.msra.mxu0 %v4832_v60  ;;  %v1142_v60 = vld [vmem:[%s6347_s0 + $0x1d] sm:$0xff] }
  0xdc   :  { %4007 = vmatprep.subr.bf16.mxu0 %v4935_v0 }
  0xdf   :  { %4008 = vmatpush3.bf16.msra.mxu0 %v4833_v62  ;;  %v1150_v62 = vpack.c.bf16 %v1143_v61, %v1142_v60 }
  0xe0   :  { %4029 = vmatprep.subr.bf16.mxu0 %v4935_v0 }
  0xe2   :  { %3990 = vmatmul.mubr.bf16.gmra.mrb[16].mxu0 %v673_v63  ;;  %v4852_v63 = vld [vmem:[%s6346_s2 + $0x210] sm:$0xff]  }
  0xe3   :  { %4009 = vmatprep.mubr.msk.bf16.mxu0 %vm4936_vm0, %v4935_v0 }
  0xea   :  { %4010 = vmatmul.mubr.bf16.vlgmr.msra.gmra.mrb[0].mxu0 %v829_v1  ;;  %v1144_v1 = vld [vmem:[%s6347_s0 + $0x2d] sm:$0xff] }
  0xeb   :  { %4030 = vmatpush3.bf16.msra.mxu0 %v4834_v2  ;;  %4013 = vmatprep.mubr.msk.bf16.mxu0 %vm4936_vm0, %v4935_v0  ;;  %v1145_v2 = vld [vmem:[%s6347_s0 + $0x35] sm:$0xff] }
  0xec   :  { %4031 = vmatprep.subr.bf16.mxu0 %v4935_v0 }
  0xef   :  { %4032 = vmatpush3.bf16.msra.mxu0 %v4835_v3  ;;  %v4853_v3 = vld [vmem:[%s6346_s2 + $0x218] sm:$0xff]  }
  0xf0   :  { %4033 = vmatprep.subr.bf16.mxu0 %v4935_v0 }
  0xf2   :  { %4014 = vmatmul.mubr.bf16.gmra.mrb[4].mxu0 %v830_v4  ;;  %v1151_v4 = vpack.c.bf16 %v1145_v2, %v1144_v1 }
  0xf3   :  { %4034 = vmatpush3.bf16.msra.mxu0 %v4836_v32  ;;  %4017 = vmatprep.mubr.msk.bf16.mxu0 %vm4936_vm0, %v4935_v0  ;;  %v4854_v32 = vld [vmem:[%s6346_s2 + $0x220] sm:$0xff]  }
  0xf4   :  { %4035 = vmatprep.subr.bf16.mxu0 %v4935_v0 }
  0xf7   :  { %4036 = vmatpush3.bf16.msra.mxu0 %v4837_v36  ;;  %v1146_v36 = vld [vmem:[%s6347_s0 + $0x3d] sm:$0xff] }
  0xf8   :  { %4037 = vmatprep.subr.bf16.mxu0 %v4935_v0 }
  0xfa   :  { %4018 = vmatmul.mubr.bf16.gmra.mrb[8].mxu0 %v831_v37  ;;  %v1147_v37 = vld [vmem:[%s6347_s0 + $0x45] sm:$0xff] }
  0xfb   :  { %4038 = vmatpush3.bf16.msra.mxu0 %v4838_v40  ;;  %4021 = vmatprep.mubr.msk.bf16.mxu0 %vm4936_vm0, %v4935_v0  ;;  %v4855_v40 = vld [vmem:[%s6346_s2 + $0x228] sm:$0xff]  }
  0xfc   :  { %4039 = vmatprep.subr.bf16.mxu0 %v4935_v0 }
  0xff   :  { %4040 = vmatpush3.bf16.msra.mxu0 %v4839_v5  ;;  %v1152_v5 = vpack.c.bf16 %v1147_v37, %v1146_v36 }
 0x100   :  { %4041 = vmatprep.subr.bf16.mxu0 %v4935_v0 }
 0x102   :  { %4022 = vmatmul.mubr.bf16.gmra.mrb[12].mxu0 %v832_v41  ;;  %v4856_v41 = vld [vmem:[%s6346_s2 + $0x230] sm:$0xff]  }
 0x103   :  { %4025 = vmatprep.mubr.msk.bf16.mxu0 %vm4936_vm0, %v4935_v0  ;;  %4042 = vmatpush3.bf16.msra.mxu0 %v4840_v45  ;;  %v1148_v45 = vld [vmem:[%s6347_s0 + $0x4d] sm:$0xff] }
 0x104   :  { %4043 = vmatprep.subr.bf16.mxu0 %v4935_v0 }
 0x107   :  { %4044 = vmatpush3.bf16.msra.mxu0 %v4841_v46  ;;  %v1153_v46 = vpack.c.bf16 %v1148_v45, %v1148_v45 }
 0x108   :  { %4065 = vmatprep.subr.bf16.mxu0 %v4935_v0 }
 0x10a   :  { %4026 = vmatmul.mubr.bf16.gmra.mrb[16].mxu0 %v833_v9  ;;  %v4863_v9 = vld [vmem:[%s6349_s5 + $0x68] sm:$0xff]  }
 0x10b   :  { %4045 = vmatprep.mubr.msk.bf16.mxu0 %vm4936_vm0, %v4935_v0  ;;  %4148 = vmatpush3.bf16.msra.mxu1 %v4863_v9 }
 0x10c   :  { %4149 = vmatprep.subr.bf16.mxu1 %v5548_v44  ;;  %v5697_v12 = vpop.permute.xlu0 %1464 }
 0x10f   :  { %4150 = vmatpush3.bf16.msra.mxu1 %v4864_v10 }
 0x110   :  { %4151 = vmatprep.subr.bf16.mxu1 %v5548_v44  ;;  %v5701_v15 = vpop.permute.xlu0 %1469 }
 0x112   :  { %4046 = vmatmul.mubr.bf16.vlgmr.msra.gmra.mrb[0].mxu0 %v989_v19 }
 0x113   :  { %4066 = vmatpush3.bf16.msra.mxu0 %v4842_v23  ;;  %4049 = vmatprep.mubr.msk.bf16.mxu0 %vm4936_vm0, %v4935_v0  ;;  %v5707_v23 = vpop.permute.xlu1 %1474 }
 0x114   :  { %4067 = vmatprep.subr.bf16.mxu0 %v4935_v0  ;;  %4152 = vmatpush3.bf16.msra.mxu1 %v4865_v11 }
 0x115   :  { %4173 = vmatprep.subr.bf16.mxu1 %v5548_v44 }
 0x117   :  { %4068 = vmatpush3.bf16.msra.mxu0 %v4843_v28  ;;  %v5715_v35 = vpop.permute.xlu1 %1479 }
 0x118   :  { %4069 = vmatprep.subr.bf16.mxu0 %v4935_v0 }
 0x11a   :  { %4050 = vmatmul.mubr.bf16.gmra.mrb[4].mxu0 %v990_v33 }
 0x11b   :  { %4070 = vmatpush3.bf16.msra.mxu0 %v4844_v34  ;;  %4053 = vmatprep.mubr.msk.bf16.mxu0 %vm4936_vm0, %v4935_v0 }
 0x11c   :  { %4071 = vmatprep.subr.bf16.mxu0 %v4935_v0 }
 0x11f   :  { %4072 = vmatpush3.bf16.msra.mxu0 %v4845_v39 }
 0x120   :  { %4073 = vmatprep.subr.bf16.mxu0 %v4935_v0  ;;  %v992_v0 = vpack.c.bf16 %v987_v48, %v986_v47 }
 0x122   :  { %4054 = vmatmul.mubr.bf16.gmra.mrb[8].mxu0 %v991_v42 }
 0x123   :  { %4074 = vmatpush3.bf16.msra.mxu0 %v4846_v43  ;;  %4057 = vmatprep.mubr.msk.bf16.mxu0 %vm4936_vm0, %v5548_v44 }
 0x124   :  { %4075 = vmatprep.subr.bf16.mxu0 %v5548_v44 }
 0x127   :  { %4076 = vmatpush3.bf16.msra.mxu0 %v4847_v49 }
 0x128   :  { %4077 = vmatprep.subr.bf16.mxu0 %v5548_v44 }
 0x12a   :  { %4058 = vmatmul.mubr.bf16.gmra.mrb[12].mxu0 %v992_v0 }
 0x12b   :  { %4061 = vmatprep.mubr.msk.bf16.mxu0 %vm4936_vm0, %v5548_v44  ;;  %4078 = vmatpush3.bf16.msra.mxu0 %v4848_v51 }
 0x12c   :  { %4079 = vmatprep.subr.bf16.mxu0 %v5548_v44 }
 0x12f   :  { %4080 = vmatpush3.bf16.msra.mxu0 %v4849_v53 }
 0x130   :  { %4101 = vmatprep.subr.bf16.mxu0 %v5548_v44 }
 0x132   :  { %4062 = vmatmul.mubr.bf16.gmra.mrb[16].mxu0 %v993_v54  ;;  %v5725_v54 = vpop.permute.xlu0 %1484 }
 0x133   :  { %4081 = vmatprep.mubr.msk.bf16.mxu0 %vm4936_vm0, %v5548_v44 }
 0x13a   :  { %4082 = vmatmul.mubr.bf16.vlgmr.msra.gmra.mrb[0].mxu0 %v1149_v57 }
 0x13b   :  { %4102 = vmatpush3.bf16.msra.mxu0 %v4850_v58  ;;  %4085 = vmatprep.mubr.msk.bf16.mxu0 %vm4936_vm0, %v5548_v44  ;;  %v5731_v58 = vpop.permute.xlu1 %1489 }
 0x13c   :  { %4103 = vmatprep.subr.bf16.mxu0 %v5548_v44 }
 0x13f   :  { %4104 = vmatpush3.bf16.msra.mxu0 %v4851_v59 }
 0x140   :  { %4105 = vmatprep.subr.bf16.mxu0 %v5548_v44 }
 0x142   :  { %4086 = vmatmul.mubr.bf16.gmra.mrb[4].mxu0 %v1150_v62 }
 0x143   :  { %4106 = vmatpush3.bf16.msra.mxu0 %v4852_v63  ;;  %4089 = vmatprep.mubr.msk.bf16.mxu0 %vm4936_vm0, %v5548_v44 }
 0x144   :  { %4107 = vmatprep.subr.bf16.mxu0 %v5548_v44 }
 0x147   :  { %4108 = vmatpush3.bf16.msra.mxu0 %v4853_v3 }
 0x148   :  { %4109 = vmatprep.subr.bf16.mxu0 %v5548_v44 }
 0x14a   :  { %4090 = vmatmul.mubr.bf16.gmra.mrb[8].mxu0 %v1151_v4 }
 0x14b   :  { %4110 = vmatpush3.bf16.msra.mxu0 %v4854_v32  ;;  %4093 = vmatprep.mubr.msk.bf16.mxu0 %vm4936_vm0, %v5548_v44  ;;  %v5739_v32 = vpop.permute.xlu0 %1494 }
 0x14c   :  { %4111 = vmatprep.subr.bf16.mxu0 %v5548_v44 }
 0x14f   :  { %4112 = vmatpush3.bf16.msra.mxu0 %v4855_v40 }
 0x150   :  { %4113 = vmatprep.subr.bf16.mxu0 %v5548_v44 }
 0x152   :  { %4094 = vmatmul.mubr.bf16.gmra.mrb[12].mxu0 %v1152_v5  ;;  %v5742_v5 = vpop.permute.xlu1 %1499 }
 0x153   :  { %4097 = vmatprep.mubr.msk.bf16.mxu0 %vm4936_vm0, %v5548_v44  ;;  %4114 = vmatpush3.bf16.msra.mxu0 %v4856_v41 }
 0x154   :  { %4115 = vmatprep.subr.bf16.mxu0 %v5548_v44 }
 0x157   :  { %4116 = vmatpush3.bf16.msra.mxu0 %v4857_v6 }
 0x15a   :  { %4098 = vmatmul.mubr.bf16.gmra.mrb[16].mxu0 %v1153_v46 }
 0x15b   :  { %4117 = vmatprep.mubr.msk.bf16.mxu0 %vm4936_vm0, %v5548_v44 }
 0x162   :  { %4118 = vmatmul.mubr.bf16.vlgmr.msra.gmra.mrb[0].mxu0 %v1309_v50 }
 0x163   :  { %4121 = vmatprep.mubr.msk.bf16.mxu0 %vm4936_vm0, %v5548_v44 }
 0x16a   :  { %4122 = vmatmul.mubr.bf16.gmra.mrb[4].mxu0 %v1310_v7 }
 0x16b   :  { %4125 = vmatprep.mubr.msk.bf16.mxu0 %vm4936_vm0, %v5548_v44 }
 0x172   :  { %4126 = vmatmul.mubr.bf16.gmra.mrb[8].mxu0 %v1311_v8 }
 0x173   :  { %4129 = vmatprep.mubr.msk.bf16.mxu0 %vm4936_vm0, %v5548_v44 }
 0x17a   :  { %4130 = vmatmul.mubr.bf16.gmra.mrb[12].mxu0 %v1312_v13 }
 0x17b   :  { %4133 = vmatprep.mubr.msk.bf16.mxu0 %vm4936_vm0, %v5548_v44 }
 0x182   :  { %4134 = vmatmul.mubr.bf16.gmra.mrb[16].mxu0 %v1313_v18  ;;  %v5745_v18 = vpop.permute.xlu0 %1504 }
 0x235   :  { %v5699_v14 = vpop.f32.mrb[0].mxu0 }
 0x236   :  { %v1507_v16 = vmul.f32 %v5697_v12, %v5699_v14  ;;  %v4119_v19 = vpop.f32.mrb[1].mxu0 }
 0x237   :  { %v5705_v20 = vpop.f32.mrb[2].mxu0 }
 0x238   :  { %v1508_v24 = vmul.f32 %v5701_v15, %v5705_v20  ;;  %v4120_v25 = vpop.f32.mrb[3].mxu0  ;;  %v1532_v28 = vmul.f32 %v1507_v16, %v5699_v14 }
 0x23a   :  { %v1516_v29 = vadd.f32 %v1508_v24, %v1507_v16  ;;  %v1533_v30 = vmul.f32 %v1508_v24, %v5705_v20 }
 0x23c   :  { %v1541_v33 = vadd.f32 %v1533_v30, %v1532_v28 }
 0x23d   :  { %v5713_v34 = vpop.f32.mrb[4].mxu0 }
 0x23e   :  { %v1509_v38 = vmul.f32 %v5707_v23, %v5713_v34  ;;  %v4123_v39 = vpop.f32.mrb[5].mxu0 }
 0x23f   :  { %v5719_v42 = vpop.f32.mrb[6].mxu0 }
 0x240   :  { %v1517_v43 = vadd.f32 %v1516_v29, %v1509_v38  ;;  %v1534_v47 = vmul.f32 %v1509_v38, %v5713_v34  ;;  %v1510_v48 = vmul.f32 %v5715_v35, %v5719_v42  ;;  %v4124_v49 = vpop.f32.mrb[7].mxu0 }
 0x242   :  { %v1542_v0 = vadd.f32 %v1541_v33, %v1534_v47  ;;  %v1518_v51 = vadd.f32 %v1517_v43, %v1510_v48  ;;  %v1535_v52 = vmul.f32 %v1510_v48, %v5719_v42 }
 0x244   :  { %v1543_v53 = vadd.f32 %v1542_v0, %v1535_v52 }
 0x245   :  { %v5727_v55 = vpop.f32.mrb[8].mxu0 }
 0x246   :  { %v1511_v56 = vmul.f32 %v5725_v54, %v5727_v55  ;;  %v4127_v57 = vpop.f32.mrb[9].mxu0 }
 0x247   :  { %v5733_v59 = vpop.f32.mrb[10].mxu0  ;;  %v1460_v57 = vld [vmem:[%s6350_s3] sm:$0x1] }
 0x248   :  { %v1519_v60 = vadd.f32 %v1518_v51, %v1511_v56  ;;  %v1536_v61 = vmul.f32 %v1511_v56, %v5727_v55  ;;  %v1512_v62 = vmul.f32 %v5731_v58, %v5733_v59  ;;  %v4128_v63 = vpop.f32.mrb[11].mxu0 }
 0x249   :  { %v1461_v63 = vld [vmem:[%s6351_s4] sm:$0x1] }
 0x24a   :  { %v1544_v1 = vadd.f32 %v1543_v53, %v1536_v61  ;;  %v1520_v2 = vadd.f32 %v1519_v60, %v1512_v62  ;;  %v1537_v3 = vmul.f32 %v1512_v62, %v5733_v59  ;;  %v1562_v53 = vlaneseq }
 0x24c   :  { %v1545_v4 = vadd.f32 %v1544_v1, %v1537_v3  ;;  %v1563_v56 = vshrl.u32 %v1562_v53, 7 }
 0x24d   :  { %v1437_v36 = vpop.f32.mrb[12].mxu0 }
 0x24e   :  { %v1513_v37 = vmul.f32 %v5739_v32, %v1437_v36  ;;  %v4131_v40 = vpop.f32.mrb[13].mxu0  ;;  %v5751_v60 = vsub.s32 0, %v1563_v56 }
 0x24f   :  { %v1440_v41 = vpop.f32.mrb[14].mxu0 }
 0x250   :  { %v1521_v45 = vadd.f32 %v1520_v2, %v1513_v37  ;;  %v1538_v6 = vmul.f32 %v1513_v37, %v1437_v36  ;;  %v1514_v46 = vmul.f32 %v5742_v5, %v1440_v41  ;;  %v4132_v50 = vpop.f32.mrb[15].mxu0 }
 0x252   :  { %v1546_v7 = vadd.f32 %v1545_v4, %v1538_v6  ;;  %v1522_v8 = vadd.f32 %v1521_v45, %v1514_v46  ;;  %v1539_v13 = vmul.f32 %v1514_v46, %v1440_v41 }
 0x254   :  { %v1547_v17 = vadd.f32 %v1546_v7, %v1539_v13 }
 0x255   :  { %v1445_v21 = vpop.f32.mrb[16].mxu0 }
 0x256   :  { %v1515_v22 = vmul.f32 %v5745_v18, %v1445_v21  ;;  %v4135_v26 = vpop.f32.mrb[17].mxu0 }
 0x257   :  { %v1448_v27 = vpop.f32.mrb[18].mxu0 }
 0x258   :  { %v1523_v31 = vadd.f32 %v1522_v8, %v1515_v22  ;;  %v1540_v9 = vmul.f32 %v1515_v22, %v1445_v21  ;;  %v4136_v10 = vpop.f32.mrb[19].mxu0 }
 0x25a   :  { %v1524_v11 = vrot.slane %v1523_v31, 4  ;;  %v1548_v16 = vadd.f32 %v1547_v17, %v1540_v9 }
 0x25c   :  { %v1525_v19 = vadd.f32 %v1524_v11, %v1523_v31  ;;  %v1549_v24 = vrot.slane %v1548_v16, 4 }
 0x25e   :  { %v1526_v25 = vrot.slane %v1525_v19, 2  ;;  %v1550_v28 = vadd.f32 %v1549_v24, %v1548_v16 }
 0x260   :  { %v1527_v29 = vadd.f32 %v1526_v25, %v1525_v19  ;;  %v1551_v30 = vrot.slane %v1550_v28, 2 }
 0x262   :  { %v1528_v33 = vrot.slane %v1527_v29, 1  ;;  %v1552_v38 = vadd.f32 %v1551_v30, %v1550_v28 }
 0x264   :  { %v1529_v39 = vadd.f32 %v1528_v33, %v1527_v29  ;;  %v1553_v43 = vrot.slane %v1552_v38, 1 }
 0x266   :  { %v1531_v47 = vmul.f32 0.03125, %v1529_v39  ;;  %v1554_v48 = vadd.f32 %v1553_v43, %v1552_v38 }
 0x268   :  { %v1555_v49 = vmul.f32 0.03125, %v1554_v48  ;;  %v1556_v0 = vmul.f32 %v1531_v47, %v1531_v47 }
 0x26a   :  { %v1557_v51 = vsub.f32 %v1555_v49, %v1556_v0 }
 0x26c   :  { %v1558_v52 = vadd.f32 1e-05, %v1557_v51 }
 0x26e   :  { %4930 = vrsqrt.f32 %v1558_v52  ;;  %v4866_v52 = vld [vmem:[%s6349_s5] sm:$0xff]  }
 0x278   :  { %v4931_v61 = vpop.eup %4930 }
 0x279   :  { %v1560_v62 = vmul.f32 %v4931_v61, %v1460_v57 }
 0x27b   :  { %v1565_v1 = vrot.slane %v1560_v62, %v5751_v60  ;;  %v1576_v2 = vmul.f32 %v1560_v62, %v1531_v47 }
 0x27d   :  { %v1570_v3 = vmul.f32 %v1565_v1, %v5719_v42  ;;  %v1571_v4 = vmul.f32 %v1565_v1, %v5727_v55  ;;  %v1572_v37 = vmul.f32 %v1565_v1, %v5733_v59  ;;  %v1573_v40 = vmul.f32 %v1565_v1, %v1437_v36 }
 0x27e   :  { %v1574_v45 = vmul.f32 %v1565_v1, %v1440_v41  ;;  %v1575_v6 = vmul.f32 %v1565_v1, %v1445_v21  ;;  %v1577_v46 = vsub.f32 %v1461_v63, %v1576_v2  ;;  %v1567_v50 = vmul.f32 %v1565_v1, %v5699_v14  ;;  %v4867_v2 = vld [vmem:[%s6349_s5 + $0x8] sm:$0xff]  }
 0x27f   :  { %v1568_v7 = vmul.f32 %v1565_v1, %v5705_v20  ;;  %v1569_v8 = vmul.f32 %v1565_v1, %v5713_v34 }
 0x280   :  { %v1582_v13 = vrot.slane %v1577_v46, %v5751_v60 }
 0x282   :  { %v1587_v17 = vadd.f32 %v1582_v13, %v1570_v3  ;;  %v1588_v22 = vadd.f32 %v1582_v13, %v1571_v4  ;;  %v1589_v26 = vadd.f32 %v1582_v13, %v1572_v37  ;;  %v1590_v42 = vadd.f32 %v1582_v13, %v1573_v40 }
 0x283   :  { %v1591_v27 = vadd.f32 %v1582_v13, %v1574_v45  ;;  %v1592_v55 = vadd.f32 %v1582_v13, %v1575_v6  ;;  %v1584_v31 = vadd.f32 %v1582_v13, %v1567_v50  ;;  %v1585_v59 = vadd.f32 %v1582_v13, %v1568_v7  ;;  %v4868_v7 = vld [vmem:[%s6349_s5 + $0x10] sm:$0xff]  }
 0x284   :  { %v1596_v36 = vmax.f32 %v1587_v17, 0.0  ;;  %v1597_v41 = vmax.f32 %v1588_v22, 0.0  ;;  %v1598_v21 = vmax.f32 %v1589_v26, 0.0  ;;  %v1599_v9 = vmax.f32 %v1590_v42, 0.0 }
 0x285   :  { %v1600_v10 = vmax.f32 %v1591_v27, 0.0  ;;  %v1601_v14 = vmax.f32 %v1592_v55, 0.0  ;;  %v1593_v11 = vmax.f32 %v1584_v31, 0.0  ;;  %v1594_v20 = vmax.f32 %v1585_v59, 0.0 }
 0x286   :  { %v5765_v34 = vmul.f32 %v1596_v36, %v5715_v35  ;;  %v5768_v16 = vmul.f32 %v1597_v41, %v5725_v54  ;;  %v5771_v19 = vmul.f32 %v1598_v21, %v5731_v58  ;;  %v5774_v24 = vmul.f32 %v1599_v9, %v5739_v32  ;;  %v4869_v21 = vld [vmem:[%s6349_s5 + $0x18] sm:$0xff]  }
 0x287   :  { %v5777_v25 = vmul.f32 %v1600_v10, %v5742_v5  ;;  %v5780_v28 = vmul.f32 %v1601_v14, %v5745_v18  ;;  %v5783_v29 = vmul.f32 %v1593_v11, %v5697_v12  ;;  %v5786_v30 = vmul.f32 %v1594_v20, %v5701_v15  ;;  %v4870_v11 = vld [vmem:[%s6349_s5 + $0x20] sm:$0xff]  }
 0x288   :  { %1625 = vst [vmem:[#allocation2 + $0x1f] sm:$0xff] %v5765_v34  ;;  %1626 = vst [vmem:[#allocation2 + $0x27] sm:$0xff] %v5768_v16  ;;  %v1586_v33 = vadd.f32 %v1582_v13, %v1569_v8  ;;  %v2263_v38 = vpack.c.bf16 %v5771_v19, %v5768_v16  ;;  %v4905_v16 = vld [vmem:[%s6349_s5 + $0x178] sm:$0xff]  }
 0x289   :  { %1627 = vst [vmem:[#allocation2 + $0x2f] sm:$0xff] %v5771_v19  ;;  %1628 = vst [vmem:[#allocation2 + $0x37] sm:$0xff] %v5774_v24  ;;  %v2261_v39 = vpack.c.bf16 %v5786_v30, %v5783_v29  ;;  %v2264_v43 = vpack.c.bf16 %v5777_v25, %v5774_v24  ;;  %v2265_v19 = vpack.c.bf16 %v5780_v28, %v5780_v28  ;;  %v4906_v24 = vld [vmem:[%s6349_s5 + $0x180] sm:$0xff]  }
 0x28a   :  { %1629 = vst [vmem:[#allocation2 + $0x3f] sm:$0xff] %v5777_v25  ;;  %1630 = vst [vmem:[#allocation2 + $0x47] sm:$0xff] %v5780_v28  ;;  %v1595_v47 = vmax.f32 %v1586_v33, 0.0  ;;  %v4871_v33 = vld [vmem:[%s6349_s5 + $0x28] sm:$0xff]   ;;  %v4908_v28 = vld [vmem:[%s6349_s5 + $0x190] sm:$0xff]  }
 0x28b   :  { %1622 = vst [vmem:[#allocation2 + $0x7] sm:$0xff] %v5783_v29  ;;  %1623 = vst [vmem:[#allocation2 + $0xf] sm:$0xff] %v5786_v30  ;;  %v4901_v29 = vld [vmem:[%s6349_s5 + $0x158] sm:$0xff]   ;;  %v4902_v30 = vld [vmem:[%s6349_s5 + $0x160] sm:$0xff]  }
 0x28c   :  { %v5803_v48 = vmul.f32 %v1595_v47, %v5707_v23  ;;  %v4907_v25 = vld [vmem:[%s6349_s5 + $0x188] sm:$0xff]  }
 0x28e   :  { %1624 = vst [vmem:[#allocation2 + $0x17] sm:$0xff] %v5803_v48  ;;  %v2262_v49 = vpack.c.bf16 %v5765_v34, %v5803_v48  ;;  %v4903_v34 = vld [vmem:[%s6349_s5 + $0x168] sm:$0xff]  }
 0x28f   :  { %v5828_v3 = vld [vmem:[#allocation2 + $0x20] sm:$0xff]  ;;  %v4911_v48 = vld [vmem:[%s6349_s5 + $0x1a8] sm:$0xff]  }
 0x290   :  { %v5811_v56 = vld [vmem:[#allocation2 + $0x28] sm:$0xff]  ;;  %v5813_v57 = vld [vmem:[#allocation2 + $0x30] sm:$0xff] }
 0x291   :  { %v5817_v62 = vld [vmem:[#allocation2 + $0x38] sm:$0xff]  ;;  %v5819_v63 = vld [vmem:[#allocation2 + $0x40] sm:$0xff]  ;;  %v2423_v1 = vpack.c.bf16 %v5813_v57, %v5811_v56  ;;  %v5855_v27 = vld [vmem:[#allocation2 + $0x2e] sm:$0xff] }
 0x292   :  { %v1661_v0 = vld [vmem:[#allocation2 + $0x1] sm:$0xff]  ;;  %v1662_v51 = vld [vmem:[#allocation2 + $0x9] sm:$0xff]  ;;  %v2424_v4 = vpack.c.bf16 %v5819_v63, %v5817_v62  ;;  %v5857_v55 = vld [vmem:[#allocation2 + $0x36] sm:$0xff] }
 0x293   :  { %v1670_v53 = vpack.c.bf16 %v1662_v51, %v1661_v0  ;;  %v5815_v61 = vld [vmem:[#allocation2 + $0x8] sm:$0xff]  ;;  %v5859_v31 = vld [vmem:[#allocation2 + $0x3e] sm:$0xff]  ;;  %v2903_v41 = vpack.c.bf16 %v5857_v55, %v5855_v27  ;;  %v1667_v47 = vld [vmem:[#allocation2 + $0x31] sm:$0xff] }
 0x294   :  { %v5844_v8 = vld [vmem:[#allocation2 + $0xe] sm:$0xff]  ;;  %v5851_v26 = vld [vmem:[#allocation2 + $0x26] sm:$0xff]  ;;  %v1668_v0 = vld [vmem:[#allocation2 + $0x39] sm:$0xff] }
 0x295   :  { %4154 = vmatmul.mubr.bf16.vlgmr.msra.gmra.mrb[0].mxu1 %v1670_v53  ;;  %v5833_v37 = vld [vmem:[#allocation2 + $0x10] sm:$0xff]  ;;  %v1664_v45 = vld [vmem:[#allocation2 + $0x19] sm:$0xff]  ;;  %v5863_v36 = vld [vmem:[#allocation2 + $0x46] sm:$0xff] }
 0x296   :  { %4174 = vmatpush3.bf16.msra.mxu1 %v4866_v52  ;;  %4157 = vmatprep.mubr.msk.bf16.mxu1 %vm4936_vm0, %v5548_v44  ;;  %v1663_v40 = vld [vmem:[#allocation2 + $0x11] sm:$0xff]  ;;  %v2421_v46 = vpack.c.bf16 %v5833_v37, %v5815_v61  ;;  %v5849_v22 = vld [vmem:[#allocation2 + $0x1e] sm:$0xff]  ;;  %v2904_v9 = vpack.c.bf16 %v5863_v36, %v5859_v31  ;;  %v1666_v14 = vld [vmem:[#allocation2 + $0x29] sm:$0xff]  ;;  %v1673_v52 = vpack.c.bf16 %v1668_v0, %v1667_v47 }
 0x297   :  { %4175 = vmatprep.subr.bf16.mxu1 %v5548_v44  ;;  %v5835_v6 = vld [vmem:[#allocation2 + $0x18] sm:$0xff]  ;;  %v1671_v17 = vpack.c.bf16 %v1664_v45, %v1663_v40  ;;  %v2902_v59 = vpack.c.bf16 %v5851_v26, %v5849_v22  ;;  %v1665_v10 = vld [vmem:[#allocation2 + $0x21] sm:$0xff]  ;;  %v4872_v51 = vld [vmem:[%s6349_s5 + $0x30] sm:$0xff]  }
 0x298   :  { %v2422_v50 = vpack.c.bf16 %v5828_v3, %v5835_v6  ;;  %v5846_v13 = vld [vmem:[#allocation2 + $0x16] sm:$0xff]  ;;  %v1672_v20 = vpack.c.bf16 %v1666_v14, %v1665_v10  ;;  %v1631_v45 = vld [vmem:[#allocation2] sm:$0xff]  ;;  %v1641_v14 = vpack.c.bf16 %v5835_v6, %v5833_v37  ;;  %v4879_v47 = vld [vmem:[%s6349_s5 + $0xa8] sm:$0xff]  }
 0x299   :  { %v2901_v42 = vpack.c.bf16 %v5846_v13, %v5844_v8  ;;  %v4873_v53 = vld [vmem:[%s6349_s5 + $0x38] sm:$0xff]   ;;  %v4876_v10 = vld [vmem:[%s6349_s5 + $0x90] sm:$0xff]   ;;  %v2575_v6 = vld [vmem:[#allocation2 + $0x24] sm:$0xff] }
 0x29a   :  { %4176 = vmatpush3.bf16.msra.mxu1 %v4867_v2  ;;  %v1669_v2 = vld [vmem:[#allocation2 + $0x41] sm:$0xff]  ;;  %v4880_v0 = vld [vmem:[%s6349_s5 + $0xb0] sm:$0xff]  }
 0x29b   :  { %4177 = vmatprep.subr.bf16.mxu1 %v5548_v44  ;;  %v1674_v40 = vpack.c.bf16 %v1669_v2, %v1669_v2  ;;  %v1932_v2 = vld [vmem:[#allocation2 + $0x2] sm:$0xff] }
 0x29c   :  { %v2574_v37 = vld [vmem:[#allocation2 + $0x1c] sm:$0xff] }
 0x29d   :  { %4158 = vmatmul.mubr.bf16.gmra.mrb[4].mxu1 %v1671_v17  ;;  %v1640_v17 = vpack.c.bf16 %v5815_v61, %v1631_v45  ;;  %v4882_v45 = vld [vmem:[%s6349_s5 + $0xc0] sm:$0xff]  }
 0x29e   :  { %4178 = vmatpush3.bf16.msra.mxu1 %v4868_v7  ;;  %4161 = vmatprep.mubr.msk.bf16.mxu1 %vm4936_vm0, %v5548_v44  ;;  %v4874_v7 = vld [vmem:[%s6349_s5 + $0x80] sm:$0xff]  }
 0x29f   :  { %4179 = vmatprep.subr.bf16.mxu1 %v5548_v44 }
 0x2a2   :  { %4180 = vmatpush3.bf16.msra.mxu1 %v4869_v21  ;;  %v4875_v21 = vld [vmem:[%s6349_s5 + $0x88] sm:$0xff]  }
 0x2a3   :  { %4181 = vmatprep.subr.bf16.mxu1 %v5548_v44 }
 0x2a5   :  { %4162 = vmatmul.mubr.bf16.gmra.mrb[8].mxu1 %v1672_v20  ;;  %v4878_v20 = vld [vmem:[%s6349_s5 + $0xa0] sm:$0xff]  }
 0x2a6   :  { %4182 = vmatpush3.bf16.msra.mxu1 %v4870_v11  ;;  %4165 = vmatprep.mubr.msk.bf16.mxu1 %vm4936_vm0, %v5548_v44  ;;  %v4877_v11 = vld [vmem:[%s6349_s5 + $0x98] sm:$0xff]  }
 0x2a7   :  { %4183 = vmatprep.subr.bf16.mxu1 %v5548_v44 }
 0x2aa   :  { %4184 = vmatpush3.bf16.msra.mxu1 %v4871_v33  ;;  %v1642_v33 = vpack.c.bf16 %v5811_v56, %v5828_v3  ;;  %v4913_v56 = vld [vmem:[%s6349_s5 + $0x1b8] sm:$0xff]  }
 0x2ab   :  { %4185 = vmatprep.subr.bf16.mxu1 %v5548_v44 }
 0x2ad   :  { %4166 = vmatmul.mubr.bf16.gmra.mrb[12].mxu1 %v1673_v52  ;;  %v4881_v52 = vld [vmem:[%s6349_s5 + $0xb8] sm:$0xff]  }
 0x2ae   :  { %4169 = vmatprep.mubr.msk.bf16.mxu1 %vm4936_vm0, %v5548_v44  ;;  %4186 = vmatpush3.bf16.msra.mxu1 %v4872_v51  ;;  %v1643_v51 = vpack.c.bf16 %v5817_v62, %v5813_v57  ;;  %v2420_v57 = vld [vmem:[#allocation2 + $0x48] sm:$0xff] }
 0x2af   :  { %4187 = vmatprep.subr.bf16.mxu1 %v5548_v44  ;;  %v2425_v61 = vpack.c.bf16 %v2420_v57, %v2420_v57  ;;  %v2572_v62 = vld [vmem:[#allocation2 + $0xc] sm:$0xff] }
 0x2b0   :  { %v4928_v57 = vld [vmem:[%s6349_s5 + $0x230] sm:$0xff]  }
 0x2b2   :  { %4188 = vmatpush3.bf16.msra.mxu1 %v4873_v53  ;;  %v1644_v53 = vpack.c.bf16 %v5819_v63, %v5819_v63  ;;  %v2573_v63 = vld [vmem:[#allocation2 + $0x14] sm:$0xff] }
 0x2b3   :  { %4209 = vmatprep.subr.bf16.mxu1 %v5548_v44  ;;  %v2581_v3 = vpack.c.bf16 %v2573_v63, %v2572_v62  ;;  %v4929_v62 = vld [vmem:[%s6349_s5 + $0x238] sm:$0xff]   ;;  %v2740_v63 = vld [vmem:[#allocation2 + $0x4d] sm:$0xff] }
 0x2b5   :  { %4170 = vmatmul.mubr.bf16.gmra.mrb[16].mxu1 %v1674_v40  ;;  %v1933_v40 = vld [vmem:[#allocation2 + $0xa] sm:$0xff] }
 0x2b6   :  { %4189 = vmatprep.mubr.msk.bf16.mxu1 %vm4936_vm0, %v5548_v44 }
 0x2bd   :  { %4190 = vmatmul.mubr.bf16.vlgmr.msra.gmra.mrb[0].mxu1 %v1640_v17  ;;  %v4883_v17 = vld [vmem:[%s6349_s5 + $0xc8] sm:$0xff]  }
 0x2be   :  { %4210 = vmatpush3.bf16.msra.mxu1 %v4874_v7  ;;  %4193 = vmatprep.mubr.msk.bf16.mxu1 %vm4936_vm0, %v5548_v44  ;;  %v1941_v7 = vpack.c.bf16 %v1933_v40, %v1932_v2  ;;  %v1939_v2 = vld [vmem:[#allocation2 + $0x3a] sm:$0xff]  ;;  %v4888_v40 = vld [vmem:[%s6349_s5 + $0xf0] sm:$0xff]  }
 0x2bf   :  { %4211 = vmatprep.subr.bf16.mxu1 %v5548_v44 }
 0x2c2   :  { %4212 = vmatpush3.bf16.msra.mxu1 %v4875_v21  ;;  %v1934_v21 = vld [vmem:[#allocation2 + $0x12] sm:$0xff] }
 0x2c3   :  { %4213 = vmatprep.subr.bf16.mxu1 %v5548_v44 }
 0x2c5   :  { %4194 = vmatmul.mubr.bf16.gmra.mrb[4].mxu1 %v1641_v14  ;;  %v4884_v14 = vld [vmem:[%s6349_s5 + $0xd0] sm:$0xff]  }
 0x2c6   :  { %4214 = vmatpush3.bf16.msra.mxu1 %v4876_v10  ;;  %4197 = vmatprep.mubr.msk.bf16.mxu1 %vm4936_vm0, %v5548_v44  ;;  %v1935_v10 = vld [vmem:[#allocation2 + $0x1a] sm:$0xff] }
 0x2c7   :  { %4215 = vmatprep.subr.bf16.mxu1 %v5548_v44 }
 0x2ca   :  { %4216 = vmatpush3.bf16.msra.mxu1 %v4877_v11  ;;  %v1942_v11 = vpack.c.bf16 %v1935_v10, %v1934_v21  ;;  %v2092_v10 = vld [vmem:[#allocation2 + $0x6] sm:$0xff] }
 0x2cb   :  { %4217 = vmatprep.subr.bf16.mxu1 %v5548_v44 }
 0x2cd   :  { %4198 = vmatmul.mubr.bf16.gmra.mrb[8].mxu1 %v1642_v33  ;;  %v1936_v33 = vld [vmem:[#allocation2 + $0x22] sm:$0xff] }
 0x2ce   :  { %4218 = vmatpush3.bf16.msra.mxu1 %v4878_v20  ;;  %4201 = vmatprep.mubr.msk.bf16.mxu1 %vm4936_vm0, %v5548_v44  ;;  %v4885_v20 = vld [vmem:[%s6349_s5 + $0xd8] sm:$0xff]  }
 0x2cf   :  { %4219 = vmatprep.subr.bf16.mxu1 %v5548_v44 }
 0x2d2   :  { %4220 = vmatpush3.bf16.msra.mxu1 %v4879_v47  ;;  %v1937_v47 = vld [vmem:[#allocation2 + $0x2a] sm:$0xff] }
 0x2d3   :  { %4221 = vmatprep.subr.bf16.mxu1 %v5548_v44 }
 0x2d5   :  { %4202 = vmatmul.mubr.bf16.gmra.mrb[12].mxu1 %v1643_v51  ;;  %v1943_v51 = vpack.c.bf16 %v1937_v47, %v1936_v33  ;;  %v4892_v33 = vld [vmem:[%s6349_s5 + $0x110] sm:$0xff]   ;;  %v2102_v47 = vpack.c.bf16 %v5849_v22, %v5846_v13 }
 0x2d6   :  { %4205 = vmatprep.mubr.msk.bf16.mxu1 %vm4936_vm0, %v5548_v44  ;;  %4222 = vmatpush3.bf16.msra.mxu1 %v4880_v0  ;;  %v4886_v0 = vld [vmem:[%s6349_s5 + $0xe0] sm:$0xff]  }
 0x2d7   :  { %4223 = vmatprep.subr.bf16.mxu1 %v5548_v44 }
 0x2da   :  { %4224 = vmatpush3.bf16.msra.mxu1 %v4881_v52  ;;  %v4887_v52 = vld [vmem:[%s6349_s5 + $0xe8] sm:$0xff]  }
 0x2db   :  { %4245 = vmatprep.subr.bf16.mxu1 %v5548_v44 }
 0x2dd   :  { %4206 = vmatmul.mubr.bf16.gmra.mrb[16].mxu1 %v1644_v53  ;;  %v1938_v53 = vld [vmem:[#allocation2 + $0x32] sm:$0xff] }
 0x2de   :  { %4225 = vmatprep.mubr.msk.bf16.mxu1 %vm4936_vm0, %v5548_v44 }
 0x2e5   :  { %4226 = vmatmul.mubr.bf16.vlgmr.msra.gmra.mrb[0].mxu1 %v1941_v7  ;;  %v4889_v7 = vld [vmem:[%s6349_s5 + $0xf8] sm:$0xff]  }
 0x2e6   :  { %4246 = vmatpush3.bf16.msra.mxu1 %v4882_v45  ;;  %4229 = vmatprep.mubr.msk.bf16.mxu1 %vm4936_vm0, %v5548_v44  ;;  %v1944_v45 = vpack.c.bf16 %v1939_v2, %v1938_v53  ;;  %v4895_v53 = vld [vmem:[%s6349_s5 + $0x128] sm:$0xff]   ;;  %v4896_v2 = vld [vmem:[%s6349_s5 + $0x130] sm:$0xff]  }
 0x2e7   :  { %4247 = vmatprep.subr.bf16.mxu1 %v5548_v44 }
 0x2ea   :  { %4248 = vmatpush3.bf16.msra.mxu1 %v4883_v17  ;;  %v1940_v17 = vld [vmem:[#allocation2 + $0x42] sm:$0xff] }
 0x2eb   :  { %4249 = vmatprep.subr.bf16.mxu1 %v5548_v44  ;;  %v1945_v21 = vpack.c.bf16 %v1940_v17, %v1940_v17  ;;  %v4898_v17 = vld [vmem:[%s6349_s5 + $0x140] sm:$0xff]  }
 0x2ed   :  { %4230 = vmatmul.mubr.bf16.gmra.mrb[4].mxu1 %v1942_v11  ;;  %v2101_v11 = vpack.c.bf16 %v5844_v8, %v2092_v10  ;;  %v4900_v10 = vld [vmem:[%s6349_s5 + $0x150] sm:$0xff]  }
 0x2ee   :  { %4250 = vmatpush3.bf16.msra.mxu1 %v4884_v14  ;;  %4233 = vmatprep.mubr.msk.bf16.mxu1 %vm4936_vm0, %v5548_v44  ;;  %v4890_v14 = vld [vmem:[%s6349_s5 + $0x100] sm:$0xff]   ;;  %v2900_v8 = vld [vmem:[#allocation2 + $0x4e] sm:$0xff] }
 0x2ef   :  { %4251 = vmatprep.subr.bf16.mxu1 %v5548_v44  ;;  %v2905_v13 = vpack.c.bf16 %v2900_v8, %v2900_v8 }
 0x2f2   :  { %4252 = vmatpush3.bf16.msra.mxu1 %v4885_v20  ;;  %v4891_v20 = vld [vmem:[%s6349_s5 + $0x108] sm:$0xff]  }
 0x2f3   :  { %4253 = vmatprep.subr.bf16.mxu1 %v5548_v44 }
 0x2f5   :  { %4234 = vmatmul.mubr.bf16.gmra.mrb[8].mxu1 %v1943_v51  ;;  %v4894_v51 = vld [vmem:[%s6349_s5 + $0x120] sm:$0xff]  }
 0x2f6   :  { %4254 = vmatpush3.bf16.msra.mxu1 %v4886_v0  ;;  %4237 = vmatprep.mubr.msk.bf16.mxu1 %vm4936_vm0, %v5548_v44  ;;  %v4893_v0 = vld [vmem:[%s6349_s5 + $0x118] sm:$0xff]  }
 0x2f7   :  { %4255 = vmatprep.subr.bf16.mxu1 %v5548_v44 }
 0x2fa   :  { %4256 = vmatpush3.bf16.msra.mxu1 %v4887_v52  ;;  %v2103_v52 = vpack.c.bf16 %v5855_v27, %v5851_v26 }
 0x2fb   :  { %4257 = vmatprep.subr.bf16.mxu1 %v5548_v44 }
 0x2fd   :  { %4238 = vmatmul.mubr.bf16.gmra.mrb[12].mxu1 %v1944_v45  ;;  %v4897_v45 = vld [vmem:[%s6349_s5 + $0x138] sm:$0xff]  }
 0x2fe   :  { %4241 = vmatprep.mubr.msk.bf16.mxu1 %vm4936_vm0, %v5548_v44  ;;  %4258 = vmatpush3.bf16.msra.mxu1 %v4888_v40  ;;  %v2104_v40 = vpack.c.bf16 %v5859_v31, %v5857_v55 }
 0x2ff   :  { %4259 = vmatprep.subr.bf16.mxu1 %v5548_v44 }
 0x302   :  { %4260 = vmatpush3.bf16.msra.mxu1 %v4889_v7  ;;  %v2105_v7 = vpack.c.bf16 %v5863_v36, %v5863_v36 }
 0x303   :  { %4281 = vmatprep.subr.bf16.mxu1 %v5548_v44 }
 0x305   :  { %4242 = vmatmul.mubr.bf16.gmra.mrb[16].mxu1 %v1945_v21  ;;  %v4899_v21 = vld [vmem:[%s6349_s5 + $0x148] sm:$0xff]  }
 0x306   :  { %4261 = vmatprep.mubr.msk.bf16.mxu1 %vm4936_vm0, %v5548_v44 }
 0x30d   :  { %4262 = vmatmul.mubr.bf16.vlgmr.msra.gmra.mrb[0].mxu1 %v2101_v11  ;;  %v2576_v11 = vld [vmem:[#allocation2 + $0x2c] sm:$0xff] }
 0x30e   :  { %4282 = vmatpush3.bf16.msra.mxu1 %v4890_v14  ;;  %4265 = vmatprep.mubr.msk.bf16.mxu1 %vm4936_vm0, %v5548_v44  ;;  %v4917_v14 = vld [vmem:[%s6349_s5 + $0x1d8] sm:$0xff]  }
 0x30f   :  { %4283 = vmatprep.subr.bf16.mxu1 %v5548_v44 }
 0x312   :  { %4284 = vmatpush3.bf16.msra.mxu1 %v4891_v20  ;;  %v2577_v20 = vld [vmem:[#allocation2 + $0x34] sm:$0xff] }
 0x313   :  { %4285 = vmatprep.subr.bf16.mxu1 %v5548_v44 }
 0x315   :  { %4266 = vmatmul.mubr.bf16.gmra.mrb[4].mxu1 %v2102_v47  ;;  %v2583_v47 = vpack.c.bf16 %v2577_v20, %v2576_v11 }
 0x316   :  { %4286 = vmatpush3.bf16.msra.mxu1 %v4892_v33  ;;  %4269 = vmatprep.mubr.msk.bf16.mxu1 %vm4936_vm0, %v5548_v44  ;;  %v4918_v33 = vld [vmem:[%s6349_s5 + $0x1e0] sm:$0xff]  }
 0x317   :  { %4287 = vmatprep.subr.bf16.mxu1 %v5548_v44 }
 0x31a   :  { %4288 = vmatpush3.bf16.msra.mxu1 %v4893_v0  ;;  %v4919_v0 = vld [vmem:[%s6349_s5 + $0x1e8] sm:$0xff]  }
 0x31b   :  { %4289 = vmatprep.subr.bf16.mxu1 %v5548_v44 }
 0x31d   :  { %4270 = vmatmul.mubr.bf16.gmra.mrb[8].mxu1 %v2103_v52  ;;  %v2579_v52 = vld [vmem:[#allocation2 + $0x44] sm:$0xff] }
 0x31e   :  { %4290 = vmatpush3.bf16.msra.mxu1 %v4894_v51  ;;  %4273 = vmatprep.mubr.msk.bf16.mxu1 %vm4936_vm0, %v5548_v44  ;;  %v2578_v51 = vld [vmem:[#allocation2 + $0x3c] sm:$0xff] }
 0x31f   :  { %4291 = vmatprep.subr.bf16.mxu1 %v5548_v44 }
 0x322   :  { %4292 = vmatpush3.bf16.msra.mxu1 %v4895_v53  ;;  %v4920_v53 = vld [vmem:[%s6349_s5 + $0x1f0] sm:$0xff]  }
 0x323   :  { %4293 = vmatprep.subr.bf16.mxu1 %v5548_v44 }
 0x325   :  { %4274 = vmatmul.mubr.bf16.gmra.mrb[12].mxu1 %v2104_v40  ;;  %v4921_v40 = vld [vmem:[%s6349_s5 + $0x1f8] sm:$0xff]  }
 0x326   :  { %4277 = vmatprep.mubr.msk.bf16.mxu1 %vm4936_vm0, %v5548_v44  ;;  %4294 = vmatpush3.bf16.msra.mxu1 %v4896_v2  ;;  %v2584_v2 = vpack.c.bf16 %v2579_v52, %v2578_v51 }
 0x327   :  { %4295 = vmatprep.subr.bf16.mxu1 %v5548_v44 }
 0x32a   :  { %4296 = vmatpush3.bf16.msra.mxu1 %v4897_v45  ;;  %v2580_v45 = vld [vmem:[#allocation2 + $0x4c] sm:$0xff] }
 0x32b   :  { %4317 = vmatprep.subr.bf16.mxu1 %v5548_v44 }
 0x32d   :  { %4278 = vmatmul.mubr.bf16.gmra.mrb[16].mxu1 %v2105_v7  ;;  %v2585_v7 = vpack.c.bf16 %v2580_v45, %v2580_v45 }
 0x32e   :  { %4297 = vmatprep.mubr.msk.bf16.mxu1 %vm4936_vm0, %v5548_v44 }
 0x335   :  { %4298 = vmatmul.mubr.bf16.vlgmr.msra.gmra.mrb[0].mxu1 %v2261_v39  ;;  %v4904_v39 = vld [vmem:[%s6349_s5 + $0x170] sm:$0xff]  }
 0x336   :  { %4318 = vmatpush3.bf16.msra.mxu1 %v4898_v17  ;;  %4301 = vmatprep.mubr.msk.bf16.mxu1 %vm4936_vm0, %v5548_v44  ;;  %v2732_v17 = vld [vmem:[#allocation2 + $0xd] sm:$0xff] }
 0x337   :  { %4319 = vmatprep.subr.bf16.mxu1 %v5548_v44 }
 0x33a   :  { %4320 = vmatpush3.bf16.msra.mxu1 %v4899_v21  ;;  %v2733_v21 = vld [vmem:[#allocation2 + $0x15] sm:$0xff] }
 0x33b   :  { %4321 = vmatprep.subr.bf16.mxu1 %v5548_v44 }
 0x33d   :  { %4302 = vmatmul.mubr.bf16.gmra.mrb[4].mxu1 %v2262_v49  ;;  %v4912_v49 = vld [vmem:[%s6349_s5 + $0x1b0] sm:$0xff]  }
 0x33e   :  { %4322 = vmatpush3.bf16.msra.mxu1 %v4900_v10  ;;  %4305 = vmatprep.mubr.msk.bf16.mxu1 %vm4936_vm0, %v5548_v44  ;;  %v4922_v10 = vld [vmem:[%s6349_s5 + $0x200] sm:$0xff]  }
 0x33f   :  { %4323 = vmatprep.subr.bf16.mxu1 %v5548_v44 }
 0x342   :  { %4324 = vmatpush3.bf16.msra.mxu1 %v4901_v29  ;;  %v2741_v29 = vpack.c.bf16 %v2733_v21, %v2732_v17 }
 0x343   :  { %4325 = vmatprep.subr.bf16.mxu1 %v5548_v44 }
 0x345   :  { %4306 = vmatmul.mubr.bf16.gmra.mrb[8].mxu1 %v2263_v38  ;;  %v4909_v38 = vld [vmem:[%s6349_s5 + $0x198] sm:$0xff]  }
 0x346   :  { %4326 = vmatpush3.bf16.msra.mxu1 %v4902_v30  ;;  %4309 = vmatprep.mubr.msk.bf16.mxu1 %vm4936_vm0, %v5548_v44  ;;  %v4923_v30 = vld [vmem:[%s6349_s5 + $0x208] sm:$0xff]  }
 0x347   :  { %4327 = vmatprep.subr.bf16.mxu1 %v5548_v44 }
 0x34a   :  { %4328 = vmatpush3.bf16.msra.mxu1 %v4903_v34  ;;  %v2734_v34 = vld [vmem:[#allocation2 + $0x1d] sm:$0xff] }
 0x34b   :  { %4329 = vmatprep.subr.bf16.mxu1 %v5548_v44 }
 0x34d   :  { %4310 = vmatmul.mubr.bf16.gmra.mrb[12].mxu1 %v2264_v43  ;;  %v4910_v43 = vld [vmem:[%s6349_s5 + $0x1a0] sm:$0xff]  }
 0x34e   :  { %4313 = vmatprep.mubr.msk.bf16.mxu1 %vm4936_vm0, %v5548_v44  ;;  %4330 = vmatpush3.bf16.msra.mxu1 %v4904_v39  ;;  %v2735_v39 = vld [vmem:[#allocation2 + $0x25] sm:$0xff] }
 0x34f   :  { %4331 = vmatprep.subr.bf16.mxu1 %v5548_v44 }
 0x352   :  { %4332 = vmatpush3.bf16.msra.mxu1 %v4905_v16  ;;  %v4924_v16 = vld [vmem:[%s6349_s5 + $0x210] sm:$0xff]  }
 0x353   :  { %4353 = vmatprep.subr.bf16.mxu1 %v5548_v44 }
 0x355   :  { %4314 = vmatmul.mubr.bf16.gmra.mrb[16].mxu1 %v2265_v19  ;;  %v2742_v19 = vpack.c.bf16 %v2735_v39, %v2734_v34 }
 0x356   :  { %4333 = vmatprep.mubr.msk.bf16.mxu1 %vm4936_vm0, %v5548_v44 }
 0x35d   :  { %4334 = vmatmul.mubr.bf16.vlgmr.msra.gmra.mrb[0].mxu1 %v2421_v46  ;;  %v4916_v46 = vld [vmem:[%s6349_s5 + $0x1d0] sm:$0xff]  }
 0x35e   :  { %4354 = vmatpush3.bf16.msra.mxu1 %v4906_v24  ;;  %4337 = vmatprep.mubr.msk.bf16.mxu1 %vm4936_vm0, %v5548_v44  ;;  %v4925_v24 = vld [vmem:[%s6349_s5 + $0x218] sm:$0xff]  }
 0x35f   :  { %4355 = vmatprep.subr.bf16.mxu1 %v5548_v44 }
 0x362   :  { %4356 = vmatpush3.bf16.msra.mxu1 %v4907_v25  ;;  %v2736_v25 = vld [vmem:[#allocation2 + $0x2d] sm:$0xff] }
 0x363   :  { %4357 = vmatprep.subr.bf16.mxu1 %v5548_v44 }
 0x365   :  { %4338 = vmatmul.mubr.bf16.gmra.mrb[4].mxu1 %v2422_v50  ;;  %v2582_v50 = vpack.c.bf16 %v2575_v6, %v2574_v37 }
 0x366   :  { %4358 = vmatpush3.bf16.msra.mxu1 %v4908_v28  ;;  %4341 = vmatprep.mubr.msk.bf16.mxu1 %vm4936_vm0, %v5548_v44  ;;  %v2737_v28 = vld [vmem:[#allocation2 + $0x35] sm:$0xff] }
 0x367   :  { %4359 = vmatprep.subr.bf16.mxu1 %v5548_v44 }
 0x36a   :  { %4360 = vmatpush3.bf16.msra.mxu1 %v4909_v38  ;;  %v4926_v38 = vld [vmem:[%s6349_s5 + $0x220] sm:$0xff]  }
 0x36b   :  { %4361 = vmatprep.subr.bf16.mxu1 %v5548_v44 }
 0x36d   :  { %4342 = vmatmul.mubr.bf16.gmra.mrb[8].mxu1 %v2423_v1  ;;  %v4914_v1 = vld [vmem:[%s6349_s5 + $0x1c0] sm:$0xff]  }
 0x36e   :  { %4362 = vmatpush3.bf16.msra.mxu1 %v4910_v43  ;;  %4345 = vmatprep.mubr.msk.bf16.mxu1 %vm4936_vm0, %v5548_v44  ;;  %v2743_v43 = vpack.c.bf16 %v2737_v28, %v2736_v25 }
 0x36f   :  { %4363 = vmatprep.subr.bf16.mxu1 %v5548_v44 }
 0x372   :  { %4364 = vmatpush3.bf16.msra.mxu1 %v4911_v48  ;;  %v4927_v48 = vld [vmem:[%s6349_s5 + $0x228] sm:$0xff]  }
 0x373   :  { %4365 = vmatprep.subr.bf16.mxu1 %v5548_v44 }
 0x375   :  { %4346 = vmatmul.mubr.bf16.gmra.mrb[12].mxu1 %v2424_v4  ;;  %v4915_v4 = vld [vmem:[%s6349_s5 + $0x1c8] sm:$0xff]  }
 0x376   :  { %4349 = vmatprep.mubr.msk.bf16.mxu1 %vm4936_vm0, %v5548_v44  ;;  %4366 = vmatpush3.bf16.msra.mxu1 %v4912_v49  ;;  %v2738_v49 = vld [vmem:[#allocation2 + $0x3d] sm:$0xff] }
 0x377   :  { %4367 = vmatprep.subr.bf16.mxu1 %v5548_v44 }
 0x37a   :  { %4368 = vmatpush3.bf16.msra.mxu1 %v4913_v56  ;;  %v2739_v56 = vld [vmem:[#allocation2 + $0x45] sm:$0xff] }
 0x37b   :  { %4389 = vmatprep.subr.bf16.mxu1 %v5548_v44 }
 0x37d   :  { %4350 = vmatmul.mubr.bf16.gmra.mrb[16].mxu1 %v2425_v61  ;;  %v2744_v61 = vpack.c.bf16 %v2739_v56, %v2738_v49 }
 0x37e   :  { %4369 = vmatprep.mubr.msk.bf16.mxu1 %vm4936_vm0, %v5548_v44 }
 0x385   :  { %4370 = vmatmul.mubr.bf16.vlgmr.msra.gmra.mrb[0].mxu1 %v2581_v3 }
 0x386   :  { %4390 = vmatpush3.bf16.msra.mxu1 %v4914_v1  ;;  %4373 = vmatprep.mubr.msk.bf16.mxu1 %vm4936_vm0, %v5548_v44  ;;  %v2745_v1 = vpack.c.bf16 %v2740_v63, %v2740_v63 }
 0x387   :  { %4391 = vmatprep.subr.bf16.mxu1 %v5548_v44 }
 0x38a   :  { %4392 = vmatpush3.bf16.msra.mxu1 %v4915_v4 }
 0x38b   :  { %4393 = vmatprep.subr.bf16.mxu1 %v5548_v44 }
 0x38d   :  { %4374 = vmatmul.mubr.bf16.gmra.mrb[4].mxu1 %v2582_v50 }
 0x38e   :  { %4394 = vmatpush3.bf16.msra.mxu1 %v4916_v46  ;;  %4377 = vmatprep.mubr.msk.bf16.mxu1 %vm4936_vm0, %v5548_v44 }
 0x38f   :  { %4395 = vmatprep.subr.bf16.mxu1 %v5548_v44 }
 0x392   :  { %4396 = vmatpush3.bf16.msra.mxu1 %v4917_v14 }
 0x393   :  { %4397 = vmatprep.subr.bf16.mxu1 %v5548_v44 }
 0x395   :  { %4378 = vmatmul.mubr.bf16.gmra.mrb[8].mxu1 %v2583_v47 }
 0x396   :  { %4398 = vmatpush3.bf16.msra.mxu1 %v4918_v33  ;;  %4381 = vmatprep.mubr.msk.bf16.mxu1 %vm4936_vm0, %v5548_v44 }
 0x397   :  { %4399 = vmatprep.subr.bf16.mxu1 %v5548_v44 }
 0x39a   :  { %4400 = vmatpush3.bf16.msra.mxu1 %v4919_v0 }
 0x39b   :  { %4401 = vmatprep.subr.bf16.mxu1 %v5548_v44 }
 0x39d   :  { %4382 = vmatmul.mubr.bf16.gmra.mrb[12].mxu1 %v2584_v2 }
 0x39e   :  { %4385 = vmatprep.mubr.msk.bf16.mxu1 %vm4936_vm0, %v5548_v44  ;;  %4402 = vmatpush3.bf16.msra.mxu1 %v4920_v53 }
 0x39f   :  { %4403 = vmatprep.subr.bf16.mxu1 %v5548_v44 }
 0x3a2   :  { %4404 = vmatpush3.bf16.msra.mxu1 %v4921_v40 }
 0x3a3   :  { %4425 = vmatprep.subr.bf16.mxu1 %v5548_v44 }
 0x3a5   :  { %4386 = vmatmul.mubr.bf16.gmra.mrb[16].mxu1 %v2585_v7 }
 0x3a6   :  { %4405 = vmatprep.mubr.msk.bf16.mxu1 %vm4936_vm0, %v5548_v44 }
 0x3ad   :  { %4406 = vmatmul.mubr.bf16.vlgmr.msra.gmra.mrb[0].mxu1 %v2741_v29 }
 0x3ae   :  { %4426 = vmatpush3.bf16.msra.mxu1 %v4922_v10  ;;  %4409 = vmatprep.mubr.msk.bf16.mxu1 %vm4936_vm0, %v5548_v44 }
 0x3af   :  { %4427 = vmatprep.subr.bf16.mxu1 %v5548_v44 }
 0x3b2   :  { %4428 = vmatpush3.bf16.msra.mxu1 %v4923_v30 }
 0x3b3   :  { %4429 = vmatprep.subr.bf16.mxu1 %v5548_v44 }
 0x3b5   :  { %4410 = vmatmul.mubr.bf16.gmra.mrb[4].mxu1 %v2742_v19 }
 0x3b6   :  { %4430 = vmatpush3.bf16.msra.mxu1 %v4924_v16  ;;  %4413 = vmatprep.mubr.msk.bf16.mxu1 %vm4936_vm0, %v5548_v44 }
 0x3b7   :  { %4431 = vmatprep.subr.bf16.mxu1 %v5548_v44 }
 0x3ba   :  { %4432 = vmatpush3.bf16.msra.mxu1 %v4925_v24 }
 0x3bb   :  { %4433 = vmatprep.subr.bf16.mxu1 %v5548_v44 }
 0x3bd   :  { %4414 = vmatmul.mubr.bf16.gmra.mrb[8].mxu1 %v2743_v43 }
 0x3be   :  { %4434 = vmatpush3.bf16.msra.mxu1 %v4926_v38  ;;  %4417 = vmatprep.mubr.msk.bf16.mxu1 %vm4936_vm0, %v5548_v44 }
 0x3bf   :  { %4435 = vmatprep.subr.bf16.mxu1 %v5548_v44 }
 0x3c2   :  { %4436 = vmatpush3.bf16.msra.mxu1 %v4927_v48 }
 0x3c3   :  { %4437 = vmatprep.subr.bf16.mxu1 %v5548_v44 }
 0x3c5   :  { %4418 = vmatmul.mubr.bf16.gmra.mrb[12].mxu1 %v2744_v61 }
 0x3c6   :  { %4421 = vmatprep.mubr.msk.bf16.mxu1 %vm4936_vm0, %v5548_v44  ;;  %4438 = vmatpush3.bf16.msra.mxu1 %v4928_v57 }
 0x3c7   :  { %4439 = vmatprep.subr.bf16.mxu1 %v5548_v44 }
 0x3ca   :  { %4440 = vmatpush3.bf16.msra.mxu1 %v4929_v62 }
 0x3cd   :  { %4422 = vmatmul.mubr.bf16.gmra.mrb[16].mxu1 %v2745_v1 }
 0x3ce   :  { %4441 = vmatprep.mubr.msk.bf16.mxu1 %vm4936_vm0, %v5548_v44 }
 0x3d5   :  { %4442 = vmatmul.mubr.bf16.vlgmr.msra.gmra.mrb[0].mxu1 %v2901_v42 }
 0x3d6   :  { %4445 = vmatprep.mubr.msk.bf16.mxu1 %vm4936_vm0, %v5548_v44 }
 0x3dd   :  { %4446 = vmatmul.mubr.bf16.gmra.mrb[4].mxu1 %v2902_v59 }
 0x3de   :  { %4449 = vmatprep.mubr.msk.bf16.mxu1 %vm4936_vm0, %v5548_v44 }
 0x3e5   :  { %4450 = vmatmul.mubr.bf16.gmra.mrb[8].mxu1 %v2903_v41 }
 0x3e6   :  { %4453 = vmatprep.mubr.msk.bf16.mxu1 %vm4936_vm0, %v5548_v44 }
 0x3ed   :  { %4454 = vmatmul.mubr.bf16.gmra.mrb[12].mxu1 %v2904_v9 }
 0x3ee   :  { %4457 = vmatprep.mubr.msk.bf16.mxu1 %vm4936_vm0, %v5548_v44 }
 0x3f5   :  { %4458 = vmatmul.mubr.bf16.gmra.mrb[16].mxu1 %v2905_v13 }
 0x4a8   :  { %v6255_v22 = vpop.f32.mrb[0].mxu1 }
 0x4a9   :  { %v3054_v26 = vmul.f32 %v6255_v22, %v5697_v12  ;;  %v4443_v42 = vpop.f32.mrb[1].mxu1 }
 0x4aa   :  { %v6259_v27 = vpop.f32.mrb[2].mxu1 }
 0x4ab   :  { %v3055_v55 = vmul.f32 %v6259_v27, %v5701_v15  ;;  %v4444_v59 = vpop.f32.mrb[3].mxu1  ;;  %v3078_v31 = vmul.f32 %v3054_v26, %v6255_v22 }
 0x4ad   :  { %v3063_v36 = vadd.f32 %v3055_v55, %v3054_v26  ;;  %v3079_v44 = vmul.f32 %v3055_v55, %v6259_v27 }
 0x4af   :  { %v3087_v41 = vadd.f32 %v3079_v44, %v3078_v31 }
 0x4b0   :  { %v6265_v9 = vpop.f32.mrb[4].mxu1 }
 0x4b1   :  { %v3056_v3 = vmul.f32 %v6265_v9, %v5707_v23  ;;  %v4447_v4 = vpop.f32.mrb[5].mxu1 }
 0x4b2   :  { %v6269_v12 = vpop.f32.mrb[6].mxu1 }
 0x4b3   :  { %v3064_v37 = vadd.f32 %v3063_v36, %v3056_v3  ;;  %v3080_v6 = vmul.f32 %v3056_v3, %v6265_v9  ;;  %v3057_v15 = vmul.f32 %v6269_v12, %v5715_v35  ;;  %v4448_v46 = vpop.f32.mrb[7].mxu1  ;;  %v3052_v3 = vld [vmem:[%s6352_s6] sm:$0x1] }
 0x4b4   :  { %v3053_v46 = vld [vmem:[%s6353_s7] sm:$0x1] }
 0x4b5   :  { %v3088_v50 = vadd.f32 %v3087_v41, %v3080_v6  ;;  %v3065_v14 = vadd.f32 %v3064_v37, %v3057_v15  ;;  %v3081_v11 = vmul.f32 %v3057_v15, %v6269_v12 }
 0x4b7   :  { %v3089_v20 = vadd.f32 %v3088_v50, %v3081_v11 }
 0x4b8   :  { %v3021_v33 = vpop.f32.mrb[8].mxu1 }
 0x4b9   :  { %v3058_v47 = vmul.f32 %v3021_v33, %v5725_v54  ;;  %v4451_v0 = vpop.f32.mrb[9].mxu1 }
 0x4ba   :  { %v3024_v23 = vpop.f32.mrb[10].mxu1 }
 0x4bb   :  { %v3066_v51 = vadd.f32 %v3065_v14, %v3058_v47  ;;  %v3082_v52 = vmul.f32 %v3058_v47, %v3021_v33  ;;  %v3059_v53 = vmul.f32 %v3024_v23, %v5731_v58  ;;  %v4452_v2 = vpop.f32.mrb[11].mxu1 }
 0x4bd   :  { %v3090_v40 = vadd.f32 %v3089_v20, %v3082_v52  ;;  %v3067_v45 = vadd.f32 %v3066_v51, %v3059_v53  ;;  %v3083_v7 = vmul.f32 %v3059_v53, %v3024_v23 }
 0x4bf   :  { %v3091_v35 = vadd.f32 %v3090_v40, %v3083_v7  ;;  %v3143_v7 = vld [vmem:[%s6347_s0 + $0x27] sm:$0xff] }
 0x4c0   :  { %v3029_v17 = vpop.f32.mrb[12].mxu1 }
 0x4c1   :  { %v3060_v21 = vmul.f32 %v3029_v17, %v5739_v32  ;;  %v4455_v10 = vpop.f32.mrb[13].mxu1 }
 0x4c2   :  { %v3032_v29 = vpop.f32.mrb[14].mxu1 }
 0x4c3   :  { %v3068_v30 = vadd.f32 %v3067_v45, %v3060_v21  ;;  %v3084_v34 = vmul.f32 %v3060_v21, %v3029_v17  ;;  %v3061_v54 = vmul.f32 %v3032_v29, %v5742_v5  ;;  %v4456_v39 = vpop.f32.mrb[15].mxu1  ;;  %v3139_v45 = vld [vmem:[%s6347_s0 + $0x7] sm:$0xff] }
 0x4c5   :  { %v3092_v16 = vadd.f32 %v3091_v35, %v3084_v34  ;;  %v3069_v19 = vadd.f32 %v3068_v30, %v3061_v54  ;;  %v3085_v24 = vmul.f32 %v3061_v54, %v3032_v29  ;;  %v3144_v35 = vld [vmem:[%s6347_s0 + $0x2f] sm:$0xff]  ;;  %v3146_v34 = vld [vmem:[%s6347_s0 + $0x3f] sm:$0xff]  ;;  %v3147_v54 = vld [vmem:[%s6347_s0 + $0x47] sm:$0xff] }
 0x4c7   :  { %v3093_v25 = vadd.f32 %v3092_v16, %v3085_v24 }
 0x4c8   :  { %v3037_v58 = vpop.f32.mrb[16].mxu1 }
 0x4c9   :  { %v3062_v28 = vmul.f32 %v3037_v58, %v5745_v18  ;;  %v4459_v38 = vpop.f32.mrb[17].mxu1 }
 0x4ca   :  { %v3040_v43 = vpop.f32.mrb[18].mxu1 }
 0x4cb   :  { %v3070_v48 = vadd.f32 %v3069_v19, %v3062_v28  ;;  %v3086_v49 = vmul.f32 %v3062_v28, %v3037_v58  ;;  %v4460_v56 = vpop.f32.mrb[19].mxu1 }
 0x4cd   :  { %v3071_v32 = vrot.slane %v3070_v48, 4  ;;  %v3094_v57 = vadd.f32 %v3093_v25, %v3086_v49 }
 0x4cf   :  { %v3072_v61 = vadd.f32 %v3071_v32, %v3070_v48  ;;  %v3095_v62 = vrot.slane %v3094_v57, 4 }
 0x4d1   :  { %v3073_v63 = vrot.slane %v3072_v61, 2  ;;  %v3096_v1 = vadd.f32 %v3095_v62, %v3094_v57 }
 0x4d3   :  { %v3074_v5 = vadd.f32 %v3073_v63, %v3072_v61  ;;  %v3097_v8 = vrot.slane %v3096_v1, 2 }
 0x4d5   :  { %v3075_v13 = vrot.slane %v3074_v5, 1  ;;  %v3098_v26 = vadd.f32 %v3097_v8, %v3096_v1 }
 0x4d7   :  { %v3076_v42 = vadd.f32 %v3075_v13, %v3074_v5  ;;  %v3099_v55 = vrot.slane %v3098_v26, 1 }
 0x4d9   :  { %v3077_v59 = vmul.f32 0.03125, %v3076_v42  ;;  %v3100_v31 = vadd.f32 %v3099_v55, %v3098_v26 }
 0x4db   :  { %v3101_v18 = vmul.f32 0.03125, %v3100_v31  ;;  %v3102_v36 = vmul.f32 %v3077_v59, %v3077_v59 }
 0x4dd   :  { %v3103_v44 = vsub.f32 %v3101_v18, %v3102_v36 }
 0x4df   :  { %v3104_v41 = vadd.f32 1e-05, %v3103_v44 }
 0x4e1   :  { %4932 = vrsqrt.f32 %v3104_v41 }
 0x4eb   :  { %v4933_v4 = vpop.eup %4932 }
 0x4ec   :  { %v3106_v37 = vmul.f32 %v4933_v4, %v3052_v3 }
 0x4ee   :  { %v3111_v6 = vrot.slane %v3106_v37, %v5751_v60  ;;  %v3122_v15 = vmul.f32 %v3106_v37, %v3077_v59 }
 0x4f0   :  { %v3113_v50 = vmul.f32 %v3111_v6, %v6255_v22  ;;  %v3114_v14 = vmul.f32 %v3111_v6, %v6259_v27  ;;  %v3115_v11 = vmul.f32 %v3111_v6, %v6265_v9  ;;  %v3116_v20 = vmul.f32 %v3111_v6, %v6269_v12  ;;  %v3140_v22 = vld [vmem:[%s6347_s0 + $0xf] sm:$0xff]  ;;  %v3141_v27 = vld [vmem:[%s6347_s0 + $0x17] sm:$0xff]  ;;  %v3142_v9 = vld [vmem:[%s6347_s0 + $0x1f] sm:$0xff] }
 0x4f1   :  { %v3117_v47 = vmul.f32 %v3111_v6, %v3021_v33  ;;  %v3118_v0 = vmul.f32 %v3111_v6, %v3024_v23  ;;  %v3119_v51 = vmul.f32 %v3111_v6, %v3029_v17  ;;  %v3120_v52 = vmul.f32 %v3111_v6, %v3032_v29  ;;  %v3145_v17 = vld [vmem:[%s6347_s0 + $0x37] sm:$0xff] }
 0x4f2   :  { %v3121_v53 = vmul.f32 %v3111_v6, %v3037_v58  ;;  %v3123_v2 = vsub.f32 %v3053_v46, %v3122_v15 }
 0x4f4   :  { %v3128_v40 = vrot.slane %v3123_v2, %v5751_v60 }
 0x4f6   :  { %v3130_v12 = vadd.f32 %v3128_v40, %v3113_v50  ;;  %v3131_v33 = vadd.f32 %v3128_v40, %v3114_v14  ;;  %v3132_v23 = vadd.f32 %v3128_v40, %v3115_v11  ;;  %v3133_v60 = vadd.f32 %v3128_v40, %v3116_v20 }
 0x4f7   :  { %v3134_v21 = vadd.f32 %v3128_v40, %v3117_v47  ;;  %v3135_v10 = vadd.f32 %v3128_v40, %v3118_v0  ;;  %v3136_v29 = vadd.f32 %v3128_v40, %v3119_v51  ;;  %v3137_v30 = vadd.f32 %v3128_v40, %v3120_v52 }
 0x4f8   :  { %v3138_v39 = vadd.f32 %v3128_v40, %v3121_v53  ;;  %v3148_v16 = vadd.f32 %v3139_v45, %v3130_v12  ;;  %v3149_v19 = vadd.f32 %v3140_v22, %v3131_v33  ;;  %v3150_v24 = vadd.f32 %v3141_v27, %v3132_v23 }
 0x4f9   :  { %v3151_v25 = vadd.f32 %v3142_v9, %v3133_v60  ;;  %v3152_v58 = vadd.f32 %v3143_v7, %v3134_v21  ;;  %v3153_v28 = vadd.f32 %v3144_v35, %v3135_v10  ;;  %v3154_v38 = vadd.f32 %v3145_v17, %v3136_v29 }
 0x4fa   :  { %v3155_v43 = vadd.f32 %v3146_v34, %v3137_v30  ;;  %v3156_v48 = vadd.f32 %v3147_v54, %v3138_v39  ;;  %v3157_v49 = vmax.f32 %v3148_v16, 0.0  ;;  %v3158_v56 = vmax.f32 %v3149_v19, 0.0 }
 0x4fb   :  { %v3159_v32 = vmax.f32 %v3150_v24, 0.0  ;;  %v3160_v57 = vmax.f32 %v3151_v25, 0.0  ;;  %v3161_v61 = vmax.f32 %v3152_v58, 0.0  ;;  %v3162_v62 = vmax.f32 %v3153_v28, 0.0 }
 0x4fc   :  { %v3163_v63 = vmax.f32 %v3154_v38, 0.0  ;;  %v3164_v1 = vmax.f32 %v3155_v43, 0.0  ;;  %v3165_v5 = vmax.f32 %v3156_v48, 0.0  ;;  %3166 = vst [vmem:[%s6354_s8] sm:$0xff] %v3157_v49  ;;  %3167 = vst [vmem:[%s6354_s8 + $0x8] sm:$0xff] %v3158_v56 }
 0x4fd   :  { %3168 = vst [vmem:[%s6354_s8 + $0x10] sm:$0xff] %v3159_v32  ;;  %3169 = vst [vmem:[%s6354_s8 + $0x18] sm:$0xff] %v3160_v57 }
 0x4fe   :  { %3170 = vst [vmem:[%s6354_s8 + $0x20] sm:$0xff] %v3161_v61  ;;  %3171 = vst [vmem:[%s6354_s8 + $0x28] sm:$0xff] %v3162_v62 }
 0x4ff   :  { %3172 = vst [vmem:[%s6354_s8 + $0x30] sm:$0xff] %v3163_v63  ;;  %3173 = vst [vmem:[%s6354_s8 + $0x38] sm:$0xff] %v3164_v1 }
 0x500   :  { %3174 = vst [vmem:[%s6354_s8 + $0x40] sm:$0xff] %v3165_v5 }

// kernel: resnet18_forward.11
= control target key start
LH: loop header
LB: loop body
LE: loop exit
PB: predicated region body
PF: predicated region fallthrough
CT: control target
= control target key end

     0   :  { %v446_v1 = vmov 0.0   ;;  %vm447_vm0 = vmmov 0   ;;  %s576_s0 = inlined_call_operand.vmem [shape: f32[2,16,128], index: 0, kind: input, shape index: {}]   ;;  %s577_s1 = inlined_call_operand.vmem [shape: bf16[128,64], index: 1, kind: input, shape index: {}]   ;;  %s578_s2 = inlined_call_operand.vmem [shape: f32[1,64], index: 2, kind: input, shape index: {}]   ;;  %s579_s3 = inlined_call_operand.vmem [shape: f32[1,64], index: 3, kind: input, shape index: {}]   ;;  %s580_s4 = inlined_call_operand.vmem [shape: f32[1,64], index: 4, kind: input, shape index: {}]   ;;  %s581_s5 = inlined_call_operand.vmem [shape: bf16[64,10], index: 5, kind: input, shape index: {}]   ;;  %s582_s6 = inlined_call_operand.vmem [shape: f32[1,10], index: 6, kind: input, shape index: {}]   ;;  %s583_s7 = inlined_call_operand.hbm [shape: f32[2,10], index: 7, kind: output, shape index: {}]  }
   0x1   :  { %v404_v0 = vld [vmem:[%s577_s1] sm:$0xff]   ;;  %368 = vmatprep.subr.bf16.mxu0 %v446_v1  ;;  %388 = vmatprep.subr.bf16.mxu1 %v446_v1  ;;  %v405_v2 = vld [vmem:[%s577_s1 + $0x8] sm:$0xff]   ;;  %v406_v3 = vld [vmem:[%s577_s1 + $0x10] sm:$0xff]  }
   0x2   :  { %369 = vmatpush3.bf16.msra.mxu0 %v404_v0  ;;  %384 = vmatprep.mubr.msk.bf16.mxu0 %vm447_vm0, %v446_v1  ;;  %v28_v4 = vld [vmem:[%s576_s0] sm:$0xff]  ;;  %v29_v5 = vld [vmem:[%s576_s0 + $0x8] sm:$0xff]  ;;  %v30_v6 = vld [vmem:[%s576_s0 + $0x10] sm:$0xff] }
   0x3   :  { %370 = vmatprep.subr.bf16.mxu0 %v446_v1  ;;  %396 = vmatprep.mubr.msk.bf16.mxu1 %vm447_vm0, %v446_v1  ;;  %v407_v7 = vld [vmem:[%s577_s1 + $0x18] sm:$0xff]   ;;  %v32_v9 = vadd.f32 %v29_v5, %v28_v4 }
   0x4   :  { %v31_v8 = vld [vmem:[%s576_s0 + $0x18] sm:$0xff] }
   0x5   :  { %v39_v10 = vadd.f32 %v31_v8, %v30_v6  ;;  %v33_v11 = vrot.slane %v32_v9, 4 }
   0x6   :  { %371 = vmatpush3.bf16.msra.mxu0 %v405_v2 }
   0x7   :  { %372 = vmatprep.subr.bf16.mxu0 %v446_v1  ;;  %v40_v12 = vrot.slane %v39_v10, 4  ;;  %v34_v13 = vadd.f32 %v33_v11, %v32_v9 }
   0xa   :  { %373 = vmatpush3.bf16.msra.mxu0 %v406_v3 }
   0xb   :  { %374 = vmatprep.subr.bf16.mxu0 %v446_v1 }
   0xc   :  { %12 = vsyncpa [#allocation3], 0  ;;  %v408_v14 = vld [vmem:[%s577_s1 + $0x20] sm:$0xff]   ;;  %v41_v15 = vadd.f32 %v40_v12, %v39_v10  ;;  %v35_v16 = vrot.slane %v34_v13, 2  ;;  %v409_v19 = vld [vmem:[%s577_s1 + $0x28] sm:$0xff]   ;;  %vm78_vm1 = vcmask 1041409  }
   0xd   :  { %v410_v24 = vld [vmem:[%s577_s1 + $0x30] sm:$0xff]   ;;  %v411_v29 = vld [vmem:[%s577_s1 + $0x38] sm:$0xff]   ;;  %v412_v35 = vld [vmem:[%s581_s5] sm:$0xff]   ;;  %vm172_vm2 = vcmask 517120   ;;  %vm279_vm4 = vcmask 523264   ;;  %s449_s12 = smov [#allocation2]  }
   0xe   :  { %375 = vmatpush3.bf16.msra.mxu0 %v407_v7  ;;  %v42_v17 = vrot.slane %v41_v15, 2  ;;  %v36_v18 = vadd.f32 %v35_v16, %v34_v13  ;;  %389 = vmatpush3.bf16.msra.mxu1 %v412_v35  ;;  %v413_v36 = vld [vmem:[%s581_s5 + $0x8] sm:$0xff]   ;;  %v414_v37 = vld [vmem:[%s581_s5 + $0x10] sm:$0xff]   ;;  %v415_v38 = vld [vmem:[%s581_s5 + $0x18] sm:$0xff]   ;;  %s331_s13 = sshll.u32 %s449_s12, 4  ;;  %vm323_vm5 = vcmask 74752   ;;  %s332_s13 = int_to_ptr.vmem [resolvable:$true] %s331_s13 }
   0xf   :  { %376 = vmatprep.subr.bf16.mxu0 %v446_v1  ;;  %390 = vmatprep.subr.bf16.mxu1 %v446_v1  ;;  %v339_v39 = vld [vmem:[%s578_s2] ss:$0 sm:$0xff]  ;;  %s422_s14 = scalar_lea.vmem %s332_s13, 32  ;;  %p427_p1 = scmp.lt.s32.totalorder %s332_s13, %s332_s13 }
  0x10   :  { %v43_v20 = vadd.f32 %v42_v17, %v41_v15  ;;  %v37_v21 = vrot.slane %v36_v18, 1  ;;  %v170_v3 = vld [vmem:[%s579_s3] sm:$0x1]  ;;  %p423_p0 = scmp.ne.s32.totalorder %s332_s13, %s422_s14  ;;  %p428_p2 = scmp.lt.s32.totalorder %s422_s14, %s422_s14 }
  0x11   :  { %v171_v7 = vld [vmem:[%s580_s4] sm:$0x1] }
  0x12   :  { %377 = vmatpush3.bf16.msra.mxu0 %v408_v14  ;;  %v44_v22 = vrot.slane %v43_v20, 1  ;;  %v38_v23 = vadd.f32 %v37_v21, %v36_v18  ;;  %391 = vmatpush3.bf16.msra.mxu1 %v413_v36  ;;  %p429_p3 = por %p428_p2, %p427_p1 }
  0x13   :  { %378 = vmatprep.subr.bf16.mxu0 %v446_v1  ;;  %392 = vmatprep.subr.bf16.mxu1 %v446_v1 }
  0x14   :  { %v45_v25 = vadd.f32 %v44_v22, %v43_v20  ;;  %v47_v26 = vmul.f32 0.0625, %v38_v23  ;;  %p430_p4 = pnand %p429_p3, %p423_p0 }
  0x16   :  { %379 = vmatpush3.bf16.msra.mxu0 %v409_v19  ;;  %v48_v27 = vmul.f32 0.0625, %v45_v25  ;;  %v49_v28 = vpack.c.bf16 %v47_v26, %v47_v26  ;;  %393 = vmatpush3.bf16.msra.mxu1 %v414_v37 }
  0x17   :  { %380 = vmatprep.subr.bf16.mxu0 %v446_v1  ;;  %394 = vmatprep.subr.bf16.mxu1 %v446_v1 }
  0x18   :  { %v50_v30 = vpack.c.bf16 %v48_v27, %v48_v27  ;;  %v76_v31 = vunpack.c.l.b16 %v49_v28 }
  0x1a   :  { %381 = vmatpush3.bf16.msra.mxu0 %v410_v24  ;;  %v77_v32 = vunpack.c.l.b16 %v50_v30  ;;  %395 = vmatpush3.bf16.msra.mxu1 %v415_v38 }
  0x1b   :  { %382 = vmatprep.subr.bf16.mxu0 %v446_v1  ;;  %v197_v1 = vlaneseq }
  0x1c   :  { %v79_v33 = vsel %vm78_vm1, %v77_v32, %v76_v31 }
  0x1d   :  { %v80_v34 = vpack.c.b16 %v79_v33, %v79_v33  ;;  %v198_v2 = vshrl.u32 %v197_v1, 7 }
  0x1e   :  { %383 = vmatpush3.bf16.msra.mxu0 %v411_v29 }
  0x1f   :  { %v199_v4 = vsub.s32 0, %v198_v2 }
  0x21   :  { %385 = vmatmul.mubr.bf16.vlgmr.msra.gmra.mrb[0].mxu0 %v80_v34  ;;  %v448_v34 = vmov -1.0  }
  0xf4   :  { %v164_v40 = vpop.f32.mrb[0].mxu0 }
  0xf5   :  { %v165_v41 = vadd.f32 %v339_v39, %v164_v40  ;;  %v386_v42 = vpop.f32.mrb[1].mxu0 }
  0xf6   :  { %v167_v43 = vpop.f32.mrb[2].mxu0 }
  0xf7   :  { %v173_v44 = vsel %vm172_vm2, %v165_v41, 0.0  ;;  %v182_v45 = vmul.f32 %v165_v41, %v165_v41  ;;  %v387_v46 = vpop.f32.mrb[3].mxu0 }
  0xf8   :  { %v174_v47 = vrot.slane %v173_v44, 4 }
  0xf9   :  { %v183_v48 = vsel %vm172_vm2, %v182_v45, 0.0 }
  0xfa   :  { %v175_v49 = vadd.f32 %v174_v47, %v173_v44  ;;  %v184_v50 = vrot.slane %v183_v48, 4 }
  0xfc   :  { %v176_v51 = vrot.slane %v175_v49, 2  ;;  %v185_v52 = vadd.f32 %v184_v50, %v183_v48 }
  0xfe   :  { %v177_v53 = vadd.f32 %v176_v51, %v175_v49  ;;  %v186_v54 = vrot.slane %v185_v52, 2 }
 0x100   :  { %v178_v55 = vrot.slane %v177_v53, 1  ;;  %v187_v56 = vadd.f32 %v186_v54, %v185_v52 }
 0x102   :  { %v179_v57 = vadd.f32 %v178_v55, %v177_v53  ;;  %v188_v58 = vrot.slane %v187_v56, 1 }
 0x104   :  { %v181_v59 = vmul.f32 0.5, %v179_v57  ;;  %v189_v60 = vadd.f32 %v188_v58, %v187_v56 }
 0x106   :  { %v190_v61 = vmul.f32 0.5, %v189_v60  ;;  %v191_v62 = vmul.f32 %v181_v59, %v181_v59 }
 0x108   :  { %v192_v63 = vsub.f32 %v190_v61, %v191_v62 }
 0x10a   :  { %v193_v0 = vadd.f32 1e-05, %v192_v63 }
 0x10c   :  { %416 = vrsqrt.f32 %v193_v0 }
 0x116   :  { %v417_v5 = vpop.eup %416 }
 0x117   :  { %v195_v6 = vmul.f32 %v417_v5, %v170_v3 }
 0x119   :  { %v200_v8 = vrot.slane %v195_v6, %v199_v4  ;;  %v203_v9 = vmul.f32 %v195_v6, %v181_v59 }
 0x11b   :  { %v204_v10 = vsub.f32 %v171_v7, %v203_v9  ;;  %v202_v11 = vmul.f32 %v200_v8, %v165_v41  ;;  %v348_v41 = vld [vmem:[%s582_s6] ss:$0 sm:$0xff] }
 0x11d   :  { %v209_v12 = vrot.slane %v204_v10, %v199_v4 }
 0x11f   :  { %v211_v13 = vadd.f32 %v209_v12, %v202_v11 }
 0x121   :  { %v213_v14 = vmul.f32 0.70710677, %v211_v13  ;;  %v212_v37 = vmul.f32 0.5, %v211_v13 }
 0x123   :  { %v216_v15 = vand.u32 2147483647, %v213_v14  ;;  %vm214_vm3 = vcmp.ge.f32.partialorder %v213_v14, 0.0 }
 0x124   :  { %v215_v35 = vsel %vm214_vm3, 1.0, %v448_v34 }
 0x125   :  { %v217_v16 = vmul.f32 0.3275911, %v216_v15  ;;  %v230_v18 = vsub.f32 0.0, %v216_v15 }
 0x127   :  { %v218_v17 = vadd.f32 1.0, %v217_v16  ;;  %v231_v20 = vmul.f32 %v230_v18, %v216_v15 }
 0x129   :  { %418 = vrcp.f32 %v218_v17  ;;  %v232_v23 = vmul.f32 1.442695, %v231_v20 }
 0x12b   :  { %420 = vpow2.f32 %v232_v23 }
 0x133   :  { %v419_v19 = vpop.eup %418 }
 0x134   :  { %v221_v21 = vmul.f32 1.0614054, %v419_v19 }
 0x135   :  { %v421_v31 = vpop.eup %420 }
 0x136   :  { %v222_v22 = vadd.f32 -1.4531521, %v221_v21 }
 0x138   :  { %v223_v24 = vmul.f32 %v419_v19, %v222_v22 }
 0x13a   :  { %v224_v25 = vadd.f32 1.4214138, %v223_v24 }
 0x13c   :  { %v225_v26 = vmul.f32 %v419_v19, %v224_v25 }
 0x13e   :  { %v226_v27 = vadd.f32 -0.28449672, %v225_v26 }
 0x140   :  { %v227_v28 = vmul.f32 %v419_v19, %v226_v27 }
 0x142   :  { %v228_v29 = vadd.f32 0.2548296, %v227_v28 }
 0x144   :  { %v229_v30 = vmul.f32 %v419_v19, %v228_v29 }
 0x146   :  { %v234_v32 = vmul.f32 %v421_v31, %v229_v30 }
 0x148   :  { %v235_v33 = vsub.f32 1.0, %v234_v32 }
 0x14a   :  { %v236_v36 = vmul.f32 %v235_v33, %v215_v35 }
 0x14c   :  { %v237_v38 = vadd.f32 1.0, %v236_v36 }
 0x14e   :  { %v238_v39 = vmul.f32 %v237_v38, %v212_v37 }
 0x150   :  { %v239_v40 = vpack.c.bf16 %v238_v39, %v238_v39 }
 0x152   :  { %397 = vmatmul.mubr.msk.bf16.vlgmr.msra.gmra.mrb[0].mxu1 %vm279_vm4, %v239_v40 }
 0x225   :  { %v317_v42 = vpop.f32.mrb[0].mxu1 }
 0x226   :  { %v318_v43 = vadd.f32 %v348_v41, %v317_v42  ;;  %v398_v44 = vpop.f32.mrb[1].mxu1 }
 0x227   :  { %v320_v45 = vpop.f32.mrb[2].mxu1 }
 0x228   :  { %v399_v46 = vpop.f32.mrb[3].mxu1  ;;  %324 = vst.msk [vmem:[#allocation2] sm:$0x3] %vm323_vm5, %v318_v43 }
 0x229   :  { %433 = shalt.err (!%p430_p4)
}
 0x22a   :  { %s434_s6 = scalar_lea.hbm %s583_s7, 32 }
 0x22b   :  { %p435_p5 = scmp.ne.s32.totalorder %s583_s7, %s434_s6  ;;  %p438_p6 = scmp.lt.u32.totalorder %s434_s6, %s583_s7 }
 0x22d   :  { %p440_p7 = pnand %p438_p6, %p435_p5 }
 0x22f   :  { %443 = shalt.err (!%p440_p7)
}
 0x230   :  { %334 = dma.vmem_to_hbm [thread:$0]  %s332_s13, 32, %s583_s7, [#allocation3]  }
 0x231   :  { %444 = dma.done.wait [#allocation3], 32  }
 0x232   :  { %445 = vsyncadd [#allocation3], 4294967264 }
 0x233   :  { %338 = vsyncpa [#allocation3], 1 }

</bundles_post_ra>
